<compile_context>
chip_gen: v5e
topology: v5e:2x2
jax: 0.10.0
libtpu: 0.0.40
codegen_flags: <defaults>
</compile_context>

<pallas_src>
import functools
import math

import jax
import jax.numpy as jnp
from jax.experimental import pallas as pl
from jax.experimental.pallas import tpu as pltpu

BN_EPS = 1e-5


def _round_up(x, m):
    return ((x + m - 1) // m) * m


# ---------------------------------------------------------------------------
# Fused GEMM kernel: out = A @ B (+ residual) (+ ReLU)
#   * A, B are bf16 MXU operands; accumulation is f32 directly in the output
#     block, which is resident across the (innermost) reduction grid axis.
#   * Epilogue (residual add / ReLU) runs on the last k step, in f32.
# ---------------------------------------------------------------------------

def _matmul_kernel(a_ref, b_ref, *refs, relu, has_res):
    if has_res:
        res_ref, o_ref = refs
    else:
        (o_ref,) = refs

    k = pl.program_id(2)

    @pl.when(k == 0)
    def _():
        o_ref[...] = jnp.zeros_like(o_ref)

    o_ref[...] += jnp.dot(a_ref[...], b_ref[...],
                          preferred_element_type=jnp.float32)

    @pl.when(k == pl.num_programs(2) - 1)
    def _():
        y = o_ref[...]
        if has_res:
            y = y + res_ref[...]
        if relu:
            y = jnp.maximum(y, 0.0)
        o_ref[...] = y


def _pick_tk(kp):
    """Deep K tiles to amortize per-grid-step overhead; tk must divide Kp."""
    if kp <= 1024:
        return kp
    best = 128
    for cand in range(256, 1025, 128):
        if kp % cand == 0:
            best = cand
    return best


def _pick_tiles(mp, kp, np_):
    tm = min(128, mp)                       # don't push dead LHS rows through the MXU
    tn = 256 if np_ % 256 == 0 else 128
    # Keep >=2 blocks on the parallel grid axes where possible (v7x megacore).
    if (mp // tm) * (np_ // tn) < 2:
        if np_ // tn < 2 and np_ >= 256 and (np_ // 2) % 128 == 0:
            tn = np_ // 2
        elif mp // tm < 2 and tm >= 32:
            tm //= 2
    tk = _pick_tk(kp)
    return tm, tn, tk


def matmul_fused(a, b, *, relu, residual=None):
    """a: (Mp, Kp) bf16, b: (Kp, Np) bf16, residual: (Mp, Np) f32 or None.
    Returns (Mp, Np) f32.  Padded B columns are zero, so padded output columns
    are exactly zero before slicing (residual is also zero-padded there)."""
    mp, kp = a.shape
    kp2, np_ = b.shape
    assert kp == kp2
    tm, tn, tk = _pick_tiles(mp, kp, np_)
    grid = (mp // tm, np_ // tn, kp // tk)

    in_specs = [pl.BlockSpec((tm, tk), lambda i, j, k: (i, k)),
                pl.BlockSpec((tk, tn), lambda i, j, k: (k, j))]
    inputs = [a, b]
    if residual is not None:
        in_specs.append(pl.BlockSpec((tm, tn), lambda i, j, k: (i, j)))
        inputs.append(residual)

    return pl.pallas_call(
        functools.partial(_matmul_kernel, relu=relu,
                          has_res=residual is not None),
        out_shape=jax.ShapeDtypeStruct((mp, np_), jnp.float32),
        grid_spec=pltpu.PrefetchScalarGridSpec(
            num_scalar_prefetch=0,
            grid=grid,
            in_specs=in_specs,
            out_specs=pl.BlockSpec((tm, tn), lambda i, j, k: (i, j)),
        ),
        compiler_params=pltpu.CompilerParams(
            dimension_semantics=("parallel", "parallel", "arbitrary")),
    )(*inputs)


# ---------------------------------------------------------------------------
# Conv (+ folded BN) (+ residual) (+ ReLU)  via im2col + fused Pallas GEMM
# ---------------------------------------------------------------------------

def conv2d_bn_act(x, w_mat, cout, ksize, stride, padding, relu, residual=None):
    """x: (N,H,W,Cin) f32 NHWC.  w_mat: (Kp, Np) bf16 weight matrix (rows ordered
    (kh, kw, cin), inference BN scale folded in, pre-padded)."""
    n, h, w, cin = x.shape
    ho = (h + 2 * padding - ksize) // stride + 1
    wo = (w + 2 * padding - ksize) // stride + 1
    m = n * ho * wo
    k = ksize * ksize * cin
    kp, np_ = w_mat.shape
    mp = _round_up(m, 16)                   # bf16 sublane packing

    xb = x.astype(jnp.bfloat16)             # cast once; halves im2col HBM traffic
    if padding:
        xb = jnp.pad(xb, ((0, 0), (padding, padding), (padding, padding), (0, 0)))
    if ksize == 1:
        patches = xb[:, ::stride, ::stride, :]
    else:
        cols = []
        for kh in range(ksize):
            for kw in range(ksize):
                cols.append(xb[:, kh:kh + stride * (ho - 1) + 1:stride,
                               kw:kw + stride * (wo - 1) + 1:stride, :])
        patches = jnp.concatenate(cols, axis=-1)      # (N,Ho,Wo, K) ordered (kh,kw,cin)
    a = patches.reshape(m, k)
    if mp > m or kp > k:
        a = jnp.pad(a, ((0, mp - m), (0, kp - k)))

    res = None
    if residual is not None:
        res = residual.reshape(m, cout)
        if mp > m or np_ > cout:
            res = jnp.pad(res, ((0, mp - m), (0, np_ - cout)))

    out = matmul_fused(a, w_mat, relu=relu, residual=res)
    return out[:m, :cout].reshape(n, ho, wo, cout)


# ---------------------------------------------------------------------------
# MaxPool2d(kernel=3, stride=2, padding=1) — gridded Pallas kernel, no 9x stack
# ---------------------------------------------------------------------------

def _maxpool_kernel(a0_ref, a1_ref, a2_ref, o_ref, *, ho):
    # W direction: three W-shifted views -> 3-tap max.
    wmax = jnp.maximum(jnp.maximum(a0_ref[...], a1_ref[...]), a2_ref[...])
    _, hp, wo, c = wmax.shape                       # hp == 2 * (ho + 1)
    # H direction (window 3, stride 2) via pair trick: only layout-preserving
    # reshapes and contiguous slices on major dims.
    wr = wmax.reshape(1, ho + 1, 2, wo, c)
    even = wr[:, :, 0]                              # rows 0, 2, ..., 2*ho
    odd = wr[:, :, 1]                               # rows 1, 3, ..., 2*ho + 1
    pair = jnp.maximum(even, odd)
    o_ref[...] = jnp.maximum(pair[:, :ho], even[:, 1:ho + 1])


def maxpool2d_3x3_s2_p1(x):
    n, h, w, c = x.shape
    assert h % 2 == 0 and w % 2 == 0
    ho, wo = h // 2, w // 2
    hp = h + 2
    xp = jnp.pad(x, ((0, 0), (1, 1), (1, 1), (0, 0)), constant_values=-jnp.inf)
    # Three W-shifted strided views (cheap fused XLA slices; ~0.84x of the input,
    # instead of the previous 9x stacked copy).
    views = [xp[:, :, d:d + 2 * (wo - 1) + 1:2, :] for d in range(3)]
    return pl.pallas_call(
        functools.partial(_maxpool_kernel, ho=ho),
        out_shape=jax.ShapeDtypeStruct((n, ho, wo, c), jnp.float32),
        grid_spec=pltpu.PrefetchScalarGridSpec(
            num_scalar_prefetch=0,
            grid=(n,),
            in_specs=[pl.BlockSpec((1, hp, wo, c), lambda b: (b, 0, 0, 0))] * 3,
            out_specs=pl.BlockSpec((1, ho, wo, c), lambda b: (b, 0, 0, 0)),
        ),
        compiler_params=pltpu.CompilerParams(dimension_semantics=("parallel",)),
    )(*views)


# ---------------------------------------------------------------------------
# Global average pool fused with the final Linear(512 -> 1024)
# ---------------------------------------------------------------------------

def _avgpool_fc_kernel(x_ref, w_ref, b_ref, o_ref):
    feat = jnp.mean(x_ref[...], axis=1)                          # (Mp, C) f32
    o_ref[...] = (jnp.dot(feat.astype(jnp.bfloat16), w_ref[...],
                          preferred_element_type=jnp.float32)
                  + b_ref[...])


def avgpool_fc(x, fc_w, fc_b):
    n, h, w, c = x.shape
    hw = h * w
    mp = _round_up(n, 8)
    xf = x.reshape(n, hw, c)
    if mp > n:
        xf = jnp.pad(xf, ((0, mp - n), (0, 0), (0, 0)))
    kp, np_ = fc_w.shape
    tn = 256 if np_ % 256 == 0 else 128
    b2 = fc_b.reshape(1, np_).astype(jnp.float32)
    out = pl.pallas_call(
        _avgpool_fc_kernel,
        out_shape=jax.ShapeDtypeStruct((mp, np_), jnp.float32),
        grid_spec=pltpu.PrefetchScalarGridSpec(
            num_scalar_prefetch=0,
            grid=(np_ // tn,),
            in_specs=[pl.BlockSpec((mp, hw, c), lambda j: (0, 0, 0)),
                      pl.BlockSpec((kp, tn), lambda j: (0, j)),
                      pl.BlockSpec((1, tn), lambda j: (0, j))],
            out_specs=pl.BlockSpec((mp, tn), lambda j: (0, j)),
        ),
        compiler_params=pltpu.CompilerParams(dimension_semantics=("parallel",)),
    )(xf, fc_w, b2)
    return out[:n]


# ---------------------------------------------------------------------------
# Parameters & forward
# ---------------------------------------------------------------------------

_STAGES = [('layer1', 64, 1), ('layer2', 128, 2), ('layer3', 256, 2), ('layer4', 512, 2)]


def _fold_conv_weight(w_oihw):
    """OIHW conv weight -> (Kp, Np) bf16 GEMM operand, BN (inference defaults)
    scale folded in; row order (kh, kw, cin) matches the im2col patch layout."""
    cout, cin, kh, kw = w_oihw.shape
    scale = 1.0 / math.sqrt(1.0 + BN_EPS)
    m = jnp.transpose(w_oihw, (2, 3, 1, 0)).reshape(kh * kw * cin, cout) * scale
    k, n = m.shape
    kp, np_ = _round_up(k, 128), _round_up(n, 128)
    if kp > k or np_ > n:
        m = jnp.pad(m, ((0, kp - k), (0, np_ - n)))
    return m.astype(jnp.bfloat16)


def init_params(key):
    keys = list(jax.random.split(key, 32))
    ki = [0]

    def nk():
        kk = keys[ki[0]]
        ki[0] += 1
        return kk

    def conv_w(cout, cin, kh, kw):
        # kaiming_normal_(mode='fan_out', nonlinearity='relu'), as in torchvision resnet
        std = math.sqrt(2.0 / (cout * kh * kw))
        return jax.random.normal(nk(), (cout, cin, kh, kw), jnp.float32) * std

    params = {'conv1': _fold_conv_weight(conv_w(64, 3, 7, 7))}
    cin = 64
    for name, cout, stride0 in _STAGES:
        blocks = []
        for bi in range(2):
            stride = stride0 if bi == 0 else 1
            in_c = cin if bi == 0 else cout
            bp = {'conv1_w': _fold_conv_weight(conv_w(cout, in_c, 3, 3)),
                  'conv2_w': _fold_conv_weight(conv_w(cout, cout, 3, 3))}
            if stride != 1 or in_c != cout:
                bp['down_w'] = _fold_conv_weight(conv_w(cout, in_c, 1, 1))
            blocks.append(bp)
        params[name] = blocks
        cin = cout

    # fc0: Linear(512 -> 1024), xavier_normal_ weight, zero bias.
    std = math.sqrt(2.0 / (512 + 1024))
    params['fc_w'] = (jax.random.normal(nk(), (512, 1024), jnp.float32) * std
                      ).astype(jnp.bfloat16)
    params['fc_b'] = jnp.zeros((1024,), jnp.float32)
    return params


def basic_block(x, bp, cout, stride):
    out = conv2d_bn_act(x, bp['conv1_w'], cout, 3, stride, 1, relu=True)
    if 'down_w' in bp:
        identity = conv2d_bn_act(x, bp['down_w'], cout, 1, stride, 0, relu=False)
    else:
        identity = x
    # conv2 + BN2 + residual add + ReLU fused into one kernel epilogue.
    return conv2d_bn_act(out, bp['conv2_w'], cout, 3, 1, 1, relu=True,
                         residual=identity)


def forward(params, x_nchw):
    x = jnp.transpose(x_nchw, (0, 2, 3, 1)).astype(jnp.float32)   # NCHW -> NHWC
    x = conv2d_bn_act(x, params['conv1'], 64, 7, 2, 3, relu=True)
    x = maxpool2d_3x3_s2_p1(x)
    for name, cout, stride0 in _STAGES:
        for bi, bp in enumerate(params[name]):
            stride = stride0 if bi == 0 else 1
            x = basic_block(x, bp, cout, stride)
    return avgpool_fc(x, params['fc_w'], params['fc_b'])          # (N, 1024)


if __name__ == "__main__":
    key = jax.random.PRNGKey(0)
    pkey, xkey = jax.random.split(key)
    params = init_params(pkey)
    # PyTorch-style NCHW input (batch=2, 3 channels, 32x32 spatial)
    x = jax.random.normal(xkey, (2, 3, 32, 32), jnp.float32)

    y = jax.jit(forward)(params, x)
    y = jax.block_until_ready(y)
    assert y.shape == (2, 1024), y.shape
    assert bool(jnp.all(jnp.isfinite(y)))
    print("KERNEL_OK")
</pallas_src>

<mosaic_0001>
module attributes {stable_mosaic.version = 11 : i64} {
  func.func @_matmul_kernel(%arg0: i32, %arg1: i32, %arg2: i32, %arg3: memref<128x256xbf16, #tpu.memory_space<vmem>>, %arg4: memref<256x128xbf16, #tpu.memory_space<vmem>>, %arg5: memref<128x128xf32, #tpu.memory_space<vmem>>) attributes {dimension_semantics = [#tpu.dimension_semantics<parallel>, #tpu.dimension_semantics<parallel>, #tpu.dimension_semantics<arbitrary>], iteration_bounds = array<i64: 4, 1, 1>, scalar_prefetch = 0 : i64, scratch_operands = 0 : i64, tpu.core_type = #tpu.core_type<tc>, window_params = [{transform_indices = @transform_0, window_bounds = array<i64: 128, 256>}, {transform_indices = @transform_1, window_bounds = array<i64: 256, 128>}, {transform_indices = @transform_2, window_bounds = array<i64: 128, 128>}]} {
    %c0_i32 = arith.constant 0 : i32
    %0 = arith.cmpi eq, %arg2, %c0_i32 : i32
    %1 = arith.extui %0 : i1 to i32
    %c0_i32_0 = arith.constant 0 : i32
    %2 = arith.cmpi ne, %1, %c0_i32_0 : i32
    scf.if %2 {
      %cst_10 = arith.constant 0.000000e+00 : f32
      %12 = vector.broadcast %cst_10 : f32 to vector<128x128xf32>
      %c0_11 = arith.constant 0 : index
      %c0_12 = arith.constant 0 : index
      %13 = vector.load %arg5[%c0_11, %c0_12] : memref<128x128xf32, #tpu.memory_space<vmem>>, vector<128x128xf32>
      tpu.vector_store %arg5[%c0_11, %c0_12], %12 {strides = array<i32>} : memref<128x128xf32, #tpu.memory_space<vmem>>, vector<128x128xf32>,
    } else {
    }
    %c0 = arith.constant 0 : index
    %c0_1 = arith.constant 0 : index
    %3 = vector.load %arg5[%c0, %c0_1] : memref<128x128xf32, #tpu.memory_space<vmem>>, vector<128x128xf32>
    %c0_2 = arith.constant 0 : index
    %c0_3 = arith.constant 0 : index
    %4 = vector.load %arg3[%c0_2, %c0_3] : memref<128x256xbf16, #tpu.memory_space<vmem>>, vector<128x256xbf16>
    %c0_4 = arith.constant 0 : index
    %c0_5 = arith.constant 0 : index
    %5 = vector.load %arg4[%c0_4, %c0_5] : memref<256x128xbf16, #tpu.memory_space<vmem>>, vector<256x128xbf16>
    %cst = arith.constant dense<0.000000e+00> : vector<128x128xf32>
    %6 = tpu.matmul %4, %5, %cst {dimension_numbers = #tpu.dot_dimension_numbers<[1], [0], [0], [1], [0, 0, 1, 1], [], []>} : vector<128x256xbf16>, vector<256x128xbf16>, vector<128x128xf32> -> vector<128x128xf32>
    %7 = arith.addf %3, %6 : vector<128x128xf32>
    %c0_6 = arith.constant 0 : index
    %c0_7 = arith.constant 0 : index
    %8 = vector.load %arg5[%c0_6, %c0_7] : memref<128x128xf32, #tpu.memory_space<vmem>>, vector<128x128xf32>
    tpu.vector_store %arg5[%c0_6, %c0_7], %7 {strides = array<i32>} : memref<128x128xf32, #tpu.memory_space<vmem>>, vector<128x128xf32>,
    %c0_i32_8 = arith.constant 0 : i32
    %9 = arith.cmpi eq, %arg2, %c0_i32_8 : i32
    %10 = arith.extui %9 : i1 to i32
    %c0_i32_9 = arith.constant 0 : i32
    %11 = arith.cmpi ne, %10, %c0_i32_9 : i32
    scf.if %11 {
      %c0_10 = arith.constant 0 : index
      %c0_11 = arith.constant 0 : index
      %12 = vector.load %arg5[%c0_10, %c0_11] : memref<128x128xf32, #tpu.memory_space<vmem>>, vector<128x128xf32>
      %cst_12 = arith.constant 0.000000e+00 : f32
      %13 = vector.broadcast %cst_12 : f32 to vector<128x128xf32>
      %14 = arith.maximumf %12, %13 : vector<128x128xf32>
      %c0_13 = arith.constant 0 : index
      %c0_14 = arith.constant 0 : index
      %15 = vector.load %arg5[%c0_13, %c0_14] : memref<128x128xf32, #tpu.memory_space<vmem>>, vector<128x128xf32>
      tpu.vector_store %arg5[%c0_13, %c0_14], %14 {strides = array<i32>} : memref<128x128xf32, #tpu.memory_space<vmem>>, vector<128x128xf32>,
    } else {
    }
    return
  }
  func.func @transform_0(%arg0: i32, %arg1: i32, %arg2: i32) -> (i32, i32) {
    %c0_i32 = arith.constant 0 : i32
    return %arg0, %arg2 : i32, i32
  }
  func.func @transform_1(%arg0: i32, %arg1: i32, %arg2: i32) -> (i32, i32) {
    %c0_i32 = arith.constant 0 : i32
    return %arg2, %arg1 : i32, i32
  }
  func.func @transform_2(%arg0: i32, %arg1: i32, %arg2: i32) -> (i32, i32) {
    %c0_i32 = arith.constant 0 : i32
    return %arg0, %arg1 : i32, i32
  }
}

module attributes {stable_mosaic.version = 11 : i64} {
  func.func @_maxpool_kernel(%arg0: i32, %arg1: memref<1x18x8x64xf32, #tpu.memory_space<vmem>>, %arg2: memref<1x18x8x64xf32, #tpu.memory_space<vmem>>, %arg3: memref<1x18x8x64xf32, #tpu.memory_space<vmem>>, %arg4: memref<1x8x8x64xf32, #tpu.memory_space<vmem>>) attributes {dimension_semantics = [#tpu.dimension_semantics<parallel>], iteration_bounds = array<i64: 2>, scalar_prefetch = 0 : i64, scratch_operands = 0 : i64, tpu.core_type = #tpu.core_type<tc>, window_params = [{transform_indices = @transform_0, window_bounds = array<i64: 1, 18, 8, 64>}, {transform_indices = @transform_1, window_bounds = array<i64: 1, 18, 8, 64>}, {transform_indices = @transform_2, window_bounds = array<i64: 1, 18, 8, 64>}, {transform_indices = @transform_3, window_bounds = array<i64: 1, 8, 8, 64>}]} {
    %c0 = arith.constant 0 : index
    %c0_0 = arith.constant 0 : index
    %c0_1 = arith.constant 0 : index
    %c0_2 = arith.constant 0 : index
    %0 = vector.load %arg1[%c0, %c0_0, %c0_1, %c0_2] : memref<1x18x8x64xf32, #tpu.memory_space<vmem>>, vector<1x18x8x64xf32>
    %c0_3 = arith.constant 0 : index
    %c0_4 = arith.constant 0 : index
    %c0_5 = arith.constant 0 : index
    %c0_6 = arith.constant 0 : index
    %1 = vector.load %arg2[%c0_3, %c0_4, %c0_5, %c0_6] : memref<1x18x8x64xf32, #tpu.memory_space<vmem>>, vector<1x18x8x64xf32>
    %2 = arith.maximumf %0, %1 : vector<1x18x8x64xf32>
    %c0_7 = arith.constant 0 : index
    %c0_8 = arith.constant 0 : index
    %c0_9 = arith.constant 0 : index
    %c0_10 = arith.constant 0 : index
    %3 = vector.load %arg3[%c0_7, %c0_8, %c0_9, %c0_10] : memref<1x18x8x64xf32, #tpu.memory_space<vmem>>, vector<1x18x8x64xf32>
    %4 = arith.maximumf %2, %3 : vector<1x18x8x64xf32>
    %5 = vector.shape_cast %4 : vector<1x18x8x64xf32> to vector<1x9x2x8x64xf32>
    %6 = vector.extract_strided_slice %5 {offsets = [0, 0, 0, 0, 0], sizes = [1, 9, 1, 8, 64], strides = [1, 1, 1, 1, 1]} : vector<1x9x2x8x64xf32> to vector<1x9x1x8x64xf32>
    %7 = vector.shape_cast %6 : vector<1x9x1x8x64xf32> to vector<1x9x8x64xf32>
    %8 = vector.extract_strided_slice %5 {offsets = [0, 0, 1, 0, 0], sizes = [1, 9, 1, 8, 64], strides = [1, 1, 1, 1, 1]} : vector<1x9x2x8x64xf32> to vector<1x9x1x8x64xf32>
    %9 = vector.shape_cast %8 : vector<1x9x1x8x64xf32> to vector<1x9x8x64xf32>
    %10 = arith.maximumf %7, %9 : vector<1x9x8x64xf32>
    %11 = vector.extract_strided_slice %10 {offsets = [0, 0, 0, 0], sizes = [1, 8, 8, 64], strides = [1, 1, 1, 1]} : vector<1x9x8x64xf32> to vector<1x8x8x64xf32>
    %12 = vector.extract_strided_slice %7 {offsets = [0, 1, 0, 0], sizes = [1, 8, 8, 64], strides = [1, 1, 1, 1]} : vector<1x9x8x64xf32> to vector<1x8x8x64xf32>
    %13 = arith.maximumf %11, %12 : vector<1x8x8x64xf32>
    %c0_11 = arith.constant 0 : index
    %c0_12 = arith.constant 0 : index
    %c0_13 = arith.constant 0 : index
    %c0_14 = arith.constant 0 : index
    %14 = vector.load %arg4[%c0_11, %c0_12, %c0_13, %c0_14] : memref<1x8x8x64xf32, #tpu.memory_space<vmem>>, vector<1x8x8x64xf32>
    tpu.vector_store %arg4[%c0_11, %c0_12, %c0_13, %c0_14], %13 {strides = array<i32>} : memref<1x8x8x64xf32, #tpu.memory_space<vmem>>, vector<1x8x8x64xf32>,
    return
  }
  func.func @transform_0(%arg0: i32) -> (i32, i32, i32, i32) {
    %c0_i32 = arith.constant 0 : i32
    %c0_i32_0 = arith.constant 0 : i32
    %c0_i32_1 = arith.constant 0 : i32
    %c0_i32_2 = arith.constant 0 : i32
    return %arg0, %c0_i32, %c0_i32_0, %c0_i32_1 : i32, i32, i32, i32
  }
  func.func @transform_1(%arg0: i32) -> (i32, i32, i32, i32) {
    %c0_i32 = arith.constant 0 : i32
    %c0_i32_0 = arith.constant 0 : i32
    %c0_i32_1 = arith.constant 0 : i32
    %c0_i32_2 = arith.constant 0 : i32
    return %arg0, %c0_i32, %c0_i32_0, %c0_i32_1 : i32, i32, i32, i32
  }
  func.func @transform_2(%arg0: i32) -> (i32, i32, i32, i32) {
    %c0_i32 = arith.constant 0 : i32
    %c0_i32_0 = arith.constant 0 : i32
    %c0_i32_1 = arith.constant 0 : i32
    %c0_i32_2 = arith.constant 0 : i32
    return %arg0, %c0_i32, %c0_i32_0, %c0_i32_1 : i32, i32, i32, i32
  }
  func.func @transform_3(%arg0: i32) -> (i32, i32, i32, i32) {
    %c0_i32 = arith.constant 0 : i32
    %c0_i32_0 = arith.constant 0 : i32
    %c0_i32_1 = arith.constant 0 : i32
    %c0_i32_2 = arith.constant 0 : i32
    return %arg0, %c0_i32, %c0_i32_0, %c0_i32_1 : i32, i32, i32, i32
  }
}

module attributes {stable_mosaic.version = 11 : i64} {
  func.func @_matmul_kernel(%arg0: i32, %arg1: i32, %arg2: i32, %arg3: memref<64x640xbf16, #tpu.memory_space<vmem>>, %arg4: memref<640x128xbf16, #tpu.memory_space<vmem>>, %arg5: memref<64x128xf32, #tpu.memory_space<vmem>>, %arg6: memref<64x128xf32, #tpu.memory_space<vmem>>) attributes {dimension_semantics = [#tpu.dimension_semantics<parallel>, #tpu.dimension_semantics<parallel>, #tpu.dimension_semantics<arbitrary>], iteration_bounds = array<i64: 2, 1, 1>, scalar_prefetch = 0 : i64, scratch_operands = 0 : i64, tpu.core_type = #tpu.core_type<tc>, window_params = [{transform_indices = @transform_0, window_bounds = array<i64: 64, 640>}, {transform_indices = @transform_1, window_bounds = array<i64: 640, 128>}, {transform_indices = @transform_2, window_bounds = array<i64: 64, 128>}, {transform_indices = @transform_3, window_bounds = array<i64: 64, 128>}]} {
    %c0_i32 = arith.constant 0 : i32
    %0 = arith.cmpi eq, %arg2, %c0_i32 : i32
    %1 = arith.extui %0 : i1 to i32
    %c0_i32_0 = arith.constant 0 : i32
    %2 = arith.cmpi ne, %1, %c0_i32_0 : i32
    scf.if %2 {
      %cst_10 = arith.constant 0.000000e+00 : f32
      %12 = vector.broadcast %cst_10 : f32 to vector<64x128xf32>
      %c0_11 = arith.constant 0 : index
      %c0_12 = arith.constant 0 : index
      %13 = vector.load %arg6[%c0_11, %c0_12] : memref<64x128xf32, #tpu.memory_space<vmem>>, vector<64x128xf32>
      tpu.vector_store %arg6[%c0_11, %c0_12], %12 {strides = array<i32>} : memref<64x128xf32, #tpu.memory_space<vmem>>, vector<64x128xf32>,
    } else {
    }
    %c0 = arith.constant 0 : index
    %c0_1 = arith.constant 0 : index
    %3 = vector.load %arg6[%c0, %c0_1] : memref<64x128xf32, #tpu.memory_space<vmem>>, vector<64x128xf32>
    %c0_2 = arith.constant 0 : index
    %c0_3 = arith.constant 0 : index
    %4 = vector.load %arg3[%c0_2, %c0_3] : memref<64x640xbf16, #tpu.memory_space<vmem>>, vector<64x640xbf16>
    %c0_4 = arith.constant 0 : index
    %c0_5 = arith.constant 0 : index
    %5 = vector.load %arg4[%c0_4, %c0_5] : memref<640x128xbf16, #tpu.memory_space<vmem>>, vector<640x128xbf16>
    %cst = arith.constant dense<0.000000e+00> : vector<64x128xf32>
    %6 = tpu.matmul %4, %5, %cst {dimension_numbers = #tpu.dot_dimension_numbers<[1], [0], [0], [1], [0, 0, 1, 1], [], []>} : vector<64x640xbf16>, vector<640x128xbf16>, vector<64x128xf32> -> vector<64x128xf32>
    %7 = arith.addf %3, %6 : vector<64x128xf32>
    %c0_6 = arith.constant 0 : index
    %c0_7 = arith.constant 0 : index
    %8 = vector.load %arg6[%c0_6, %c0_7] : memref<64x128xf32, #tpu.memory_space<vmem>>, vector<64x128xf32>
    tpu.vector_store %arg6[%c0_6, %c0_7], %7 {strides = array<i32>} : memref<64x128xf32, #tpu.memory_space<vmem>>, vector<64x128xf32>,
    %c0_i32_8 = arith.constant 0 : i32
    %9 = arith.cmpi eq, %arg2, %c0_i32_8 : i32
    %10 = arith.extui %9 : i1 to i32
    %c0_i32_9 = arith.constant 0 : i32
    %11 = arith.cmpi ne, %10, %c0_i32_9 : i32
    scf.if %11 {
      %c0_10 = arith.constant 0 : index
      %c0_11 = arith.constant 0 : index
      %12 = vector.load %arg6[%c0_10, %c0_11] : memref<64x128xf32, #tpu.memory_space<vmem>>, vector<64x128xf32>
      %c0_12 = arith.constant 0 : index
      %c0_13 = arith.constant 0 : index
      %13 = vector.load %arg5[%c0_12, %c0_13] : memref<64x128xf32, #tpu.memory_space<vmem>>, vector<64x128xf32>
      %14 = arith.addf %12, %13 : vector<64x128xf32>
      %cst_14 = arith.constant 0.000000e+00 : f32
      %15 = vector.broadcast %cst_14 : f32 to vector<64x128xf32>
      %16 = arith.maximumf %14, %15 : vector<64x128xf32>
      %c0_15 = arith.constant 0 : index
      %c0_16 = arith.constant 0 : index
      %17 = vector.load %arg6[%c0_15, %c0_16] : memref<64x128xf32, #tpu.memory_space<vmem>>, vector<64x128xf32>
      tpu.vector_store %arg6[%c0_15, %c0_16], %16 {strides = array<i32>} : memref<64x128xf32, #tpu.memory_space<vmem>>, vector<64x128xf32>,
    } else {
    }
    return
  }
  func.func @transform_0(%arg0: i32, %arg1: i32, %arg2: i32) -> (i32, i32) {
    %c0_i32 = arith.constant 0 : i32
    return %arg0, %arg2 : i32, i32
  }
  func.func @transform_1(%arg0: i32, %arg1: i32, %arg2: i32) -> (i32, i32) {
    %c0_i32 = arith.constant 0 : i32
    return %arg2, %arg1 : i32, i32
  }
  func.func @transform_2(%arg0: i32, %arg1: i32, %arg2: i32) -> (i32, i32) {
    %c0_i32 = arith.constant 0 : i32
    return %arg0, %arg1 : i32, i32
  }
  func.func @transform_3(%arg0: i32, %arg1: i32, %arg2: i32) -> (i32, i32) {
    %c0_i32 = arith.constant 0 : i32
    return %arg0, %arg1 : i32, i32
  }
}

module attributes {stable_mosaic.version = 11 : i64} {
  func.func @_matmul_kernel(%arg0: i32, %arg1: i32, %arg2: i32, %arg3: memref<64x640xbf16, #tpu.memory_space<vmem>>, %arg4: memref<640x128xbf16, #tpu.memory_space<vmem>>, %arg5: memref<64x128xf32, #tpu.memory_space<vmem>>) attributes {dimension_semantics = [#tpu.dimension_semantics<parallel>, #tpu.dimension_semantics<parallel>, #tpu.dimension_semantics<arbitrary>], iteration_bounds = array<i64: 2, 1, 1>, scalar_prefetch = 0 : i64, scratch_operands = 0 : i64, tpu.core_type = #tpu.core_type<tc>, window_params = [{transform_indices = @transform_0, window_bounds = array<i64: 64, 640>}, {transform_indices = @transform_1, window_bounds = array<i64: 640, 128>}, {transform_indices = @transform_2, window_bounds = array<i64: 64, 128>}]} {
    %c0_i32 = arith.constant 0 : i32
    %0 = arith.cmpi eq, %arg2, %c0_i32 : i32
    %1 = arith.extui %0 : i1 to i32
    %c0_i32_0 = arith.constant 0 : i32
    %2 = arith.cmpi ne, %1, %c0_i32_0 : i32
    scf.if %2 {
      %cst_10 = arith.constant 0.000000e+00 : f32
      %12 = vector.broadcast %cst_10 : f32 to vector<64x128xf32>
      %c0_11 = arith.constant 0 : index
      %c0_12 = arith.constant 0 : index
      %13 = vector.load %arg5[%c0_11, %c0_12] : memref<64x128xf32, #tpu.memory_space<vmem>>, vector<64x128xf32>
      tpu.vector_store %arg5[%c0_11, %c0_12], %12 {strides = array<i32>} : memref<64x128xf32, #tpu.memory_space<vmem>>, vector<64x128xf32>,
    } else {
    }
    %c0 = arith.constant 0 : index
    %c0_1 = arith.constant 0 : index
    %3 = vector.load %arg5[%c0, %c0_1] : memref<64x128xf32, #tpu.memory_space<vmem>>, vector<64x128xf32>
    %c0_2 = arith.constant 0 : index
    %c0_3 = arith.constant 0 : index
    %4 = vector.load %arg3[%c0_2, %c0_3] : memref<64x640xbf16, #tpu.memory_space<vmem>>, vector<64x640xbf16>
    %c0_4 = arith.constant 0 : index
    %c0_5 = arith.constant 0 : index
    %5 = vector.load %arg4[%c0_4, %c0_5] : memref<640x128xbf16, #tpu.memory_space<vmem>>, vector<640x128xbf16>
    %cst = arith.constant dense<0.000000e+00> : vector<64x128xf32>
    %6 = tpu.matmul %4, %5, %cst {dimension_numbers = #tpu.dot_dimension_numbers<[1], [0], [0], [1], [0, 0, 1, 1], [], []>} : vector<64x640xbf16>, vector<640x128xbf16>, vector<64x128xf32> -> vector<64x128xf32>
    %7 = arith.addf %3, %6 : vector<64x128xf32>
    %c0_6 = arith.constant 0 : index
    %c0_7 = arith.constant 0 : index
    %8 = vector.load %arg5[%c0_6, %c0_7] : memref<64x128xf32, #tpu.memory_space<vmem>>, vector<64x128xf32>
    tpu.vector_store %arg5[%c0_6, %c0_7], %7 {strides = array<i32>} : memref<64x128xf32, #tpu.memory_space<vmem>>, vector<64x128xf32>,
    %c0_i32_8 = arith.constant 0 : i32
    %9 = arith.cmpi eq, %arg2, %c0_i32_8 : i32
    %10 = arith.extui %9 : i1 to i32
    %c0_i32_9 = arith.constant 0 : i32
    %11 = arith.cmpi ne, %10, %c0_i32_9 : i32
    scf.if %11 {
      %c0_10 = arith.constant 0 : index
      %c0_11 = arith.constant 0 : index
      %12 = vector.load %arg5[%c0_10, %c0_11] : memref<64x128xf32, #tpu.memory_space<vmem>>, vector<64x128xf32>
      %cst_12 = arith.constant 0.000000e+00 : f32
      %13 = vector.broadcast %cst_12 : f32 to vector<64x128xf32>
      %14 = arith.maximumf %12, %13 : vector<64x128xf32>
      %c0_13 = arith.constant 0 : index
      %c0_14 = arith.constant 0 : index
      %15 = vector.load %arg5[%c0_13, %c0_14] : memref<64x128xf32, #tpu.memory_space<vmem>>, vector<64x128xf32>
      tpu.vector_store %arg5[%c0_13, %c0_14], %14 {strides = array<i32>} : memref<64x128xf32, #tpu.memory_space<vmem>>, vector<64x128xf32>,
    } else {
    }
    return
  }
  func.func @transform_0(%arg0: i32, %arg1: i32, %arg2: i32) -> (i32, i32) {
    %c0_i32 = arith.constant 0 : i32
    return %arg0, %arg2 : i32, i32
  }
  func.func @transform_1(%arg0: i32, %arg1: i32, %arg2: i32) -> (i32, i32) {
    %c0_i32 = arith.constant 0 : i32
    return %arg2, %arg1 : i32, i32
  }
  func.func @transform_2(%arg0: i32, %arg1: i32, %arg2: i32) -> (i32, i32) {
    %c0_i32 = arith.constant 0 : i32
    return %arg0, %arg1 : i32, i32
  }
}

module attributes {stable_mosaic.version = 11 : i64} {
  func.func @_matmul_kernel(%arg0: i32, %arg1: i32, %arg2: i32, %arg3: memref<16x640xbf16, #tpu.memory_space<vmem>>, %arg4: memref<640x128xbf16, #tpu.memory_space<vmem>>, %arg5: memref<16x128xf32, #tpu.memory_space<vmem>>) attributes {dimension_semantics = [#tpu.dimension_semantics<parallel>, #tpu.dimension_semantics<parallel>, #tpu.dimension_semantics<arbitrary>], iteration_bounds = array<i64: 2, 1, 1>, scalar_prefetch = 0 : i64, scratch_operands = 0 : i64, tpu.core_type = #tpu.core_type<tc>, window_params = [{transform_indices = @transform_0, window_bounds = array<i64: 16, 640>}, {transform_indices = @transform_1, window_bounds = array<i64: 640, 128>}, {transform_indices = @transform_2, window_bounds = array<i64: 16, 128>}]} {
    %c0_i32 = arith.constant 0 : i32
    %0 = arith.cmpi eq, %arg2, %c0_i32 : i32
    %1 = arith.extui %0 : i1 to i32
    %c0_i32_0 = arith.constant 0 : i32
    %2 = arith.cmpi ne, %1, %c0_i32_0 : i32
    scf.if %2 {
      %cst_10 = arith.constant 0.000000e+00 : f32
      %12 = vector.broadcast %cst_10 : f32 to vector<16x128xf32>
      %c0_11 = arith.constant 0 : index
      %c0_12 = arith.constant 0 : index
      %13 = vector.load %arg5[%c0_11, %c0_12] : memref<16x128xf32, #tpu.memory_space<vmem>>, vector<16x128xf32>
      tpu.vector_store %arg5[%c0_11, %c0_12], %12 {strides = array<i32>} : memref<16x128xf32, #tpu.memory_space<vmem>>, vector<16x128xf32>,
    } else {
    }
    %c0 = arith.constant 0 : index
    %c0_1 = arith.constant 0 : index
    %3 = vector.load %arg5[%c0, %c0_1] : memref<16x128xf32, #tpu.memory_space<vmem>>, vector<16x128xf32>
    %c0_2 = arith.constant 0 : index
    %c0_3 = arith.constant 0 : index
    %4 = vector.load %arg3[%c0_2, %c0_3] : memref<16x640xbf16, #tpu.memory_space<vmem>>, vector<16x640xbf16>
    %c0_4 = arith.constant 0 : index
    %c0_5 = arith.constant 0 : index
    %5 = vector.load %arg4[%c0_4, %c0_5] : memref<640x128xbf16, #tpu.memory_space<vmem>>, vector<640x128xbf16>
    %cst = arith.constant dense<0.000000e+00> : vector<16x128xf32>
    %6 = tpu.matmul %4, %5, %cst {dimension_numbers = #tpu.dot_dimension_numbers<[1], [0], [0], [1], [0, 0, 1, 1], [], []>} : vector<16x640xbf16>, vector<640x128xbf16>, vector<16x128xf32> -> vector<16x128xf32>
    %7 = arith.addf %3, %6 : vector<16x128xf32>
    %c0_6 = arith.constant 0 : index
    %c0_7 = arith.constant 0 : index
    %8 = vector.load %arg5[%c0_6, %c0_7] : memref<16x128xf32, #tpu.memory_space<vmem>>, vector<16x128xf32>
    tpu.vector_store %arg5[%c0_6, %c0_7], %7 {strides = array<i32>} : memref<16x128xf32, #tpu.memory_space<vmem>>, vector<16x128xf32>,
    %c0_i32_8 = arith.constant 0 : i32
    %9 = arith.cmpi eq, %arg2, %c0_i32_8 : i32
    %10 = arith.extui %9 : i1 to i32
    %c0_i32_9 = arith.constant 0 : i32
    %11 = arith.cmpi ne, %10, %c0_i32_9 : i32
    scf.if %11 {
      %c0_10 = arith.constant 0 : index
      %c0_11 = arith.constant 0 : index
      %12 = vector.load %arg5[%c0_10, %c0_11] : memref<16x128xf32, #tpu.memory_space<vmem>>, vector<16x128xf32>
      %cst_12 = arith.constant 0.000000e+00 : f32
      %13 = vector.broadcast %cst_12 : f32 to vector<16x128xf32>
      %14 = arith.maximumf %12, %13 : vector<16x128xf32>
      %c0_13 = arith.constant 0 : index
      %c0_14 = arith.constant 0 : index
      %15 = vector.load %arg5[%c0_13, %c0_14] : memref<16x128xf32, #tpu.memory_space<vmem>>, vector<16x128xf32>
      tpu.vector_store %arg5[%c0_13, %c0_14], %14 {strides = array<i32>} : memref<16x128xf32, #tpu.memory_space<vmem>>, vector<16x128xf32>,
    } else {
    }
    return
  }
  func.func @transform_0(%arg0: i32, %arg1: i32, %arg2: i32) -> (i32, i32) {
    %c0_i32 = arith.constant 0 : i32
    return %arg0, %arg2 : i32, i32
  }
  func.func @transform_1(%arg0: i32, %arg1: i32, %arg2: i32) -> (i32, i32) {
    %c0_i32 = arith.constant 0 : i32
    return %arg2, %arg1 : i32, i32
  }
  func.func @transform_2(%arg0: i32, %arg1: i32, %arg2: i32) -> (i32, i32) {
    %c0_i32 = arith.constant 0 : i32
    return %arg0, %arg1 : i32, i32
  }
}

module attributes {stable_mosaic.version = 11 : i64} {
  func.func @_matmul_kernel(%arg0: i32, %arg1: i32, %arg2: i32, %arg3: memref<16x384xbf16, #tpu.memory_space<vmem>>, %arg4: memref<384x128xbf16, #tpu.memory_space<vmem>>, %arg5: memref<16x128xf32, #tpu.memory_space<vmem>>, %arg6: memref<16x128xf32, #tpu.memory_space<vmem>>) attributes {dimension_semantics = [#tpu.dimension_semantics<parallel>, #tpu.dimension_semantics<parallel>, #tpu.dimension_semantics<arbitrary>], iteration_bounds = array<i64: 2, 1, 3>, scalar_prefetch = 0 : i64, scratch_operands = 0 : i64, tpu.core_type = #tpu.core_type<tc>, window_params = [{transform_indices = @transform_0, window_bounds = array<i64: 16, 384>}, {transform_indices = @transform_1, window_bounds = array<i64: 384, 128>}, {transform_indices = @transform_2, window_bounds = array<i64: 16, 128>}, {transform_indices = @transform_3, window_bounds = array<i64: 16, 128>}]} {
    %c0_i32 = arith.constant 0 : i32
    %0 = arith.cmpi eq, %arg2, %c0_i32 : i32
    %1 = arith.extui %0 : i1 to i32
    %c0_i32_0 = arith.constant 0 : i32
    %2 = arith.cmpi ne, %1, %c0_i32_0 : i32
    scf.if %2 {
      %cst_9 = arith.constant 0.000000e+00 : f32
      %12 = vector.broadcast %cst_9 : f32 to vector<16x128xf32>
      %c0_10 = arith.constant 0 : index
      %c0_11 = arith.constant 0 : index
      %13 = vector.load %arg6[%c0_10, %c0_11] : memref<16x128xf32, #tpu.memory_space<vmem>>, vector<16x128xf32>
      tpu.vector_store %arg6[%c0_10, %c0_11], %12 {strides = array<i32>} : memref<16x128xf32, #tpu.memory_space<vmem>>, vector<16x128xf32>,
    } else {
    }
    %c0 = arith.constant 0 : index
    %c0_1 = arith.constant 0 : index
    %3 = vector.load %arg6[%c0, %c0_1] : memref<16x128xf32, #tpu.memory_space<vmem>>, vector<16x128xf32>
    %c0_2 = arith.constant 0 : index
    %c0_3 = arith.constant 0 : index
    %4 = vector.load %arg3[%c0_2, %c0_3] : memref<16x384xbf16, #tpu.memory_space<vmem>>, vector<16x384xbf16>
    %c0_4 = arith.constant 0 : index
    %c0_5 = arith.constant 0 : index
    %5 = vector.load %arg4[%c0_4, %c0_5] : memref<384x128xbf16, #tpu.memory_space<vmem>>, vector<384x128xbf16>
    %cst = arith.constant dense<0.000000e+00> : vector<16x128xf32>
    %6 = tpu.matmul %4, %5, %cst {dimension_numbers = #tpu.dot_dimension_numbers<[1], [0], [0], [1], [0, 0, 1, 1], [], []>} : vector<16x384xbf16>, vector<384x128xbf16>, vector<16x128xf32> -> vector<16x128xf32>
    %7 = arith.addf %3, %6 : vector<16x128xf32>
    %c0_6 = arith.constant 0 : index
    %c0_7 = arith.constant 0 : index
    %8 = vector.load %arg6[%c0_6, %c0_7] : memref<16x128xf32, #tpu.memory_space<vmem>>, vector<16x128xf32>
    tpu.vector_store %arg6[%c0_6, %c0_7], %7 {strides = array<i32>} : memref<16x128xf32, #tpu.memory_space<vmem>>, vector<16x128xf32>,
    %c2_i32 = arith.constant 2 : i32
    %9 = arith.cmpi eq, %arg2, %c2_i32 : i32
    %10 = arith.extui %9 : i1 to i32
    %c0_i32_8 = arith.constant 0 : i32
    %11 = arith.cmpi ne, %10, %c0_i32_8 : i32
    scf.if %11 {
      %c0_9 = arith.constant 0 : index
      %c0_10 = arith.constant 0 : index
      %12 = vector.load %arg6[%c0_9, %c0_10] : memref<16x128xf32, #tpu.memory_space<vmem>>, vector<16x128xf32>
      %c0_11 = arith.constant 0 : index
      %c0_12 = arith.constant 0 : index
      %13 = vector.load %arg5[%c0_11, %c0_12] : memref<16x128xf32, #tpu.memory_space<vmem>>, vector<16x128xf32>
      %14 = arith.addf %12, %13 : vector<16x128xf32>
      %cst_13 = arith.constant 0.000000e+00 : f32
      %15 = vector.broadcast %cst_13 : f32 to vector<16x128xf32>
      %16 = arith.maximumf %14, %15 : vector<16x128xf32>
      %c0_14 = arith.constant 0 : index
      %c0_15 = arith.constant 0 : index
      %17 = vector.load %arg6[%c0_14, %c0_15] : memref<16x128xf32, #tpu.memory_space<vmem>>, vector<16x128xf32>
      tpu.vector_store %arg6[%c0_14, %c0_15], %16 {strides = array<i32>} : memref<16x128xf32, #tpu.memory_space<vmem>>, vector<16x128xf32>,
    } else {
    }
    return
  }
  func.func @transform_0(%arg0: i32, %arg1: i32, %arg2: i32) -> (i32, i32) {
    %c0_i32 = arith.constant 0 : i32
    return %arg0, %arg2 : i32, i32
  }
  func.func @transform_1(%arg0: i32, %arg1: i32, %arg2: i32) -> (i32, i32) {
    %c0_i32 = arith.constant 0 : i32
    return %arg2, %arg1 : i32, i32
  }
  func.func @transform_2(%arg0: i32, %arg1: i32, %arg2: i32) -> (i32, i32) {
    %c0_i32 = arith.constant 0 : i32
    return %arg0, %arg1 : i32, i32
  }
  func.func @transform_3(%arg0: i32, %arg1: i32, %arg2: i32) -> (i32, i32) {
    %c0_i32 = arith.constant 0 : i32
    return %arg0, %arg1 : i32, i32
  }
}

module attributes {stable_mosaic.version = 11 : i64} {
  func.func @_matmul_kernel(%arg0: i32, %arg1: i32, %arg2: i32, %arg3: memref<16x128xbf16, #tpu.memory_space<vmem>>, %arg4: memref<128x128xbf16, #tpu.memory_space<vmem>>, %arg5: memref<16x128xf32, #tpu.memory_space<vmem>>) attributes {dimension_semantics = [#tpu.dimension_semantics<parallel>, #tpu.dimension_semantics<parallel>, #tpu.dimension_semantics<arbitrary>], iteration_bounds = array<i64: 2, 1, 1>, scalar_prefetch = 0 : i64, scratch_operands = 0 : i64, tpu.core_type = #tpu.core_type<tc>, window_params = [{transform_indices = @transform_0, window_bounds = array<i64: 16, 128>}, {transform_indices = @transform_1, window_bounds = array<i64: 128, 128>}, {transform_indices = @transform_2, window_bounds = array<i64: 16, 128>}]} {
    %c0_i32 = arith.constant 0 : i32
    %0 = arith.cmpi eq, %arg2, %c0_i32 : i32
    %1 = arith.extui %0 : i1 to i32
    %c0_i32_0 = arith.constant 0 : i32
    %2 = arith.cmpi ne, %1, %c0_i32_0 : i32
    scf.if %2 {
      %cst_10 = arith.constant 0.000000e+00 : f32
      %12 = vector.broadcast %cst_10 : f32 to vector<16x128xf32>
      %c0_11 = arith.constant 0 : index
      %c0_12 = arith.constant 0 : index
      %13 = vector.load %arg5[%c0_11, %c0_12] : memref<16x128xf32, #tpu.memory_space<vmem>>, vector<16x128xf32>
      tpu.vector_store %arg5[%c0_11, %c0_12], %12 {strides = array<i32>} : memref<16x128xf32, #tpu.memory_space<vmem>>, vector<16x128xf32>,
    } else {
    }
    %c0 = arith.constant 0 : index
    %c0_1 = arith.constant 0 : index
    %3 = vector.load %arg5[%c0, %c0_1] : memref<16x128xf32, #tpu.memory_space<vmem>>, vector<16x128xf32>
    %c0_2 = arith.constant 0 : index
    %c0_3 = arith.constant 0 : index
    %4 = vector.load %arg3[%c0_2, %c0_3] : memref<16x128xbf16, #tpu.memory_space<vmem>>, vector<16x128xbf16>
    %c0_4 = arith.constant 0 : index
    %c0_5 = arith.constant 0 : index
    %5 = vector.load %arg4[%c0_4, %c0_5] : memref<128x128xbf16, #tpu.memory_space<vmem>>, vector<128x128xbf16>
    %cst = arith.constant dense<0.000000e+00> : vector<16x128xf32>
    %6 = tpu.matmul %4, %5, %cst {dimension_numbers = #tpu.dot_dimension_numbers<[1], [0], [0], [1], [0, 0, 1, 1], [], []>} : vector<16x128xbf16>, vector<128x128xbf16>, vector<16x128xf32> -> vector<16x128xf32>
    %7 = arith.addf %3, %6 : vector<16x128xf32>
    %c0_6 = arith.constant 0 : index
    %c0_7 = arith.constant 0 : index
    %8 = vector.load %arg5[%c0_6, %c0_7] : memref<16x128xf32, #tpu.memory_space<vmem>>, vector<16x128xf32>
    tpu.vector_store %arg5[%c0_6, %c0_7], %7 {strides = array<i32>} : memref<16x128xf32, #tpu.memory_space<vmem>>, vector<16x128xf32>,
    %c0_i32_8 = arith.constant 0 : i32
    %9 = arith.cmpi eq, %arg2, %c0_i32_8 : i32
    %10 = arith.extui %9 : i1 to i32
    %c0_i32_9 = arith.constant 0 : i32
    %11 = arith.cmpi ne, %10, %c0_i32_9 : i32
    scf.if %11 {
      %c0_10 = arith.constant 0 : index
      %c0_11 = arith.constant 0 : index
      %12 = vector.load %arg5[%c0_10, %c0_11] : memref<16x128xf32, #tpu.memory_space<vmem>>, vector<16x128xf32>
      %c0_12 = arith.constant 0 : index
      %c0_13 = arith.constant 0 : index
      %13 = vector.load %arg5[%c0_12, %c0_13] : memref<16x128xf32, #tpu.memory_space<vmem>>, vector<16x128xf32>
      tpu.vector_store %arg5[%c0_12, %c0_13], %12 {strides = array<i32>} : memref<16x128xf32, #tpu.memory_space<vmem>>, vector<16x128xf32>,
    } else {
    }
    return
  }
  func.func @transform_0(%arg0: i32, %arg1: i32, %arg2: i32) -> (i32, i32) {
    %c0_i32 = arith.constant 0 : i32
    return %arg0, %arg2 : i32, i32
  }
  func.func @transform_1(%arg0: i32, %arg1: i32, %arg2: i32) -> (i32, i32) {
    %c0_i32 = arith.constant 0 : i32
    return %arg2, %arg1 : i32, i32
  }
  func.func @transform_2(%arg0: i32, %arg1: i32, %arg2: i32) -> (i32, i32) {
    %c0_i32 = arith.constant 0 : i32
    return %arg0, %arg1 : i32, i32
  }
}

module attributes {stable_mosaic.version = 11 : i64} {
  func.func @_matmul_kernel(%arg0: i32, %arg1: i32, %arg2: i32, %arg3: memref<16x384xbf16, #tpu.memory_space<vmem>>, %arg4: memref<384x128xbf16, #tpu.memory_space<vmem>>, %arg5: memref<16x128xf32, #tpu.memory_space<vmem>>) attributes {dimension_semantics = [#tpu.dimension_semantics<parallel>, #tpu.dimension_semantics<parallel>, #tpu.dimension_semantics<arbitrary>], iteration_bounds = array<i64: 2, 1, 3>, scalar_prefetch = 0 : i64, scratch_operands = 0 : i64, tpu.core_type = #tpu.core_type<tc>, window_params = [{transform_indices = @transform_0, window_bounds = array<i64: 16, 384>}, {transform_indices = @transform_1, window_bounds = array<i64: 384, 128>}, {transform_indices = @transform_2, window_bounds = array<i64: 16, 128>}]} {
    %c0_i32 = arith.constant 0 : i32
    %0 = arith.cmpi eq, %arg2, %c0_i32 : i32
    %1 = arith.extui %0 : i1 to i32
    %c0_i32_0 = arith.constant 0 : i32
    %2 = arith.cmpi ne, %1, %c0_i32_0 : i32
    scf.if %2 {
      %cst_9 = arith.constant 0.000000e+00 : f32
      %12 = vector.broadcast %cst_9 : f32 to vector<16x128xf32>
      %c0_10 = arith.constant 0 : index
      %c0_11 = arith.constant 0 : index
      %13 = vector.load %arg5[%c0_10, %c0_11] : memref<16x128xf32, #tpu.memory_space<vmem>>, vector<16x128xf32>
      tpu.vector_store %arg5[%c0_10, %c0_11], %12 {strides = array<i32>} : memref<16x128xf32, #tpu.memory_space<vmem>>, vector<16x128xf32>,
    } else {
    }
    %c0 = arith.constant 0 : index
    %c0_1 = arith.constant 0 : index
    %3 = vector.load %arg5[%c0, %c0_1] : memref<16x128xf32, #tpu.memory_space<vmem>>, vector<16x128xf32>
    %c0_2 = arith.constant 0 : index
    %c0_3 = arith.constant 0 : index
    %4 = vector.load %arg3[%c0_2, %c0_3] : memref<16x384xbf16, #tpu.memory_space<vmem>>, vector<16x384xbf16>
    %c0_4 = arith.constant 0 : index
    %c0_5 = arith.constant 0 : index
    %5 = vector.load %arg4[%c0_4, %c0_5] : memref<384x128xbf16, #tpu.memory_space<vmem>>, vector<384x128xbf16>
    %cst = arith.constant dense<0.000000e+00> : vector<16x128xf32>
    %6 = tpu.matmul %4, %5, %cst {dimension_numbers = #tpu.dot_dimension_numbers<[1], [0], [0], [1], [0, 0, 1, 1], [], []>} : vector<16x384xbf16>, vector<384x128xbf16>, vector<16x128xf32> -> vector<16x128xf32>
    %7 = arith.addf %3, %6 : vector<16x128xf32>
    %c0_6 = arith.constant 0 : index
    %c0_7 = arith.constant 0 : index
    %8 = vector.load %arg5[%c0_6, %c0_7] : memref<16x128xf32, #tpu.memory_space<vmem>>, vector<16x128xf32>
    tpu.vector_store %arg5[%c0_6, %c0_7], %7 {strides = array<i32>} : memref<16x128xf32, #tpu.memory_space<vmem>>, vector<16x128xf32>,
    %c2_i32 = arith.constant 2 : i32
    %9 = arith.cmpi eq, %arg2, %c2_i32 : i32
    %10 = arith.extui %9 : i1 to i32
    %c0_i32_8 = arith.constant 0 : i32
    %11 = arith.cmpi ne, %10, %c0_i32_8 : i32
    scf.if %11 {
      %c0_9 = arith.constant 0 : index
      %c0_10 = arith.constant 0 : index
      %12 = vector.load %arg5[%c0_9, %c0_10] : memref<16x128xf32, #tpu.memory_space<vmem>>, vector<16x128xf32>
      %cst_11 = arith.constant 0.000000e+00 : f32
      %13 = vector.broadcast %cst_11 : f32 to vector<16x128xf32>
      %14 = arith.maximumf %12, %13 : vector<16x128xf32>
      %c0_12 = arith.constant 0 : index
      %c0_13 = arith.constant 0 : index
      %15 = vector.load %arg5[%c0_12, %c0_13] : memref<16x128xf32, #tpu.memory_space<vmem>>, vector<16x128xf32>
      tpu.vector_store %arg5[%c0_12, %c0_13], %14 {strides = array<i32>} : memref<16x128xf32, #tpu.memory_space<vmem>>, vector<16x128xf32>,
    } else {
    }
    return
  }
  func.func @transform_0(%arg0: i32, %arg1: i32, %arg2: i32) -> (i32, i32) {
    %c0_i32 = arith.constant 0 : i32
    return %arg0, %arg2 : i32, i32
  }
  func.func @transform_1(%arg0: i32, %arg1: i32, %arg2: i32) -> (i32, i32) {
    %c0_i32 = arith.constant 0 : i32
    return %arg2, %arg1 : i32, i32
  }
  func.func @transform_2(%arg0: i32, %arg1: i32, %arg2: i32) -> (i32, i32) {
    %c0_i32 = arith.constant 0 : i32
    return %arg0, %arg1 : i32, i32
  }
}

module attributes {stable_mosaic.version = 11 : i64} {
  func.func @_matmul_kernel(%arg0: i32, %arg1: i32, %arg2: i32, %arg3: memref<16x384xbf16, #tpu.memory_space<vmem>>, %arg4: memref<384x128xbf16, #tpu.memory_space<vmem>>, %arg5: memref<16x128xf32, #tpu.memory_space<vmem>>) attributes {dimension_semantics = [#tpu.dimension_semantics<parallel>, #tpu.dimension_semantics<parallel>, #tpu.dimension_semantics<arbitrary>], iteration_bounds = array<i64: 1, 2, 3>, scalar_prefetch = 0 : i64, scratch_operands = 0 : i64, tpu.core_type = #tpu.core_type<tc>, window_params = [{transform_indices = @transform_0, window_bounds = array<i64: 16, 384>}, {transform_indices = @transform_1, window_bounds = array<i64: 384, 128>}, {transform_indices = @transform_2, window_bounds = array<i64: 16, 128>}]} {
    %c0_i32 = arith.constant 0 : i32
    %0 = arith.cmpi eq, %arg2, %c0_i32 : i32
    %1 = arith.extui %0 : i1 to i32
    %c0_i32_0 = arith.constant 0 : i32
    %2 = arith.cmpi ne, %1, %c0_i32_0 : i32
    scf.if %2 {
      %cst_9 = arith.constant 0.000000e+00 : f32
      %12 = vector.broadcast %cst_9 : f32 to vector<16x128xf32>
      %c0_10 = arith.constant 0 : index
      %c0_11 = arith.constant 0 : index
      %13 = vector.load %arg5[%c0_10, %c0_11] : memref<16x128xf32, #tpu.memory_space<vmem>>, vector<16x128xf32>
      tpu.vector_store %arg5[%c0_10, %c0_11], %12 {strides = array<i32>} : memref<16x128xf32, #tpu.memory_space<vmem>>, vector<16x128xf32>,
    } else {
    }
    %c0 = arith.constant 0 : index
    %c0_1 = arith.constant 0 : index
    %3 = vector.load %arg5[%c0, %c0_1] : memref<16x128xf32, #tpu.memory_space<vmem>>, vector<16x128xf32>
    %c0_2 = arith.constant 0 : index
    %c0_3 = arith.constant 0 : index
    %4 = vector.load %arg3[%c0_2, %c0_3] : memref<16x384xbf16, #tpu.memory_space<vmem>>, vector<16x384xbf16>
    %c0_4 = arith.constant 0 : index
    %c0_5 = arith.constant 0 : index
    %5 = vector.load %arg4[%c0_4, %c0_5] : memref<384x128xbf16, #tpu.memory_space<vmem>>, vector<384x128xbf16>
    %cst = arith.constant dense<0.000000e+00> : vector<16x128xf32>
    %6 = tpu.matmul %4, %5, %cst {dimension_numbers = #tpu.dot_dimension_numbers<[1], [0], [0], [1], [0, 0, 1, 1], [], []>} : vector<16x384xbf16>, vector<384x128xbf16>, vector<16x128xf32> -> vector<16x128xf32>
    %7 = arith.addf %3, %6 : vector<16x128xf32>
    %c0_6 = arith.constant 0 : index
    %c0_7 = arith.constant 0 : index
    %8 = vector.load %arg5[%c0_6, %c0_7] : memref<16x128xf32, #tpu.memory_space<vmem>>, vector<16x128xf32>
    tpu.vector_store %arg5[%c0_6, %c0_7], %7 {strides = array<i32>} : memref<16x128xf32, #tpu.memory_space<vmem>>, vector<16x128xf32>,
    %c2_i32 = arith.constant 2 : i32
    %9 = arith.cmpi eq, %arg2, %c2_i32 : i32
    %10 = arith.extui %9 : i1 to i32
    %c0_i32_8 = arith.constant 0 : i32
    %11 = arith.cmpi ne, %10, %c0_i32_8 : i32
    scf.if %11 {
      %c0_9 = arith.constant 0 : index
      %c0_10 = arith.constant 0 : index
      %12 = vector.load %arg5[%c0_9, %c0_10] : memref<16x128xf32, #tpu.memory_space<vmem>>, vector<16x128xf32>
      %cst_11 = arith.constant 0.000000e+00 : f32
      %13 = vector.broadcast %cst_11 : f32 to vector<16x128xf32>
      %14 = arith.maximumf %12, %13 : vector<16x128xf32>
      %c0_12 = arith.constant 0 : index
      %c0_13 = arith.constant 0 : index
      %15 = vector.load %arg5[%c0_12, %c0_13] : memref<16x128xf32, #tpu.memory_space<vmem>>, vector<16x128xf32>
      tpu.vector_store %arg5[%c0_12, %c0_13], %14 {strides = array<i32>} : memref<16x128xf32, #tpu.memory_space<vmem>>, vector<16x128xf32>,
    } else {
    }
    return
  }
  func.func @transform_0(%arg0: i32, %arg1: i32, %arg2: i32) -> (i32, i32) {
    %c0_i32 = arith.constant 0 : i32
    return %arg0, %arg2 : i32, i32
  }
  func.func @transform_1(%arg0: i32, %arg1: i32, %arg2: i32) -> (i32, i32) {
    %c0_i32 = arith.constant 0 : i32
    return %arg2, %arg1 : i32, i32
  }
  func.func @transform_2(%arg0: i32, %arg1: i32, %arg2: i32) -> (i32, i32) {
    %c0_i32 = arith.constant 0 : i32
    return %arg0, %arg1 : i32, i32
  }
}

module attributes {stable_mosaic.version = 11 : i64} {
  func.func @_matmul_kernel(%arg0: i32, %arg1: i32, %arg2: i32, %arg3: memref<16x128xbf16, #tpu.memory_space<vmem>>, %arg4: memref<128x128xbf16, #tpu.memory_space<vmem>>, %arg5: memref<16x128xf32, #tpu.memory_space<vmem>>) attributes {dimension_semantics = [#tpu.dimension_semantics<parallel>, #tpu.dimension_semantics<parallel>, #tpu.dimension_semantics<arbitrary>], iteration_bounds = array<i64: 1, 2, 1>, scalar_prefetch = 0 : i64, scratch_operands = 0 : i64, tpu.core_type = #tpu.core_type<tc>, window_params = [{transform_indices = @transform_0, window_bounds = array<i64: 16, 128>}, {transform_indices = @transform_1, window_bounds = array<i64: 128, 128>}, {transform_indices = @transform_2, window_bounds = array<i64: 16, 128>}]} {
    %c0_i32 = arith.constant 0 : i32
    %0 = arith.cmpi eq, %arg2, %c0_i32 : i32
    %1 = arith.extui %0 : i1 to i32
    %c0_i32_0 = arith.constant 0 : i32
    %2 = arith.cmpi ne, %1, %c0_i32_0 : i32
    scf.if %2 {
      %cst_10 = arith.constant 0.000000e+00 : f32
      %12 = vector.broadcast %cst_10 : f32 to vector<16x128xf32>
      %c0_11 = arith.constant 0 : index
      %c0_12 = arith.constant 0 : index
      %13 = vector.load %arg5[%c0_11, %c0_12] : memref<16x128xf32, #tpu.memory_space<vmem>>, vector<16x128xf32>
      tpu.vector_store %arg5[%c0_11, %c0_12], %12 {strides = array<i32>} : memref<16x128xf32, #tpu.memory_space<vmem>>, vector<16x128xf32>,
    } else {
    }
    %c0 = arith.constant 0 : index
    %c0_1 = arith.constant 0 : index
    %3 = vector.load %arg5[%c0, %c0_1] : memref<16x128xf32, #tpu.memory_space<vmem>>, vector<16x128xf32>
    %c0_2 = arith.constant 0 : index
    %c0_3 = arith.constant 0 : index
    %4 = vector.load %arg3[%c0_2, %c0_3] : memref<16x128xbf16, #tpu.memory_space<vmem>>, vector<16x128xbf16>
    %c0_4 = arith.constant 0 : index
    %c0_5 = arith.constant 0 : index
    %5 = vector.load %arg4[%c0_4, %c0_5] : memref<128x128xbf16, #tpu.memory_space<vmem>>, vector<128x128xbf16>
    %cst = arith.constant dense<0.000000e+00> : vector<16x128xf32>
    %6 = tpu.matmul %4, %5, %cst {dimension_numbers = #tpu.dot_dimension_numbers<[1], [0], [0], [1], [0, 0, 1, 1], [], []>} : vector<16x128xbf16>, vector<128x128xbf16>, vector<16x128xf32> -> vector<16x128xf32>
    %7 = arith.addf %3, %6 : vector<16x128xf32>
    %c0_6 = arith.constant 0 : index
    %c0_7 = arith.constant 0 : index
    %8 = vector.load %arg5[%c0_6, %c0_7] : memref<16x128xf32, #tpu.memory_space<vmem>>, vector<16x128xf32>
    tpu.vector_store %arg5[%c0_6, %c0_7], %7 {strides = array<i32>} : memref<16x128xf32, #tpu.memory_space<vmem>>, vector<16x128xf32>,
    %c0_i32_8 = arith.constant 0 : i32
    %9 = arith.cmpi eq, %arg2, %c0_i32_8 : i32
    %10 = arith.extui %9 : i1 to i32
    %c0_i32_9 = arith.constant 0 : i32
    %11 = arith.cmpi ne, %10, %c0_i32_9 : i32
    scf.if %11 {
      %c0_10 = arith.constant 0 : index
      %c0_11 = arith.constant 0 : index
      %12 = vector.load %arg5[%c0_10, %c0_11] : memref<16x128xf32, #tpu.memory_space<vmem>>, vector<16x128xf32>
      %c0_12 = arith.constant 0 : index
      %c0_13 = arith.constant 0 : index
      %13 = vector.load %arg5[%c0_12, %c0_13] : memref<16x128xf32, #tpu.memory_space<vmem>>, vector<16x128xf32>
      tpu.vector_store %arg5[%c0_12, %c0_13], %12 {strides = array<i32>} : memref<16x128xf32, #tpu.memory_space<vmem>>, vector<16x128xf32>,
    } else {
    }
    return
  }
  func.func @transform_0(%arg0: i32, %arg1: i32, %arg2: i32) -> (i32, i32) {
    %c0_i32 = arith.constant 0 : i32
    return %arg0, %arg2 : i32, i32
  }
  func.func @transform_1(%arg0: i32, %arg1: i32, %arg2: i32) -> (i32, i32) {
    %c0_i32 = arith.constant 0 : i32
    return %arg2, %arg1 : i32, i32
  }
  func.func @transform_2(%arg0: i32, %arg1: i32, %arg2: i32) -> (i32, i32) {
    %c0_i32 = arith.constant 0 : i32
    return %arg0, %arg1 : i32, i32
  }
}

module attributes {stable_mosaic.version = 11 : i64} {
  func.func @_matmul_kernel(%arg0: i32, %arg1: i32, %arg2: i32, %arg3: memref<16x768xbf16, #tpu.memory_space<vmem>>, %arg4: memref<768x128xbf16, #tpu.memory_space<vmem>>, %arg5: memref<16x128xf32, #tpu.memory_space<vmem>>, %arg6: memref<16x128xf32, #tpu.memory_space<vmem>>) attributes {dimension_semantics = [#tpu.dimension_semantics<parallel>, #tpu.dimension_semantics<parallel>, #tpu.dimension_semantics<arbitrary>], iteration_bounds = array<i64: 1, 2, 3>, scalar_prefetch = 0 : i64, scratch_operands = 0 : i64, tpu.core_type = #tpu.core_type<tc>, window_params = [{transform_indices = @transform_0, window_bounds = array<i64: 16, 768>}, {transform_indices = @transform_1, window_bounds = array<i64: 768, 128>}, {transform_indices = @transform_2, window_bounds = array<i64: 16, 128>}, {transform_indices = @transform_3, window_bounds = array<i64: 16, 128>}]} {
    %c0_i32 = arith.constant 0 : i32
    %0 = arith.cmpi eq, %arg2, %c0_i32 : i32
    %1 = arith.extui %0 : i1 to i32
    %c0_i32_0 = arith.constant 0 : i32
    %2 = arith.cmpi ne, %1, %c0_i32_0 : i32
    scf.if %2 {
      %cst_9 = arith.constant 0.000000e+00 : f32
      %12 = vector.broadcast %cst_9 : f32 to vector<16x128xf32>
      %c0_10 = arith.constant 0 : index
      %c0_11 = arith.constant 0 : index
      %13 = vector.load %arg6[%c0_10, %c0_11] : memref<16x128xf32, #tpu.memory_space<vmem>>, vector<16x128xf32>
      tpu.vector_store %arg6[%c0_10, %c0_11], %12 {strides = array<i32>} : memref<16x128xf32, #tpu.memory_space<vmem>>, vector<16x128xf32>,
    } else {
    }
    %c0 = arith.constant 0 : index
    %c0_1 = arith.constant 0 : index
    %3 = vector.load %arg6[%c0, %c0_1] : memref<16x128xf32, #tpu.memory_space<vmem>>, vector<16x128xf32>
    %c0_2 = arith.constant 0 : index
    %c0_3 = arith.constant 0 : index
    %4 = vector.load %arg3[%c0_2, %c0_3] : memref<16x768xbf16, #tpu.memory_space<vmem>>, vector<16x768xbf16>
    %c0_4 = arith.constant 0 : index
    %c0_5 = arith.constant 0 : index
    %5 = vector.load %arg4[%c0_4, %c0_5] : memref<768x128xbf16, #tpu.memory_space<vmem>>, vector<768x128xbf16>
    %cst = arith.constant dense<0.000000e+00> : vector<16x128xf32>
    %6 = tpu.matmul %4, %5, %cst {dimension_numbers = #tpu.dot_dimension_numbers<[1], [0], [0], [1], [0, 0, 1, 1], [], []>} : vector<16x768xbf16>, vector<768x128xbf16>, vector<16x128xf32> -> vector<16x128xf32>
    %7 = arith.addf %3, %6 : vector<16x128xf32>
    %c0_6 = arith.constant 0 : index
    %c0_7 = arith.constant 0 : index
    %8 = vector.load %arg6[%c0_6, %c0_7] : memref<16x128xf32, #tpu.memory_space<vmem>>, vector<16x128xf32>
    tpu.vector_store %arg6[%c0_6, %c0_7], %7 {strides = array<i32>} : memref<16x128xf32, #tpu.memory_space<vmem>>, vector<16x128xf32>,
    %c2_i32 = arith.constant 2 : i32
    %9 = arith.cmpi eq, %arg2, %c2_i32 : i32
    %10 = arith.extui %9 : i1 to i32
    %c0_i32_8 = arith.constant 0 : i32
    %11 = arith.cmpi ne, %10, %c0_i32_8 : i32
    scf.if %11 {
      %c0_9 = arith.constant 0 : index
      %c0_10 = arith.constant 0 : index
      %12 = vector.load %arg6[%c0_9, %c0_10] : memref<16x128xf32, #tpu.memory_space<vmem>>, vector<16x128xf32>
      %c0_11 = arith.constant 0 : index
      %c0_12 = arith.constant 0 : index
      %13 = vector.load %arg5[%c0_11, %c0_12] : memref<16x128xf32, #tpu.memory_space<vmem>>, vector<16x128xf32>
      %14 = arith.addf %12, %13 : vector<16x128xf32>
      %cst_13 = arith.constant 0.000000e+00 : f32
      %15 = vector.broadcast %cst_13 : f32 to vector<16x128xf32>
      %16 = arith.maximumf %14, %15 : vector<16x128xf32>
      %c0_14 = arith.constant 0 : index
      %c0_15 = arith.constant 0 : index
      %17 = vector.load %arg6[%c0_14, %c0_15] : memref<16x128xf32, #tpu.memory_space<vmem>>, vector<16x128xf32>
      tpu.vector_store %arg6[%c0_14, %c0_15], %16 {strides = array<i32>} : memref<16x128xf32, #tpu.memory_space<vmem>>, vector<16x128xf32>,
    } else {
    }
    return
  }
  func.func @transform_0(%arg0: i32, %arg1: i32, %arg2: i32) -> (i32, i32) {
    %c0_i32 = arith.constant 0 : i32
    return %arg0, %arg2 : i32, i32
  }
  func.func @transform_1(%arg0: i32, %arg1: i32, %arg2: i32) -> (i32, i32) {
    %c0_i32 = arith.constant 0 : i32
    return %arg2, %arg1 : i32, i32
  }
  func.func @transform_2(%arg0: i32, %arg1: i32, %arg2: i32) -> (i32, i32) {
    %c0_i32 = arith.constant 0 : i32
    return %arg0, %arg1 : i32, i32
  }
  func.func @transform_3(%arg0: i32, %arg1: i32, %arg2: i32) -> (i32, i32) {
    %c0_i32 = arith.constant 0 : i32
    return %arg0, %arg1 : i32, i32
  }
}

module attributes {stable_mosaic.version = 11 : i64} {
  func.func @_matmul_kernel(%arg0: i32, %arg1: i32, %arg2: i32, %arg3: memref<16x768xbf16, #tpu.memory_space<vmem>>, %arg4: memref<768x128xbf16, #tpu.memory_space<vmem>>, %arg5: memref<16x128xf32, #tpu.memory_space<vmem>>) attributes {dimension_semantics = [#tpu.dimension_semantics<parallel>, #tpu.dimension_semantics<parallel>, #tpu.dimension_semantics<arbitrary>], iteration_bounds = array<i64: 1, 2, 3>, scalar_prefetch = 0 : i64, scratch_operands = 0 : i64, tpu.core_type = #tpu.core_type<tc>, window_params = [{transform_indices = @transform_0, window_bounds = array<i64: 16, 768>}, {transform_indices = @transform_1, window_bounds = array<i64: 768, 128>}, {transform_indices = @transform_2, window_bounds = array<i64: 16, 128>}]} {
    %c0_i32 = arith.constant 0 : i32
    %0 = arith.cmpi eq, %arg2, %c0_i32 : i32
    %1 = arith.extui %0 : i1 to i32
    %c0_i32_0 = arith.constant 0 : i32
    %2 = arith.cmpi ne, %1, %c0_i32_0 : i32
    scf.if %2 {
      %cst_9 = arith.constant 0.000000e+00 : f32
      %12 = vector.broadcast %cst_9 : f32 to vector<16x128xf32>
      %c0_10 = arith.constant 0 : index
      %c0_11 = arith.constant 0 : index
      %13 = vector.load %arg5[%c0_10, %c0_11] : memref<16x128xf32, #tpu.memory_space<vmem>>, vector<16x128xf32>
      tpu.vector_store %arg5[%c0_10, %c0_11], %12 {strides = array<i32>} : memref<16x128xf32, #tpu.memory_space<vmem>>, vector<16x128xf32>,
    } else {
    }
    %c0 = arith.constant 0 : index
    %c0_1 = arith.constant 0 : index
    %3 = vector.load %arg5[%c0, %c0_1] : memref<16x128xf32, #tpu.memory_space<vmem>>, vector<16x128xf32>
    %c0_2 = arith.constant 0 : index
    %c0_3 = arith.constant 0 : index
    %4 = vector.load %arg3[%c0_2, %c0_3] : memref<16x768xbf16, #tpu.memory_space<vmem>>, vector<16x768xbf16>
    %c0_4 = arith.constant 0 : index
    %c0_5 = arith.constant 0 : index
    %5 = vector.load %arg4[%c0_4, %c0_5] : memref<768x128xbf16, #tpu.memory_space<vmem>>, vector<768x128xbf16>
    %cst = arith.constant dense<0.000000e+00> : vector<16x128xf32>
    %6 = tpu.matmul %4, %5, %cst {dimension_numbers = #tpu.dot_dimension_numbers<[1], [0], [0], [1], [0, 0, 1, 1], [], []>} : vector<16x768xbf16>, vector<768x128xbf16>, vector<16x128xf32> -> vector<16x128xf32>
    %7 = arith.addf %3, %6 : vector<16x128xf32>
    %c0_6 = arith.constant 0 : index
    %c0_7 = arith.constant 0 : index
    %8 = vector.load %arg5[%c0_6, %c0_7] : memref<16x128xf32, #tpu.memory_space<vmem>>, vector<16x128xf32>
    tpu.vector_store %arg5[%c0_6, %c0_7], %7 {strides = array<i32>} : memref<16x128xf32, #tpu.memory_space<vmem>>, vector<16x128xf32>,
    %c2_i32 = arith.constant 2 : i32
    %9 = arith.cmpi eq, %arg2, %c2_i32 : i32
    %10 = arith.extui %9 : i1 to i32
    %c0_i32_8 = arith.constant 0 : i32
    %11 = arith.cmpi ne, %10, %c0_i32_8 : i32
    scf.if %11 {
      %c0_9 = arith.constant 0 : index
      %c0_10 = arith.constant 0 : index
      %12 = vector.load %arg5[%c0_9, %c0_10] : memref<16x128xf32, #tpu.memory_space<vmem>>, vector<16x128xf32>
      %cst_11 = arith.constant 0.000000e+00 : f32
      %13 = vector.broadcast %cst_11 : f32 to vector<16x128xf32>
      %14 = arith.maximumf %12, %13 : vector<16x128xf32>
      %c0_12 = arith.constant 0 : index
      %c0_13 = arith.constant 0 : index
      %15 = vector.load %arg5[%c0_12, %c0_13] : memref<16x128xf32, #tpu.memory_space<vmem>>, vector<16x128xf32>
      tpu.vector_store %arg5[%c0_12, %c0_13], %14 {strides = array<i32>} : memref<16x128xf32, #tpu.memory_space<vmem>>, vector<16x128xf32>,
    } else {
    }
    return
  }
  func.func @transform_0(%arg0: i32, %arg1: i32, %arg2: i32) -> (i32, i32) {
    %c0_i32 = arith.constant 0 : i32
    return %arg0, %arg2 : i32, i32
  }
  func.func @transform_1(%arg0: i32, %arg1: i32, %arg2: i32) -> (i32, i32) {
    %c0_i32 = arith.constant 0 : i32
    return %arg2, %arg1 : i32, i32
  }
  func.func @transform_2(%arg0: i32, %arg1: i32, %arg2: i32) -> (i32, i32) {
    %c0_i32 = arith.constant 0 : i32
    return %arg0, %arg1 : i32, i32
  }
}

module attributes {stable_mosaic.version = 11 : i64} {
  func.func @_matmul_kernel(%arg0: i32, %arg1: i32, %arg2: i32, %arg3: memref<16x768xbf16, #tpu.memory_space<vmem>>, %arg4: memref<768x256xbf16, #tpu.memory_space<vmem>>, %arg5: memref<16x256xf32, #tpu.memory_space<vmem>>) attributes {dimension_semantics = [#tpu.dimension_semantics<parallel>, #tpu.dimension_semantics<parallel>, #tpu.dimension_semantics<arbitrary>], iteration_bounds = array<i64: 1, 2, 3>, scalar_prefetch = 0 : i64, scratch_operands = 0 : i64, tpu.core_type = #tpu.core_type<tc>, window_params = [{transform_indices = @transform_0, window_bounds = array<i64: 16, 768>}, {transform_indices = @transform_1, window_bounds = array<i64: 768, 256>}, {transform_indices = @transform_2, window_bounds = array<i64: 16, 256>}]} {
    %c0_i32 = arith.constant 0 : i32
    %0 = arith.cmpi eq, %arg2, %c0_i32 : i32
    %1 = arith.extui %0 : i1 to i32
    %c0_i32_0 = arith.constant 0 : i32
    %2 = arith.cmpi ne, %1, %c0_i32_0 : i32
    scf.if %2 {
      %cst_9 = arith.constant 0.000000e+00 : f32
      %12 = vector.broadcast %cst_9 : f32 to vector<16x256xf32>
      %c0_10 = arith.constant 0 : index
      %c0_11 = arith.constant 0 : index
      %13 = vector.load %arg5[%c0_10, %c0_11] : memref<16x256xf32, #tpu.memory_space<vmem>>, vector<16x256xf32>
      tpu.vector_store %arg5[%c0_10, %c0_11], %12 {strides = array<i32>} : memref<16x256xf32, #tpu.memory_space<vmem>>, vector<16x256xf32>,
    } else {
    }
    %c0 = arith.constant 0 : index
    %c0_1 = arith.constant 0 : index
    %3 = vector.load %arg5[%c0, %c0_1] : memref<16x256xf32, #tpu.memory_space<vmem>>, vector<16x256xf32>
    %c0_2 = arith.constant 0 : index
    %c0_3 = arith.constant 0 : index
    %4 = vector.load %arg3[%c0_2, %c0_3] : memref<16x768xbf16, #tpu.memory_space<vmem>>, vector<16x768xbf16>
    %c0_4 = arith.constant 0 : index
    %c0_5 = arith.constant 0 : index
    %5 = vector.load %arg4[%c0_4, %c0_5] : memref<768x256xbf16, #tpu.memory_space<vmem>>, vector<768x256xbf16>
    %cst = arith.constant dense<0.000000e+00> : vector<16x256xf32>
    %6 = tpu.matmul %4, %5, %cst {dimension_numbers = #tpu.dot_dimension_numbers<[1], [0], [0], [1], [0, 0, 1, 1], [], []>} : vector<16x768xbf16>, vector<768x256xbf16>, vector<16x256xf32> -> vector<16x256xf32>
    %7 = arith.addf %3, %6 : vector<16x256xf32>
    %c0_6 = arith.constant 0 : index
    %c0_7 = arith.constant 0 : index
    %8 = vector.load %arg5[%c0_6, %c0_7] : memref<16x256xf32, #tpu.memory_space<vmem>>, vector<16x256xf32>
    tpu.vector_store %arg5[%c0_6, %c0_7], %7 {strides = array<i32>} : memref<16x256xf32, #tpu.memory_space<vmem>>, vector<16x256xf32>,
    %c2_i32 = arith.constant 2 : i32
    %9 = arith.cmpi eq, %arg2, %c2_i32 : i32
    %10 = arith.extui %9 : i1 to i32
    %c0_i32_8 = arith.constant 0 : i32
    %11 = arith.cmpi ne, %10, %c0_i32_8 : i32
    scf.if %11 {
      %c0_9 = arith.constant 0 : index
      %c0_10 = arith.constant 0 : index
      %12 = vector.load %arg5[%c0_9, %c0_10] : memref<16x256xf32, #tpu.memory_space<vmem>>, vector<16x256xf32>
      %cst_11 = arith.constant 0.000000e+00 : f32
      %13 = vector.broadcast %cst_11 : f32 to vector<16x256xf32>
      %14 = arith.maximumf %12, %13 : vector<16x256xf32>
      %c0_12 = arith.constant 0 : index
      %c0_13 = arith.constant 0 : index
      %15 = vector.load %arg5[%c0_12, %c0_13] : memref<16x256xf32, #tpu.memory_space<vmem>>, vector<16x256xf32>
      tpu.vector_store %arg5[%c0_12, %c0_13], %14 {strides = array<i32>} : memref<16x256xf32, #tpu.memory_space<vmem>>, vector<16x256xf32>,
    } else {
    }
    return
  }
  func.func @transform_0(%arg0: i32, %arg1: i32, %arg2: i32) -> (i32, i32) {
    %c0_i32 = arith.constant 0 : i32
    return %arg0, %arg2 : i32, i32
  }
  func.func @transform_1(%arg0: i32, %arg1: i32, %arg2: i32) -> (i32, i32) {
    %c0_i32 = arith.constant 0 : i32
    return %arg2, %arg1 : i32, i32
  }
  func.func @transform_2(%arg0: i32, %arg1: i32, %arg2: i32) -> (i32, i32) {
    %c0_i32 = arith.constant 0 : i32
    return %arg0, %arg1 : i32, i32
  }
}

module attributes {stable_mosaic.version = 11 : i64} {
  func.func @_matmul_kernel(%arg0: i32, %arg1: i32, %arg2: i32, %arg3: memref<16x256xbf16, #tpu.memory_space<vmem>>, %arg4: memref<256x256xbf16, #tpu.memory_space<vmem>>, %arg5: memref<16x256xf32, #tpu.memory_space<vmem>>) attributes {dimension_semantics = [#tpu.dimension_semantics<parallel>, #tpu.dimension_semantics<parallel>, #tpu.dimension_semantics<arbitrary>], iteration_bounds = array<i64: 1, 2, 1>, scalar_prefetch = 0 : i64, scratch_operands = 0 : i64, tpu.core_type = #tpu.core_type<tc>, window_params = [{transform_indices = @transform_0, window_bounds = array<i64: 16, 256>}, {transform_indices = @transform_1, window_bounds = array<i64: 256, 256>}, {transform_indices = @transform_2, window_bounds = array<i64: 16, 256>}]} {
    %c0_i32 = arith.constant 0 : i32
    %0 = arith.cmpi eq, %arg2, %c0_i32 : i32
    %1 = arith.extui %0 : i1 to i32
    %c0_i32_0 = arith.constant 0 : i32
    %2 = arith.cmpi ne, %1, %c0_i32_0 : i32
    scf.if %2 {
      %cst_10 = arith.constant 0.000000e+00 : f32
      %12 = vector.broadcast %cst_10 : f32 to vector<16x256xf32>
      %c0_11 = arith.constant 0 : index
      %c0_12 = arith.constant 0 : index
      %13 = vector.load %arg5[%c0_11, %c0_12] : memref<16x256xf32, #tpu.memory_space<vmem>>, vector<16x256xf32>
      tpu.vector_store %arg5[%c0_11, %c0_12], %12 {strides = array<i32>} : memref<16x256xf32, #tpu.memory_space<vmem>>, vector<16x256xf32>,
    } else {
    }
    %c0 = arith.constant 0 : index
    %c0_1 = arith.constant 0 : index
    %3 = vector.load %arg5[%c0, %c0_1] : memref<16x256xf32, #tpu.memory_space<vmem>>, vector<16x256xf32>
    %c0_2 = arith.constant 0 : index
    %c0_3 = arith.constant 0 : index
    %4 = vector.load %arg3[%c0_2, %c0_3] : memref<16x256xbf16, #tpu.memory_space<vmem>>, vector<16x256xbf16>
    %c0_4 = arith.constant 0 : index
    %c0_5 = arith.constant 0 : index
    %5 = vector.load %arg4[%c0_4, %c0_5] : memref<256x256xbf16, #tpu.memory_space<vmem>>, vector<256x256xbf16>
    %cst = arith.constant dense<0.000000e+00> : vector<16x256xf32>
    %6 = tpu.matmul %4, %5, %cst {dimension_numbers = #tpu.dot_dimension_numbers<[1], [0], [0], [1], [0, 0, 1, 1], [], []>} : vector<16x256xbf16>, vector<256x256xbf16>, vector<16x256xf32> -> vector<16x256xf32>
    %7 = arith.addf %3, %6 : vector<16x256xf32>
    %c0_6 = arith.constant 0 : index
    %c0_7 = arith.constant 0 : index
    %8 = vector.load %arg5[%c0_6, %c0_7] : memref<16x256xf32, #tpu.memory_space<vmem>>, vector<16x256xf32>
    tpu.vector_store %arg5[%c0_6, %c0_7], %7 {strides = array<i32>} : memref<16x256xf32, #tpu.memory_space<vmem>>, vector<16x256xf32>,
    %c0_i32_8 = arith.constant 0 : i32
    %9 = arith.cmpi eq, %arg2, %c0_i32_8 : i32
    %10 = arith.extui %9 : i1 to i32
    %c0_i32_9 = arith.constant 0 : i32
    %11 = arith.cmpi ne, %10, %c0_i32_9 : i32
    scf.if %11 {
      %c0_10 = arith.constant 0 : index
      %c0_11 = arith.constant 0 : index
      %12 = vector.load %arg5[%c0_10, %c0_11] : memref<16x256xf32, #tpu.memory_space<vmem>>, vector<16x256xf32>
      %c0_12 = arith.constant 0 : index
      %c0_13 = arith.constant 0 : index
      %13 = vector.load %arg5[%c0_12, %c0_13] : memref<16x256xf32, #tpu.memory_space<vmem>>, vector<16x256xf32>
      tpu.vector_store %arg5[%c0_12, %c0_13], %12 {strides = array<i32>} : memref<16x256xf32, #tpu.memory_space<vmem>>, vector<16x256xf32>,
    } else {
    }
    return
  }
  func.func @transform_0(%arg0: i32, %arg1: i32, %arg2: i32) -> (i32, i32) {
    %c0_i32 = arith.constant 0 : i32
    return %arg0, %arg2 : i32, i32
  }
  func.func @transform_1(%arg0: i32, %arg1: i32, %arg2: i32) -> (i32, i32) {
    %c0_i32 = arith.constant 0 : i32
    return %arg2, %arg1 : i32, i32
  }
  func.func @transform_2(%arg0: i32, %arg1: i32, %arg2: i32) -> (i32, i32) {
    %c0_i32 = arith.constant 0 : i32
    return %arg0, %arg1 : i32, i32
  }
}

module attributes {stable_mosaic.version = 11 : i64} {
  func.func @_matmul_kernel(%arg0: i32, %arg1: i32, %arg2: i32, %arg3: memref<16x768xbf16, #tpu.memory_space<vmem>>, %arg4: memref<768x256xbf16, #tpu.memory_space<vmem>>, %arg5: memref<16x256xf32, #tpu.memory_space<vmem>>, %arg6: memref<16x256xf32, #tpu.memory_space<vmem>>) attributes {dimension_semantics = [#tpu.dimension_semantics<parallel>, #tpu.dimension_semantics<parallel>, #tpu.dimension_semantics<arbitrary>], iteration_bounds = array<i64: 1, 2, 6>, scalar_prefetch = 0 : i64, scratch_operands = 0 : i64, tpu.core_type = #tpu.core_type<tc>, window_params = [{transform_indices = @transform_0, window_bounds = array<i64: 16, 768>}, {transform_indices = @transform_1, window_bounds = array<i64: 768, 256>}, {transform_indices = @transform_2, window_bounds = array<i64: 16, 256>}, {transform_indices = @transform_3, window_bounds = array<i64: 16, 256>}]} {
    %c0_i32 = arith.constant 0 : i32
    %0 = arith.cmpi eq, %arg2, %c0_i32 : i32
    %1 = arith.extui %0 : i1 to i32
    %c0_i32_0 = arith.constant 0 : i32
    %2 = arith.cmpi ne, %1, %c0_i32_0 : i32
    scf.if %2 {
      %cst_9 = arith.constant 0.000000e+00 : f32
      %12 = vector.broadcast %cst_9 : f32 to vector<16x256xf32>
      %c0_10 = arith.constant 0 : index
      %c0_11 = arith.constant 0 : index
      %13 = vector.load %arg6[%c0_10, %c0_11] : memref<16x256xf32, #tpu.memory_space<vmem>>, vector<16x256xf32>
      tpu.vector_store %arg6[%c0_10, %c0_11], %12 {strides = array<i32>} : memref<16x256xf32, #tpu.memory_space<vmem>>, vector<16x256xf32>,
    } else {
    }
    %c0 = arith.constant 0 : index
    %c0_1 = arith.constant 0 : index
    %3 = vector.load %arg6[%c0, %c0_1] : memref<16x256xf32, #tpu.memory_space<vmem>>, vector<16x256xf32>
    %c0_2 = arith.constant 0 : index
    %c0_3 = arith.constant 0 : index
    %4 = vector.load %arg3[%c0_2, %c0_3] : memref<16x768xbf16, #tpu.memory_space<vmem>>, vector<16x768xbf16>
    %c0_4 = arith.constant 0 : index
    %c0_5 = arith.constant 0 : index
    %5 = vector.load %arg4[%c0_4, %c0_5] : memref<768x256xbf16, #tpu.memory_space<vmem>>, vector<768x256xbf16>
    %cst = arith.constant dense<0.000000e+00> : vector<16x256xf32>
    %6 = tpu.matmul %4, %5, %cst {dimension_numbers = #tpu.dot_dimension_numbers<[1], [0], [0], [1], [0, 0, 1, 1], [], []>} : vector<16x768xbf16>, vector<768x256xbf16>, vector<16x256xf32> -> vector<16x256xf32>
    %7 = arith.addf %3, %6 : vector<16x256xf32>
    %c0_6 = arith.constant 0 : index
    %c0_7 = arith.constant 0 : index
    %8 = vector.load %arg6[%c0_6, %c0_7] : memref<16x256xf32, #tpu.memory_space<vmem>>, vector<16x256xf32>
    tpu.vector_store %arg6[%c0_6, %c0_7], %7 {strides = array<i32>} : memref<16x256xf32, #tpu.memory_space<vmem>>, vector<16x256xf32>,
    %c5_i32 = arith.constant 5 : i32
    %9 = arith.cmpi eq, %arg2, %c5_i32 : i32
    %10 = arith.extui %9 : i1 to i32
    %c0_i32_8 = arith.constant 0 : i32
    %11 = arith.cmpi ne, %10, %c0_i32_8 : i32
    scf.if %11 {
      %c0_9 = arith.constant 0 : index
      %c0_10 = arith.constant 0 : index
      %12 = vector.load %arg6[%c0_9, %c0_10] : memref<16x256xf32, #tpu.memory_space<vmem>>, vector<16x256xf32>
      %c0_11 = arith.constant 0 : index
      %c0_12 = arith.constant 0 : index
      %13 = vector.load %arg5[%c0_11, %c0_12] : memref<16x256xf32, #tpu.memory_space<vmem>>, vector<16x256xf32>
      %14 = arith.addf %12, %13 : vector<16x256xf32>
      %cst_13 = arith.constant 0.000000e+00 : f32
      %15 = vector.broadcast %cst_13 : f32 to vector<16x256xf32>
      %16 = arith.maximumf %14, %15 : vector<16x256xf32>
      %c0_14 = arith.constant 0 : index
      %c0_15 = arith.constant 0 : index
      %17 = vector.load %arg6[%c0_14, %c0_15] : memref<16x256xf32, #tpu.memory_space<vmem>>, vector<16x256xf32>
      tpu.vector_store %arg6[%c0_14, %c0_15], %16 {strides = array<i32>} : memref<16x256xf32, #tpu.memory_space<vmem>>, vector<16x256xf32>,
    } else {
    }
    return
  }
  func.func @transform_0(%arg0: i32, %arg1: i32, %arg2: i32) -> (i32, i32) {
    %c0_i32 = arith.constant 0 : i32
    return %arg0, %arg2 : i32, i32
  }
  func.func @transform_1(%arg0: i32, %arg1: i32, %arg2: i32) -> (i32, i32) {
    %c0_i32 = arith.constant 0 : i32
    return %arg2, %arg1 : i32, i32
  }
  func.func @transform_2(%arg0: i32, %arg1: i32, %arg2: i32) -> (i32, i32) {
    %c0_i32 = arith.constant 0 : i32
    return %arg0, %arg1 : i32, i32
  }
  func.func @transform_3(%arg0: i32, %arg1: i32, %arg2: i32) -> (i32, i32) {
    %c0_i32 = arith.constant 0 : i32
    return %arg0, %arg1 : i32, i32
  }
}

module attributes {stable_mosaic.version = 11 : i64} {
  func.func @_matmul_kernel(%arg0: i32, %arg1: i32, %arg2: i32, %arg3: memref<16x768xbf16, #tpu.memory_space<vmem>>, %arg4: memref<768x256xbf16, #tpu.memory_space<vmem>>, %arg5: memref<16x256xf32, #tpu.memory_space<vmem>>) attributes {dimension_semantics = [#tpu.dimension_semantics<parallel>, #tpu.dimension_semantics<parallel>, #tpu.dimension_semantics<arbitrary>], iteration_bounds = array<i64: 1, 2, 6>, scalar_prefetch = 0 : i64, scratch_operands = 0 : i64, tpu.core_type = #tpu.core_type<tc>, window_params = [{transform_indices = @transform_0, window_bounds = array<i64: 16, 768>}, {transform_indices = @transform_1, window_bounds = array<i64: 768, 256>}, {transform_indices = @transform_2, window_bounds = array<i64: 16, 256>}]} {
    %c0_i32 = arith.constant 0 : i32
    %0 = arith.cmpi eq, %arg2, %c0_i32 : i32
    %1 = arith.extui %0 : i1 to i32
    %c0_i32_0 = arith.constant 0 : i32
    %2 = arith.cmpi ne, %1, %c0_i32_0 : i32
    scf.if %2 {
      %cst_9 = arith.constant 0.000000e+00 : f32
      %12 = vector.broadcast %cst_9 : f32 to vector<16x256xf32>
      %c0_10 = arith.constant 0 : index
      %c0_11 = arith.constant 0 : index
      %13 = vector.load %arg5[%c0_10, %c0_11] : memref<16x256xf32, #tpu.memory_space<vmem>>, vector<16x256xf32>
      tpu.vector_store %arg5[%c0_10, %c0_11], %12 {strides = array<i32>} : memref<16x256xf32, #tpu.memory_space<vmem>>, vector<16x256xf32>,
    } else {
    }
    %c0 = arith.constant 0 : index
    %c0_1 = arith.constant 0 : index
    %3 = vector.load %arg5[%c0, %c0_1] : memref<16x256xf32, #tpu.memory_space<vmem>>, vector<16x256xf32>
    %c0_2 = arith.constant 0 : index
    %c0_3 = arith.constant 0 : index
    %4 = vector.load %arg3[%c0_2, %c0_3] : memref<16x768xbf16, #tpu.memory_space<vmem>>, vector<16x768xbf16>
    %c0_4 = arith.constant 0 : index
    %c0_5 = arith.constant 0 : index
    %5 = vector.load %arg4[%c0_4, %c0_5] : memref<768x256xbf16, #tpu.memory_space<vmem>>, vector<768x256xbf16>
    %cst = arith.constant dense<0.000000e+00> : vector<16x256xf32>
    %6 = tpu.matmul %4, %5, %cst {dimension_numbers = #tpu.dot_dimension_numbers<[1], [0], [0], [1], [0, 0, 1, 1], [], []>} : vector<16x768xbf16>, vector<768x256xbf16>, vector<16x256xf32> -> vector<16x256xf32>
    %7 = arith.addf %3, %6 : vector<16x256xf32>
    %c0_6 = arith.constant 0 : index
    %c0_7 = arith.constant 0 : index
    %8 = vector.load %arg5[%c0_6, %c0_7] : memref<16x256xf32, #tpu.memory_space<vmem>>, vector<16x256xf32>
    tpu.vector_store %arg5[%c0_6, %c0_7], %7 {strides = array<i32>} : memref<16x256xf32, #tpu.memory_space<vmem>>, vector<16x256xf32>,
    %c5_i32 = arith.constant 5 : i32
    %9 = arith.cmpi eq, %arg2, %c5_i32 : i32
    %10 = arith.extui %9 : i1 to i32
    %c0_i32_8 = arith.constant 0 : i32
    %11 = arith.cmpi ne, %10, %c0_i32_8 : i32
    scf.if %11 {
      %c0_9 = arith.constant 0 : index
      %c0_10 = arith.constant 0 : index
      %12 = vector.load %arg5[%c0_9, %c0_10] : memref<16x256xf32, #tpu.memory_space<vmem>>, vector<16x256xf32>
      %cst_11 = arith.constant 0.000000e+00 : f32
      %13 = vector.broadcast %cst_11 : f32 to vector<16x256xf32>
      %14 = arith.maximumf %12, %13 : vector<16x256xf32>
      %c0_12 = arith.constant 0 : index
      %c0_13 = arith.constant 0 : index
      %15 = vector.load %arg5[%c0_12, %c0_13] : memref<16x256xf32, #tpu.memory_space<vmem>>, vector<16x256xf32>
      tpu.vector_store %arg5[%c0_12, %c0_13], %14 {strides = array<i32>} : memref<16x256xf32, #tpu.memory_space<vmem>>, vector<16x256xf32>,
    } else {
    }
    return
  }
  func.func @transform_0(%arg0: i32, %arg1: i32, %arg2: i32) -> (i32, i32) {
    %c0_i32 = arith.constant 0 : i32
    return %arg0, %arg2 : i32, i32
  }
  func.func @transform_1(%arg0: i32, %arg1: i32, %arg2: i32) -> (i32, i32) {
    %c0_i32 = arith.constant 0 : i32
    return %arg2, %arg1 : i32, i32
  }
  func.func @transform_2(%arg0: i32, %arg1: i32, %arg2: i32) -> (i32, i32) {
    %c0_i32 = arith.constant 0 : i32
    return %arg0, %arg1 : i32, i32
  }
}

module attributes {stable_mosaic.version = 11 : i64} {
  func.func @_avgpool_fc_kernel(%arg0: i32, %arg1: memref<8x1x512xf32, #tpu.memory_space<vmem>>, %arg2: memref<512x256xbf16, #tpu.memory_space<vmem>>, %arg3: memref<1x256xf32, #tpu.memory_space<vmem>>, %arg4: memref<8x256xf32, #tpu.memory_space<vmem>>) attributes {dimension_semantics = [#tpu.dimension_semantics<parallel>], iteration_bounds = array<i64: 4>, scalar_prefetch = 0 : i64, scratch_operands = 0 : i64, tpu.core_type = #tpu.core_type<tc>, window_params = [{pipeline_mode = #tpu.pipeline_mode<synchronous>, transform_indices = @transform_0, window_bounds = array<i64: 8, 1, 512>}, {transform_indices = @transform_1, window_bounds = array<i64: 512, 256>}, {transform_indices = @transform_2, window_bounds = array<i64: 1, 256>}, {transform_indices = @transform_3, window_bounds = array<i64: 8, 256>}]} {
    %c0 = arith.constant 0 : index
    %c0_0 = arith.constant 0 : index
    %c0_1 = arith.constant 0 : index
    %0 = vector.load %arg1[%c0, %c0_0, %c0_1] : memref<8x1x512xf32, #tpu.memory_space<vmem>>, vector<8x1x512xf32>
    %cst = arith.constant dense<0.000000e+00> : vector<8x512xf32>
    %1 = vector.multi_reduction <add>, %0, %cst [1] : vector<8x1x512xf32> to vector<8x512xf32>
    %cst_2 = arith.constant 1.000000e+00 : f32
    %2 = vector.broadcast %cst_2 : f32 to vector<8x512xf32>
    %3 = arith.divf %1, %2 : vector<8x512xf32>
    %4 = arith.truncf %3 : vector<8x512xf32> to vector<8x512xbf16>
    %c0_3 = arith.constant 0 : index
    %c0_4 = arith.constant 0 : index
    %5 = vector.load %arg2[%c0_3, %c0_4] : memref<512x256xbf16, #tpu.memory_space<vmem>>, vector<512x256xbf16>
    %cst_5 = arith.constant dense<0.000000e+00> : vector<8x256xf32>
    %6 = tpu.matmul %4, %5, %cst_5 {dimension_numbers = #tpu.dot_dimension_numbers<[1], [0], [0], [1], [0, 0, 1, 1], [], []>} : vector<8x512xbf16>, vector<512x256xbf16>, vector<8x256xf32> -> vector<8x256xf32>
    %c0_6 = arith.constant 0 : index
    %c0_7 = arith.constant 0 : index
    %7 = vector.load %arg3[%c0_6, %c0_7] : memref<1x256xf32, #tpu.memory_space<vmem>>, vector<1x256xf32>
    %8 = vector.broadcast %7 : vector<1x256xf32> to vector<8x256xf32>
    %9 = arith.addf %6, %8 : vector<8x256xf32>
    %c0_8 = arith.constant 0 : index
    %c0_9 = arith.constant 0 : index
    %10 = vector.load %arg4[%c0_8, %c0_9] : memref<8x256xf32, #tpu.memory_space<vmem>>, vector<8x256xf32>
    tpu.vector_store %arg4[%c0_8, %c0_9], %9 {strides = array<i32>} : memref<8x256xf32, #tpu.memory_space<vmem>>, vector<8x256xf32>,
    return
  }
  func.func @transform_0(%arg0: i32) -> (i32, i32, i32) {
    %c0_i32 = arith.constant 0 : i32
    %c0_i32_0 = arith.constant 0 : i32
    %c0_i32_1 = arith.constant 0 : i32
    %c0_i32_2 = arith.constant 0 : i32
    return %c0_i32, %c0_i32_0, %c0_i32_1 : i32, i32, i32
  }
  func.func @transform_1(%arg0: i32) -> (i32, i32) {
    %c0_i32 = arith.constant 0 : i32
    %c0_i32_0 = arith.constant 0 : i32
    return %c0_i32, %arg0 : i32, i32
  }
  func.func @transform_2(%arg0: i32) -> (i32, i32) {
    %c0_i32 = arith.constant 0 : i32
    %c0_i32_0 = arith.constant 0 : i32
    return %c0_i32, %arg0 : i32, i32
  }
  func.func @transform_3(%arg0: i32) -> (i32, i32) {
    %c0_i32 = arith.constant 0 : i32
    %c0_i32_0 = arith.constant 0 : i32
    return %c0_i32, %arg0 : i32, i32
  }
}

</mosaic_0001>

<bundles_post_ra>
// kernel: forward.23
= control target key start
LH: loop header
LB: loop body
LE: loop exit
PB: predicated region body
PF: predicated region fallthrough
CT: control target
= control target key end

     0   :  { %s450_s12 = smov 0   ;;  %s552_s0 = inlined_call_operand.vmem [shape: f32[2,18,8,64], index: 0, kind: input, shape index: {}]   ;;  %s553_s1 = inlined_call_operand.vmem [shape: f32[2,18,8,64], index: 1, kind: input, shape index: {}]   ;;  %s554_s2 = inlined_call_operand.vmem [shape: f32[2,18,8,64], index: 2, kind: input, shape index: {}]   ;;  %s555_s3 = inlined_call_operand.vmem [shape: f32[2,8,8,64], index: 3, kind: output, shape index: {}]  }
   0x1 LB: > { %s400_s13 = sadd.s32 4294967295, %s428_s12   ;;  %p404_p0 = scmp.ge.s32.totalorder %s428_s12, 1  ;;  %s428_s12 = sphi %s450_s12, %s13_s12  }
   0x2   : > { %p157_p1 = scmp.lt.s32.totalorder %s428_s12, 3 }
   0x4   : > { %p158_p2 = pnand %p404_p0, %p157_p1 }
   0x5   : > { %p191_p3 = scmp.lt.s32.totalorder (!%p158_p2), %s400_s13, 1 }
   0x6   : > { %161 = sbr.rel (%p158_p2) target bundleno = 40 (0x28), region = 32 }
   0xb   : > { %s557_s13 = smov (!%p191_p3, %s400_s13), 1  ;;  %vm312_vm0 = vcmask 523264  }
   0xc   : > { %s413_s14 = smul.u32 144, %s557_s13  ;;  %s412_s24 = sshll.u32 %s557_s13, 6 }
   0xd   : > { %s501_s27 = scalar_lea.vmem %s555_s3, %s412_s24 }
   0xe   : > { %s464_s17 = scalar_lea.vmem %s552_s0, %s413_s14  ;;  %s469_s20 = scalar_lea.vmem %s553_s1, %s413_s14 }
   0xf   : > { %s474_s23 = scalar_lea.vmem %s554_s2, %s413_s14  ;;  %v211_v0 = vld [vmem:[%s464_s17] sm:$0xff]  ;;  %v212_v1 = vld [vmem:[%s464_s17 + $0x8] sm:$0xff]  ;;  %v213_v2 = vld [vmem:[%s464_s17 + $0x10] sm:$0xff] }
  0x10   : > { %v228_v3 = vld [vmem:[%s469_s20] sm:$0xff]  ;;  %v229_v4 = vld [vmem:[%s469_s20 + $0x8] sm:$0xff]  ;;  %v230_v5 = vld [vmem:[%s469_s20 + $0x10] sm:$0xff] }
  0x11   : > { %v245_v6 = vmax.f32 %v211_v0, %v228_v3  ;;  %v246_v7 = vmax.f32 %v212_v1, %v229_v4  ;;  %v247_v8 = vmax.f32 %v213_v2, %v230_v5  ;;  %v262_v9 = vld [vmem:[%s474_s23] sm:$0xff]  ;;  %v263_v10 = vld [vmem:[%s474_s23 + $0x8] sm:$0xff]  ;;  %v264_v11 = vld [vmem:[%s474_s23 + $0x10] sm:$0xff] }
  0x12   : > { %v214_v12 = vld [vmem:[%s464_s17 + $0x18] sm:$0xff]  ;;  %v215_v13 = vld [vmem:[%s464_s17 + $0x20] sm:$0xff]  ;;  %v216_v23 = vld [vmem:[%s464_s17 + $0x28] sm:$0xff] }
  0x13   : > { %v231_v14 = vld [vmem:[%s469_s20 + $0x18] sm:$0xff]  ;;  %v279_v15 = vmax.f32 %v245_v6, %v262_v9  ;;  %v280_v16 = vmax.f32 %v246_v7, %v263_v10  ;;  %v281_v17 = vmax.f32 %v247_v8, %v264_v11  ;;  %v232_v18 = vld [vmem:[%s469_s20 + $0x20] sm:$0xff]  ;;  %v217_v24 = vld [vmem:[%s464_s17 + $0x30] sm:$0xff] }
  0x14   : > { %v248_v19 = vmax.f32 %v214_v12, %v231_v14  ;;  %v265_v20 = vld [vmem:[%s474_s23 + $0x18] sm:$0xff]  ;;  %v266_v21 = vld [vmem:[%s474_s23 + $0x20] sm:$0xff]  ;;  %v249_v22 = vmax.f32 %v215_v13, %v232_v18  ;;  %v233_v25 = vld [vmem:[%s469_s20 + $0x28] sm:$0xff] }
  0x15   : > { %v296_v26 = vmax.f32 %v279_v15, %v280_v16  ;;  %v234_v28 = vld [vmem:[%s469_s20 + $0x30] sm:$0xff]  ;;  %v250_v29 = vmax.f32 %v216_v23, %v233_v25  ;;  %v267_v30 = vld [vmem:[%s474_s23 + $0x28] sm:$0xff]  ;;  %v218_v34 = vld [vmem:[%s464_s17 + $0x38] sm:$0xff] }
  0x16   : > { %v282_v27 = vmax.f32 %v248_v19, %v265_v20  ;;  %v268_v31 = vld [vmem:[%s474_s23 + $0x30] sm:$0xff]  ;;  %v283_v32 = vmax.f32 %v249_v22, %v266_v21  ;;  %v251_v33 = vmax.f32 %v217_v24, %v234_v28  ;;  %v219_v35 = vld [vmem:[%s464_s17 + $0x40] sm:$0xff]  ;;  %v235_v36 = vld [vmem:[%s469_s20 + $0x38] sm:$0xff] }
  0x17   : > { %v304_v37 = vmax.f32 %v296_v26, %v281_v17  ;;  %v284_v39 = vmax.f32 %v250_v29, %v267_v30  ;;  %v236_v40 = vld [vmem:[%s469_s20 + $0x40] sm:$0xff]  ;;  %v252_v41 = vmax.f32 %v218_v34, %v235_v36  ;;  %v269_v42 = vld [vmem:[%s474_s23 + $0x38] sm:$0xff]  ;;  %v220_v46 = vld [vmem:[%s464_s17 + $0x48] sm:$0xff] }
  0x18   : > { %v297_v38 = vmax.f32 %v281_v17, %v282_v27  ;;  %v270_v43 = vld [vmem:[%s474_s23 + $0x40] sm:$0xff]  ;;  %v285_v44 = vmax.f32 %v251_v33, %v268_v31  ;;  %v253_v45 = vmax.f32 %v219_v35, %v236_v40  ;;  %v221_v47 = vld [vmem:[%s464_s17 + $0x50] sm:$0xff]  ;;  %v237_v48 = vld [vmem:[%s469_s20 + $0x48] sm:$0xff] }
  0x19   : > { %313 = vst.msk [vmem:[%s501_s27] sm:$0xff] %vm312_vm0, %v304_v37  ;;  %v298_v50 = vmax.f32 %v283_v32, %v284_v39  ;;  %v286_v51 = vmax.f32 %v252_v41, %v269_v42  ;;  %v238_v52 = vld [vmem:[%s469_s20 + $0x50] sm:$0xff]  ;;  %v254_v53 = vmax.f32 %v220_v46, %v237_v48  ;;  %v271_v54 = vld [vmem:[%s474_s23 + $0x48] sm:$0xff]  ;;  %v222_v58 = vld [vmem:[%s464_s17 + $0x58] sm:$0xff] }
  0x1a   : > { %v305_v49 = vmax.f32 %v297_v38, %v283_v32  ;;  %v272_v55 = vld [vmem:[%s474_s23 + $0x50] sm:$0xff]  ;;  %v287_v56 = vmax.f32 %v253_v45, %v270_v43  ;;  %v255_v57 = vmax.f32 %v221_v47, %v238_v52  ;;  %v223_v59 = vld [vmem:[%s464_s17 + $0x60] sm:$0xff]  ;;  %v239_v60 = vld [vmem:[%s469_s20 + $0x58] sm:$0xff] }
  0x1b   : > { %v306_v61 = vmax.f32 %v298_v50, %v285_v44  ;;  %v299_v62 = vmax.f32 %v285_v44, %v286_v51  ;;  %v288_v63 = vmax.f32 %v254_v53, %v271_v54  ;;  %v240_v0 = vld [vmem:[%s469_s20 + $0x60] sm:$0xff]  ;;  %v256_v1 = vmax.f32 %v222_v58, %v239_v60  ;;  %v273_v2 = vld [vmem:[%s474_s23 + $0x58] sm:$0xff]  ;;  %v224_v6 = vld [vmem:[%s464_s17 + $0x68] sm:$0xff] }
  0x1c   : > { %314 = vst.msk [vmem:[%s501_s27 + $0x8] sm:$0xff] %vm312_vm0, %v305_v49  ;;  %v274_v3 = vld [vmem:[%s474_s23 + $0x60] sm:$0xff]  ;;  %v289_v4 = vmax.f32 %v255_v57, %v272_v55  ;;  %v257_v5 = vmax.f32 %v223_v59, %v240_v0  ;;  %v225_v7 = vld [vmem:[%s464_s17 + $0x70] sm:$0xff]  ;;  %v241_v8 = vld [vmem:[%s469_s20 + $0x68] sm:$0xff] }
  0x1d   : > { %315 = vst.msk [vmem:[%s501_s27 + $0x10] sm:$0xff] %vm312_vm0, %v306_v61  ;;  %v307_v9 = vmax.f32 %v299_v62, %v287_v56  ;;  %v300_v10 = vmax.f32 %v287_v56, %v288_v63  ;;  %v290_v11 = vmax.f32 %v256_v1, %v273_v2  ;;  %v242_v12 = vld [vmem:[%s469_s20 + $0x70] sm:$0xff]  ;;  %v258_v13 = vmax.f32 %v224_v6, %v241_v8  ;;  %v275_v14 = vld [vmem:[%s474_s23 + $0x68] sm:$0xff]  ;;  %v226_v18 = vld [vmem:[%s464_s17 + $0x78] sm:$0xff] }
  0x1e   : > { %v276_v15 = vld [vmem:[%s474_s23 + $0x70] sm:$0xff]  ;;  %v291_v16 = vmax.f32 %v257_v5, %v274_v3  ;;  %v259_v17 = vmax.f32 %v225_v7, %v242_v12  ;;  %v227_v19 = vld [vmem:[%s464_s17 + $0x80] sm:$0xff]  ;;  %v243_v20 = vld [vmem:[%s469_s20 + $0x78] sm:$0xff] }
  0x1f   : > { %316 = vst.msk [vmem:[%s501_s27 + $0x18] sm:$0xff] %vm312_vm0, %v307_v9  ;;  %v308_v21 = vmax.f32 %v300_v10, %v289_v4  ;;  %v301_v22 = vmax.f32 %v289_v4, %v290_v11  ;;  %v292_v23 = vmax.f32 %v258_v13, %v275_v14  ;;  %v244_v24 = vld [vmem:[%s469_s20 + $0x80] sm:$0xff]  ;;  %v260_v25 = vmax.f32 %v226_v18, %v243_v20  ;;  %v277_v26 = vld [vmem:[%s474_s23 + $0x78] sm:$0xff] }
  0x20   : > { %v278_v27 = vld [vmem:[%s474_s23 + $0x80] sm:$0xff]  ;;  %v293_v28 = vmax.f32 %v259_v17, %v276_v15  ;;  %v261_v29 = vmax.f32 %v227_v19, %v244_v24 }
  0x21   : > { %317 = vst.msk [vmem:[%s501_s27 + $0x20] sm:$0xff] %vm312_vm0, %v308_v21  ;;  %v309_v30 = vmax.f32 %v301_v22, %v291_v16  ;;  %v302_v31 = vmax.f32 %v291_v16, %v292_v23  ;;  %v294_v32 = vmax.f32 %v260_v25, %v277_v26 }
  0x22   : > { %v295_v33 = vmax.f32 %v261_v29, %v278_v27 }
  0x23   : > { %318 = vst.msk [vmem:[%s501_s27 + $0x28] sm:$0xff] %vm312_vm0, %v309_v30  ;;  %v310_v34 = vmax.f32 %v302_v31, %v293_v28  ;;  %v303_v35 = vmax.f32 %v293_v28, %v294_v32 }
  0x25   : > { %319 = vst.msk [vmem:[%s501_s27 + $0x30] sm:$0xff] %vm312_vm0, %v310_v34  ;;  %v311_v36 = vmax.f32 %v303_v35, %v295_v33 }
  0x27   : > { %320 = vst.msk [vmem:[%s501_s27 + $0x38] sm:$0xff] %vm312_vm0, %v311_v36 }
  0x28 PF: > { %s13_s12 = sadd.s32 1, %s428_s12  }
  0x29   : > { %p10_p4 = scmp.ge.s32.totalorder %s13_s12, 4  }
  0x2b   :  { %12 = sbr.rel (!%p10_p4) target bundleno = 1 (0x1), region = 68 }

// kernel: forward.22
= control target key start
LH: loop header
LB: loop body
LE: loop exit
PB: predicated region body
PF: predicated region fallthrough
CT: control target
= control target key end

     0   :  { %s1023_s9 = smov 0   ;;  %s1025_s10 = smov 0   ;;  %s1166_s0 = inlined_call_operand.vmem [shape: bf16[512,256], index: 0, kind: input, shape index: {}]   ;;  %s1167_s1 = inlined_call_operand.vmem [shape: bf16[256,128], index: 1, kind: input, shape index: {}]   ;;  %s1168_s2 = inlined_call_operand.vmem [shape: f32[512,128], index: 2, kind: output, shape index: {}]  }
   0x1   :  { %s1027_s11 = smov 0  }
   0x2 LB: > { %s31_s12 = sadd.s32 1, %s1002_s10  ;;  %p774_p0 = scmp.ge.s32.totalorder %s1006_s11, 1  ;;  %s1006_s11 = sphi %s1027_s11, %s12_s11   ;;  %s1002_s10 = sphi %s1025_s10, %s1170_s10   ;;  %s998_s9 = sphi %s1023_s9, %s1169_s9  }
   0x3   : > { %p33_p1 = scmp.ge.s32.totalorder %s31_s12, 4  ;;  %p158_p2 = scmp.lt.s32.totalorder %s1006_s11, 5 }
   0x5   : > { %s1172_s12 = smov (%p33_p1, %s31_s12), 0  ;;  %p159_p3 = pnand %p774_p0, %p158_p2 }
   0x6   : > { %s775_s25 = sshll.u32 (!%p159_p3), %s998_s9, 4 }
   0x7   : > { %162 = sbr.rel (%p159_p3) target bundleno = 238 (0xee), region = 28  ;;  %p198_p4 = scmp.lt.s32.totalorder (!%p159_p3), %s775_s25, 63 }
   0xc   : > { %v934_v0 = vld [vmem:[%s1167_s1 + $0x38] sm:$0xff]  ;;  %v933_v2 = vld [vmem:[%s1167_s1 + $0x30] sm:$0xff]  ;;  %v932_v4 = vld [vmem:[%s1167_s1 + $0x28] sm:$0xff]  ;;  %s1174_s25 = smov (!%p198_p4, %s775_s25), 63 }
   0xd   : > { %v942_v1 = vld [vmem:[%s1167_s1 + $0x78] sm:$0xff]  ;;  %486 = vmatpush.bf16.msra.mxu0 %v934_v0  ;;  %943 = vmatpush.bf16.msra.mxu2 %v934_v0  ;;  %v941_v3 = vld [vmem:[%s1167_s1 + $0x70] sm:$0xff]  ;;  %v940_v5 = vld [vmem:[%s1167_s1 + $0x68] sm:$0xff]  ;;  %s910_s13 = sshll.u32 %s1174_s25, 3 }
   0xe   : > { %535 = vmatpush.bf16.msra.mxu1 %v942_v1  ;;  %951 = vmatpush.bf16.msra.mxu3 %v942_v1  ;;  %v931_v6 = vld [vmem:[%s1167_s1 + $0x20] sm:$0xff]  ;;  %v930_v8 = vld [vmem:[%s1167_s1 + $0x18] sm:$0xff]  ;;  %v929_v10 = vld [vmem:[%s1167_s1 + $0x10] sm:$0xff]  ;;  %s1091_s18 = scalar_lea.vmem %s1166_s0, %s910_s13  ;;  %s1139_s28 = scalar_lea.vmem %s1168_s2, %s910_s13 }
   0xf   : > { %v939_v7 = vld [vmem:[%s1167_s1 + $0x60] sm:$0xff]  ;;  %v938_v9 = vld [vmem:[%s1167_s1 + $0x58] sm:$0xff]  ;;  %v937_v11 = vld [vmem:[%s1167_s1 + $0x50] sm:$0xff] }
  0x10   : > { %v928_v12 = vld [vmem:[%s1167_s1 + $0x8] sm:$0xff]  ;;  %v927_v14 = vld [vmem:[%s1167_s1] sm:$0xff]  ;;  %v790_v28 = vld [vmem:[%s1091_s18 + $0x10] sm:$0xf] }
  0x11   : > { %487 = vmatpush.bf16.msra.mxu0 %v933_v2  ;;  %944 = vmatpush.bf16.msra.mxu2 %v933_v2  ;;  %v936_v13 = vld [vmem:[%s1167_s1 + $0x48] sm:$0xff]  ;;  %v935_v15 = vld [vmem:[%s1167_s1 + $0x40] sm:$0xff]  ;;  %v914_v29 = vld [vmem:[%s1091_s18 + $0x14] sm:$0xf0] }
  0x12   : > { %536 = vmatpush.bf16.msra.mxu1 %v941_v3  ;;  %952 = vmatpush.bf16.msra.mxu3 %v941_v3  ;;  %v782_v16 = vld [vmem:[%s1091_s18] sm:$0xf]  ;;  %v912_v17 = vld [vmem:[%s1091_s18 + $0x4] sm:$0xf0]  ;;  %v911_v20 = vld [vmem:[%s1091_s18 + $0x4] sm:$0xf]  ;;  %v791_v36 = vor.u32 %v914_v29, %v790_v28 }
  0x13   : > { %v814_v18 = vld [vmem:[%s1091_s18 + $0x40] sm:$0xf]  ;;  %v920_v19 = vld [vmem:[%s1091_s18 + $0x44] sm:$0xf0]  ;;  %v784_v21 = vld [vmem:[%s1091_s18 + $0x8] sm:$0xf0]  ;;  %v783_v24 = vor.u32 %v912_v17, %v782_v16 }
  0x14   : > { %v919_v22 = vld [vmem:[%s1091_s18 + $0x44] sm:$0xf]  ;;  %v816_v23 = vld [vmem:[%s1091_s18 + $0x48] sm:$0xf0]  ;;  %v815_v25 = vor.u32 %v920_v19, %v814_v18  ;;  %v787_v26 = vor.u32 %v911_v20, %v784_v21  ;;  %v822_v30 = vld [vmem:[%s1091_s18 + $0x50] sm:$0xf] }
  0x15   : > { %488 = vmatpush.bf16.msra.mxu0 %v932_v4  ;;  %945 = vmatpush.bf16.msra.mxu2 %v932_v4  ;;  %v819_v27 = vor.u32 %v919_v22, %v816_v23  ;;  %v922_v31 = vld [vmem:[%s1091_s18 + $0x54] sm:$0xf0]  ;;  %v913_v32 = vld [vmem:[%s1091_s18 + $0x14] sm:$0xf]  ;;  %v792_v33 = vld [vmem:[%s1091_s18 + $0x18] sm:$0xf0] }
  0x16   : > { %537 = vmatpush.bf16.msra.mxu1 %v940_v5  ;;  %953 = vmatpush.bf16.msra.mxu3 %v940_v5  ;;  %v921_v34 = vld [vmem:[%s1091_s18 + $0x54] sm:$0xf]  ;;  %v824_v35 = vld [vmem:[%s1091_s18 + $0x58] sm:$0xf0]  ;;  %v823_v37 = vor.u32 %v922_v31, %v822_v30  ;;  %v795_v38 = vor.u32 %v913_v32, %v792_v33  ;;  %v798_v40 = vld [vmem:[%s1091_s18 + $0x20] sm:$0xf] }
  0x17   : > { %v827_v39 = vor.u32 %v921_v34, %v824_v35  ;;  %v916_v41 = vld [vmem:[%s1091_s18 + $0x24] sm:$0xf0]  ;;  %v830_v42 = vld [vmem:[%s1091_s18 + $0x60] sm:$0xf]  ;;  %v915_v44 = vld [vmem:[%s1091_s18 + $0x24] sm:$0xf] }
  0x18   : > { %v924_v43 = vld [vmem:[%s1091_s18 + $0x64] sm:$0xf0]  ;;  %v800_v45 = vld [vmem:[%s1091_s18 + $0x28] sm:$0xf0]  ;;  %v923_v46 = vld [vmem:[%s1091_s18 + $0x64] sm:$0xf]  ;;  %v799_v48 = vor.u32 %v916_v41, %v798_v40 }
  0x19   : > { %489 = vmatpush.bf16.msra.mxu0 %v931_v6  ;;  %946 = vmatpush.bf16.msra.mxu2 %v931_v6  ;;  %v832_v47 = vld [vmem:[%s1091_s18 + $0x68] sm:$0xf0]  ;;  %v831_v49 = vor.u32 %v924_v43, %v830_v42  ;;  %v803_v50 = vor.u32 %v915_v44, %v800_v45  ;;  %v806_v52 = vld [vmem:[%s1091_s18 + $0x30] sm:$0xf]  ;;  %v918_v53 = vld [vmem:[%s1091_s18 + $0x34] sm:$0xf0] }
  0x1a   : > { %538 = vmatpush.bf16.msra.mxu1 %v939_v7  ;;  %954 = vmatpush.bf16.msra.mxu3 %v939_v7  ;;  %v835_v51 = vor.u32 %v923_v46, %v832_v47  ;;  %v838_v54 = vld [vmem:[%s1091_s18 + $0x70] sm:$0xf]  ;;  %v926_v55 = vld [vmem:[%s1091_s18 + $0x74] sm:$0xf0]  ;;  %v917_v56 = vld [vmem:[%s1091_s18 + $0x34] sm:$0xf]  ;;  %v807_v60 = vor.u32 %v918_v53, %v806_v52 }
  0x1b   : > { %v808_v57 = vld [vmem:[%s1091_s18 + $0x38] sm:$0xf0]  ;;  %v925_v58 = vld [vmem:[%s1091_s18 + $0x74] sm:$0xf]  ;;  %v839_v61 = vor.u32 %v926_v55, %v838_v54 }
  0x1c   : > { %v840_v59 = vld [vmem:[%s1091_s18 + $0x78] sm:$0xf0]  ;;  %v811_v62 = vor.u32 %v917_v56, %v808_v57 }
  0x1d   : > { %490 = vmatpush.bf16.msra.mxu0 %v930_v8  ;;  %947 = vmatpush.bf16.msra.mxu2 %v930_v8  ;;  %v843_v63 = vor.u32 %v925_v58, %v840_v59 }
  0x1e   : > { %539 = vmatpush.bf16.msra.mxu1 %v938_v9  ;;  %955 = vmatpush.bf16.msra.mxu3 %v938_v9 }
  0x21   : > { %491 = vmatpush.bf16.msra.mxu0 %v929_v10  ;;  %948 = vmatpush.bf16.msra.mxu2 %v929_v10 }
  0x22   : > { %540 = vmatpush.bf16.msra.mxu1 %v937_v11  ;;  %956 = vmatpush.bf16.msra.mxu3 %v937_v11 }
  0x25   : > { %492 = vmatpush.bf16.msra.mxu0 %v928_v12  ;;  %949 = vmatpush.bf16.msra.mxu2 %v928_v12 }
  0x26   : > { %541 = vmatpush.bf16.msra.mxu1 %v936_v13  ;;  %957 = vmatpush.bf16.msra.mxu3 %v936_v13 }
  0x29   : > { %493 = vmatpush.bf16.msra.mxu0 %v927_v14  ;;  %950 = vmatpush.bf16.msra.mxu2 %v927_v14 }
  0x2a   : > { %542 = vmatpush.bf16.msra.mxu1 %v935_v15  ;;  %958 = vmatpush.bf16.msra.mxu3 %v935_v15 }
  0x2c   : > { %494 = vmatmul.bf16.vlgmr.msra.gmra.mxu0 %v783_v24  ;;  %514 = vmatmul.bf16.vlgmr.msra.gmra.mxu2 %v815_v25 }
  0x2d   : > { %543 = vmatmul.bf16.vlgmr.msra.gmra.mxu1 %v787_v26  ;;  %563 = vmatmul.bf16.vlgmr.msra.gmra.mxu3 %v819_v27 }
  0x3c   : > { %499 = vmatmul.bf16.gmra.mxu0 %v791_v36  ;;  %519 = vmatmul.bf16.gmra.mxu2 %v823_v37 }
  0x3d   : > { %548 = vmatmul.bf16.gmra.mxu1 %v795_v38  ;;  %568 = vmatmul.bf16.gmra.mxu3 %v827_v39 }
  0x4c   : > { %504 = vmatmul.bf16.gmra.mxu0 %v799_v48  ;;  %524 = vmatmul.bf16.gmra.mxu2 %v831_v49 }
  0x4d   : > { %553 = vmatmul.bf16.gmra.mxu1 %v803_v50  ;;  %573 = vmatmul.bf16.gmra.mxu3 %v835_v51 }
  0x5c   : > { %509 = vmatmul.bf16.gmra.mxu0 %v807_v60  ;;  %529 = vmatmul.bf16.gmra.mxu2 %v839_v61 }
  0x5d   : > { %558 = vmatmul.bf16.gmra.mxu1 %v811_v62  ;;  %578 = vmatmul.bf16.gmra.mxu3 %v843_v63 }
  0xa9   : > { %v495_v0 = vpop.f32.mrf.mxu0 }
  0xaa   : > { %v544_v1 = vpop.f32.mrf.mxu1 }
  0xab   : > { %v545_v2 = vadd.f32 %v544_v1, %v495_v0 }
  0xad   : > { %v635_v3 = vmax.f32 %v545_v2, 0.0 }
  0xaf   : > { %v515_v4 = vpop.f32.mrf.mxu2  ;;  %651 = vst [vmem:[%s1139_s28] sm:$0xff] %v635_v3 }
  0xb0   : > { %v564_v5 = vpop.f32.mrf.mxu3 }
  0xb1   : > { %v565_v6 = vadd.f32 %v564_v5, %v515_v4  ;;  %v497_v7 = vpop.f32.mrf.mxu0 }
  0xb2   : > { %v546_v8 = vpop.f32.mrf.mxu1 }
  0xb3   : > { %v547_v9 = vadd.f32 %v546_v8, %v497_v7  ;;  %v643_v10 = vmax.f32 %v565_v6, 0.0 }
  0xb5   : > { %659 = vst [vmem:[%s1139_s28 + $0x40] sm:$0xff] %v643_v10  ;;  %v636_v11 = vmax.f32 %v547_v9, 0.0 }
  0xb7   : > { %v517_v12 = vpop.f32.mrf.mxu2  ;;  %652 = vst [vmem:[%s1139_s28 + $0x8] sm:$0xff] %v636_v11 }
  0xb8   : > { %v566_v13 = vpop.f32.mrf.mxu3 }
  0xb9   : > { %v567_v14 = vadd.f32 %v566_v13, %v517_v12  ;;  %v500_v15 = vpop.f32.mrf.mxu0 }
  0xba   : > { %v549_v16 = vpop.f32.mrf.mxu1 }
  0xbb   : > { %v550_v17 = vadd.f32 %v549_v16, %v500_v15  ;;  %v644_v18 = vmax.f32 %v567_v14, 0.0 }
  0xbd   : > { %660 = vst [vmem:[%s1139_s28 + $0x48] sm:$0xff] %v644_v18  ;;  %v637_v19 = vmax.f32 %v550_v17, 0.0 }
  0xbf   : > { %v520_v20 = vpop.f32.mrf.mxu2  ;;  %653 = vst [vmem:[%s1139_s28 + $0x10] sm:$0xff] %v637_v19 }
  0xc0   : > { %v569_v21 = vpop.f32.mrf.mxu3 }
  0xc1   : > { %v570_v22 = vadd.f32 %v569_v21, %v520_v20  ;;  %v502_v23 = vpop.f32.mrf.mxu0 }
  0xc2   : > { %v551_v24 = vpop.f32.mrf.mxu1 }
  0xc3   : > { %v552_v25 = vadd.f32 %v551_v24, %v502_v23  ;;  %v645_v26 = vmax.f32 %v570_v22, 0.0 }
  0xc5   : > { %661 = vst [vmem:[%s1139_s28 + $0x50] sm:$0xff] %v645_v26  ;;  %v638_v27 = vmax.f32 %v552_v25, 0.0 }
  0xc7   : > { %v522_v28 = vpop.f32.mrf.mxu2  ;;  %654 = vst [vmem:[%s1139_s28 + $0x18] sm:$0xff] %v638_v27 }
  0xc8   : > { %v571_v29 = vpop.f32.mrf.mxu3 }
  0xc9   : > { %v572_v30 = vadd.f32 %v571_v29, %v522_v28  ;;  %v505_v31 = vpop.f32.mrf.mxu0 }
  0xca   : > { %v554_v32 = vpop.f32.mrf.mxu1 }
  0xcb   : > { %v555_v33 = vadd.f32 %v554_v32, %v505_v31  ;;  %v646_v34 = vmax.f32 %v572_v30, 0.0 }
  0xcd   : > { %662 = vst [vmem:[%s1139_s28 + $0x58] sm:$0xff] %v646_v34  ;;  %v639_v35 = vmax.f32 %v555_v33, 0.0 }
  0xcf   : > { %v525_v36 = vpop.f32.mrf.mxu2  ;;  %655 = vst [vmem:[%s1139_s28 + $0x20] sm:$0xff] %v639_v35 }
  0xd0   : > { %v574_v37 = vpop.f32.mrf.mxu3 }
  0xd1   : > { %v575_v38 = vadd.f32 %v574_v37, %v525_v36  ;;  %v507_v39 = vpop.f32.mrf.mxu0 }
  0xd2   : > { %v556_v40 = vpop.f32.mrf.mxu1 }
  0xd3   : > { %v557_v41 = vadd.f32 %v556_v40, %v507_v39  ;;  %v647_v42 = vmax.f32 %v575_v38, 0.0 }
  0xd5   : > { %663 = vst [vmem:[%s1139_s28 + $0x60] sm:$0xff] %v647_v42  ;;  %v640_v43 = vmax.f32 %v557_v41, 0.0 }
  0xd7   : > { %v527_v44 = vpop.f32.mrf.mxu2  ;;  %656 = vst [vmem:[%s1139_s28 + $0x28] sm:$0xff] %v640_v43 }
  0xd8   : > { %v576_v45 = vpop.f32.mrf.mxu3 }
  0xd9   : > { %v577_v46 = vadd.f32 %v576_v45, %v527_v44  ;;  %v510_v47 = vpop.f32.mrf.mxu0 }
  0xda   : > { %v559_v48 = vpop.f32.mrf.mxu1 }
  0xdb   : > { %v560_v49 = vadd.f32 %v559_v48, %v510_v47  ;;  %v648_v50 = vmax.f32 %v577_v46, 0.0 }
  0xdd   : > { %664 = vst [vmem:[%s1139_s28 + $0x68] sm:$0xff] %v648_v50  ;;  %v641_v51 = vmax.f32 %v560_v49, 0.0 }
  0xdf   : > { %v530_v52 = vpop.f32.mrf.mxu2  ;;  %657 = vst [vmem:[%s1139_s28 + $0x30] sm:$0xff] %v641_v51 }
  0xe0   : > { %v579_v53 = vpop.f32.mrf.mxu3 }
  0xe1   : > { %v580_v54 = vadd.f32 %v579_v53, %v530_v52  ;;  %v512_v55 = vpop.f32.mrf.mxu0 }
  0xe2   : > { %v561_v56 = vpop.f32.mrf.mxu1 }
  0xe3   : > { %v562_v57 = vadd.f32 %v561_v56, %v512_v55  ;;  %v649_v58 = vmax.f32 %v580_v54, 0.0 }
  0xe5   : > { %665 = vst [vmem:[%s1139_s28 + $0x70] sm:$0xff] %v649_v58  ;;  %v642_v59 = vmax.f32 %v562_v57, 0.0 }
  0xe7   : > { %v532_v60 = vpop.f32.mrf.mxu2  ;;  %658 = vst [vmem:[%s1139_s28 + $0x38] sm:$0xff] %v642_v59 }
  0xe8   : > { %v581_v61 = vpop.f32.mrf.mxu3 }
  0xe9   : > { %v582_v62 = vadd.f32 %v581_v61, %v532_v60 }
  0xeb   : > { %v650_v63 = vmax.f32 %v582_v62, 0.0 }
  0xed   : > { %666 = vst [vmem:[%s1139_s28 + $0x78] sm:$0xff] %v650_v63 }
  0xee PF: > { %s12_s11 = sadd.s32 1, %s1006_s11   ;;  %s1169_s9 = smov %s1002_s10 }
  0xef   : > { %p9_p5 = scmp.ge.s32.totalorder %s12_s11, 6   ;;  %s1170_s10 = smov %s1172_s12 }
  0xf1   :  { %11 = sbr.rel (!%p9_p5) target bundleno = 2 (0x2), region = 69 }

// kernel: forward.25
= control target key start
LH: loop header
LB: loop body
LE: loop exit
PB: predicated region body
PF: predicated region fallthrough
CT: control target
= control target key end

     0   :  { %s1475_s12 = smov 0   ;;  %s1477_s13 = smov 0   ;;  %s1709_s0 = inlined_call_operand.vmem [shape: bf16[128,640], index: 0, kind: input, shape index: {}]   ;;  %s1710_s1 = inlined_call_operand.vmem [shape: bf16[640,128], index: 1, kind: input, shape index: {}]   ;;  %s1711_s2 = inlined_call_operand.vmem [shape: f32[128,128], index: 2, kind: input, shape index: {}]   ;;  %s1712_s3 = inlined_call_operand.vmem [shape: f32[128,128], index: 3, kind: output, shape index: {}]  }
   0x1   :  { %s1479_s14 = smov 0  }
   0x2 LB: > { %s32_s15 = sadd.s32 1, %s1449_s13  ;;  %p1080_p0 = scmp.ge.s32.totalorder %s1453_s14, 1  ;;  %s1453_s14 = sphi %s1479_s14, %s13_s14   ;;  %s1449_s13 = sphi %s1477_s13, %s1714_s13   ;;  %s1445_s12 = sphi %s1475_s12, %s1713_s12  }
   0x3   : > { %p34_p1 = scmp.ge.s32.totalorder %s32_s15, 2  ;;  %p199_p2 = scmp.lt.s32.totalorder %s1453_s14, 3 }
   0x5   : > { %s1716_s15 = smov (%p34_p1, %s32_s15), 0  ;;  %p200_p3 = pnand %p1080_p0, %p199_p2 }
   0x6   : > { %s1081_s5 = sshll.u32 (!%p200_p3), %s1445_s12, 3 }
   0x7   : > { %203 = sbr.rel (%p200_p3) target bundleno = 271 (0x10f), region = 32  ;;  %p249_p4 = scmp.lt.s32.totalorder (!%p200_p3), %s1081_s5, 15 }
   0xc   : > { %v1356_v0 = vld [vmem:[%s1710_s1 + $0x38] sm:$0xff]  ;;  %v1355_v2 = vld [vmem:[%s1710_s1 + $0x30] sm:$0xff]  ;;  %v1354_v6 = vld [vmem:[%s1710_s1 + $0x28] sm:$0xff]  ;;  %s1718_s5 = smov (!%p249_p4, %s1081_s5), 15 }
   0xd   : > { %v1372_v1 = vld [vmem:[%s1710_s1 + $0xb8] sm:$0xff]  ;;  %1389 = vmatpush.bf16.msra.mxu1 %v1356_v0  ;;  %754 = vmatpush.bf16.msra.mxu0 %v1356_v0  ;;  %v1371_v3 = vld [vmem:[%s1710_s1 + $0xb0] sm:$0xff]  ;;  %v1370_v7 = vld [vmem:[%s1710_s1 + $0xa8] sm:$0xff]  ;;  %s1405_s25 = smul.u32 20, %s1718_s5 }
   0xe   : > { %812 = vmatpush.bf16.msra.mxu2 %v1372_v1  ;;  %v1380_v4 = vld [vmem:[%s1710_s1 + $0xf8] sm:$0xff]  ;;  %v1379_v5 = vld [vmem:[%s1710_s1 + $0xf0] sm:$0xff]  ;;  %v1378_v8 = vld [vmem:[%s1710_s1 + $0xe8] sm:$0xff] }
   0xf   : > { %841 = vmatpush.bf16.msra.mxu3 %v1380_v4  ;;  %v1353_v9 = vld [vmem:[%s1710_s1 + $0x20] sm:$0xff]  ;;  %v1352_v12 = vld [vmem:[%s1710_s1 + $0x18] sm:$0xff]  ;;  %v1351_v15 = vld [vmem:[%s1710_s1 + $0x10] sm:$0xff]  ;;  %s1559_s8 = scalar_lea.vmem %s1709_s0, %s1405_s25 }
  0x10   : > { %v1369_v10 = vld [vmem:[%s1710_s1 + $0xa0] sm:$0xff]  ;;  %v1368_v13 = vld [vmem:[%s1710_s1 + $0x98] sm:$0xff]  ;;  %v1367_v16 = vld [vmem:[%s1710_s1 + $0x90] sm:$0xff] }
  0x11   : > { %1390 = vmatpush.bf16.msra.mxu1 %v1355_v2  ;;  %755 = vmatpush.bf16.msra.mxu0 %v1355_v2  ;;  %v1377_v11 = vld [vmem:[%s1710_s1 + $0xe0] sm:$0xff]  ;;  %v1376_v14 = vld [vmem:[%s1710_s1 + $0xd8] sm:$0xff]  ;;  %v1375_v17 = vld [vmem:[%s1710_s1 + $0xd0] sm:$0xff] }
  0x12   : > { %813 = vmatpush.bf16.msra.mxu2 %v1371_v3  ;;  %v1350_v18 = vld [vmem:[%s1710_s1 + $0x8] sm:$0xff]  ;;  %v1349_v20 = vld [vmem:[%s1710_s1] sm:$0xff]  ;;  %v1129_v21 = vld [vmem:[%s1559_s8 + $0x50] sm:$0xf] }
  0x13   : > { %842 = vmatpush.bf16.msra.mxu3 %v1379_v5  ;;  %v1366_v19 = vld [vmem:[%s1710_s1 + $0x88] sm:$0xff]  ;;  %v1364_v22 = vld [vmem:[%s1710_s1 + $0x78] sm:$0xff]  ;;  %v1341_v24 = vld [vmem:[%s1559_s8 + $0x60] sm:$0xf0] }
  0x14   : > { %v1374_v23 = vld [vmem:[%s1710_s1 + $0xc8] sm:$0xff]  ;;  %v1089_v25 = vld [vmem:[%s1559_s8] sm:$0xf]  ;;  %v1331_v26 = vld [vmem:[%s1559_s8 + $0x10] sm:$0xf0]  ;;  %v1130_v31 = vor.u32 %v1341_v24, %v1129_v21 }
  0x15   : > { %1391 = vmatpush.bf16.msra.mxu1 %v1354_v6  ;;  %756 = vmatpush.bf16.msra.mxu0 %v1354_v6  ;;  %v1365_v27 = vld [vmem:[%s1710_s1 + $0x80] sm:$0xff]  ;;  %v1097_v28 = vld [vmem:[%s1559_s8 + $0x8] sm:$0xf]  ;;  %v1332_v29 = vld [vmem:[%s1559_s8 + $0x18] sm:$0xf0]  ;;  %v1090_v32 = vor.u32 %v1331_v26, %v1089_v25 }
  0x16   : > { %814 = vmatpush.bf16.msra.mxu2 %v1370_v7  ;;  %v1388_v30 = vld [vmem:[%s1710_s1 + $0x138] sm:$0xff]  ;;  %v1098_v33 = vor.u32 %v1332_v29, %v1097_v28  ;;  %v1373_v34 = vld [vmem:[%s1710_s1 + $0xc0] sm:$0xff]  ;;  %v1330_v35 = vld [vmem:[%s1559_s8 + $0xc] sm:$0xf] }
  0x17   : > { %843 = vmatpush.bf16.msra.mxu3 %v1378_v8  ;;  %v1099_v36 = vld [vmem:[%s1559_s8 + $0x1c] sm:$0xf0]  ;;  %v1363_v37 = vld [vmem:[%s1710_s1 + $0x70] sm:$0xff]  ;;  %v1362_v40 = vld [vmem:[%s1710_s1 + $0x68] sm:$0xff] }
  0x18   : > { %v1387_v38 = vld [vmem:[%s1710_s1 + $0x130] sm:$0xff]  ;;  %v1102_v39 = vor.u32 %v1330_v35, %v1099_v36  ;;  %v1386_v41 = vld [vmem:[%s1710_s1 + $0x128] sm:$0xff]  ;;  %v1361_v42 = vld [vmem:[%s1710_s1 + $0x60] sm:$0xff] }
  0x19   : > { %1392 = vmatpush.bf16.msra.mxu1 %v1353_v9  ;;  %757 = vmatpush.bf16.msra.mxu0 %v1353_v9  ;;  %v1385_v43 = vld [vmem:[%s1710_s1 + $0x120] sm:$0xff]  ;;  %v1149_v44 = vld [vmem:[%s1559_s8 + $0x78] sm:$0xf]  ;;  %v1346_v45 = vld [vmem:[%s1559_s8 + $0x88] sm:$0xf0] }
  0x1a   : > { %815 = vmatpush.bf16.msra.mxu2 %v1369_v10  ;;  %v1109_v46 = vld [vmem:[%s1559_s8 + $0x28] sm:$0xf]  ;;  %v1336_v47 = vld [vmem:[%s1559_s8 + $0x38] sm:$0xf0]  ;;  %v1117_v49 = vld [vmem:[%s1559_s8 + $0x30] sm:$0xf]  ;;  %v1150_v52 = vor.u32 %v1346_v45, %v1149_v44 }
  0x1b   : > { %844 = vmatpush.bf16.msra.mxu3 %v1377_v11  ;;  %v1360_v48 = vld [vmem:[%s1710_s1 + $0x58] sm:$0xff]  ;;  %v1337_v50 = vld [vmem:[%s1559_s8 + $0x40] sm:$0xf0]  ;;  %v1110_v53 = vor.u32 %v1336_v47, %v1109_v46  ;;  %v1335_v55 = vld [vmem:[%s1559_s8 + $0x34] sm:$0xf] }
  0x1c   : > { %v1384_v51 = vld [vmem:[%s1710_s1 + $0x118] sm:$0xff]  ;;  %v1118_v54 = vor.u32 %v1337_v50, %v1117_v49  ;;  %v1119_v56 = vld [vmem:[%s1559_s8 + $0x44] sm:$0xf0]  ;;  %v1359_v57 = vld [vmem:[%s1710_s1 + $0x50] sm:$0xff] }
  0x1d   : > { %1393 = vmatpush.bf16.msra.mxu1 %v1352_v12  ;;  %758 = vmatpush.bf16.msra.mxu0 %v1352_v12  ;;  %v1383_v58 = vld [vmem:[%s1710_s1 + $0x110] sm:$0xff]  ;;  %v1122_v59 = vor.u32 %v1335_v55, %v1119_v56  ;;  %v1358_v60 = vld [vmem:[%s1710_s1 + $0x48] sm:$0xff]  ;;  %v1357_v62 = vld [vmem:[%s1710_s1 + $0x40] sm:$0xff] }
  0x1e   : > { %816 = vmatpush.bf16.msra.mxu2 %v1368_v13  ;;  %v1382_v61 = vld [vmem:[%s1710_s1 + $0x108] sm:$0xff]  ;;  %v1381_v63 = vld [vmem:[%s1710_s1 + $0x100] sm:$0xff]  ;;  %v1091_v1 = vld [vmem:[%s1559_s8 + $0x14] sm:$0xf0] }
  0x1f   : > { %845 = vmatpush.bf16.msra.mxu3 %v1376_v14  ;;  %v1329_v0 = vld [vmem:[%s1559_s8 + $0x4] sm:$0xf]  ;;  %v1105_v2 = vld [vmem:[%s1559_s8 + $0x10] sm:$0xf]  ;;  %v1137_v4 = vld [vmem:[%s1559_s8 + $0x58] sm:$0xf] }
  0x20   : > { %v1333_v3 = vld [vmem:[%s1559_s8 + $0x20] sm:$0xf0]  ;;  %v1342_v5 = vld [vmem:[%s1559_s8 + $0x68] sm:$0xf0]  ;;  %v1094_v6 = vor.u32 %v1329_v0, %v1091_v1  ;;  %v1340_v9 = vld [vmem:[%s1559_s8 + $0x5c] sm:$0xf] }
  0x21   : > { %1394 = vmatpush.bf16.msra.mxu1 %v1351_v15  ;;  %759 = vmatpush.bf16.msra.mxu0 %v1351_v15  ;;  %v1106_v7 = vor.u32 %v1333_v3, %v1105_v2  ;;  %v1138_v8 = vor.u32 %v1342_v5, %v1137_v4  ;;  %v1139_v10 = vld [vmem:[%s1559_s8 + $0x6c] sm:$0xf0]  ;;  %v1334_v12 = vld [vmem:[%s1559_s8 + $0x2c] sm:$0xf]  ;;  %v1111_v13 = vld [vmem:[%s1559_s8 + $0x3c] sm:$0xf0] }
  0x22   : > { %817 = vmatpush.bf16.msra.mxu2 %v1367_v16  ;;  %v1142_v11 = vor.u32 %v1340_v9, %v1139_v10  ;;  %v1125_v14 = vld [vmem:[%s1559_s8 + $0x38] sm:$0xf]  ;;  %v1338_v15 = vld [vmem:[%s1559_s8 + $0x48] sm:$0xf0]  ;;  %v1157_v16 = vld [vmem:[%s1559_s8 + $0x80] sm:$0xf] }
  0x23   : > { %846 = vmatpush.bf16.msra.mxu3 %v1375_v17  ;;  %v1347_v17 = vld [vmem:[%s1559_s8 + $0x90] sm:$0xf0]  ;;  %v1345_v21 = vld [vmem:[%s1559_s8 + $0x84] sm:$0xf]  ;;  %v1131_v25 = vld [vmem:[%s1559_s8 + $0x64] sm:$0xf0] }
  0x24   : > { %v1339_v24 = vld [vmem:[%s1559_s8 + $0x54] sm:$0xf]  ;;  %v1145_v26 = vld [vmem:[%s1559_s8 + $0x60] sm:$0xf]  ;;  %v1165_v28 = vld [vmem:[%s1559_s8 + $0x88] sm:$0xf] }
  0x25   : > { %1395 = vmatpush.bf16.msra.mxu1 %v1350_v18  ;;  %760 = vmatpush.bf16.msra.mxu0 %v1350_v18  ;;  %v1114_v18 = vor.u32 %v1334_v12, %v1111_v13  ;;  %v1348_v29 = vld [vmem:[%s1559_s8 + $0x98] sm:$0xf0] }
  0x26   : > { %818 = vmatpush.bf16.msra.mxu2 %v1366_v19  ;;  %v1126_v19 = vor.u32 %v1338_v15, %v1125_v14 }
  0x27   : > { %847 = vmatpush.bf16.msra.mxu3 %v1374_v23 }
  0x29   : > { %1396 = vmatpush.bf16.msra.mxu1 %v1349_v20  ;;  %761 = vmatpush.bf16.msra.mxu0 %v1349_v20  ;;  %v1158_v20 = vor.u32 %v1347_v17, %v1157_v16 }
  0x2a   : > { %819 = vmatpush.bf16.msra.mxu2 %v1365_v27  ;;  %v1343_v27 = vld [vmem:[%s1559_s8 + $0x70] sm:$0xf0] }
  0x2b   : > { %848 = vmatpush.bf16.msra.mxu3 %v1373_v34  ;;  %v1151_v34 = vld [vmem:[%s1559_s8 + $0x8c] sm:$0xf0] }
  0x2c   : > { %772 = vmatmul.bf16.vlgmr.msra.gmra.mxu1 %v1130_v31  ;;  %762 = vmatmul.bf16.vlgmr.msra.gmra.mxu0 %v1090_v32  ;;  %v1146_v31 = vor.u32 %v1343_v27, %v1145_v26  ;;  %v1166_v32 = vor.u32 %v1348_v29, %v1165_v28 }
  0x2d   : > { %783 = vmatpush.bf16.msrb.mxu1 %v1364_v22  ;;  %870 = vmatpush.bf16.msrb.mxu0 %v1388_v30  ;;  %v1159_v22 = vld [vmem:[%s1559_s8 + $0x94] sm:$0xf0] }
  0x2e   : > { %1397 = vmatpush.bf16.msrb.mxu2 %v1388_v30  ;;  %849 = vmatmul.bf16.vlgmr.msra.gmra.mxu3 %v1102_v39  ;;  %v1162_v23 = vor.u32 %v1345_v21, %v1159_v22  ;;  %v1134_v30 = vor.u32 %v1339_v24, %v1131_v25 }
  0x2f   : > { %820 = vmatmul.bf16.vlgmr.msra.gmra.mxu2 %v1098_v33  ;;  %v1344_v33 = vld [vmem:[%s1559_s8 + $0x7c] sm:$0xf]  ;;  %s1084_s8 = sshll.u32 %s1718_s5, 3 }
  0x30   : > { %v1154_v35 = vor.u32 %v1344_v33, %v1151_v34  ;;  %s1674_s9 = scalar_lea.vmem %s1711_s2, %s1084_s8  ;;  %s1680_s5 = scalar_lea.vmem %s1712_s3, %s1084_s8 }
  0x31   : > { %784 = vmatpush.bf16.msrb.mxu1 %v1363_v37  ;;  %871 = vmatpush.bf16.msrb.mxu0 %v1387_v38  ;;  %v926_v56 = vld [vmem:[%s1674_s9] sm:$0xff]  ;;  %v927_v3 = vld [vmem:[%s1674_s9 + $0x8] sm:$0xff]  ;;  %v928_v14 = vld [vmem:[%s1674_s9 + $0x10] sm:$0xff] }
  0x32   : > { %1398 = vmatpush.bf16.msrb.mxu2 %v1387_v38  ;;  %v929_v25 = vld [vmem:[%s1674_s9 + $0x18] sm:$0xff] }
  0x35   : > { %785 = vmatpush.bf16.msrb.mxu1 %v1362_v40  ;;  %872 = vmatpush.bf16.msrb.mxu0 %v1386_v41 }
  0x36   : > { %1399 = vmatpush.bf16.msrb.mxu2 %v1386_v41 }
  0x39   : > { %786 = vmatpush.bf16.msrb.mxu1 %v1361_v42  ;;  %873 = vmatpush.bf16.msrb.mxu0 %v1385_v43 }
  0x3a   : > { %1400 = vmatpush.bf16.msrb.mxu2 %v1385_v43 }
  0x3c   : > { %777 = vmatmul.bf16.gmra.mxu1 %v1150_v52  ;;  %767 = vmatmul.bf16.gmra.mxu0 %v1110_v53 }
  0x3d   : > { %787 = vmatpush.bf16.msrb.mxu1 %v1360_v48  ;;  %874 = vmatpush.bf16.msrb.mxu0 %v1384_v51 }
  0x3e   : > { %1401 = vmatpush.bf16.msrb.mxu2 %v1384_v51  ;;  %854 = vmatmul.bf16.gmra.mxu3 %v1122_v59 }
  0x3f   : > { %825 = vmatmul.bf16.gmra.mxu2 %v1118_v54 }
  0x41   : > { %788 = vmatpush.bf16.msrb.mxu1 %v1359_v57  ;;  %875 = vmatpush.bf16.msrb.mxu0 %v1383_v58 }
  0x42   : > { %1402 = vmatpush.bf16.msrb.mxu2 %v1383_v58 }
  0x45   : > { %789 = vmatpush.bf16.msrb.mxu1 %v1358_v60  ;;  %876 = vmatpush.bf16.msrb.mxu0 %v1382_v61 }
  0x46   : > { %1403 = vmatpush.bf16.msrb.mxu2 %v1382_v61 }
  0x49   : > { %790 = vmatpush.bf16.msrb.mxu1 %v1357_v62  ;;  %877 = vmatpush.bf16.msrb.mxu0 %v1381_v63 }
  0x4a   : > { %1404 = vmatpush.bf16.msrb.mxu2 %v1381_v63 }
  0x4c   : > { %791 = vmatmul.bf16.vlgmr.msrb.gmra.mxu1 %v1094_v6  ;;  %878 = vmatmul.bf16.vlgmr.msrb.gmra.mxu0 %v1106_v7 }
  0x4e   : > { %859 = vmatmul.bf16.gmra.mxu3 %v1142_v11 }
  0x4f   : > { %830 = vmatmul.bf16.gmra.mxu2 %v1138_v8 }
  0x5c   : > { %796 = vmatmul.bf16.gmra.mxu1 %v1114_v18  ;;  %883 = vmatmul.bf16.gmra.mxu0 %v1126_v19 }
  0x5e   : > { %864 = vmatmul.bf16.gmra.mxu3 %v1162_v23 }
  0x5f   : > { %835 = vmatmul.bf16.gmra.mxu2 %v1158_v20 }
  0x6c   : > { %801 = vmatmul.bf16.gmra.mxu1 %v1134_v30  ;;  %888 = vmatmul.bf16.gmra.mxu0 %v1146_v31 }
  0x6f   : > { %893 = vmatmul.bf16.vlgmr.msrb.gmra.mxu2 %v1166_v32 }
  0x7c   : > { %806 = vmatmul.bf16.gmra.mxu1 %v1154_v35  ;;  %v930_v35 = vld [vmem:[%s1674_s9 + $0x20] sm:$0xff] }
  0xa9   : > { %v773_v36 = vpop.f32.mrf.mxu1  ;;  %v763_v37 = vpop.f32.mrf.mxu0 }
  0xb1   : > { %v1664_v39 = vpop.f32.mrf.mxu1  ;;  %v765_v40 = vpop.f32.mrf.mxu0 }
  0xb2   : > { %v821_v38 = vpop.f32.mrf.mxu2  ;;  %v850_v44 = vpop.f32.mrf.mxu3 }
  0xb9   : > { %v1666_v42 = vpop.f32.mrf.mxu1  ;;  %v768_v43 = vpop.f32.mrf.mxu0 }
  0xba   : > { %v823_v41 = vpop.f32.mrf.mxu2  ;;  %v852_v48 = vpop.f32.mrf.mxu3 }
  0xc1   : > { %v1668_v46 = vpop.f32.mrf.mxu1  ;;  %v770_v47 = vpop.f32.mrf.mxu0 }
  0xc2   : > { %v826_v45 = vpop.f32.mrf.mxu2  ;;  %v855_v60 = vpop.f32.mrf.mxu3 }
  0xc9   : > { %v792_v49 = vpop.f32.mrf.mxu1  ;;  %v879_v50 = vpop.f32.mrf.mxu0 }
  0xca   : > { %v793_v51 = vadd.f32 %v792_v49, %v763_v37  ;;  %v828_v52 = vpop.f32.mrf.mxu2  ;;  %v857_v9 = vpop.f32.mrf.mxu3 }
  0xcc   : > { %v822_v53 = vadd.f32 %v821_v38, %v793_v51 }
  0xce   : > { %v851_v54 = vadd.f32 %v850_v44, %v822_v53 }
  0xd0   : > { %v880_v55 = vadd.f32 %v879_v50, %v851_v54 }
  0xd1   : > { %v794_v57 = vpop.f32.mrf.mxu1  ;;  %v881_v58 = vpop.f32.mrf.mxu0 }
  0xd2   : > { %v795_v59 = vadd.f32 %v794_v57, %v765_v40  ;;  %v934_v61 = vadd.f32 %v926_v56, %v880_v55  ;;  %v831_v63 = vpop.f32.mrf.mxu2  ;;  %v860_v22 = vpop.f32.mrf.mxu3  ;;  %v932_v57 = vld [vmem:[%s1674_s9 + $0x30] sm:$0xff] }
  0xd4   : > { %v824_v62 = vadd.f32 %v823_v41, %v795_v59  ;;  %v942_v0 = vmax.f32 %v934_v61, 0.0 }
  0xd6   : > { %v853_v1 = vadd.f32 %v852_v48, %v824_v62  ;;  %950 = vst [vmem:[%s1680_s5] sm:$0xff] %v942_v0  ;;  %v931_v48 = vld [vmem:[%s1674_s9 + $0x28] sm:$0xff] }
  0xd8   : > { %v882_v2 = vadd.f32 %v881_v58, %v853_v1 }
  0xd9   : > { %v797_v4 = vpop.f32.mrf.mxu1  ;;  %v884_v5 = vpop.f32.mrf.mxu0 }
  0xda   : > { %v798_v6 = vadd.f32 %v797_v4, %v768_v43  ;;  %v935_v7 = vadd.f32 %v927_v3, %v882_v2  ;;  %v833_v12 = vpop.f32.mrf.mxu2  ;;  %v862_v34 = vpop.f32.mrf.mxu3  ;;  %v933_v2 = vld [vmem:[%s1674_s9 + $0x38] sm:$0xff] }
  0xdc   : > { %v827_v8 = vadd.f32 %v826_v45, %v798_v6  ;;  %v943_v10 = vmax.f32 %v935_v7, 0.0 }
  0xde   : > { %v856_v11 = vadd.f32 %v855_v60, %v827_v8  ;;  %951 = vst [vmem:[%s1680_s5 + $0x8] sm:$0xff] %v943_v10 }
  0xe0   : > { %v885_v13 = vadd.f32 %v884_v5, %v856_v11 }
  0xe1   : > { %v799_v15 = vpop.f32.mrf.mxu1  ;;  %v886_v16 = vpop.f32.mrf.mxu0 }
  0xe2   : > { %v800_v17 = vadd.f32 %v799_v15, %v770_v47  ;;  %v936_v18 = vadd.f32 %v928_v14, %v885_v13  ;;  %v836_v24 = vpop.f32.mrf.mxu2  ;;  %v865_v51 = vpop.f32.mrf.mxu3 }
  0xe4   : > { %v829_v19 = vadd.f32 %v828_v52, %v800_v17  ;;  %v944_v20 = vmax.f32 %v936_v18, 0.0 }
  0xe6   : > { %v858_v21 = vadd.f32 %v857_v9, %v829_v19  ;;  %952 = vst [vmem:[%s1680_s5 + $0x10] sm:$0xff] %v944_v20 }
  0xe8   : > { %v887_v23 = vadd.f32 %v886_v16, %v858_v21 }
  0xe9   : > { %v802_v26 = vpop.f32.mrf.mxu1  ;;  %v889_v28 = vpop.f32.mrf.mxu0 }
  0xea   : > { %v803_v27 = vadd.f32 %v802_v26, %v773_v36  ;;  %v937_v29 = vadd.f32 %v929_v25, %v887_v23  ;;  %v838_v40 = vpop.f32.mrf.mxu2  ;;  %v867_v62 = vpop.f32.mrf.mxu3 }
  0xec   : > { %v832_v30 = vadd.f32 %v831_v63, %v803_v27  ;;  %v945_v31 = vmax.f32 %v937_v29, 0.0 }
  0xee   : > { %v861_v32 = vadd.f32 %v860_v22, %v832_v30  ;;  %953 = vst [vmem:[%s1680_s5 + $0x18] sm:$0xff] %v945_v31 }
  0xf0   : > { %v890_v33 = vadd.f32 %v889_v28, %v861_v32 }
  0xf1   : > { %v804_v37 = vpop.f32.mrf.mxu1  ;;  %v891_v44 = vpop.f32.mrf.mxu0 }
  0xf2   : > { %v805_v38 = vadd.f32 %v804_v37, %v1664_v39  ;;  %v938_v41 = vadd.f32 %v930_v35, %v890_v33  ;;  %v894_v54 = vpop.f32.mrf.mxu2 }
  0xf4   : > { %v834_v43 = vadd.f32 %v833_v12, %v805_v38  ;;  %v946_v36 = vmax.f32 %v938_v41, 0.0 }
  0xf6   : > { %v863_v45 = vadd.f32 %v862_v34, %v834_v43  ;;  %954 = vst [vmem:[%s1680_s5 + $0x20] sm:$0xff] %v946_v36 }
  0xf8   : > { %v892_v47 = vadd.f32 %v891_v44, %v863_v45 }
  0xf9   : > { %v807_v49 = vpop.f32.mrf.mxu1 }
  0xfa   : > { %v808_v50 = vadd.f32 %v807_v49, %v1666_v42  ;;  %v939_v52 = vadd.f32 %v931_v48, %v892_v47  ;;  %v896_v0 = vpop.f32.mrf.mxu2 }
  0xfc   : > { %v837_v53 = vadd.f32 %v836_v24, %v808_v50  ;;  %v947_v39 = vmax.f32 %v939_v52, 0.0 }
  0xfe   : > { %v866_v55 = vadd.f32 %v865_v51, %v837_v53  ;;  %955 = vst [vmem:[%s1680_s5 + $0x28] sm:$0xff] %v947_v39 }
 0x100   : > { %v895_v56 = vadd.f32 %v894_v54, %v866_v55 }
 0x101   : > { %v809_v58 = vpop.f32.mrf.mxu1 }
 0x102   : > { %v810_v59 = vadd.f32 %v809_v58, %v1668_v46  ;;  %v940_v60 = vadd.f32 %v932_v57, %v895_v56 }
 0x104   : > { %v839_v61 = vadd.f32 %v838_v40, %v810_v59  ;;  %v948_v63 = vmax.f32 %v940_v60, 0.0 }
 0x106   : > { %v868_v42 = vadd.f32 %v867_v62, %v839_v61  ;;  %956 = vst [vmem:[%s1680_s5 + $0x30] sm:$0xff] %v948_v63 }
 0x108   : > { %v897_v1 = vadd.f32 %v896_v0, %v868_v42 }
 0x10a   : > { %v941_v3 = vadd.f32 %v933_v2, %v897_v1 }
 0x10c   : > { %v949_v4 = vmax.f32 %v941_v3, 0.0 }
 0x10e   : > { %957 = vst [vmem:[%s1680_s5 + $0x38] sm:$0xff] %v949_v4 }
 0x10f PF: > { %s13_s14 = sadd.s32 1, %s1453_s14   ;;  %s1713_s12 = smov %s1449_s13 }
 0x110   : > { %p10_p5 = scmp.ge.s32.totalorder %s13_s14, 4   ;;  %s1714_s13 = smov %s1716_s15 }
 0x112   :  { %12 = sbr.rel (!%p10_p5) target bundleno = 2 (0x2), region = 76 }

// kernel: forward.24
= control target key start
LH: loop header
LB: loop body
LE: loop exit
PB: predicated region body
PF: predicated region fallthrough
CT: control target
= control target key end

     0   :  { %s1377_s9 = smov 0   ;;  %s1379_s10 = smov 0   ;;  %s1595_s0 = inlined_call_operand.vmem [shape: bf16[128,640], index: 0, kind: input, shape index: {}]   ;;  %s1596_s1 = inlined_call_operand.vmem [shape: bf16[640,128], index: 1, kind: input, shape index: {}]   ;;  %s1597_s2 = inlined_call_operand.vmem [shape: f32[128,128], index: 2, kind: output, shape index: {}]  }
   0x1   :  { %s1381_s11 = smov 0  }
   0x2 LB: > { %s31_s12 = sadd.s32 1, %s1356_s10  ;;  %p989_p0 = scmp.ge.s32.totalorder %s1360_s11, 1  ;;  %s1360_s11 = sphi %s1381_s11, %s12_s11   ;;  %s1356_s10 = sphi %s1379_s10, %s1599_s10   ;;  %s1352_s9 = sphi %s1377_s9, %s1598_s9  }
   0x3   : > { %p33_p1 = scmp.ge.s32.totalorder %s31_s12, 2  ;;  %p158_p2 = scmp.lt.s32.totalorder %s1360_s11, 3 }
   0x5   : > { %s1601_s12 = smov (%p33_p1, %s31_s12), 0  ;;  %p159_p3 = pnand %p989_p0, %p158_p2 }
   0x6   : > { %s990_s29 = sshll.u32 (!%p159_p3), %s1352_s9, 3 }
   0x7   : > { %162 = sbr.rel (%p159_p3) target bundleno = 269 (0x10d), region = 28  ;;  %p198_p4 = scmp.lt.s32.totalorder (!%p159_p3), %s990_s29, 15 }
   0xc   : > { %v1263_v0 = vld [vmem:[%s1596_s1 + $0x38] sm:$0xff]  ;;  %v1262_v2 = vld [vmem:[%s1596_s1 + $0x30] sm:$0xff]  ;;  %v1261_v6 = vld [vmem:[%s1596_s1 + $0x28] sm:$0xff]  ;;  %s1603_s29 = smov (!%p198_p4, %s990_s29), 15 }
   0xd   : > { %v1279_v1 = vld [vmem:[%s1596_s1 + $0xb8] sm:$0xff]  ;;  %1296 = vmatpush.bf16.msra.mxu1 %v1263_v0  ;;  %694 = vmatpush.bf16.msra.mxu0 %v1263_v0  ;;  %v1278_v3 = vld [vmem:[%s1596_s1 + $0xb0] sm:$0xff]  ;;  %v1277_v7 = vld [vmem:[%s1596_s1 + $0xa8] sm:$0xff]  ;;  %s1312_s21 = smul.u32 20, %s1603_s29 }
   0xe   : > { %752 = vmatpush.bf16.msra.mxu2 %v1279_v1  ;;  %v1287_v4 = vld [vmem:[%s1596_s1 + $0xf8] sm:$0xff]  ;;  %v1286_v5 = vld [vmem:[%s1596_s1 + $0xf0] sm:$0xff]  ;;  %v1285_v8 = vld [vmem:[%s1596_s1 + $0xe8] sm:$0xff] }
   0xf   : > { %781 = vmatpush.bf16.msra.mxu3 %v1287_v4  ;;  %v1260_v9 = vld [vmem:[%s1596_s1 + $0x20] sm:$0xff]  ;;  %v1259_v12 = vld [vmem:[%s1596_s1 + $0x18] sm:$0xff]  ;;  %v1258_v15 = vld [vmem:[%s1596_s1 + $0x10] sm:$0xff]  ;;  %s1461_s3 = scalar_lea.vmem %s1595_s0, %s1312_s21 }
  0x10   : > { %v1276_v10 = vld [vmem:[%s1596_s1 + $0xa0] sm:$0xff]  ;;  %v1275_v13 = vld [vmem:[%s1596_s1 + $0x98] sm:$0xff]  ;;  %v1274_v16 = vld [vmem:[%s1596_s1 + $0x90] sm:$0xff] }
  0x11   : > { %1297 = vmatpush.bf16.msra.mxu1 %v1262_v2  ;;  %695 = vmatpush.bf16.msra.mxu0 %v1262_v2  ;;  %v1284_v11 = vld [vmem:[%s1596_s1 + $0xe0] sm:$0xff]  ;;  %v1283_v14 = vld [vmem:[%s1596_s1 + $0xd8] sm:$0xff]  ;;  %v1282_v17 = vld [vmem:[%s1596_s1 + $0xd0] sm:$0xff] }
  0x12   : > { %753 = vmatpush.bf16.msra.mxu2 %v1278_v3  ;;  %v1257_v18 = vld [vmem:[%s1596_s1 + $0x8] sm:$0xff]  ;;  %v1256_v20 = vld [vmem:[%s1596_s1] sm:$0xff]  ;;  %v1036_v21 = vld [vmem:[%s1461_s3 + $0x50] sm:$0xf] }
  0x13   : > { %782 = vmatpush.bf16.msra.mxu3 %v1286_v5  ;;  %v1273_v19 = vld [vmem:[%s1596_s1 + $0x88] sm:$0xff]  ;;  %v1271_v22 = vld [vmem:[%s1596_s1 + $0x78] sm:$0xff]  ;;  %v1248_v24 = vld [vmem:[%s1461_s3 + $0x60] sm:$0xf0] }
  0x14   : > { %v1281_v23 = vld [vmem:[%s1596_s1 + $0xc8] sm:$0xff]  ;;  %v996_v25 = vld [vmem:[%s1461_s3] sm:$0xf]  ;;  %v1238_v26 = vld [vmem:[%s1461_s3 + $0x10] sm:$0xf0]  ;;  %v1037_v31 = vor.u32 %v1248_v24, %v1036_v21 }
  0x15   : > { %1298 = vmatpush.bf16.msra.mxu1 %v1261_v6  ;;  %696 = vmatpush.bf16.msra.mxu0 %v1261_v6  ;;  %v1272_v27 = vld [vmem:[%s1596_s1 + $0x80] sm:$0xff]  ;;  %v1004_v28 = vld [vmem:[%s1461_s3 + $0x8] sm:$0xf]  ;;  %v1239_v29 = vld [vmem:[%s1461_s3 + $0x18] sm:$0xf0]  ;;  %v997_v32 = vor.u32 %v1238_v26, %v996_v25 }
  0x16   : > { %754 = vmatpush.bf16.msra.mxu2 %v1277_v7  ;;  %v1295_v30 = vld [vmem:[%s1596_s1 + $0x138] sm:$0xff]  ;;  %v1005_v33 = vor.u32 %v1239_v29, %v1004_v28  ;;  %v1280_v34 = vld [vmem:[%s1596_s1 + $0xc0] sm:$0xff]  ;;  %v1237_v35 = vld [vmem:[%s1461_s3 + $0xc] sm:$0xf] }
  0x17   : > { %783 = vmatpush.bf16.msra.mxu3 %v1285_v8  ;;  %v1006_v36 = vld [vmem:[%s1461_s3 + $0x1c] sm:$0xf0]  ;;  %v1270_v37 = vld [vmem:[%s1596_s1 + $0x70] sm:$0xff]  ;;  %v1269_v40 = vld [vmem:[%s1596_s1 + $0x68] sm:$0xff] }
  0x18   : > { %v1294_v38 = vld [vmem:[%s1596_s1 + $0x130] sm:$0xff]  ;;  %v1009_v39 = vor.u32 %v1237_v35, %v1006_v36  ;;  %v1293_v41 = vld [vmem:[%s1596_s1 + $0x128] sm:$0xff]  ;;  %v1268_v42 = vld [vmem:[%s1596_s1 + $0x60] sm:$0xff] }
  0x19   : > { %1299 = vmatpush.bf16.msra.mxu1 %v1260_v9  ;;  %697 = vmatpush.bf16.msra.mxu0 %v1260_v9  ;;  %v1292_v43 = vld [vmem:[%s1596_s1 + $0x120] sm:$0xff]  ;;  %v1056_v44 = vld [vmem:[%s1461_s3 + $0x78] sm:$0xf]  ;;  %v1253_v45 = vld [vmem:[%s1461_s3 + $0x88] sm:$0xf0] }
  0x1a   : > { %755 = vmatpush.bf16.msra.mxu2 %v1276_v10  ;;  %v1016_v46 = vld [vmem:[%s1461_s3 + $0x28] sm:$0xf]  ;;  %v1243_v47 = vld [vmem:[%s1461_s3 + $0x38] sm:$0xf0]  ;;  %v1024_v49 = vld [vmem:[%s1461_s3 + $0x30] sm:$0xf]  ;;  %v1057_v52 = vor.u32 %v1253_v45, %v1056_v44 }
  0x1b   : > { %784 = vmatpush.bf16.msra.mxu3 %v1284_v11  ;;  %v1267_v48 = vld [vmem:[%s1596_s1 + $0x58] sm:$0xff]  ;;  %v1244_v50 = vld [vmem:[%s1461_s3 + $0x40] sm:$0xf0]  ;;  %v1017_v53 = vor.u32 %v1243_v47, %v1016_v46  ;;  %v1242_v55 = vld [vmem:[%s1461_s3 + $0x34] sm:$0xf] }
  0x1c   : > { %v1291_v51 = vld [vmem:[%s1596_s1 + $0x118] sm:$0xff]  ;;  %v1025_v54 = vor.u32 %v1244_v50, %v1024_v49  ;;  %v1026_v56 = vld [vmem:[%s1461_s3 + $0x44] sm:$0xf0]  ;;  %v1266_v57 = vld [vmem:[%s1596_s1 + $0x50] sm:$0xff] }
  0x1d   : > { %1300 = vmatpush.bf16.msra.mxu1 %v1259_v12  ;;  %698 = vmatpush.bf16.msra.mxu0 %v1259_v12  ;;  %v1290_v58 = vld [vmem:[%s1596_s1 + $0x110] sm:$0xff]  ;;  %v1029_v59 = vor.u32 %v1242_v55, %v1026_v56  ;;  %v1265_v60 = vld [vmem:[%s1596_s1 + $0x48] sm:$0xff]  ;;  %v1264_v62 = vld [vmem:[%s1596_s1 + $0x40] sm:$0xff] }
  0x1e   : > { %756 = vmatpush.bf16.msra.mxu2 %v1275_v13  ;;  %v1289_v61 = vld [vmem:[%s1596_s1 + $0x108] sm:$0xff]  ;;  %v1288_v63 = vld [vmem:[%s1596_s1 + $0x100] sm:$0xff]  ;;  %v998_v1 = vld [vmem:[%s1461_s3 + $0x14] sm:$0xf0] }
  0x1f   : > { %785 = vmatpush.bf16.msra.mxu3 %v1283_v14  ;;  %v1236_v0 = vld [vmem:[%s1461_s3 + $0x4] sm:$0xf]  ;;  %v1012_v2 = vld [vmem:[%s1461_s3 + $0x10] sm:$0xf]  ;;  %v1044_v4 = vld [vmem:[%s1461_s3 + $0x58] sm:$0xf] }
  0x20   : > { %v1240_v3 = vld [vmem:[%s1461_s3 + $0x20] sm:$0xf0]  ;;  %v1249_v5 = vld [vmem:[%s1461_s3 + $0x68] sm:$0xf0]  ;;  %v1001_v6 = vor.u32 %v1236_v0, %v998_v1  ;;  %v1247_v9 = vld [vmem:[%s1461_s3 + $0x5c] sm:$0xf] }
  0x21   : > { %1301 = vmatpush.bf16.msra.mxu1 %v1258_v15  ;;  %699 = vmatpush.bf16.msra.mxu0 %v1258_v15  ;;  %v1013_v7 = vor.u32 %v1240_v3, %v1012_v2  ;;  %v1045_v8 = vor.u32 %v1249_v5, %v1044_v4  ;;  %v1046_v10 = vld [vmem:[%s1461_s3 + $0x6c] sm:$0xf0]  ;;  %v1241_v12 = vld [vmem:[%s1461_s3 + $0x2c] sm:$0xf]  ;;  %v1018_v13 = vld [vmem:[%s1461_s3 + $0x3c] sm:$0xf0] }
  0x22   : > { %757 = vmatpush.bf16.msra.mxu2 %v1274_v16  ;;  %v1049_v11 = vor.u32 %v1247_v9, %v1046_v10  ;;  %v1032_v14 = vld [vmem:[%s1461_s3 + $0x38] sm:$0xf]  ;;  %v1245_v15 = vld [vmem:[%s1461_s3 + $0x48] sm:$0xf0]  ;;  %v1064_v16 = vld [vmem:[%s1461_s3 + $0x80] sm:$0xf] }
  0x23   : > { %786 = vmatpush.bf16.msra.mxu3 %v1282_v17  ;;  %v1254_v17 = vld [vmem:[%s1461_s3 + $0x90] sm:$0xf0]  ;;  %v1252_v21 = vld [vmem:[%s1461_s3 + $0x84] sm:$0xf]  ;;  %v1038_v25 = vld [vmem:[%s1461_s3 + $0x64] sm:$0xf0] }
  0x24   : > { %v1246_v24 = vld [vmem:[%s1461_s3 + $0x54] sm:$0xf]  ;;  %v1052_v26 = vld [vmem:[%s1461_s3 + $0x60] sm:$0xf]  ;;  %v1072_v28 = vld [vmem:[%s1461_s3 + $0x88] sm:$0xf] }
  0x25   : > { %1302 = vmatpush.bf16.msra.mxu1 %v1257_v18  ;;  %700 = vmatpush.bf16.msra.mxu0 %v1257_v18  ;;  %v1021_v18 = vor.u32 %v1241_v12, %v1018_v13  ;;  %v1255_v29 = vld [vmem:[%s1461_s3 + $0x98] sm:$0xf0] }
  0x26   : > { %758 = vmatpush.bf16.msra.mxu2 %v1273_v19  ;;  %v1033_v19 = vor.u32 %v1245_v15, %v1032_v14 }
  0x27   : > { %787 = vmatpush.bf16.msra.mxu3 %v1281_v23 }
  0x29   : > { %1303 = vmatpush.bf16.msra.mxu1 %v1256_v20  ;;  %701 = vmatpush.bf16.msra.mxu0 %v1256_v20  ;;  %v1065_v20 = vor.u32 %v1254_v17, %v1064_v16 }
  0x2a   : > { %759 = vmatpush.bf16.msra.mxu2 %v1272_v27  ;;  %v1250_v27 = vld [vmem:[%s1461_s3 + $0x70] sm:$0xf0] }
  0x2b   : > { %788 = vmatpush.bf16.msra.mxu3 %v1280_v34  ;;  %v1058_v34 = vld [vmem:[%s1461_s3 + $0x8c] sm:$0xf0] }
  0x2c   : > { %712 = vmatmul.bf16.vlgmr.msra.gmra.mxu1 %v1037_v31  ;;  %702 = vmatmul.bf16.vlgmr.msra.gmra.mxu0 %v997_v32  ;;  %v1053_v31 = vor.u32 %v1250_v27, %v1052_v26  ;;  %v1073_v32 = vor.u32 %v1255_v29, %v1072_v28 }
  0x2d   : > { %723 = vmatpush.bf16.msrb.mxu1 %v1271_v22  ;;  %810 = vmatpush.bf16.msrb.mxu0 %v1295_v30  ;;  %v1066_v22 = vld [vmem:[%s1461_s3 + $0x94] sm:$0xf0] }
  0x2e   : > { %1304 = vmatpush.bf16.msrb.mxu2 %v1295_v30  ;;  %789 = vmatmul.bf16.vlgmr.msra.gmra.mxu3 %v1009_v39  ;;  %v1069_v23 = vor.u32 %v1252_v21, %v1066_v22  ;;  %v1041_v30 = vor.u32 %v1246_v24, %v1038_v25 }
  0x2f   : > { %760 = vmatmul.bf16.vlgmr.msra.gmra.mxu2 %v1005_v33  ;;  %v1251_v33 = vld [vmem:[%s1461_s3 + $0x7c] sm:$0xf]  ;;  %s993_s3 = sshll.u32 %s1603_s29, 3 }
  0x30   : > { %v1061_v35 = vor.u32 %v1251_v33, %v1058_v34  ;;  %s1574_s28 = scalar_lea.vmem %s1597_s2, %s993_s3 }
  0x31   : > { %724 = vmatpush.bf16.msrb.mxu1 %v1270_v37  ;;  %811 = vmatpush.bf16.msrb.mxu0 %v1294_v38 }
  0x32   : > { %1305 = vmatpush.bf16.msrb.mxu2 %v1294_v38 }
  0x35   : > { %725 = vmatpush.bf16.msrb.mxu1 %v1269_v40  ;;  %812 = vmatpush.bf16.msrb.mxu0 %v1293_v41 }
  0x36   : > { %1306 = vmatpush.bf16.msrb.mxu2 %v1293_v41 }
  0x39   : > { %726 = vmatpush.bf16.msrb.mxu1 %v1268_v42  ;;  %813 = vmatpush.bf16.msrb.mxu0 %v1292_v43 }
  0x3a   : > { %1307 = vmatpush.bf16.msrb.mxu2 %v1292_v43 }
  0x3c   : > { %717 = vmatmul.bf16.gmra.mxu1 %v1057_v52  ;;  %707 = vmatmul.bf16.gmra.mxu0 %v1017_v53 }
  0x3d   : > { %727 = vmatpush.bf16.msrb.mxu1 %v1267_v48  ;;  %814 = vmatpush.bf16.msrb.mxu0 %v1291_v51 }
  0x3e   : > { %1308 = vmatpush.bf16.msrb.mxu2 %v1291_v51  ;;  %794 = vmatmul.bf16.gmra.mxu3 %v1029_v59 }
  0x3f   : > { %765 = vmatmul.bf16.gmra.mxu2 %v1025_v54 }
  0x41   : > { %728 = vmatpush.bf16.msrb.mxu1 %v1266_v57  ;;  %815 = vmatpush.bf16.msrb.mxu0 %v1290_v58 }
  0x42   : > { %1309 = vmatpush.bf16.msrb.mxu2 %v1290_v58 }
  0x45   : > { %729 = vmatpush.bf16.msrb.mxu1 %v1265_v60  ;;  %816 = vmatpush.bf16.msrb.mxu0 %v1289_v61 }
  0x46   : > { %1310 = vmatpush.bf16.msrb.mxu2 %v1289_v61 }
  0x49   : > { %730 = vmatpush.bf16.msrb.mxu1 %v1264_v62  ;;  %817 = vmatpush.bf16.msrb.mxu0 %v1288_v63 }
  0x4a   : > { %1311 = vmatpush.bf16.msrb.mxu2 %v1288_v63 }
  0x4c   : > { %731 = vmatmul.bf16.vlgmr.msrb.gmra.mxu1 %v1001_v6  ;;  %818 = vmatmul.bf16.vlgmr.msrb.gmra.mxu0 %v1013_v7 }
  0x4e   : > { %799 = vmatmul.bf16.gmra.mxu3 %v1049_v11 }
  0x4f   : > { %770 = vmatmul.bf16.gmra.mxu2 %v1045_v8 }
  0x5c   : > { %736 = vmatmul.bf16.gmra.mxu1 %v1021_v18  ;;  %823 = vmatmul.bf16.gmra.mxu0 %v1033_v19 }
  0x5e   : > { %804 = vmatmul.bf16.gmra.mxu3 %v1069_v23 }
  0x5f   : > { %775 = vmatmul.bf16.gmra.mxu2 %v1065_v20 }
  0x6c   : > { %741 = vmatmul.bf16.gmra.mxu1 %v1041_v30  ;;  %828 = vmatmul.bf16.gmra.mxu0 %v1053_v31 }
  0x6f   : > { %833 = vmatmul.bf16.vlgmr.msrb.gmra.mxu2 %v1073_v32 }
  0x7c   : > { %746 = vmatmul.bf16.gmra.mxu1 %v1061_v35 }
  0xa9   : > { %v713_v36 = vpop.f32.mrf.mxu1  ;;  %v703_v37 = vpop.f32.mrf.mxu0 }
  0xb1   : > { %v715_v39 = vpop.f32.mrf.mxu1  ;;  %v705_v40 = vpop.f32.mrf.mxu0 }
  0xb2   : > { %v761_v38 = vpop.f32.mrf.mxu2  ;;  %v790_v44 = vpop.f32.mrf.mxu3 }
  0xb9   : > { %v1566_v42 = vpop.f32.mrf.mxu1  ;;  %v708_v43 = vpop.f32.mrf.mxu0 }
  0xba   : > { %v763_v41 = vpop.f32.mrf.mxu2  ;;  %v792_v48 = vpop.f32.mrf.mxu3 }
  0xc1   : > { %v1568_v46 = vpop.f32.mrf.mxu1  ;;  %v710_v47 = vpop.f32.mrf.mxu0 }
  0xc2   : > { %v766_v45 = vpop.f32.mrf.mxu2  ;;  %v795_v59 = vpop.f32.mrf.mxu3 }
  0xc9   : > { %v732_v49 = vpop.f32.mrf.mxu1  ;;  %v819_v50 = vpop.f32.mrf.mxu0 }
  0xca   : > { %v733_v51 = vadd.f32 %v732_v49, %v703_v37  ;;  %v768_v52 = vpop.f32.mrf.mxu2  ;;  %v797_v6 = vpop.f32.mrf.mxu3 }
  0xcc   : > { %v762_v53 = vadd.f32 %v761_v38, %v733_v51 }
  0xce   : > { %v791_v54 = vadd.f32 %v790_v44, %v762_v53 }
  0xd0   : > { %v820_v55 = vadd.f32 %v819_v50, %v791_v54 }
  0xd1   : > { %v734_v56 = vpop.f32.mrf.mxu1  ;;  %v821_v57 = vpop.f32.mrf.mxu0 }
  0xd2   : > { %v735_v58 = vadd.f32 %v734_v56, %v705_v40  ;;  %v866_v60 = vmax.f32 %v820_v55, 0.0  ;;  %v771_v62 = vpop.f32.mrf.mxu2  ;;  %v800_v16 = vpop.f32.mrf.mxu3 }
  0xd4   : > { %v764_v61 = vadd.f32 %v763_v41, %v735_v58  ;;  %874 = vst [vmem:[%s1574_s28] sm:$0xff] %v866_v60 }
  0xd6   : > { %v793_v63 = vadd.f32 %v792_v48, %v764_v61 }
  0xd8   : > { %v822_v0 = vadd.f32 %v821_v57, %v793_v63 }
  0xd9   : > { %v737_v1 = vpop.f32.mrf.mxu1  ;;  %v824_v2 = vpop.f32.mrf.mxu0 }
  0xda   : > { %v738_v3 = vadd.f32 %v737_v1, %v708_v43  ;;  %v867_v4 = vmax.f32 %v822_v0, 0.0  ;;  %v773_v8 = vpop.f32.mrf.mxu2  ;;  %v802_v26 = vpop.f32.mrf.mxu3 }
  0xdc   : > { %v767_v5 = vadd.f32 %v766_v45, %v738_v3  ;;  %875 = vst [vmem:[%s1574_s28 + $0x8] sm:$0xff] %v867_v4 }
  0xde   : > { %v796_v7 = vadd.f32 %v795_v59, %v767_v5 }
  0xe0   : > { %v825_v9 = vadd.f32 %v824_v2, %v796_v7 }
  0xe1   : > { %v739_v10 = vpop.f32.mrf.mxu1  ;;  %v826_v11 = vpop.f32.mrf.mxu0 }
  0xe2   : > { %v740_v12 = vadd.f32 %v739_v10, %v710_v47  ;;  %v868_v13 = vmax.f32 %v825_v9, 0.0  ;;  %v776_v18 = vpop.f32.mrf.mxu2  ;;  %v805_v37 = vpop.f32.mrf.mxu3 }
  0xe4   : > { %v769_v14 = vadd.f32 %v768_v52, %v740_v12  ;;  %876 = vst [vmem:[%s1574_s28 + $0x10] sm:$0xff] %v868_v13 }
  0xe6   : > { %v798_v15 = vadd.f32 %v797_v6, %v769_v14 }
  0xe8   : > { %v827_v17 = vadd.f32 %v826_v11, %v798_v15 }
  0xe9   : > { %v742_v19 = vpop.f32.mrf.mxu1  ;;  %v829_v21 = vpop.f32.mrf.mxu0 }
  0xea   : > { %v743_v20 = vadd.f32 %v742_v19, %v713_v36  ;;  %v869_v22 = vmax.f32 %v827_v17, 0.0  ;;  %v778_v29 = vpop.f32.mrf.mxu2  ;;  %v807_v49 = vpop.f32.mrf.mxu3 }
  0xec   : > { %v772_v23 = vadd.f32 %v771_v62, %v743_v20  ;;  %877 = vst [vmem:[%s1574_s28 + $0x18] sm:$0xff] %v869_v22 }
  0xee   : > { %v801_v24 = vadd.f32 %v800_v16, %v772_v23 }
  0xf0   : > { %v830_v25 = vadd.f32 %v829_v21, %v801_v24 }
  0xf1   : > { %v744_v27 = vpop.f32.mrf.mxu1  ;;  %v831_v32 = vpop.f32.mrf.mxu0 }
  0xf2   : > { %v745_v28 = vadd.f32 %v744_v27, %v715_v39  ;;  %v870_v30 = vmax.f32 %v830_v25, 0.0  ;;  %v834_v41 = vpop.f32.mrf.mxu2 }
  0xf4   : > { %v774_v31 = vadd.f32 %v773_v8, %v745_v28  ;;  %878 = vst [vmem:[%s1574_s28 + $0x20] sm:$0xff] %v870_v30 }
  0xf6   : > { %v803_v33 = vadd.f32 %v802_v26, %v774_v31 }
  0xf8   : > { %v832_v34 = vadd.f32 %v831_v32, %v803_v33 }
  0xf9   : > { %v747_v35 = vpop.f32.mrf.mxu1 }
  0xfa   : > { %v748_v36 = vadd.f32 %v747_v35, %v1566_v42  ;;  %v871_v38 = vmax.f32 %v832_v34, 0.0  ;;  %v836_v51 = vpop.f32.mrf.mxu2 }
  0xfc   : > { %v777_v40 = vadd.f32 %v776_v18, %v748_v36  ;;  %879 = vst [vmem:[%s1574_s28 + $0x28] sm:$0xff] %v871_v38 }
  0xfe   : > { %v806_v43 = vadd.f32 %v805_v37, %v777_v40 }
 0x100   : > { %v835_v44 = vadd.f32 %v834_v41, %v806_v43 }
 0x101   : > { %v749_v39 = vpop.f32.mrf.mxu1 }
 0x102   : > { %v750_v45 = vadd.f32 %v749_v39, %v1568_v46  ;;  %v872_v47 = vmax.f32 %v835_v44, 0.0 }
 0x104   : > { %v779_v48 = vadd.f32 %v778_v29, %v750_v45  ;;  %880 = vst [vmem:[%s1574_s28 + $0x30] sm:$0xff] %v872_v47 }
 0x106   : > { %v808_v50 = vadd.f32 %v807_v49, %v779_v48 }
 0x108   : > { %v837_v52 = vadd.f32 %v836_v51, %v808_v50 }
 0x10a   : > { %v873_v53 = vmax.f32 %v837_v52, 0.0 }
 0x10c   : > { %881 = vst [vmem:[%s1574_s28 + $0x38] sm:$0xff] %v873_v53 }
 0x10d PF: > { %s12_s11 = sadd.s32 1, %s1360_s11   ;;  %s1598_s9 = smov %s1356_s10 }
 0x10e   : > { %p9_p5 = scmp.ge.s32.totalorder %s12_s11, 4   ;;  %s1599_s10 = smov %s1601_s12 }
 0x110   :  { %11 = sbr.rel (!%p9_p5) target bundleno = 2 (0x2), region = 69 }

// kernel: forward.28
= control target key start
LH: loop header
LB: loop body
LE: loop exit
PB: predicated region body
PF: predicated region fallthrough
CT: control target
= control target key end

     0   :  { %s1074_s9 = smov 0   ;;  %s1076_s10 = smov 0   ;;  %s1246_s0 = inlined_call_operand.vmem [shape: bf16[32,640], index: 0, kind: input, shape index: {}]   ;;  %s1247_s1 = inlined_call_operand.vmem [shape: bf16[640,128], index: 1, kind: input, shape index: {}]   ;;  %s1248_s2 = inlined_call_operand.vmem [shape: f32[32,128], index: 2, kind: output, shape index: {}]  }
   0x1   :  { %s1078_s11 = smov 0  }
   0x2 LB: > { %s31_s12 = sadd.s32 1, %s1052_s10  ;;  %p776_p0 = scmp.ge.s32.totalorder %s1056_s11, 1  ;;  %s1056_s11 = sphi %s1078_s11, %s12_s11   ;;  %s1052_s10 = sphi %s1076_s10, %s1250_s10   ;;  %s1048_s9 = sphi %s1074_s9, %s1249_s9  }
   0x3   : > { %p33_p1 = scmp.ge.s32.totalorder %s31_s12, 2  ;;  %p158_p2 = scmp.lt.s32.totalorder %s1056_s11, 3 }
   0x5   : > { %s1252_s12 = smov (%p33_p1, %s31_s12), 0  ;;  %p159_p3 = pnand %p776_p0, %p158_p2 }
   0x6   : > { %s777_s13 = sshll.u32 (!%p159_p3), %s1048_s9, 1 }
   0x7   : > { %162 = sbr.rel (%p159_p3) target bundleno = 217 (0xd9), region = 28  ;;  %p198_p4 = scmp.lt.s32.totalorder (!%p159_p3), %s777_s13, 3 }
   0xc   : > { %v975_v0 = vld [vmem:[%s1247_s1 + $0x38] sm:$0xff]  ;;  %v974_v4 = vld [vmem:[%s1247_s1 + $0x30] sm:$0xff]  ;;  %v973_v8 = vld [vmem:[%s1247_s1 + $0x28] sm:$0xff]  ;;  %s1254_s13 = smov (!%p198_p4, %s777_s13), 3  ;;  %v1058_v55 = vmov 0.0  }
   0xd   : > { %v991_v1 = vld [vmem:[%s1247_s1 + $0xb8] sm:$0xff]  ;;  %586 = vmatpush.bf16.msra.mxu0 %v975_v0  ;;  %v990_v5 = vld [vmem:[%s1247_s1 + $0xb0] sm:$0xff]  ;;  %v989_v9 = vld [vmem:[%s1247_s1 + $0xa8] sm:$0xff]  ;;  %s1008_s5 = smul.u32 20, %s1254_s13  ;;  %s780_s26 = sshll.u32 %s1254_s13, 3 }
   0xe   : > { %v999_v2 = vld [vmem:[%s1247_s1 + $0xf8] sm:$0xff]  ;;  %614 = vmatpush.bf16.msra.mxu2 %v991_v1  ;;  %v998_v6 = vld [vmem:[%s1247_s1 + $0xf0] sm:$0xff]  ;;  %v997_v10 = vld [vmem:[%s1247_s1 + $0xe8] sm:$0xff]  ;;  %s224_s29 = scalar_lea.vmem %s1248_s2, %s780_s26 }
   0xf   : > { %v983_v3 = vld [vmem:[%s1247_s1 + $0x78] sm:$0xff]  ;;  %628 = vmatpush.bf16.msra.mxu3 %v999_v2  ;;  %v982_v7 = vld [vmem:[%s1247_s1 + $0x70] sm:$0xff]  ;;  %v981_v11 = vld [vmem:[%s1247_s1 + $0x68] sm:$0xff]  ;;  %s1179_s21 = scalar_lea.vmem %s1246_s0, %s1008_s5  ;;  %230 = vst [vmem:[%s224_s29] sm:$0xff] %v1058_v55 }
  0x10   : > { %600 = vmatpush.bf16.msra.mxu1 %v983_v3  ;;  %v972_v12 = vld [vmem:[%s1247_s1 + $0x20] sm:$0xff]  ;;  %v971_v16 = vld [vmem:[%s1247_s1 + $0x18] sm:$0xff]  ;;  %v970_v20 = vld [vmem:[%s1247_s1 + $0x10] sm:$0xff]  ;;  %231 = vst [vmem:[%s224_s29 + $0x8] sm:$0xff] %v1058_v55 }
  0x11   : > { %587 = vmatpush.bf16.msra.mxu0 %v974_v4  ;;  %v988_v13 = vld [vmem:[%s1247_s1 + $0xa0] sm:$0xff]  ;;  %v987_v17 = vld [vmem:[%s1247_s1 + $0x98] sm:$0xff]  ;;  %v986_v21 = vld [vmem:[%s1247_s1 + $0x90] sm:$0xff] }
  0x12   : > { %615 = vmatpush.bf16.msra.mxu2 %v990_v5  ;;  %v996_v14 = vld [vmem:[%s1247_s1 + $0xe0] sm:$0xff]  ;;  %v995_v18 = vld [vmem:[%s1247_s1 + $0xd8] sm:$0xff]  ;;  %v994_v22 = vld [vmem:[%s1247_s1 + $0xd0] sm:$0xff] }
  0x13   : > { %629 = vmatpush.bf16.msra.mxu3 %v998_v6  ;;  %v980_v15 = vld [vmem:[%s1247_s1 + $0x60] sm:$0xff]  ;;  %v979_v19 = vld [vmem:[%s1247_s1 + $0x58] sm:$0xff]  ;;  %v978_v23 = vld [vmem:[%s1247_s1 + $0x50] sm:$0xff] }
  0x14   : > { %601 = vmatpush.bf16.msra.mxu1 %v982_v7  ;;  %v969_v24 = vld [vmem:[%s1247_s1 + $0x8] sm:$0xff]  ;;  %v968_v28 = vld [vmem:[%s1247_s1] sm:$0xff]  ;;  %v1007_v30 = vld [vmem:[%s1247_s1 + $0x138] sm:$0xff] }
  0x15   : > { %588 = vmatpush.bf16.msra.mxu0 %v973_v8  ;;  %v985_v25 = vld [vmem:[%s1247_s1 + $0x88] sm:$0xff]  ;;  %v984_v29 = vld [vmem:[%s1247_s1 + $0x80] sm:$0xff]  ;;  %v966_v32 = vld [vmem:[%s1179_s21 + $0x18] sm:$0xf0] }
  0x16   : > { %616 = vmatpush.bf16.msra.mxu2 %v989_v9  ;;  %v993_v26 = vld [vmem:[%s1247_s1 + $0xc8] sm:$0xff]  ;;  %v783_v33 = vld [vmem:[%s1179_s21] sm:$0xf]  ;;  %v965_v34 = vld [vmem:[%s1179_s21 + $0x10] sm:$0xf0] }
  0x17   : > { %630 = vmatpush.bf16.msra.mxu3 %v997_v10  ;;  %v977_v27 = vld [vmem:[%s1247_s1 + $0x48] sm:$0xff]  ;;  %v992_v35 = vld [vmem:[%s1247_s1 + $0xc0] sm:$0xff]  ;;  %v785_v40 = vld [vmem:[%s1179_s21 + $0x14] sm:$0xf0]  ;;  %v784_v42 = vor.u32 %v965_v34, %v783_v33 }
  0x18   : > { %602 = vmatpush.bf16.msra.mxu1 %v981_v11  ;;  %v791_v31 = vld [vmem:[%s1179_s21 + $0x8] sm:$0xf]  ;;  %v964_v36 = vld [vmem:[%s1179_s21 + $0xc] sm:$0xf]  ;;  %v793_v37 = vld [vmem:[%s1179_s21 + $0x1c] sm:$0xf0] }
  0x19   : > { %589 = vmatpush.bf16.msra.mxu0 %v972_v12  ;;  %v976_v38 = vld [vmem:[%s1247_s1 + $0x40] sm:$0xff]  ;;  %v792_v41 = vor.u32 %v966_v32, %v791_v31  ;;  %v796_v43 = vor.u32 %v964_v36, %v793_v37  ;;  %v1006_v44 = vld [vmem:[%s1247_s1 + $0x130] sm:$0xff]  ;;  %v1005_v46 = vld [vmem:[%s1247_s1 + $0x128] sm:$0xff] }
  0x1a   : > { %617 = vmatpush.bf16.msra.mxu2 %v988_v13  ;;  %v963_v39 = vld [vmem:[%s1179_s21 + $0x4] sm:$0xf]  ;;  %v1003_v48 = vld [vmem:[%s1247_s1 + $0x118] sm:$0xff]  ;;  %v1002_v49 = vld [vmem:[%s1247_s1 + $0x110] sm:$0xff] }
  0x1b   : > { %631 = vmatpush.bf16.msra.mxu3 %v996_v14  ;;  %v788_v45 = vor.u32 %v963_v39, %v785_v40  ;;  %v1004_v47 = vld [vmem:[%s1247_s1 + $0x120] sm:$0xff]  ;;  %v1001_v50 = vld [vmem:[%s1247_s1 + $0x108] sm:$0xff]  ;;  %v799_v52 = vld [vmem:[%s1179_s21 + $0x10] sm:$0xf] }
  0x1c   : > { %603 = vmatpush.bf16.msra.mxu1 %v980_v15  ;;  %v1000_v51 = vld [vmem:[%s1247_s1 + $0x100] sm:$0xff] }
  0x1d   : > { %590 = vmatpush.bf16.msra.mxu0 %v971_v16  ;;  %v967_v53 = vld [vmem:[%s1179_s21 + $0x20] sm:$0xf0] }
  0x1e   : > { %618 = vmatpush.bf16.msra.mxu2 %v987_v17  ;;  %v800_v54 = vor.u32 %v967_v53, %v799_v52  ;;  %v232_v3 = vld [vmem:[%s224_s29] sm:$0xff] }
  0x1f   : > { %632 = vmatpush.bf16.msra.mxu3 %v995_v18 }
  0x20   : > { %604 = vmatpush.bf16.msra.mxu1 %v979_v19 }
  0x21   : > { %591 = vmatpush.bf16.msra.mxu0 %v970_v20 }
  0x22   : > { %619 = vmatpush.bf16.msra.mxu2 %v986_v21 }
  0x23   : > { %633 = vmatpush.bf16.msra.mxu3 %v994_v22 }
  0x24   : > { %605 = vmatpush.bf16.msra.mxu1 %v978_v23 }
  0x25   : > { %592 = vmatpush.bf16.msra.mxu0 %v969_v24 }
  0x26   : > { %620 = vmatpush.bf16.msra.mxu2 %v985_v25 }
  0x27   : > { %634 = vmatpush.bf16.msra.mxu3 %v993_v26 }
  0x28   : > { %606 = vmatpush.bf16.msra.mxu1 %v977_v27 }
  0x29   : > { %593 = vmatpush.bf16.msra.mxu0 %v968_v28 }
  0x2a   : > { %621 = vmatpush.bf16.msra.mxu2 %v984_v29 }
  0x2b   : > { %635 = vmatpush.bf16.msra.mxu3 %v992_v35 }
  0x2c   : > { %607 = vmatpush.bf16.msra.mxu1 %v976_v38  ;;  %594 = vmatmul.bf16.vlgmr.msra.gmra.mxu0 %v784_v42 }
  0x2d   : > { %642 = vmatpush.bf16.msrb.mxu0 %v1007_v30  ;;  %622 = vmatmul.bf16.vlgmr.msra.gmra.mxu2 %v792_v41 }
  0x2e   : > { %636 = vmatmul.bf16.vlgmr.msra.gmra.mxu3 %v796_v43 }
  0x2f   : > { %608 = vmatmul.bf16.vlgmr.msra.gmra.mxu1 %v788_v45 }
  0x31   : > { %643 = vmatpush.bf16.msrb.mxu0 %v1006_v44 }
  0x35   : > { %644 = vmatpush.bf16.msrb.mxu0 %v1005_v46 }
  0x39   : > { %645 = vmatpush.bf16.msrb.mxu0 %v1004_v47 }
  0x3d   : > { %646 = vmatpush.bf16.msrb.mxu0 %v1003_v48 }
  0x41   : > { %647 = vmatpush.bf16.msrb.mxu0 %v1002_v49 }
  0x45   : > { %648 = vmatpush.bf16.msrb.mxu0 %v1001_v50 }
  0x49   : > { %649 = vmatpush.bf16.msrb.mxu0 %v1000_v51 }
  0x4c   : > { %650 = vmatmul.bf16.vlgmr.msrb.gmra.mxu0 %v800_v54 }
  0xa9   : > { %v595_v56 = vpop.f32.mrf.mxu0 }
  0xac   : > { %v609_v57 = vpop.f32.mrf.mxu1 }
  0xad   : > { %v610_v59 = vadd.f32 %v609_v57, %v595_v56 }
  0xb0   : > { %v623_v58 = vpop.f32.mrf.mxu2 }
  0xb1   : > { %v597_v60 = vpop.f32.mrf.mxu0  ;;  %v637_v61 = vpop.f32.mrf.mxu3  ;;  %v624_v62 = vadd.f32 %v623_v58, %v610_v59 }
  0xb3   : > { %v638_v0 = vadd.f32 %v637_v61, %v624_v62 }
  0xb4   : > { %v611_v63 = vpop.f32.mrf.mxu1 }
  0xb5   : > { %v612_v1 = vadd.f32 %v611_v63, %v597_v60 }
  0xb8   : > { %v625_v2 = vpop.f32.mrf.mxu2 }
  0xb9   : > { %v626_v6 = vadd.f32 %v625_v2, %v612_v1  ;;  %v639_v8 = vpop.f32.mrf.mxu3 }
  0xbb   : > { %v640_v9 = vadd.f32 %v639_v8, %v626_v6 }
  0xc9   : > { %v651_v4 = vpop.f32.mrf.mxu0 }
  0xca   : > { %v652_v5 = vadd.f32 %v651_v4, %v638_v0 }
  0xcc   : > { %v656_v7 = vadd.f32 %v652_v5, %v232_v3 }
  0xce   : > { %658 = vst [vmem:[%s224_s29] sm:$0xff] %v656_v7 }
  0xd1   : > { %v653_v10 = vpop.f32.mrf.mxu0 }
  0xd2   : > { %v654_v11 = vadd.f32 %v653_v10, %v640_v9 }
  0xd4   : > { %659 = vst [vmem:[%s224_s29 + $0x8] sm:$0xff] %v654_v11  ;;  %v666_v14 = vmax.f32 %v654_v11, 0.0 }
  0xd5   : > { %v663_v12 = vld [vmem:[%s224_s29] sm:$0xff] }
  0xd6   : > { %v665_v13 = vmax.f32 %v663_v12, 0.0  ;;  %668 = vst [vmem:[%s224_s29 + $0x8] sm:$0xff] %v666_v14 }
  0xd8   : > { %667 = vst [vmem:[%s224_s29] sm:$0xff] %v665_v13 }
  0xd9 PF: > { %s12_s11 = sadd.s32 1, %s1056_s11   ;;  %s1249_s9 = smov %s1052_s10 }
  0xda   : > { %p9_p5 = scmp.ge.s32.totalorder %s12_s11, 4   ;;  %s1250_s10 = smov %s1252_s12 }
  0xdc   :  { %11 = sbr.rel (!%p9_p5) target bundleno = 2 (0x2), region = 69 }

// kernel: forward.30
= control target key start
LH: loop header
LB: loop body
LE: loop exit
PB: predicated region body
PF: predicated region fallthrough
CT: control target
= control target key end

     0   :  { %s1005_s12 = smov 0   ;;  %s1007_s13 = smov 0   ;;  %s1152_s0 = inlined_call_operand.vmem [shape: bf16[32,1152], index: 0, kind: input, shape index: {}]   ;;  %s1153_s1 = inlined_call_operand.vmem [shape: bf16[1152,128], index: 1, kind: input, shape index: {}]   ;;  %s1154_s2 = inlined_call_operand.vmem [shape: f32[32,128], index: 2, kind: input, shape index: {}]   ;;  %s1155_s3 = inlined_call_operand.vmem [shape: f32[32,128], index: 3, kind: output, shape index: {}]  }
   0x1   :  { %s1009_s14 = smov 0   ;;  %s1011_s15 = smov 0  }
   0x2   :  { %s1013_s16 = smov 0   ;;  %s1015_s17 = smov 0  }
   0x3   :  { %s1017_s18 = smov 0  }
   0x4 LB: > { %s25_s19 = sadd.s32 1, %s974_s16  ;;  %s32_s20 = sadd.s32 1, %s978_s17  ;;  %s982_s18 = sphi %s1017_s18, %s13_s18   ;;  %s978_s17 = sphi %s1015_s17, %s1161_s17   ;;  %s974_s16 = sphi %s1013_s16, %s1160_s16   ;;  %s970_s15 = sphi %s1011_s15, %s1159_s15   ;;  %s966_s14 = sphi %s1009_s14, %s1158_s14   ;;  %s962_s13 = sphi %s1007_s13, %s1157_s13   ;;  %s958_s12 = sphi %s1005_s12, %s1156_s12  }
   0x5   : > { %p26_p0 = scmp.ge.s32.totalorder %s25_s19, 3  ;;  %p48_p1 = scmp.ne.s32.totalorder %s962_s13, %s958_s12 }
   0x6   : > { %p49_p2 = scmp.eq.s32.totalorder %s982_s18, 0  ;;  %s41_s24 = sadd.s32 1, %s962_s13 }
   0x7   : > { %s1163_s19 = smov (%p26_p0, %s25_s19), 0  ;;  %s1165_s20 = smov (!%p26_p0, %s32_s20), %s978_s17 }
   0x8   : > { %p50_p3 = por %p49_p2, %p48_p1  ;;  %p34_p4 = scmp.ge.s32.totalorder %s1165_s20, 2 }
   0x9   : > { %s37_s21 = ssub.s32 %s974_s16, %s1163_s19  ;;  %p715_p6 = scmp.ge.s32.totalorder %s982_s18, 6 }
   0xa   : > { %s1167_s20 = smov (%p34_p4, %s1165_s20), 0 }
   0xb   : > { %s36_s22 = ssub.s32 %s978_s17, %s1167_s20  ;;  %158 = sbr.rel (%p715_p6) target bundleno = 29 (0x1d), region = 16 }
   0xc   : > { %s38_s23 = sor.u32 %s37_s21, %s36_s22 }
   0xd   : > { %p39_p5 = scmp.eq.s32.totalorder %s38_s23, 0 }
   0xf   : > { %s1056_s25 = scalar_select %p39_p5, %s962_s13, %s41_s24  }
  0x10   : > { %161 = sbr.rel (!%p50_p3) target bundleno = 29 (0x1d), region = 20  ;;  %s163_s26 = sand.u32 (%p50_p3), 1, %s962_s13  }
  0x11   : > { %s167_s27 = smul.u32 (%p50_p3), 3, %s974_s16 }
  0x12   : > { %s868_s28 = smul.u32 (%p50_p3), 24, %s163_s26 }
  0x13   : > { %s869_s29 = smul.u32 (%p50_p3), 18, %s978_s17 }
  0x14   : > { %s165_s8 = scalar_lea.vmem (%p50_p3), [#allocation2], %s868_s28 }
  0x15   : > { %s169_s30 = sadd.s32 %s869_s29, %s167_s27 }
  0x16   : > { %s718_s4 = sshll.u32 %s169_s30, 2 }
  0x17   : > { %s171_s7 = scalar_lea.vmem %s1152_s0, %s718_s4 }
  0x18   : > { %v186_v0 = vld [vmem:[%s171_s7] sm:$0xff]  ;;  %v719_v2 = vld [vmem:[%s171_s7 + $0x8] sm:$0xf]  ;;  %v721_v3 = vld [vmem:[%s171_s7 + $0x2c] sm:$0xf] }
  0x19   : > { %v188_v1 = vld [vmem:[%s171_s7 + $0x24] sm:$0xff]  ;;  %187 = vst [vmem:[%s165_s8] sm:$0xff] %v186_v0 }
  0x1a   : > { %189 = vst [vmem:[%s165_s8 + $0xc] sm:$0xff] %v188_v1 }
  0x1b   : > { %720 = vst [vmem:[%s165_s8 + $0x8] sm:$0xf] %v719_v2 }
  0x1c   : > { %722 = vst [vmem:[%s165_s8 + $0x14] sm:$0xf] %v721_v3 }
  0x1d PF: > { %p723_p7 = scmp.ge.s32.totalorder %s982_s18, 1  ;;  %p230_p8 = scmp.lt.s32.totalorder %s982_s18, 7 }
  0x1f   : > { %p231_p9 = pnand %p723_p7, %p230_p8 }
  0x20   : > { %s237_s9 = sand.u32 (!%p231_p9), 1, %s958_s12   ;;  %s281_s10 = smul.u32 (!%p231_p9), 48, %s966_s14 }
  0x21   : > { %234 = sbr.rel (%p231_p9) target bundleno = 240 (0xf0), region = 54  ;;  %s725_s21 = sshll.u32 (!%p231_p9), %s970_s15, 1 }
  0x22   : > { %s870_s11 = smul.u32 (!%p231_p9), 24, %s237_s9  ;;  %p282_p10 = scmp.lt.s32.totalorder (!%p231_p9), %s281_s10, 143 }
  0x23   : > { %p291_p11 = scmp.lt.s32.totalorder (!%p231_p9), %s725_s21, 3  ;;  %p729_p12 = scmp.ne.s32.totalorder (!%p231_p9), %s966_s14, 0 }
  0x24   : > { %s1085_s5 = scalar_lea.vmem (!%p231_p9), [#allocation2], %s870_s11 }
  0x26   : > { %s1169_s10 = smov (!%p282_p10, %s281_s10), 143  ;;  %s1171_s21 = smov (!%p291_p11, %s725_s21), 3 }
  0x27   : > { %s724_s22 = sshll.u32 %s1169_s10, 2  ;;  %s726_s27 = sshll.u32 %s1171_s21, 3 }
  0x28   : > { %s1073_s26 = scalar_lea.vmem %s1153_s1, %s724_s22  ;;  %s1078_s30 = scalar_lea.vmem %s1154_s2, %s726_s27 }
  0x29   : > { %s1083_s15 = scalar_lea.vmem %s1155_s3, %s726_s27  ;;  %311 = sbr.rel (%p729_p12) target bundleno = 49 (0x31), region = 62 }
  0x2e   : > { %v984_v4 = vmov 0.0  }
  0x2f   : > { %312 = vst [vmem:[%s1083_s15] sm:$0xff] %v984_v4 }
  0x30   : > { %313 = vst [vmem:[%s1083_s15 + $0x8] sm:$0xff] %v984_v4 }
  0x31 PF: > { %v851_v5 = vld [vmem:[%s1073_s26 + $0x38] sm:$0xff]  ;;  %v850_v8 = vld [vmem:[%s1073_s26 + $0x30] sm:$0xff]  ;;  %v849_v11 = vld [vmem:[%s1073_s26 + $0x28] sm:$0xff]  ;;  %p838_p13 = scmp.ne.s32.totalorder %s966_s14, 2 }
  0x32   : > { %v859_v6 = vld [vmem:[%s1073_s26 + $0x78] sm:$0xff]  ;;  %528 = vmatpush.bf16.msra.mxu0 %v851_v5  ;;  %v858_v9 = vld [vmem:[%s1073_s26 + $0x70] sm:$0xff]  ;;  %v857_v12 = vld [vmem:[%s1073_s26 + $0x68] sm:$0xff] }
  0x33   : > { %v867_v7 = vld [vmem:[%s1073_s26 + $0xb8] sm:$0xff]  ;;  %542 = vmatpush.bf16.msra.mxu1 %v859_v6  ;;  %v866_v10 = vld [vmem:[%s1073_s26 + $0xb0] sm:$0xff]  ;;  %v865_v13 = vld [vmem:[%s1073_s26 + $0xa8] sm:$0xff] }
  0x34   : > { %556 = vmatpush.bf16.msra.mxu2 %v867_v7  ;;  %v848_v14 = vld [vmem:[%s1073_s26 + $0x20] sm:$0xff]  ;;  %v847_v17 = vld [vmem:[%s1073_s26 + $0x18] sm:$0xff]  ;;  %v846_v20 = vld [vmem:[%s1073_s26 + $0x10] sm:$0xff] }
  0x35   : > { %v856_v15 = vld [vmem:[%s1073_s26 + $0x60] sm:$0xff]  ;;  %v855_v18 = vld [vmem:[%s1073_s26 + $0x58] sm:$0xff]  ;;  %v854_v21 = vld [vmem:[%s1073_s26 + $0x50] sm:$0xff] }
  0x36   : > { %529 = vmatpush.bf16.msra.mxu0 %v850_v8  ;;  %v864_v16 = vld [vmem:[%s1073_s26 + $0xa0] sm:$0xff]  ;;  %v863_v19 = vld [vmem:[%s1073_s26 + $0x98] sm:$0xff]  ;;  %v862_v22 = vld [vmem:[%s1073_s26 + $0x90] sm:$0xff] }
  0x37   : > { %543 = vmatpush.bf16.msra.mxu1 %v858_v9  ;;  %v845_v23 = vld [vmem:[%s1073_s26 + $0x8] sm:$0xff]  ;;  %v844_v26 = vld [vmem:[%s1073_s26] sm:$0xff] }
  0x38   : > { %557 = vmatpush.bf16.msra.mxu2 %v866_v10  ;;  %v853_v24 = vld [vmem:[%s1073_s26 + $0x48] sm:$0xff]  ;;  %v852_v27 = vld [vmem:[%s1073_s26 + $0x40] sm:$0xff] }
  0x39   : > { %v861_v25 = vld [vmem:[%s1073_s26 + $0x88] sm:$0xff]  ;;  %v732_v28 = vld [vmem:[%s1085_s5] sm:$0xf]  ;;  %v841_v30 = vld [vmem:[%s1085_s5 + $0x4] sm:$0xf] }
  0x3a   : > { %530 = vmatpush.bf16.msra.mxu0 %v849_v11  ;;  %v842_v29 = vld [vmem:[%s1085_s5 + $0x8] sm:$0xf0]  ;;  %v734_v31 = vld [vmem:[%s1085_s5 + $0xc] sm:$0xf0]  ;;  %v740_v33 = vld [vmem:[%s1085_s5 + $0x8] sm:$0xf] }
  0x3b   : > { %544 = vmatpush.bf16.msra.mxu1 %v857_v12  ;;  %v860_v32 = vld [vmem:[%s1073_s26 + $0x80] sm:$0xff]  ;;  %v843_v34 = vld [vmem:[%s1085_s5 + $0x10] sm:$0xf0]  ;;  %v733_v35 = vor.u32 %v842_v29, %v732_v28  ;;  %v737_v36 = vor.u32 %v841_v30, %v734_v31 }
  0x3c   : > { %558 = vmatpush.bf16.msra.mxu2 %v865_v13  ;;  %v741_v37 = vor.u32 %v843_v34, %v740_v33  ;;  %v314_v41 = vld [vmem:[%s1083_s15] sm:$0xff]  ;;  %v315_v44 = vld [vmem:[%s1083_s15 + $0x8] sm:$0xff] }
  0x3e   : > { %531 = vmatpush.bf16.msra.mxu0 %v848_v14 }
  0x3f   : > { %545 = vmatpush.bf16.msra.mxu1 %v856_v15 }
  0x40   : > { %559 = vmatpush.bf16.msra.mxu2 %v864_v16 }
  0x42   : > { %532 = vmatpush.bf16.msra.mxu0 %v847_v17 }
  0x43   : > { %546 = vmatpush.bf16.msra.mxu1 %v855_v18 }
  0x44   : > { %560 = vmatpush.bf16.msra.mxu2 %v863_v19 }
  0x46   : > { %533 = vmatpush.bf16.msra.mxu0 %v846_v20 }
  0x47   : > { %547 = vmatpush.bf16.msra.mxu1 %v854_v21 }
  0x48   : > { %561 = vmatpush.bf16.msra.mxu2 %v862_v22 }
  0x4a   : > { %534 = vmatpush.bf16.msra.mxu0 %v845_v23 }
  0x4b   : > { %548 = vmatpush.bf16.msra.mxu1 %v853_v24 }
  0x4c   : > { %562 = vmatpush.bf16.msra.mxu2 %v861_v25 }
  0x4e   : > { %535 = vmatpush.bf16.msra.mxu0 %v844_v26 }
  0x4f   : > { %549 = vmatpush.bf16.msra.mxu1 %v852_v27 }
  0x50   : > { %563 = vmatpush.bf16.msra.mxu2 %v860_v32 }
  0x51   : > { %536 = vmatmul.bf16.vlgmr.msra.gmra.mxu0 %v733_v35 }
  0x52   : > { %550 = vmatmul.bf16.vlgmr.msra.gmra.mxu1 %v737_v36 }
  0x53   : > { %564 = vmatmul.bf16.vlgmr.msra.gmra.mxu2 %v741_v37 }
  0xce   : > { %v537_v38 = vpop.f32.mrf.mxu0 }
  0xcf   : > { %v551_v39 = vpop.f32.mrf.mxu1 }
  0xd0   : > { %v552_v40 = vadd.f32 %v551_v39, %v537_v38 }
  0xd6   : > { %v565_v42 = vpop.f32.mrf.mxu2  ;;  %v539_v46 = vpop.f32.mrf.mxu0 }
  0xd7   : > { %v566_v43 = vadd.f32 %v565_v42, %v552_v40  ;;  %v553_v47 = vpop.f32.mrf.mxu1 }
  0xd8   : > { %v554_v48 = vadd.f32 %v553_v47, %v539_v46 }
  0xd9   : > { %v570_v45 = vadd.f32 %v566_v43, %v314_v41 }
  0xdb   : > { %572 = vst [vmem:[%s1083_s15] sm:$0xff] %v570_v45 }
  0xde   : > { %v567_v49 = vpop.f32.mrf.mxu2 }
  0xdf   : > { %v568_v50 = vadd.f32 %v567_v49, %v554_v48  ;;  %577 = sbr.rel (%p838_p13) target bundleno = 240 (0xf0), region = 66 }
  0xe1   : > { %v571_v51 = vadd.f32 %v568_v50, %v315_v44 }
  0xe3   : > { %573 = vst [vmem:[%s1083_s15 + $0x8] sm:$0xff] %v571_v51 }
  0xe4   : > { %v578_v52 = vld [vmem:[%s1083_s15] sm:$0xff]  ;;  %v581_v55 = vld [vmem:[%s1078_s30 + $0x8] sm:$0xff] }
  0xe5   : > { %v580_v54 = vld [vmem:[%s1078_s30] sm:$0xff] }
  0xe6   : > { %v582_v56 = vadd.f32 %v580_v54, %v578_v52 }
  0xe8   : > { %v584_v58 = vmax.f32 %v582_v56, 0.0 }
  0xea   : > { %v579_v53 = vld [vmem:[%s1083_s15 + $0x8] sm:$0xff]  ;;  %586 = vst [vmem:[%s1083_s15] sm:$0xff] %v584_v58 }
  0xeb   : > { %v583_v57 = vadd.f32 %v581_v55, %v579_v53 }
  0xed   : > { %v585_v59 = vmax.f32 %v583_v57, 0.0 }
  0xef   : > { %587 = vst [vmem:[%s1083_s15 + $0x8] sm:$0xff] %v585_v59 }
  0xf0 PF: > { %s13_s18 = sadd.s32 1, %s982_s18   ;;  %s1156_s12 = smov %s962_s13 }
  0xf1   : > { %p10_p0 = scmp.ge.s32.totalorder %s13_s18, 8   ;;  %s1157_s13 = smov %s1056_s25 }
  0xf2   : > { %s1158_s14 = smov %s974_s16  ;;  %s1159_s15 = smov %s978_s17 }
  0xf3   : > { %s1160_s16 = smov %s1163_s19  ;;  %s1161_s17 = smov %s1167_s20 }
  0xf4   :  { %12 = sbr.rel (!%p10_p0) target bundleno = 4 (0x4), region = 113 }

// kernel: forward.29
= control target key start
LH: loop header
LB: loop body
LE: loop exit
PB: predicated region body
PF: predicated region fallthrough
CT: control target
= control target key end

     0   :  { %7 = vsyncpa [#allocation3], 0  ;;  %s589_s9 = smov 0   ;;  %s591_s10 = smov 0   ;;  %s626_s0 = inlined_call_operand.vmem [shape: bf16[32,128], index: 0, kind: input, shape index: {}]   ;;  %s627_s1 = inlined_call_operand.hbm [shape: bf16[128,128], index: 1, kind: input, shape index: {}]   ;;  %s628_s2 = inlined_call_operand.vmem [shape: f32[32,128], index: 2, kind: output, shape index: {}]  }
   0x1   :  { %s593_s11 = smov 0  }
   0x2 LB: > { %s416_s12 = sadd.s32 4294967295, %s568_s11   ;;  %s32_s13 = sadd.s32 1, %s564_s10  ;;  %s568_s11 = sphi %s593_s11, %s13_s11   ;;  %s564_s10 = sphi %s591_s10, %s630_s10   ;;  %s560_s9 = sphi %s589_s9, %s629_s9  }
   0x3   : > { %p34_p0 = scmp.ge.s32.totalorder %s32_s13, 2  ;;  %p418_p1 = scmp.ge.s32.totalorder %s568_s11, 1 }
   0x4   : > { %p121_p2 = scmp.lt.s32.totalorder %s568_s11, 3  ;;  %p482_p4 = scmp.eq.s32.totalorder %s416_s12, 0 }
   0x5   : > { %s632_s13 = smov (%p34_p0, %s32_s13), 0  ;;  %s136_s16 = sshll.u32 %s627_s1, 4  ;;  %s137_s16 = int_to_ptr.hbm [resolvable:$true] %s136_s16 }
   0x6   : > { %p122_p3 = pnand %p418_p1, %p121_p2  ;;  %s570_s17 = smov [#allocation2]  }
   0x7   : > { %s138_s18 = sshll.u32 %s570_s17, 4  ;;  %s571_s19 = smov 64   ;;  %s139_s18 = int_to_ptr.vmem [resolvable:$true] %s138_s18 }
   0x8   : > { %p478_p5 = pneg %p122_p3  ;;  %s572_s20 = smov 4  }
   0x9   : > { %166 = sbr.rel (%p122_p3) target bundleno = 182 (0xb6), region = 28 }
   0xa   : > { %p479_p6 = pnand %p482_p4, %p478_p5 }
   0xc   : > { %481 = dma.hbm_to_vmem [thread:$0]  (!%p479_p6), %s137_s16, 1024, %s139_s18, [#allocation3], %s571_s19, %s571_s19, %s572_s20  }
   0xe   : > { %555 = dma.done.wait (%p482_p4), [#allocation3], 1024  }
   0xf   : > { %557 = vsyncadd (%p482_p4), [#allocation3], 4294966272  ;;  %s423_s21 = sshll.u32 %s560_s9, 1  ;;  %v473_v0 = vld [vmem:[#allocation2 + $0x38] sm:$0xff]  ;;  %v573_v1 = vmov 0.0   ;;  %v472_v2 = vld [vmem:[#allocation2 + $0x30] sm:$0xff] }
  0x10   : > { %p196_p7 = scmp.lt.s32.totalorder %s423_s21, 3  ;;  %294 = vmatpush.bf16.msra.mxu0 %v473_v0  ;;  %v471_v3 = vld [vmem:[#allocation2 + $0x28] sm:$0xff]  ;;  %v470_v4 = vld [vmem:[#allocation2 + $0x20] sm:$0xff]  ;;  %v469_v5 = vld [vmem:[#allocation2 + $0x18] sm:$0xff] }
  0x11   : > { %v468_v6 = vld [vmem:[#allocation2 + $0x10] sm:$0xff]  ;;  %v467_v7 = vld [vmem:[#allocation2 + $0x8] sm:$0xff]  ;;  %v466_v8 = vld [vmem:[#allocation2] sm:$0xff] }
  0x12   : > { %s634_s21 = smov (!%p196_p7, %s423_s21), 3 }
  0x13   : > { %s426_s22 = sshll.u32 %s634_s21, 3  ;;  %s424_s26 = sshll.u32 %s634_s21, 2 }
  0x14   : > { %s212_s25 = scalar_lea.vmem %s628_s2, %s426_s22  ;;  %295 = vmatpush.bf16.msra.mxu0 %v472_v2  ;;  %s202_s29 = scalar_lea.vmem %s626_s0, %s424_s26 }
  0x15   : > { %218 = vst [vmem:[%s212_s25] sm:$0xff] %v573_v1  ;;  %v465_v9 = vld [vmem:[%s202_s29] sm:$0xff] }
  0x16   : > { %219 = vst [vmem:[%s212_s25 + $0x8] sm:$0xff] %v573_v1 }
  0x18   : > { %296 = vmatpush.bf16.msra.mxu0 %v471_v3 }
  0x1c   : > { %297 = vmatpush.bf16.msra.mxu0 %v470_v4  ;;  %v220_v10 = vld [vmem:[%s212_s25] sm:$0xff] }
  0x20   : > { %298 = vmatpush.bf16.msra.mxu0 %v469_v5 }
  0x24   : > { %299 = vmatpush.bf16.msra.mxu0 %v468_v6 }
  0x28   : > { %300 = vmatpush.bf16.msra.mxu0 %v467_v7 }
  0x2c   : > { %301 = vmatpush.bf16.msra.mxu0 %v466_v8 }
  0x2f   : > { %302 = vmatmul.bf16.vlgmr.msra.gmra.mxu0 %v465_v9 }
  0xac   : > { %v303_v11 = vpop.f32.mrf.mxu0 }
  0xad   : > { %v308_v12 = vadd.f32 %v303_v11, %v220_v10 }
  0xaf   : > { %310 = vst [vmem:[%s212_s25] sm:$0xff] %v308_v12 }
  0xb4   : > { %v305_v13 = vpop.f32.mrf.mxu0 }
  0xb5   : > { %311 = vst [vmem:[%s212_s25 + $0x8] sm:$0xff] %v305_v13  }
  0xb6 PF: > { %s13_s11 = sadd.s32 1, %s568_s11   ;;  %s629_s9 = smov %s564_s10 }
  0xb7   : > { %p10_p8 = scmp.ge.s32.totalorder %s13_s11, 4   ;;  %s630_s10 = smov %s632_s13 }
  0xb9   :  { %12 = sbr.rel (!%p10_p8) target bundleno = 2 (0x2), region = 72 }
  0xbe   :  { %347 = vsyncpa [#allocation3], 1 }
  0xbf   :  { %349 = vsyncpa [#allocation3 + $0x1], 1 }

// kernel: forward.31
= control target key start
LH: loop header
LB: loop body
LE: loop exit
PB: predicated region body
PF: predicated region fallthrough
CT: control target
= control target key end

     0   :  { %s919_s9 = smov 0   ;;  %s921_s10 = smov 0   ;;  %s1059_s0 = inlined_call_operand.vmem [shape: bf16[32,1152], index: 0, kind: input, shape index: {}]   ;;  %s1060_s1 = inlined_call_operand.vmem [shape: bf16[1152,128], index: 1, kind: input, shape index: {}]   ;;  %s1061_s2 = inlined_call_operand.vmem [shape: f32[32,128], index: 2, kind: output, shape index: {}]  }
   0x1   :  { %s923_s11 = smov 0   ;;  %s925_s12 = smov 0  }
   0x2   :  { %s927_s13 = smov 0   ;;  %s929_s14 = smov 0  }
   0x3   :  { %s931_s15 = smov 0  }
   0x4 LB: > { %s24_s16 = sadd.s32 1, %s893_s13  ;;  %s31_s17 = sadd.s32 1, %s897_s14  ;;  %s901_s15 = sphi %s931_s15, %s12_s15   ;;  %s897_s14 = sphi %s929_s14, %s1067_s14   ;;  %s893_s13 = sphi %s927_s13, %s1066_s13   ;;  %s889_s12 = sphi %s925_s12, %s1065_s12   ;;  %s885_s11 = sphi %s923_s11, %s1064_s11   ;;  %s881_s10 = sphi %s921_s10, %s1063_s10   ;;  %s877_s9 = sphi %s919_s9, %s1062_s9  }
   0x5   : > { %p25_p0 = scmp.ge.s32.totalorder %s24_s16, 3  ;;  %p47_p1 = scmp.ne.s32.totalorder %s881_s10, %s877_s9 }
   0x6   : > { %p48_p2 = scmp.eq.s32.totalorder %s901_s15, 0  ;;  %s40_s21 = sadd.s32 1, %s881_s10 }
   0x7   : > { %s1069_s16 = smov (%p25_p0, %s24_s16), 0  ;;  %s1071_s17 = smov (!%p25_p0, %s31_s17), %s897_s14 }
   0x8   : > { %p49_p3 = por %p48_p2, %p47_p1  ;;  %p33_p4 = scmp.ge.s32.totalorder %s1071_s17, 2 }
   0x9   : > { %s36_s18 = ssub.s32 %s893_s13, %s1069_s16  ;;  %p636_p6 = scmp.ge.s32.totalorder %s901_s15, 6 }
   0xa   : > { %s1073_s17 = smov (%p33_p4, %s1071_s17), 0 }
   0xb   : > { %s35_s19 = ssub.s32 %s897_s14, %s1073_s17  ;;  %129 = sbr.rel (%p636_p6) target bundleno = 29 (0x1d), region = 16 }
   0xc   : > { %s37_s20 = sor.u32 %s36_s18, %s35_s19 }
   0xd   : > { %p38_p5 = scmp.eq.s32.totalorder %s37_s20, 0 }
   0xf   : > { %s970_s22 = scalar_select %p38_p5, %s881_s10, %s40_s21  }
  0x10   : > { %132 = sbr.rel (!%p49_p3) target bundleno = 29 (0x1d), region = 20  ;;  %s134_s23 = sand.u32 (%p49_p3), 1, %s881_s10  }
  0x11   : > { %s138_s24 = smul.u32 (%p49_p3), 3, %s893_s13 }
  0x12   : > { %s787_s25 = smul.u32 (%p49_p3), 24, %s134_s23 }
  0x13   : > { %s788_s26 = smul.u32 (%p49_p3), 18, %s897_s14 }
  0x14   : > { %s136_s4 = scalar_lea.vmem (%p49_p3), [#allocation2], %s787_s25 }
  0x15   : > { %s140_s27 = sadd.s32 %s788_s26, %s138_s24 }
  0x16   : > { %s639_s28 = sshll.u32 %s140_s27, 2 }
  0x17   : > { %s142_s3 = scalar_lea.vmem %s1059_s0, %s639_s28 }
  0x18   : > { %v157_v0 = vld [vmem:[%s142_s3] sm:$0xff]  ;;  %v640_v2 = vld [vmem:[%s142_s3 + $0x8] sm:$0xf]  ;;  %v642_v3 = vld [vmem:[%s142_s3 + $0x2c] sm:$0xf] }
  0x19   : > { %v159_v1 = vld [vmem:[%s142_s3 + $0x24] sm:$0xff]  ;;  %158 = vst [vmem:[%s136_s4] sm:$0xff] %v157_v0 }
  0x1a   : > { %160 = vst [vmem:[%s136_s4 + $0xc] sm:$0xff] %v159_v1 }
  0x1b   : > { %641 = vst [vmem:[%s136_s4 + $0x8] sm:$0xf] %v640_v2 }
  0x1c   : > { %643 = vst [vmem:[%s136_s4 + $0x14] sm:$0xf] %v642_v3 }
  0x1d PF: > { %p644_p7 = scmp.ge.s32.totalorder %s901_s15, 1  ;;  %p189_p8 = scmp.lt.s32.totalorder %s901_s15, 7 }
  0x1f   : > { %p190_p9 = pnand %p644_p7, %p189_p8 }
  0x20   : > { %s196_s5 = sand.u32 (!%p190_p9), 1, %s877_s9   ;;  %s230_s6 = smul.u32 (!%p190_p9), 48, %s885_s11 }
  0x21   : > { %193 = sbr.rel (%p190_p9) target bundleno = 238 (0xee), region = 50  ;;  %s646_s8 = sshll.u32 (!%p190_p9), %s889_s12, 1 }
  0x22   : > { %s789_s7 = smul.u32 (!%p190_p9), 24, %s196_s5  ;;  %p231_p10 = scmp.lt.s32.totalorder (!%p190_p9), %s230_s6, 143 }
  0x23   : > { %p240_p11 = scmp.lt.s32.totalorder (!%p190_p9), %s646_s8, 3  ;;  %p648_p12 = scmp.ne.s32.totalorder (!%p190_p9), %s885_s11, 0 }
  0x24   : > { %s994_s9 = scalar_lea.vmem (!%p190_p9), [#allocation2], %s789_s7 }
  0x26   : > { %s1075_s6 = smov (!%p231_p10, %s230_s6), 143  ;;  %s1077_s8 = smov (!%p240_p11, %s646_s8), 3 }
  0x27   : > { %s645_s18 = sshll.u32 %s1075_s6, 2  ;;  %s647_s23 = sshll.u32 %s1077_s8, 3 }
  0x28   : > { %s987_s21 = scalar_lea.vmem %s1060_s1, %s645_s18  ;;  %s992_s26 = scalar_lea.vmem %s1061_s2, %s647_s23 }
  0x29   : > { %251 = sbr.rel (%p648_p12) target bundleno = 49 (0x31), region = 58 }
  0x2e   : > { %v903_v4 = vmov 0.0  }
  0x2f   : > { %252 = vst [vmem:[%s992_s26] sm:$0xff] %v903_v4 }
  0x30   : > { %253 = vst [vmem:[%s992_s26 + $0x8] sm:$0xff] %v903_v4 }
  0x31 PF: > { %v770_v5 = vld [vmem:[%s987_s21 + $0x38] sm:$0xff]  ;;  %v769_v8 = vld [vmem:[%s987_s21 + $0x30] sm:$0xff]  ;;  %v768_v11 = vld [vmem:[%s987_s21 + $0x28] sm:$0xff]  ;;  %p757_p13 = scmp.ne.s32.totalorder %s885_s11, 2 }
  0x32   : > { %v778_v6 = vld [vmem:[%s987_s21 + $0x78] sm:$0xff]  ;;  %468 = vmatpush.bf16.msra.mxu0 %v770_v5  ;;  %v777_v9 = vld [vmem:[%s987_s21 + $0x70] sm:$0xff]  ;;  %v776_v12 = vld [vmem:[%s987_s21 + $0x68] sm:$0xff] }
  0x33   : > { %v786_v7 = vld [vmem:[%s987_s21 + $0xb8] sm:$0xff]  ;;  %482 = vmatpush.bf16.msra.mxu1 %v778_v6  ;;  %v785_v10 = vld [vmem:[%s987_s21 + $0xb0] sm:$0xff]  ;;  %v784_v13 = vld [vmem:[%s987_s21 + $0xa8] sm:$0xff] }
  0x34   : > { %496 = vmatpush.bf16.msra.mxu2 %v786_v7  ;;  %v767_v14 = vld [vmem:[%s987_s21 + $0x20] sm:$0xff]  ;;  %v766_v17 = vld [vmem:[%s987_s21 + $0x18] sm:$0xff]  ;;  %v765_v20 = vld [vmem:[%s987_s21 + $0x10] sm:$0xff] }
  0x35   : > { %v775_v15 = vld [vmem:[%s987_s21 + $0x60] sm:$0xff]  ;;  %v774_v18 = vld [vmem:[%s987_s21 + $0x58] sm:$0xff]  ;;  %v773_v21 = vld [vmem:[%s987_s21 + $0x50] sm:$0xff] }
  0x36   : > { %469 = vmatpush.bf16.msra.mxu0 %v769_v8  ;;  %v783_v16 = vld [vmem:[%s987_s21 + $0xa0] sm:$0xff]  ;;  %v782_v19 = vld [vmem:[%s987_s21 + $0x98] sm:$0xff]  ;;  %v781_v22 = vld [vmem:[%s987_s21 + $0x90] sm:$0xff] }
  0x37   : > { %483 = vmatpush.bf16.msra.mxu1 %v777_v9  ;;  %v764_v23 = vld [vmem:[%s987_s21 + $0x8] sm:$0xff]  ;;  %v763_v26 = vld [vmem:[%s987_s21] sm:$0xff] }
  0x38   : > { %497 = vmatpush.bf16.msra.mxu2 %v785_v10  ;;  %v772_v24 = vld [vmem:[%s987_s21 + $0x48] sm:$0xff]  ;;  %v771_v27 = vld [vmem:[%s987_s21 + $0x40] sm:$0xff] }
  0x39   : > { %v780_v25 = vld [vmem:[%s987_s21 + $0x88] sm:$0xff]  ;;  %v651_v28 = vld [vmem:[%s994_s9] sm:$0xf]  ;;  %v760_v30 = vld [vmem:[%s994_s9 + $0x4] sm:$0xf] }
  0x3a   : > { %470 = vmatpush.bf16.msra.mxu0 %v768_v11  ;;  %v761_v29 = vld [vmem:[%s994_s9 + $0x8] sm:$0xf0]  ;;  %v653_v31 = vld [vmem:[%s994_s9 + $0xc] sm:$0xf0]  ;;  %v659_v33 = vld [vmem:[%s994_s9 + $0x8] sm:$0xf] }
  0x3b   : > { %484 = vmatpush.bf16.msra.mxu1 %v776_v12  ;;  %v779_v32 = vld [vmem:[%s987_s21 + $0x80] sm:$0xff]  ;;  %v762_v34 = vld [vmem:[%s994_s9 + $0x10] sm:$0xf0]  ;;  %v652_v35 = vor.u32 %v761_v29, %v651_v28  ;;  %v656_v36 = vor.u32 %v760_v30, %v653_v31 }
  0x3c   : > { %498 = vmatpush.bf16.msra.mxu2 %v784_v13  ;;  %v660_v37 = vor.u32 %v762_v34, %v659_v33  ;;  %v254_v41 = vld [vmem:[%s992_s26] sm:$0xff]  ;;  %v255_v44 = vld [vmem:[%s992_s26 + $0x8] sm:$0xff] }
  0x3e   : > { %471 = vmatpush.bf16.msra.mxu0 %v767_v14 }
  0x3f   : > { %485 = vmatpush.bf16.msra.mxu1 %v775_v15 }
  0x40   : > { %499 = vmatpush.bf16.msra.mxu2 %v783_v16 }
  0x42   : > { %472 = vmatpush.bf16.msra.mxu0 %v766_v17 }
  0x43   : > { %486 = vmatpush.bf16.msra.mxu1 %v774_v18 }
  0x44   : > { %500 = vmatpush.bf16.msra.mxu2 %v782_v19 }
  0x46   : > { %473 = vmatpush.bf16.msra.mxu0 %v765_v20 }
  0x47   : > { %487 = vmatpush.bf16.msra.mxu1 %v773_v21 }
  0x48   : > { %501 = vmatpush.bf16.msra.mxu2 %v781_v22 }
  0x4a   : > { %474 = vmatpush.bf16.msra.mxu0 %v764_v23 }
  0x4b   : > { %488 = vmatpush.bf16.msra.mxu1 %v772_v24 }
  0x4c   : > { %502 = vmatpush.bf16.msra.mxu2 %v780_v25 }
  0x4e   : > { %475 = vmatpush.bf16.msra.mxu0 %v763_v26 }
  0x4f   : > { %489 = vmatpush.bf16.msra.mxu1 %v771_v27 }
  0x50   : > { %503 = vmatpush.bf16.msra.mxu2 %v779_v32 }
  0x51   : > { %476 = vmatmul.bf16.vlgmr.msra.gmra.mxu0 %v652_v35 }
  0x52   : > { %490 = vmatmul.bf16.vlgmr.msra.gmra.mxu1 %v656_v36 }
  0x53   : > { %504 = vmatmul.bf16.vlgmr.msra.gmra.mxu2 %v660_v37 }
  0xce   : > { %v477_v38 = vpop.f32.mrf.mxu0 }
  0xcf   : > { %v491_v39 = vpop.f32.mrf.mxu1 }
  0xd0   : > { %v492_v40 = vadd.f32 %v491_v39, %v477_v38 }
  0xd6   : > { %v505_v42 = vpop.f32.mrf.mxu2  ;;  %v479_v46 = vpop.f32.mrf.mxu0 }
  0xd7   : > { %v506_v43 = vadd.f32 %v505_v42, %v492_v40  ;;  %v493_v47 = vpop.f32.mrf.mxu1 }
  0xd8   : > { %v494_v48 = vadd.f32 %v493_v47, %v479_v46 }
  0xd9   : > { %v510_v45 = vadd.f32 %v506_v43, %v254_v41 }
  0xdb   : > { %512 = vst [vmem:[%s992_s26] sm:$0xff] %v510_v45 }
  0xde   : > { %v507_v49 = vpop.f32.mrf.mxu2 }
  0xdf   : > { %v508_v50 = vadd.f32 %v507_v49, %v494_v48  ;;  %517 = sbr.rel (%p757_p13) target bundleno = 238 (0xee), region = 62 }
  0xe1   : > { %v511_v51 = vadd.f32 %v508_v50, %v255_v44 }
  0xe3   : > { %513 = vst [vmem:[%s992_s26 + $0x8] sm:$0xff] %v511_v51 }
  0xe4   : > { %v518_v52 = vld [vmem:[%s992_s26] sm:$0xff] }
  0xe5   : > { %v520_v54 = vmax.f32 %v518_v52, 0.0 }
  0xe7   : > { %522 = vst [vmem:[%s992_s26] sm:$0xff] %v520_v54 }
  0xea   : > { %v519_v53 = vld [vmem:[%s992_s26 + $0x8] sm:$0xff] }
  0xeb   : > { %v521_v55 = vmax.f32 %v519_v53, 0.0 }
  0xed   : > { %523 = vst [vmem:[%s992_s26 + $0x8] sm:$0xff] %v521_v55 }
  0xee PF: > { %s12_s15 = sadd.s32 1, %s901_s15   ;;  %s1062_s9 = smov %s881_s10 }
  0xef   : > { %p9_p0 = scmp.ge.s32.totalorder %s12_s15, 8   ;;  %s1063_s10 = smov %s970_s22 }
  0xf0   : > { %s1064_s11 = smov %s893_s13  ;;  %s1065_s12 = smov %s897_s14 }
  0xf1   : > { %s1066_s13 = smov %s1069_s16  ;;  %s1067_s14 = smov %s1073_s17 }
  0xf2   :  { %11 = sbr.rel (!%p9_p0) target bundleno = 4 (0x4), region = 106 }

// kernel: forward.33
= control target key start
LH: loop header
LB: loop body
LE: loop exit
PB: predicated region body
PF: predicated region fallthrough
CT: control target
= control target key end

     0   :  { %s1238_s9 = smov 0   ;;  %s1240_s10 = smov 0   ;;  %s1546_s0 = inlined_call_operand.vmem [shape: bf16[16,1152], index: 0, kind: input, shape index: {}]   ;;  %s1547_s1 = inlined_call_operand.vmem [shape: bf16[1152,256], index: 1, kind: input, shape index: {}]   ;;  %s1548_s2 = inlined_call_operand.vmem [shape: f32[16,256], index: 2, kind: output, shape index: {}]  }
   0x1   :  { %s1242_s11 = smov 0   ;;  %s1244_s12 = smov 0  }
   0x2   :  { %s1246_s13 = smov 0   ;;  %s1248_s14 = smov 0  }
   0x3   :  { %s1250_s15 = smov 0   ;;  %s1252_s16 = smov 0  }
   0x4   :  { %s1254_s17 = smov 0   ;;  %s1256_s18 = smov 0  }
   0x5   :  { %s1258_s19 = smov 0  }
   0x6 LB: > { %s885_s20 = sadd.s32 4294967295, %s1220_s19   ;;  %s24_s21 = sadd.s32 1, %s1212_s17  ;;  %s1220_s19 = sphi %s1258_s19, %s12_s19   ;;  %s1216_s18 = sphi %s1256_s18, %s1561_s18   ;;  %s1212_s17 = sphi %s1254_s17, %s1560_s17   ;;  %s1208_s16 = sphi %s1252_s16, %s1559_s16   ;;  %s1204_s15 = sphi %s1250_s15, %s1558_s15   ;;  %s1200_s14 = sphi %s1248_s14, %s1557_s14   ;;  %s1196_s13 = sphi %s1246_s13, %s1556_s13   ;;  %s1192_s12 = sphi %s1244_s12, %s1555_s12   ;;  %s1188_s11 = sphi %s1242_s11, %s1554_s11   ;;  %s1184_s10 = sphi %s1240_s10, %s1553_s10   ;;  %s1180_s9 = sphi %s1238_s9, %s1552_s9  }
   0x7   : > { %p25_p0 = scmp.ge.s32.totalorder %s24_s21, 3  ;;  %s27_s22 = sadd.s32 1, %s1216_s18 }
   0x8   : > { %s40_s23 = sadd.s32 1, %s1200_s14  ;;  %p47_p1 = scmp.ne.s32.totalorder %s1200_s14, %s1196_s13 }
   0x9   : > { %s1563_s21 = smov (%p25_p0, %s24_s21), 0  ;;  %s1565_s22 = smov (!%p25_p0, %s27_s22), %s1216_s18 }
   0xa   : > { %s36_s24 = ssub.s32 %s1212_s17, %s1563_s21  ;;  %p48_p2 = scmp.eq.s32.totalorder %s1220_s19, 0 }
   0xb   : > { %p29_p3 = scmp.ge.s32.totalorder %s1565_s22, 2  ;;  %p38_p4 = scmp.eq.s32.totalorder %s36_s24, 0 }
   0xc   : > { %p1305_p5 = por %p48_p2, %p47_p1  ;;  %s68_s26 = sadd.s32 1, %s1192_s12 }
   0xd   : > { %s1567_s22 = smov (%p29_p3, %s1565_s22), 0  ;;  %p75_p6 = scmp.ne.s32.totalorder %s1192_s12, %s1188_s11 }
   0xe   : > { %s1313_s27 = scalar_select %p38_p4, %s1200_s14, %s40_s23  }
   0xf   : > { %s64_s28 = ssub.s32 %s1216_s18, %s1567_s22  ;;  %p1319_p9 = por %p75_p6, %p48_p2 }
  0x10   : > { %s65_s29 = sor.u32 %s64_s28, %s36_s24  ;;  %p94_p7 = scmp.eq.s32.totalorder %s64_s28, 0 }
  0x11   : > { %p66_p8 = scmp.eq.s32.totalorder %s65_s29, 0  ;;  %s96_s3 = sadd.s32 1, %s1184_s10 }
  0x12   : > { %p106_p10 = scmp.ne.s32.totalorder %s1184_s10, %s1180_s9  ;;  %p107_p11 = scmp.eq.s32.totalorder %s885_s20, 5 }
  0x13   : > { %s1327_s4 = scalar_select %p66_p8, %s1192_s12, %s68_s26  }
  0x14   : > { %s1330_s5 = scalar_select %p94_p7, %s1184_s10, %s96_s3  }
  0x15   : > { %p1332_p12 = por %p107_p11, %p106_p10  ;;  %p888_p13 = scmp.ge.s32.totalorder %s1220_s19, 6 }
  0x17   : > { %129 = sbr.rel (%p888_p13) target bundleno = 92 (0x5c), region = 16 }
  0x1c   : > { %132 = sbr.rel (!%p1305_p5) target bundleno = 37 (0x25), region = 20  ;;  %s134_s7 = sand.u32 (%p1305_p5), 1, %s1200_s14  }
  0x1d   : > { %s1012_s8 = smul.u32 (%p1305_p5), 12, %s1212_s17 }
  0x1e   : > { %s1041_s23 = smul.u32 (%p1305_p5), 24, %s134_s7 }
  0x1f   : > { %s142_s28 = scalar_lea.vmem (%p1305_p5), %s1546_s0, %s1012_s8 }
  0x20   : > { %v157_v0 = vld [vmem:[%s142_s28] sm:$0xff] (%p1305_p5)  ;;  %v890_v2 = vld [vmem:[%s142_s28 + $0x8] sm:$0xf] (%p1305_p5)  ;;  %s136_s20 = scalar_lea.vmem (%p1305_p5), [#allocation2], %s1041_s23  ;;  %v892_v3 = vld [vmem:[%s142_s28 + $0x2c] sm:$0xf] (%p1305_p5) }
  0x21   : > { %v159_v1 = vld [vmem:[%s142_s28 + $0x24] sm:$0xff]  ;;  %158 = vst [vmem:[%s136_s20] sm:$0xff] %v157_v0 }
  0x22   : > { %160 = vst [vmem:[%s136_s20 + $0xc] sm:$0xff] %v159_v1 }
  0x23   : > { %891 = vst [vmem:[%s136_s20 + $0x8] sm:$0xf] %v890_v2 }
  0x24   : > { %893 = vst [vmem:[%s136_s20 + $0x14] sm:$0xf] %v892_v3 }
  0x25 PF: > { %178 = sbr.rel (!%p1319_p9) target bundleno = 92 (0x5c), region = 46  ;;  %s180_s25 = sand.u32 (%p1319_p9), 1, %s1192_s12  }
  0x26   : > { %s1013_s29 = smul.u32 (%p1319_p9), 96, %s1212_s17 }
  0x27   : > { %s1042_s3 = smul.u32 (%p1319_p9), 192, %s180_s25 }
  0x28   : > { %s185_s7 = sadd.s32 (%p1319_p9), %s1216_s18, %s1013_s29 }
  0x29   : > { %s895_s8 = sshll.u32 (%p1319_p9), %s185_s7, 2  ;;  %s1357_s30 = scalar_lea.vmem (%p1319_p9), [#allocation3], %s1042_s3 }
  0x2a   : > { %s1352_s23 = scalar_lea.vmem %s1547_s1, %s895_s8 }
  0x2b   : > { %v204_v4 = vld [vmem:[%s1352_s23] sm:$0xf]  ;;  %v206_v5 = vld [vmem:[%s1352_s23 + $0x8] sm:$0xf]  ;;  %v208_v6 = vld [vmem:[%s1352_s23 + $0x10] sm:$0xf] }
  0x2c   : > { %205 = vst [vmem:[%s1357_s30] sm:$0xf] %v204_v4  ;;  %v210_v7 = vld [vmem:[%s1352_s23 + $0x18] sm:$0xf]  ;;  %v212_v8 = vld [vmem:[%s1352_s23 + $0x20] sm:$0xf] }
  0x2d   : > { %207 = vst [vmem:[%s1357_s30 + $0x4] sm:$0xf] %v206_v5  ;;  %v214_v9 = vld [vmem:[%s1352_s23 + $0x28] sm:$0xf]  ;;  %v216_v10 = vld [vmem:[%s1352_s23 + $0x30] sm:$0xf] }
  0x2e   : > { %209 = vst [vmem:[%s1357_s30 + $0x8] sm:$0xf] %v208_v6  ;;  %v218_v11 = vld [vmem:[%s1352_s23 + $0x38] sm:$0xf]  ;;  %v220_v12 = vld [vmem:[%s1352_s23 + $0x40] sm:$0xf] }
  0x2f   : > { %211 = vst [vmem:[%s1357_s30 + $0xc] sm:$0xf] %v210_v7  ;;  %v222_v13 = vld [vmem:[%s1352_s23 + $0x48] sm:$0xf]  ;;  %v224_v14 = vld [vmem:[%s1352_s23 + $0x50] sm:$0xf] }
  0x30   : > { %213 = vst [vmem:[%s1357_s30 + $0x10] sm:$0xf] %v212_v8  ;;  %v226_v15 = vld [vmem:[%s1352_s23 + $0x58] sm:$0xf]  ;;  %v228_v16 = vld [vmem:[%s1352_s23 + $0x60] sm:$0xf] }
  0x31   : > { %215 = vst [vmem:[%s1357_s30 + $0x14] sm:$0xf] %v214_v9  ;;  %v230_v17 = vld [vmem:[%s1352_s23 + $0x68] sm:$0xf]  ;;  %v232_v18 = vld [vmem:[%s1352_s23 + $0x70] sm:$0xf] }
  0x32   : > { %217 = vst [vmem:[%s1357_s30 + $0x18] sm:$0xf] %v216_v10  ;;  %v234_v19 = vld [vmem:[%s1352_s23 + $0x78] sm:$0xf]  ;;  %v236_v20 = vld [vmem:[%s1352_s23 + $0x80] sm:$0xf] }
  0x33   : > { %219 = vst [vmem:[%s1357_s30 + $0x1c] sm:$0xf] %v218_v11  ;;  %v238_v21 = vld [vmem:[%s1352_s23 + $0x88] sm:$0xf]  ;;  %v240_v22 = vld [vmem:[%s1352_s23 + $0x90] sm:$0xf] }
  0x34   : > { %221 = vst [vmem:[%s1357_s30 + $0x20] sm:$0xf] %v220_v12  ;;  %v242_v23 = vld [vmem:[%s1352_s23 + $0x98] sm:$0xf]  ;;  %v244_v24 = vld [vmem:[%s1352_s23 + $0xa0] sm:$0xf] }
  0x35   : > { %223 = vst [vmem:[%s1357_s30 + $0x24] sm:$0xf] %v222_v13  ;;  %v246_v25 = vld [vmem:[%s1352_s23 + $0xa8] sm:$0xf]  ;;  %v248_v26 = vld [vmem:[%s1352_s23 + $0xb0] sm:$0xf] }
  0x36   : > { %225 = vst [vmem:[%s1357_s30 + $0x28] sm:$0xf] %v224_v14  ;;  %v250_v27 = vld [vmem:[%s1352_s23 + $0xb8] sm:$0xf]  ;;  %v252_v28 = vld [vmem:[%s1352_s23 + $0xc0] sm:$0xf] }
  0x37   : > { %227 = vst [vmem:[%s1357_s30 + $0x2c] sm:$0xf] %v226_v15  ;;  %v254_v29 = vld [vmem:[%s1352_s23 + $0xc8] sm:$0xf]  ;;  %v256_v30 = vld [vmem:[%s1352_s23 + $0xd0] sm:$0xf] }
  0x38   : > { %229 = vst [vmem:[%s1357_s30 + $0x30] sm:$0xf] %v228_v16  ;;  %v258_v31 = vld [vmem:[%s1352_s23 + $0xd8] sm:$0xf]  ;;  %v260_v32 = vld [vmem:[%s1352_s23 + $0xe0] sm:$0xf] }
  0x39   : > { %231 = vst [vmem:[%s1357_s30 + $0x34] sm:$0xf] %v230_v17  ;;  %v262_v33 = vld [vmem:[%s1352_s23 + $0xe8] sm:$0xf]  ;;  %v264_v34 = vld [vmem:[%s1352_s23 + $0xf0] sm:$0xf] }
  0x3a   : > { %233 = vst [vmem:[%s1357_s30 + $0x38] sm:$0xf] %v232_v18  ;;  %v266_v35 = vld [vmem:[%s1352_s23 + $0xf8] sm:$0xf]  ;;  %v268_v36 = vld [vmem:[%s1352_s23 + $0x100] sm:$0xf] }
  0x3b   : > { %235 = vst [vmem:[%s1357_s30 + $0x3c] sm:$0xf] %v234_v19  ;;  %v270_v37 = vld [vmem:[%s1352_s23 + $0x108] sm:$0xf]  ;;  %v272_v38 = vld [vmem:[%s1352_s23 + $0x110] sm:$0xf] }
  0x3c   : > { %237 = vst [vmem:[%s1357_s30 + $0x40] sm:$0xf] %v236_v20  ;;  %v274_v39 = vld [vmem:[%s1352_s23 + $0x118] sm:$0xf]  ;;  %v276_v40 = vld [vmem:[%s1352_s23 + $0x120] sm:$0xf] }
  0x3d   : > { %239 = vst [vmem:[%s1357_s30 + $0x44] sm:$0xf] %v238_v21  ;;  %v278_v41 = vld [vmem:[%s1352_s23 + $0x128] sm:$0xf]  ;;  %v280_v42 = vld [vmem:[%s1352_s23 + $0x130] sm:$0xf] }
  0x3e   : > { %241 = vst [vmem:[%s1357_s30 + $0x48] sm:$0xf] %v240_v22  ;;  %v282_v43 = vld [vmem:[%s1352_s23 + $0x138] sm:$0xf]  ;;  %v284_v44 = vld [vmem:[%s1352_s23 + $0x140] sm:$0xf] }
  0x3f   : > { %243 = vst [vmem:[%s1357_s30 + $0x4c] sm:$0xf] %v242_v23  ;;  %v286_v45 = vld [vmem:[%s1352_s23 + $0x148] sm:$0xf]  ;;  %v288_v46 = vld [vmem:[%s1352_s23 + $0x150] sm:$0xf] }
  0x40   : > { %245 = vst [vmem:[%s1357_s30 + $0x50] sm:$0xf] %v244_v24  ;;  %v290_v47 = vld [vmem:[%s1352_s23 + $0x158] sm:$0xf]  ;;  %v292_v48 = vld [vmem:[%s1352_s23 + $0x160] sm:$0xf] }
  0x41   : > { %247 = vst [vmem:[%s1357_s30 + $0x54] sm:$0xf] %v246_v25  ;;  %v294_v49 = vld [vmem:[%s1352_s23 + $0x168] sm:$0xf]  ;;  %v296_v50 = vld [vmem:[%s1352_s23 + $0x170] sm:$0xf] }
  0x42   : > { %249 = vst [vmem:[%s1357_s30 + $0x58] sm:$0xf] %v248_v26  ;;  %v298_v51 = vld [vmem:[%s1352_s23 + $0x178] sm:$0xf] }
  0x43   : > { %251 = vst [vmem:[%s1357_s30 + $0x5c] sm:$0xf] %v250_v27 }
  0x44   : > { %253 = vst [vmem:[%s1357_s30 + $0x60] sm:$0xf] %v252_v28 }
  0x45   : > { %255 = vst [vmem:[%s1357_s30 + $0x64] sm:$0xf] %v254_v29 }
  0x46   : > { %257 = vst [vmem:[%s1357_s30 + $0x68] sm:$0xf] %v256_v30 }
  0x47   : > { %259 = vst [vmem:[%s1357_s30 + $0x6c] sm:$0xf] %v258_v31 }
  0x48   : > { %261 = vst [vmem:[%s1357_s30 + $0x70] sm:$0xf] %v260_v32 }
  0x49   : > { %263 = vst [vmem:[%s1357_s30 + $0x74] sm:$0xf] %v262_v33 }
  0x4a   : > { %265 = vst [vmem:[%s1357_s30 + $0x78] sm:$0xf] %v264_v34 }
  0x4b   : > { %267 = vst [vmem:[%s1357_s30 + $0x7c] sm:$0xf] %v266_v35 }
  0x4c   : > { %269 = vst [vmem:[%s1357_s30 + $0x80] sm:$0xf] %v268_v36 }
  0x4d   : > { %271 = vst [vmem:[%s1357_s30 + $0x84] sm:$0xf] %v270_v37 }
  0x4e   : > { %273 = vst [vmem:[%s1357_s30 + $0x88] sm:$0xf] %v272_v38 }
  0x4f   : > { %275 = vst [vmem:[%s1357_s30 + $0x8c] sm:$0xf] %v274_v39 }
  0x50   : > { %277 = vst [vmem:[%s1357_s30 + $0x90] sm:$0xf] %v276_v40 }
  0x51   : > { %279 = vst [vmem:[%s1357_s30 + $0x94] sm:$0xf] %v278_v41 }
  0x52   : > { %281 = vst [vmem:[%s1357_s30 + $0x98] sm:$0xf] %v280_v42 }
  0x53   : > { %283 = vst [vmem:[%s1357_s30 + $0x9c] sm:$0xf] %v282_v43 }
  0x54   : > { %285 = vst [vmem:[%s1357_s30 + $0xa0] sm:$0xf] %v284_v44 }
  0x55   : > { %287 = vst [vmem:[%s1357_s30 + $0xa4] sm:$0xf] %v286_v45 }
  0x56   : > { %289 = vst [vmem:[%s1357_s30 + $0xa8] sm:$0xf] %v288_v46 }
  0x57   : > { %291 = vst [vmem:[%s1357_s30 + $0xac] sm:$0xf] %v290_v47 }
  0x58   : > { %293 = vst [vmem:[%s1357_s30 + $0xb0] sm:$0xf] %v292_v48 }
  0x59   : > { %295 = vst [vmem:[%s1357_s30 + $0xb4] sm:$0xf] %v294_v49 }
  0x5a   : > { %297 = vst [vmem:[%s1357_s30 + $0xb8] sm:$0xf] %v296_v50 }
  0x5b   : > { %299 = vst [vmem:[%s1357_s30 + $0xbc] sm:$0xf] %v298_v51 }
  0x5c PF: > { %p896_p0 = scmp.ge.s32.totalorder %s1220_s19, 1  ;;  %p418_p1 = scmp.lt.s32.totalorder %s1220_s19, 7 }
  0x5e   : > { %p419_p2 = pnand %p896_p0, %p418_p1 }
  0x5f   : > { %s425_s28 = sand.u32 (!%p419_p2), 1, %s1196_s13   ;;  %s432_s20 = sand.u32 (!%p419_p2), 1, %s1188_s11  }
  0x60   : > { %422 = sbr.rel (%p419_p2) target bundleno = 306 (0x132), region = 87  ;;  %s453_s29 = sand.u32 (!%p419_p2), 1, %s1180_s9  }
  0x61   : > { %s1043_s25 = smul.u32 (!%p419_p2), 24, %s425_s28  ;;  %s897_s7 = sshll.u32 (!%p419_p2), %s453_s29, 4 }
  0x62   : > { %s1044_s3 = smul.u32 (!%p419_p2), 192, %s432_s20  ;;  %s1461_s26 = scalar_lea.vmem (!%p419_p2), [#allocation4], %s897_s7 }
  0x63   : > { %s1457_s8 = scalar_lea.vmem (!%p419_p2), [#allocation2], %s1043_s25  ;;  %p898_p3 = scmp.ne.s32.totalorder (!%p419_p2), %s1204_s15, 0 }
  0x64   : > { %s1459_s24 = scalar_lea.vmem (!%p419_p2), [#allocation3], %s1044_s3 }
  0x65   : > { %463 = sbr.rel (%p898_p3) target bundleno = 109 (0x6d), region = 99 }
  0x6a   : > { %v1222_v52 = vmov 0.0  }
  0x6b   : > { %464 = vst [vmem:[%s1461_s26] sm:$0xff] %v1222_v52 }
  0x6c   : > { %465 = vst [vmem:[%s1461_s26 + $0x8] sm:$0xff] %v1222_v52 }
  0x6d PF: > { %v1024_v53 = vld [vmem:[%s1459_s24 + $0x38] sm:$0xff]  ;;  %v1023_v56 = vld [vmem:[%s1459_s24 + $0x30] sm:$0xff]  ;;  %v1022_v59 = vld [vmem:[%s1459_s24 + $0x28] sm:$0xff]  ;;  %p1007_p4 = scmp.ne.s32.totalorder %s1204_s15, 2 }
  0x6e   : > { %v1032_v54 = vld [vmem:[%s1459_s24 + $0x78] sm:$0xff]  ;;  %680 = vmatpush.bf16.msra.mxu0 %v1024_v53  ;;  %v1031_v57 = vld [vmem:[%s1459_s24 + $0x70] sm:$0xff]  ;;  %v1030_v60 = vld [vmem:[%s1459_s24 + $0x68] sm:$0xff] }
  0x6f   : > { %v1040_v55 = vld [vmem:[%s1459_s24 + $0xb8] sm:$0xff]  ;;  %694 = vmatpush.bf16.msra.mxu1 %v1032_v54  ;;  %v1039_v58 = vld [vmem:[%s1459_s24 + $0xb0] sm:$0xff]  ;;  %v1038_v61 = vld [vmem:[%s1459_s24 + $0xa8] sm:$0xff] }
  0x70   : > { %708 = vmatpush.bf16.msra.mxu2 %v1040_v55  ;;  %v1021_v62 = vld [vmem:[%s1459_s24 + $0x20] sm:$0xff]  ;;  %v1020_v1 = vld [vmem:[%s1459_s24 + $0x18] sm:$0xff]  ;;  %v1019_v4 = vld [vmem:[%s1459_s24 + $0x10] sm:$0xff] }
  0x71   : > { %v1029_v63 = vld [vmem:[%s1459_s24 + $0x60] sm:$0xff]  ;;  %v1028_v2 = vld [vmem:[%s1459_s24 + $0x58] sm:$0xff]  ;;  %v1027_v5 = vld [vmem:[%s1459_s24 + $0x50] sm:$0xff] }
  0x72   : > { %681 = vmatpush.bf16.msra.mxu0 %v1023_v56  ;;  %v1037_v0 = vld [vmem:[%s1459_s24 + $0xa0] sm:$0xff]  ;;  %v1036_v3 = vld [vmem:[%s1459_s24 + $0x98] sm:$0xff]  ;;  %v1035_v6 = vld [vmem:[%s1459_s24 + $0x90] sm:$0xff] }
  0x73   : > { %695 = vmatpush.bf16.msra.mxu1 %v1031_v57  ;;  %v1018_v7 = vld [vmem:[%s1459_s24 + $0x8] sm:$0xff]  ;;  %v1017_v10 = vld [vmem:[%s1459_s24] sm:$0xff]  ;;  %v1015_v13 = vld [vmem:[%s1457_s8 + $0x8] sm:$0xf0] }
  0x74   : > { %709 = vmatpush.bf16.msra.mxu2 %v1039_v58  ;;  %v1026_v8 = vld [vmem:[%s1459_s24 + $0x48] sm:$0xff]  ;;  %v1025_v11 = vld [vmem:[%s1459_s24 + $0x40] sm:$0xff]  ;;  %v909_v17 = vld [vmem:[%s1457_s8 + $0x8] sm:$0xf] }
  0x75   : > { %v1034_v9 = vld [vmem:[%s1459_s24 + $0x88] sm:$0xff]  ;;  %v903_v15 = vld [vmem:[%s1457_s8 + $0xc] sm:$0xf0]  ;;  %v1016_v18 = vld [vmem:[%s1457_s8 + $0x10] sm:$0xf0] }
  0x76   : > { %682 = vmatpush.bf16.msra.mxu0 %v1022_v59  ;;  %v901_v12 = vld [vmem:[%s1457_s8] sm:$0xf]  ;;  %v1014_v14 = vld [vmem:[%s1457_s8 + $0x4] sm:$0xf]  ;;  %v1033_v16 = vld [vmem:[%s1459_s24 + $0x80] sm:$0xff]  ;;  %v910_v21 = vor.u32 %v1016_v18, %v909_v17 }
  0x77   : > { %696 = vmatpush.bf16.msra.mxu1 %v1030_v60  ;;  %v902_v19 = vor.u32 %v1015_v13, %v901_v12  ;;  %v906_v20 = vor.u32 %v1014_v14, %v903_v15  ;;  %v466_v25 = vld [vmem:[%s1461_s26] sm:$0xff]  ;;  %v467_v32 = vld [vmem:[%s1461_s26 + $0x8] sm:$0xff] }
  0x78   : > { %710 = vmatpush.bf16.msra.mxu2 %v1038_v61 }
  0x7a   : > { %683 = vmatpush.bf16.msra.mxu0 %v1021_v62 }
  0x7b   : > { %697 = vmatpush.bf16.msra.mxu1 %v1029_v63 }
  0x7c   : > { %711 = vmatpush.bf16.msra.mxu2 %v1037_v0 }
  0x7e   : > { %684 = vmatpush.bf16.msra.mxu0 %v1020_v1 }
  0x7f   : > { %698 = vmatpush.bf16.msra.mxu1 %v1028_v2 }
  0x80   : > { %712 = vmatpush.bf16.msra.mxu2 %v1036_v3 }
  0x82   : > { %685 = vmatpush.bf16.msra.mxu0 %v1019_v4 }
  0x83   : > { %699 = vmatpush.bf16.msra.mxu1 %v1027_v5 }
  0x84   : > { %713 = vmatpush.bf16.msra.mxu2 %v1035_v6 }
  0x86   : > { %686 = vmatpush.bf16.msra.mxu0 %v1018_v7 }
  0x87   : > { %700 = vmatpush.bf16.msra.mxu1 %v1026_v8 }
  0x88   : > { %714 = vmatpush.bf16.msra.mxu2 %v1034_v9 }
  0x8a   : > { %687 = vmatpush.bf16.msra.mxu0 %v1017_v10 }
  0x8b   : > { %701 = vmatpush.bf16.msra.mxu1 %v1025_v11 }
  0x8c   : > { %715 = vmatpush.bf16.msra.mxu2 %v1033_v16 }
  0x8d   : > { %688 = vmatmul.bf16.vlgmr.msra.gmra.mxu0 %v902_v19 }
  0x8e   : > { %702 = vmatmul.bf16.vlgmr.msra.gmra.mxu1 %v906_v20 }
  0x8f   : > { %716 = vmatmul.bf16.vlgmr.msra.gmra.mxu2 %v910_v21 }
 0x10a   : > { %v689_v22 = vpop.f32.mrf.mxu0 }
 0x10b   : > { %v703_v23 = vpop.f32.mrf.mxu1 }
 0x10c   : > { %v704_v24 = vadd.f32 %v703_v23, %v689_v22 }
 0x112   : > { %v717_v26 = vpop.f32.mrf.mxu2  ;;  %v691_v29 = vpop.f32.mrf.mxu0 }
 0x113   : > { %v718_v27 = vadd.f32 %v717_v26, %v704_v24  ;;  %v705_v30 = vpop.f32.mrf.mxu1 }
 0x114   : > { %v706_v31 = vadd.f32 %v705_v30, %v691_v29 }
 0x115   : > { %v722_v28 = vadd.f32 %v718_v27, %v466_v25 }
 0x117   : > { %724 = vst [vmem:[%s1461_s26] sm:$0xff] %v722_v28 }
 0x11a   : > { %v719_v33 = vpop.f32.mrf.mxu2 }
 0x11b   : > { %v720_v34 = vadd.f32 %v719_v33, %v706_v31  ;;  %729 = sbr.rel (%p1007_p4) target bundleno = 298 (0x12a), region = 103 }
 0x11d   : > { %v723_v35 = vadd.f32 %v720_v34, %v467_v32 }
 0x11f   : > { %725 = vst [vmem:[%s1461_s26 + $0x8] sm:$0xff] %v723_v35 }
 0x120   : > { %v730_v36 = vld [vmem:[%s1461_s26] sm:$0xff] }
 0x121   : > { %v732_v38 = vmax.f32 %v730_v36, 0.0 }
 0x123   : > { %734 = vst [vmem:[%s1461_s26] sm:$0xff] %v732_v38 }
 0x126   : > { %v731_v37 = vld [vmem:[%s1461_s26 + $0x8] sm:$0xff] }
 0x127   : > { %v733_v39 = vmax.f32 %v731_v37, 0.0 }
 0x129   : > { %735 = vst [vmem:[%s1461_s26 + $0x8] sm:$0xff] %v733_v39 }
 0x12a PF: > { %742 = sbr.rel (!%p1332_p12) target bundleno = 306 (0x132), region = 107  ;;  %s1009_s9 = sshll.u32 (%p1332_p12), %s1208_s16, 3  ;;  %v778_v40 = vld [vmem:[%s1461_s26] sm:$0xff] (%p1332_p12) }
 0x12b   : > { %s747_s15 = scalar_lea.vmem (%p1332_p12), %s1548_s2, %s1009_s9 }
 0x12c   : > { %779 = vst [vmem:[%s747_s15] sm:$0xff] (%p1332_p12), %v778_v40 }
 0x130   : > { %v780_v41 = vld [vmem:[%s1461_s26 + $0x8] sm:$0xff] }
 0x131   : > { %781 = vst [vmem:[%s747_s15 + $0x10] sm:$0xff] %v780_v41 }
 0x132 PF: > { %s12_s19 = sadd.s32 1, %s1220_s19   ;;  %s1552_s9 = smov %s1184_s10 }
 0x133   : > { %p9_p5 = scmp.ge.s32.totalorder %s12_s19, 8   ;;  %s1553_s10 = smov %s1330_s5 }
 0x134   : > { %s1554_s11 = smov %s1192_s12  ;;  %s1555_s12 = smov %s1327_s4 }
 0x135   : > { %s1556_s13 = smov %s1200_s14  ;;  %s1557_s14 = smov %s1313_s27 }
 0x136   : > { %s1558_s15 = smov %s1212_s17  ;;  %s1559_s16 = smov %s1216_s18 }
 0x137   : > { %s1560_s17 = smov %s1563_s21  ;;  %s1561_s18 = smov %s1567_s22 }
 0x138   :  { %11 = sbr.rel (!%p9_p5) target bundleno = 6 (0x6), region = 190 }

// kernel: forward.34
= control target key start
LH: loop header
LB: loop body
LE: loop exit
PB: predicated region body
PF: predicated region fallthrough
CT: control target
= control target key end

     0   :  { %7 = vsyncpa [#allocation3], 0  ;;  %s783_s0 = inlined_call_operand.vmem [shape: bf16[16,128], index: 0, kind: input, shape index: {}]   ;;  %s784_s1 = inlined_call_operand.hbm [shape: bf16[128,256], index: 1, kind: input, shape index: {}]   ;;  %s785_s2 = inlined_call_operand.vmem [shape: f32[16,256], index: 2, kind: output, shape index: {}]  }
   0x1   :  { %9 = vsyncpa [#allocation3 + $0x1], 0  ;;  %s687_s9 = smov 0   ;;  %s689_s10 = smov 0  }
   0x2   :  { %s691_s11 = smov 0   ;;  %s693_s12 = smov 0  }
   0x3   :  { %s695_s13 = smov 0   ;;  %s697_s14 = smov 0  }
   0x4 LB: > { %s469_s15 = sadd.s32 4294967295, %s667_s14   ;;  %s30_s16 = sadd.s32 1, %s663_s13  ;;  %s667_s14 = sphi %s697_s14, %s15_s14   ;;  %s663_s13 = sphi %s695_s13, %s793_s13   ;;  %s659_s12 = sphi %s693_s12, %s792_s12   ;;  %s655_s11 = sphi %s691_s11, %s791_s11   ;;  %s651_s10 = sphi %s689_s10, %s790_s10   ;;  %s647_s9 = sphi %s687_s9, %s789_s9  }
   0x5   : > { %p32_p0 = scmp.ge.s32.totalorder %s30_s16, 2  ;;  %s71_s17 = sadd.s32 1, %s655_s11 }
   0x6   : > { %p78_p1 = scmp.ne.s32.totalorder %s655_s11, %s651_s10  ;;  %p79_p2 = scmp.eq.s32.totalorder %s667_s14, 0 }
   0x7   : > { %s795_s16 = smov (%p32_p0, %s30_s16), 0  ;;  %p84_p4 = scmp.ne.s32.totalorder %s651_s10, %s647_s9 }
   0x8   : > { %p723_p3 = por %p79_p2, %p78_p1  ;;  %s67_s19 = ssub.s32 %s663_s13, %s795_s16 }
   0x9   : > { %p85_p5 = scmp.eq.s32.totalorder %s469_s15, 0  ;;  %p69_p6 = scmp.eq.s32.totalorder %s67_s19, 0 }
   0xa   : > { %p110_p7 = scmp.eq.s32.totalorder %s469_s15, 1  ;;  %p534_p10 = scmp.lt.s32.totalorder %s667_s14, 2 }
   0xb   : > { %p730_p8 = por %p85_p5, %p84_p4  ;;  %s148_s23 = sand.u32 1, %s655_s11  }
   0xc   : > { %s735_s21 = scalar_select %p69_p6, %s655_s11, %s71_s17  }
   0xd   : > { %p737_p9 = por %p110_p7, %p78_p1  ;;  %s475_s24 = sshll.u32 %s663_s13, 2 }
   0xe   : > { %s474_s25 = sshll.u32 %s148_s23, 6  ;;  %s159_s28 = scalar_lea.hbm %s784_s1, %s475_s24 }
   0xf   : > { %s160_s29 = sshll.u32 %s159_s28, 4  ;;  %s152_s30 = scalar_lea.vmem [#allocation2], %s474_s25  ;;  %s161_s29 = int_to_ptr.hbm [resolvable:$true] %s160_s29 }
  0x10   : > { %s162_s3 = sshll.u32 %s152_s30, 4  ;;  %p531_p11 = pnand %p534_p10, %p723_p3  ;;  %s163_s3 = int_to_ptr.vmem [resolvable:$true] %s162_s3 }
  0x11   : > { %p476_p12 = scmp.ge.s32.totalorder %s667_s14, 1  ;;  %s149_s4 = scalar_lea.sflag [#allocation3], %s148_s23 }
  0x12   : > { %s669_s5 = smov 128   ;;  %s670_s6 = smov 64  }
  0x13   : > { %s671_s7 = smov 4   ;;  %p170_p13 = scmp.lt.s32.totalorder %s667_s14, 3 }
  0x14   : > { %533 = dma.hbm_to_vmem [thread:$0]  (!%p531_p11), %s161_s29, 1024, %s163_s3, %s149_s4, %s669_s5, %s670_s6, %s671_s7  }
  0x15   : > { %p171_p0 = pnand %p476_p12, %p170_p13 }
  0x16   : > { %s176_s8 = sand.u32 (!%p171_p0), 1, %s651_s10  }
  0x17   : > { %174 = sbr.rel (%p171_p0) target bundleno = 204 (0xcc), region = 28  ;;  %s477_s9 = sshll.u32 (!%p171_p0), %s176_s8, 6 }
  0x18   : > { %s177_s15 = scalar_lea.sflag (!%p171_p0), [#allocation3], %s176_s8  ;;  %s180_s17 = scalar_lea.vmem (!%p171_p0), [#allocation2], %s477_s9 }
  0x1c   : > { %642 = dma.done.wait (%p730_p8), %s177_s15, 1024  }
  0x1d   : > { %644 = vsyncadd (%p730_p8), %s177_s15, 4294966272  ;;  %v527_v0 = vld [vmem:[%s180_s17 + $0x38] sm:$0xff]  ;;  %v526_v1 = vld [vmem:[%s180_s17 + $0x30] sm:$0xff]  ;;  %s478_s20 = sshll.u32 %s176_s8, 4  ;;  %s516_s24 = sshll.u32 (%p737_p9), %s659_s12, 3 }
  0x1e   : > { %300 = vmatpush.bf16.msra.mxu0 %v527_v0  ;;  %v525_v2 = vld [vmem:[%s180_s17 + $0x28] sm:$0xff]  ;;  %v524_v3 = vld [vmem:[%s180_s17 + $0x20] sm:$0xff]  ;;  %v523_v4 = vld [vmem:[%s180_s17 + $0x18] sm:$0xff]  ;;  %s208_s23 = scalar_lea.vmem [#allocation4], %s478_s20  ;;  %s336_s27 = scalar_lea.vmem (%p737_p9), %s785_s2, %s516_s24 }
  0x1f   : > { %v522_v5 = vld [vmem:[%s180_s17 + $0x10] sm:$0xff]  ;;  %v521_v6 = vld [vmem:[%s180_s17 + $0x8] sm:$0xff]  ;;  %v520_v7 = vld [vmem:[%s180_s17] sm:$0xff] }
  0x20   : > { %v519_v8 = vld [vmem:[%s783_s0] sm:$0xff] }
  0x22   : > { %301 = vmatpush.bf16.msra.mxu0 %v526_v1 }
  0x26   : > { %302 = vmatpush.bf16.msra.mxu0 %v525_v2 }
  0x2a   : > { %303 = vmatpush.bf16.msra.mxu0 %v524_v3 }
  0x2e   : > { %304 = vmatpush.bf16.msra.mxu0 %v523_v4 }
  0x32   : > { %305 = vmatpush.bf16.msra.mxu0 %v522_v5 }
  0x36   : > { %306 = vmatpush.bf16.msra.mxu0 %v521_v6 }
  0x3a   : > { %307 = vmatpush.bf16.msra.mxu0 %v520_v7 }
  0x3d   : > { %308 = vmatmul.bf16.vlgmr.msra.gmra.mxu0 %v519_v8 }
  0xba   : > { %v309_v9 = vpop.f32.mrf.mxu0 }
  0xbb   : > { %323 = vst [vmem:[%s208_s23] sm:$0xff] %v309_v9 }
  0xbf   : > { %331 = sbr.rel (!%p737_p9) target bundleno = 204 (0xcc), region = 44 }
  0xc2   : > { %v311_v10 = vpop.f32.mrf.mxu0  ;;  %v367_v11 = vld [vmem:[%s208_s23] sm:$0xff] (%p737_p9) }
  0xc3   : > { %324 = vst [vmem:[%s208_s23 + $0x8] sm:$0xff] %v311_v10 }
  0xc4   : > { %368 = vst [vmem:[%s336_s27] sm:$0xff] %v367_v11 }
  0xca   : > { %v369_v12 = vld [vmem:[%s208_s23 + $0x8] sm:$0xff] }
  0xcb   : > { %370 = vst [vmem:[%s336_s27 + $0x10] sm:$0xff] %v369_v12 }
  0xcc PF: > { %s15_s14 = sadd.s32 1, %s667_s14   ;;  %s789_s9 = smov %s651_s10 }
  0xcd   : > { %p12_p1 = scmp.ge.s32.totalorder %s15_s14, 4   ;;  %s790_s10 = smov %s655_s11 }
  0xce   : > { %s791_s11 = smov %s735_s21  ;;  %s792_s12 = smov %s663_s13 }
  0xcf   : > { %s793_s13 = smov %s795_s16  ;;  %14 = sbr.rel (!%p12_p1) target bundleno = 4 (0x4), region = 117 }
  0xd4   :  { %386 = vsyncpa [#allocation3], 1 }
  0xd5   :  { %388 = vsyncpa [#allocation3 + $0x1], 1 }

// kernel: forward.35
= control target key start
LH: loop header
LB: loop body
LE: loop exit
PB: predicated region body
PF: predicated region fallthrough
CT: control target
= control target key end

     0   :  { %s2384_s0 = inlined_call_operand.vmem [shape: bf16[16,2304], index: 0, kind: input, shape index: {}]   ;;  %s2385_s1 = inlined_call_operand.vmem [shape: bf16[2304,256], index: 1, kind: input, shape index: {}]   ;;  %s2386_s2 = inlined_call_operand.vmem [shape: f32[16,256], index: 2, kind: input, shape index: {}]   ;;  %s2387_s3 = inlined_call_operand.vmem [shape: f32[16,256], index: 3, kind: output, shape index: {}]  }
   0x1   :  { %2389 = sst [smem:[#allocation7_spill]] %s2384_s0 }
   0x2   :  { %s1925_s12 = smov 0   ;;  %s1927_s13 = smov 0  }
   0x3   :  { %s1929_s14 = smov 0   ;;  %s1931_s15 = smov 0  }
   0x4   :  { %s1933_s16 = smov 0   ;;  %s1935_s17 = smov 0  }
   0x5   :  { %s1937_s18 = smov 0   ;;  %s1939_s19 = smov 0  }
   0x6   :  { %s1941_s20 = smov 0   ;;  %s1943_s21 = smov 0  }
   0x7   :  { %s1945_s22 = smov 0  }
   0x8 LB: > { %s1433_s23 = sadd.s32 4294967295, %s1902_s22   ;;  %s25_s24 = sadd.s32 1, %s1894_s20  ;;  %s1902_s22 = sphi %s1945_s22, %s13_s22   ;;  %s1898_s21 = sphi %s1943_s21, %s2406_s21   ;;  %s1894_s20 = sphi %s1941_s20, %s2405_s20   ;;  %s1890_s19 = sphi %s1939_s19, %s2404_s19   ;;  %s1886_s18 = sphi %s1937_s18, %s2403_s18   ;;  %s1882_s17 = sphi %s1935_s17, %s2402_s17   ;;  %s1878_s16 = sphi %s1933_s16, %s2401_s16   ;;  %s1874_s15 = sphi %s1931_s15, %s2400_s15   ;;  %s1870_s14 = sphi %s1929_s14, %s2399_s14   ;;  %s1866_s13 = sphi %s1927_s13, %s2398_s13   ;;  %s1862_s12 = sphi %s1925_s12, %s2397_s12  }
   0x9   : > { %p26_p0 = scmp.ge.s32.totalorder %s25_s24, 3  ;;  %s28_s25 = sadd.s32 1, %s1898_s21 }
   0xa   : > { %s41_s26 = sadd.s32 1, %s1882_s17  ;;  %p48_p1 = scmp.ne.s32.totalorder %s1882_s17, %s1878_s16 }
   0xb   : > { %s2408_s24 = smov (%p26_p0, %s25_s24), 0  ;;  %s2410_s25 = smov (!%p26_p0, %s28_s25), %s1898_s21 }
   0xc   : > { %s37_s27 = ssub.s32 %s1894_s20, %s2408_s24  ;;  %p49_p2 = scmp.eq.s32.totalorder %s1902_s22, 0 }
   0xd   : > { %p30_p3 = scmp.ge.s32.totalorder %s2410_s25, 2  ;;  %p39_p4 = scmp.eq.s32.totalorder %s37_s27, 0 }
   0xe   : > { %p1994_p5 = por %p49_p2, %p48_p1  ;;  %s69_s29 = sadd.s32 1, %s1874_s15 }
   0xf   : > { %s2412_s25 = smov (%p30_p3, %s2410_s25), 0  ;;  %p76_p6 = scmp.ne.s32.totalorder %s1874_s15, %s1870_s14 }
  0x10   : > { %2391 = sst [smem:[#allocation6_spill]] %s2412_s25  ;;  %s65_s4 = ssub.s32 %s1898_s21, %s2412_s25 }
  0x11   : > { %s2002_s30 = scalar_select %p39_p4, %s1882_s17, %s41_s26  }
  0x12   : > { %s66_s5 = sor.u32 %s65_s4, %s37_s27  ;;  %p95_p7 = scmp.eq.s32.totalorder %s65_s4, 0 }
  0x13   : > { %p67_p8 = scmp.eq.s32.totalorder %s66_s5, 0  ;;  %p2010_p9 = por %p76_p6, %p49_p2 }
  0x14   : > { %s97_s7 = sadd.s32 1, %s1866_s13  ;;  %p104_p10 = scmp.ne.s32.totalorder %s1866_s13, %s1862_s12 }
  0x15   : > { %s2018_s8 = scalar_select %p67_p8, %s1874_s15, %s69_s29  }
  0x16   : > { %s2021_s9 = scalar_select %p95_p7, %s1866_s13, %s97_s7  }
  0x17   : > { %p2025_p11 = por %p104_p10, %p49_p2  ;;  %p136_p12 = scmp.eq.s32.totalorder %s1433_s23, 5 }
  0x18   : > { %p1436_p0 = scmp.ge.s32.totalorder %s1902_s22, 6 }
  0x19   : > { %p2029_p13 = por %p136_p12, %p104_p10 }
  0x1a   : > { %158 = sbr.rel (%p1436_p0) target bundleno = 155 (0x9b), region = 16 }
  0x1f   : > { %161 = sbr.rel (!%p1994_p5) target bundleno = 46 (0x2e), region = 20  ;;  %s163_s26 = sand.u32 (%p1994_p5), 1, %s1882_s17  }
  0x20   : > { %s1667_s27 = smul.u32 (%p1994_p5), 24, %s1894_s20  ;;  %s2395_s0 = sld [smem:[#allocation7_spill]] (%p1994_p5) }
  0x21   : > { %s1723_s29 = smul.u32 (%p1994_p5), 48, %s163_s26 }
  0x23   : > { %s165_s23 = scalar_lea.vmem (%p1994_p5), [#allocation2], %s1723_s29 }
  0x26   : > { %s171_s7 = scalar_lea.vmem %s2395_s0, %s1667_s27 }
  0x27   : > { %v184_v0 = vld [vmem:[%s171_s7] sm:$0xff]  ;;  %v186_v1 = vld [vmem:[%s171_s7 + $0x8] sm:$0xff]  ;;  %v188_v2 = vld [vmem:[%s171_s7 + $0x10] sm:$0xff] }
  0x28   : > { %185 = vst [vmem:[%s165_s23] sm:$0xff] %v184_v0  ;;  %v190_v3 = vld [vmem:[%s171_s7 + $0x48] sm:$0xff]  ;;  %v192_v4 = vld [vmem:[%s171_s7 + $0x50] sm:$0xff]  ;;  %v194_v5 = vld [vmem:[%s171_s7 + $0x58] sm:$0xff] }
  0x29   : > { %187 = vst [vmem:[%s165_s23 + $0x8] sm:$0xff] %v186_v1 }
  0x2a   : > { %189 = vst [vmem:[%s165_s23 + $0x10] sm:$0xff] %v188_v2 }
  0x2b   : > { %191 = vst [vmem:[%s165_s23 + $0x18] sm:$0xff] %v190_v3 }
  0x2c   : > { %193 = vst [vmem:[%s165_s23 + $0x20] sm:$0xff] %v192_v4 }
  0x2d   : > { %195 = vst [vmem:[%s165_s23 + $0x28] sm:$0xff] %v194_v5 }
  0x2e PF: > { %201 = sbr.rel (!%p2010_p9) target bundleno = 149 (0x95), region = 43  ;;  %s203_s28 = sand.u32 (%p2010_p9), 1, %s1874_s15  }
  0x2f   : > { %s1668_s26 = smul.u32 (%p2010_p9), 192, %s1894_s20 }
  0x30   : > { %s1724_s27 = smul.u32 (%p2010_p9), 384, %s203_s28 }
  0x31   : > { %s208_s29 = sadd.s32 (%p2010_p9), %s1898_s21, %s1668_s26 }
  0x32   : > { %s1439_s4 = sshll.u32 (%p2010_p9), %s208_s29, 2  ;;  %s2054_s6 = scalar_lea.vmem (%p2010_p9), [#allocation3], %s1724_s27 }
  0x33   : > { %s2049_s25 = scalar_lea.vmem %s2385_s1, %s1439_s4 }
  0x34   : > { %v227_v6 = vld [vmem:[%s2049_s25] sm:$0xf]  ;;  %v229_v7 = vld [vmem:[%s2049_s25 + $0x8] sm:$0xf]  ;;  %v231_v8 = vld [vmem:[%s2049_s25 + $0x10] sm:$0xf] }
  0x35   : > { %228 = vst [vmem:[%s2054_s6] sm:$0xf] %v227_v6  ;;  %v233_v9 = vld [vmem:[%s2049_s25 + $0x18] sm:$0xf]  ;;  %v235_v10 = vld [vmem:[%s2049_s25 + $0x20] sm:$0xf] }
  0x36   : > { %230 = vst [vmem:[%s2054_s6 + $0x4] sm:$0xf] %v229_v7  ;;  %v237_v11 = vld [vmem:[%s2049_s25 + $0x28] sm:$0xf]  ;;  %v239_v12 = vld [vmem:[%s2049_s25 + $0x30] sm:$0xf] }
  0x37   : > { %232 = vst [vmem:[%s2054_s6 + $0x8] sm:$0xf] %v231_v8  ;;  %v241_v13 = vld [vmem:[%s2049_s25 + $0x38] sm:$0xf]  ;;  %v243_v14 = vld [vmem:[%s2049_s25 + $0x40] sm:$0xf] }
  0x38   : > { %234 = vst [vmem:[%s2054_s6 + $0xc] sm:$0xf] %v233_v9  ;;  %v245_v15 = vld [vmem:[%s2049_s25 + $0x48] sm:$0xf]  ;;  %v247_v16 = vld [vmem:[%s2049_s25 + $0x50] sm:$0xf] }
  0x39   : > { %236 = vst [vmem:[%s2054_s6 + $0x10] sm:$0xf] %v235_v10  ;;  %v249_v17 = vld [vmem:[%s2049_s25 + $0x58] sm:$0xf]  ;;  %v251_v18 = vld [vmem:[%s2049_s25 + $0x60] sm:$0xf] }
  0x3a   : > { %238 = vst [vmem:[%s2054_s6 + $0x14] sm:$0xf] %v237_v11  ;;  %v253_v19 = vld [vmem:[%s2049_s25 + $0x68] sm:$0xf]  ;;  %v255_v20 = vld [vmem:[%s2049_s25 + $0x70] sm:$0xf] }
  0x3b   : > { %240 = vst [vmem:[%s2054_s6 + $0x18] sm:$0xf] %v239_v12  ;;  %v257_v21 = vld [vmem:[%s2049_s25 + $0x78] sm:$0xf]  ;;  %v259_v22 = vld [vmem:[%s2049_s25 + $0x80] sm:$0xf] }
  0x3c   : > { %242 = vst [vmem:[%s2054_s6 + $0x1c] sm:$0xf] %v241_v13  ;;  %v261_v23 = vld [vmem:[%s2049_s25 + $0x88] sm:$0xf]  ;;  %v263_v24 = vld [vmem:[%s2049_s25 + $0x90] sm:$0xf] }
  0x3d   : > { %244 = vst [vmem:[%s2054_s6 + $0x20] sm:$0xf] %v243_v14  ;;  %v265_v25 = vld [vmem:[%s2049_s25 + $0x98] sm:$0xf]  ;;  %v267_v26 = vld [vmem:[%s2049_s25 + $0xa0] sm:$0xf] }
  0x3e   : > { %246 = vst [vmem:[%s2054_s6 + $0x24] sm:$0xf] %v245_v15  ;;  %v269_v27 = vld [vmem:[%s2049_s25 + $0xa8] sm:$0xf]  ;;  %v271_v28 = vld [vmem:[%s2049_s25 + $0xb0] sm:$0xf] }
  0x3f   : > { %248 = vst [vmem:[%s2054_s6 + $0x28] sm:$0xf] %v247_v16  ;;  %v273_v29 = vld [vmem:[%s2049_s25 + $0xb8] sm:$0xf]  ;;  %v275_v30 = vld [vmem:[%s2049_s25 + $0xc0] sm:$0xf] }
  0x40   : > { %250 = vst [vmem:[%s2054_s6 + $0x2c] sm:$0xf] %v249_v17  ;;  %v277_v31 = vld [vmem:[%s2049_s25 + $0xc8] sm:$0xf]  ;;  %v279_v32 = vld [vmem:[%s2049_s25 + $0xd0] sm:$0xf] }
  0x41   : > { %252 = vst [vmem:[%s2054_s6 + $0x30] sm:$0xf] %v251_v18  ;;  %v281_v33 = vld [vmem:[%s2049_s25 + $0xd8] sm:$0xf]  ;;  %v283_v34 = vld [vmem:[%s2049_s25 + $0xe0] sm:$0xf] }
  0x42   : > { %254 = vst [vmem:[%s2054_s6 + $0x34] sm:$0xf] %v253_v19  ;;  %v285_v35 = vld [vmem:[%s2049_s25 + $0xe8] sm:$0xf]  ;;  %v287_v36 = vld [vmem:[%s2049_s25 + $0xf0] sm:$0xf] }
  0x43   : > { %256 = vst [vmem:[%s2054_s6 + $0x38] sm:$0xf] %v255_v20  ;;  %v289_v37 = vld [vmem:[%s2049_s25 + $0xf8] sm:$0xf]  ;;  %v291_v38 = vld [vmem:[%s2049_s25 + $0x100] sm:$0xf] }
  0x44   : > { %258 = vst [vmem:[%s2054_s6 + $0x3c] sm:$0xf] %v257_v21  ;;  %v293_v39 = vld [vmem:[%s2049_s25 + $0x108] sm:$0xf]  ;;  %v295_v40 = vld [vmem:[%s2049_s25 + $0x110] sm:$0xf] }
  0x45   : > { %260 = vst [vmem:[%s2054_s6 + $0x40] sm:$0xf] %v259_v22  ;;  %v297_v41 = vld [vmem:[%s2049_s25 + $0x118] sm:$0xf]  ;;  %v299_v42 = vld [vmem:[%s2049_s25 + $0x120] sm:$0xf] }
  0x46   : > { %262 = vst [vmem:[%s2054_s6 + $0x44] sm:$0xf] %v261_v23  ;;  %v301_v43 = vld [vmem:[%s2049_s25 + $0x128] sm:$0xf]  ;;  %v303_v44 = vld [vmem:[%s2049_s25 + $0x130] sm:$0xf] }
  0x47   : > { %264 = vst [vmem:[%s2054_s6 + $0x48] sm:$0xf] %v263_v24  ;;  %v305_v45 = vld [vmem:[%s2049_s25 + $0x138] sm:$0xf]  ;;  %v307_v46 = vld [vmem:[%s2049_s25 + $0x140] sm:$0xf] }
  0x48   : > { %266 = vst [vmem:[%s2054_s6 + $0x4c] sm:$0xf] %v265_v25  ;;  %v309_v47 = vld [vmem:[%s2049_s25 + $0x148] sm:$0xf]  ;;  %v311_v48 = vld [vmem:[%s2049_s25 + $0x150] sm:$0xf] }
  0x49   : > { %268 = vst [vmem:[%s2054_s6 + $0x50] sm:$0xf] %v267_v26  ;;  %v313_v49 = vld [vmem:[%s2049_s25 + $0x158] sm:$0xf]  ;;  %v315_v50 = vld [vmem:[%s2049_s25 + $0x160] sm:$0xf] }
  0x4a   : > { %270 = vst [vmem:[%s2054_s6 + $0x54] sm:$0xf] %v269_v27  ;;  %v317_v51 = vld [vmem:[%s2049_s25 + $0x168] sm:$0xf]  ;;  %v319_v52 = vld [vmem:[%s2049_s25 + $0x170] sm:$0xf] }
  0x4b   : > { %272 = vst [vmem:[%s2054_s6 + $0x58] sm:$0xf] %v271_v28  ;;  %v321_v53 = vld [vmem:[%s2049_s25 + $0x178] sm:$0xf]  ;;  %v323_v54 = vld [vmem:[%s2049_s25 + $0x180] sm:$0xf] }
  0x4c   : > { %274 = vst [vmem:[%s2054_s6 + $0x5c] sm:$0xf] %v273_v29  ;;  %v325_v55 = vld [vmem:[%s2049_s25 + $0x188] sm:$0xf]  ;;  %v327_v56 = vld [vmem:[%s2049_s25 + $0x190] sm:$0xf] }
  0x4d   : > { %276 = vst [vmem:[%s2054_s6 + $0x60] sm:$0xf] %v275_v30  ;;  %v329_v57 = vld [vmem:[%s2049_s25 + $0x198] sm:$0xf]  ;;  %v331_v58 = vld [vmem:[%s2049_s25 + $0x1a0] sm:$0xf] }
  0x4e   : > { %278 = vst [vmem:[%s2054_s6 + $0x64] sm:$0xf] %v277_v31  ;;  %v333_v59 = vld [vmem:[%s2049_s25 + $0x1a8] sm:$0xf]  ;;  %v335_v60 = vld [vmem:[%s2049_s25 + $0x1b0] sm:$0xf] }
  0x4f   : > { %280 = vst [vmem:[%s2054_s6 + $0x68] sm:$0xf] %v279_v32  ;;  %v337_v61 = vld [vmem:[%s2049_s25 + $0x1b8] sm:$0xf]  ;;  %v339_v62 = vld [vmem:[%s2049_s25 + $0x1c0] sm:$0xf] }
  0x50   : > { %282 = vst [vmem:[%s2054_s6 + $0x6c] sm:$0xf] %v281_v33  ;;  %v341_v63 = vld [vmem:[%s2049_s25 + $0x1c8] sm:$0xf]  ;;  %v343_v0 = vld [vmem:[%s2049_s25 + $0x1d0] sm:$0xf] }
  0x51   : > { %284 = vst [vmem:[%s2054_s6 + $0x70] sm:$0xf] %v283_v34  ;;  %v345_v1 = vld [vmem:[%s2049_s25 + $0x1d8] sm:$0xf]  ;;  %v347_v2 = vld [vmem:[%s2049_s25 + $0x1e0] sm:$0xf] }
  0x52   : > { %286 = vst [vmem:[%s2054_s6 + $0x74] sm:$0xf] %v285_v35  ;;  %v349_v3 = vld [vmem:[%s2049_s25 + $0x1e8] sm:$0xf]  ;;  %v351_v4 = vld [vmem:[%s2049_s25 + $0x1f0] sm:$0xf] }
  0x53   : > { %288 = vst [vmem:[%s2054_s6 + $0x78] sm:$0xf] %v287_v36  ;;  %v353_v5 = vld [vmem:[%s2049_s25 + $0x1f8] sm:$0xf]  ;;  %v355_v6 = vld [vmem:[%s2049_s25 + $0x200] sm:$0xf] }
  0x54   : > { %290 = vst [vmem:[%s2054_s6 + $0x7c] sm:$0xf] %v289_v37  ;;  %v357_v7 = vld [vmem:[%s2049_s25 + $0x208] sm:$0xf]  ;;  %v359_v8 = vld [vmem:[%s2049_s25 + $0x210] sm:$0xf] }
  0x55   : > { %292 = vst [vmem:[%s2054_s6 + $0x80] sm:$0xf] %v291_v38  ;;  %v361_v9 = vld [vmem:[%s2049_s25 + $0x218] sm:$0xf]  ;;  %v363_v10 = vld [vmem:[%s2049_s25 + $0x220] sm:$0xf] }
  0x56   : > { %294 = vst [vmem:[%s2054_s6 + $0x84] sm:$0xf] %v293_v39  ;;  %v365_v11 = vld [vmem:[%s2049_s25 + $0x228] sm:$0xf]  ;;  %v367_v12 = vld [vmem:[%s2049_s25 + $0x230] sm:$0xf] }
  0x57   : > { %296 = vst [vmem:[%s2054_s6 + $0x88] sm:$0xf] %v295_v40  ;;  %v369_v13 = vld [vmem:[%s2049_s25 + $0x238] sm:$0xf]  ;;  %v371_v14 = vld [vmem:[%s2049_s25 + $0x240] sm:$0xf] }
  0x58   : > { %298 = vst [vmem:[%s2054_s6 + $0x8c] sm:$0xf] %v297_v41  ;;  %v373_v15 = vld [vmem:[%s2049_s25 + $0x248] sm:$0xf]  ;;  %v375_v16 = vld [vmem:[%s2049_s25 + $0x250] sm:$0xf] }
  0x59   : > { %300 = vst [vmem:[%s2054_s6 + $0x90] sm:$0xf] %v299_v42  ;;  %v377_v17 = vld [vmem:[%s2049_s25 + $0x258] sm:$0xf]  ;;  %v379_v18 = vld [vmem:[%s2049_s25 + $0x260] sm:$0xf] }
  0x5a   : > { %302 = vst [vmem:[%s2054_s6 + $0x94] sm:$0xf] %v301_v43  ;;  %v381_v19 = vld [vmem:[%s2049_s25 + $0x268] sm:$0xf]  ;;  %v383_v20 = vld [vmem:[%s2049_s25 + $0x270] sm:$0xf] }
  0x5b   : > { %304 = vst [vmem:[%s2054_s6 + $0x98] sm:$0xf] %v303_v44  ;;  %v385_v21 = vld [vmem:[%s2049_s25 + $0x278] sm:$0xf]  ;;  %v387_v22 = vld [vmem:[%s2049_s25 + $0x280] sm:$0xf] }
  0x5c   : > { %306 = vst [vmem:[%s2054_s6 + $0x9c] sm:$0xf] %v305_v45  ;;  %v389_v23 = vld [vmem:[%s2049_s25 + $0x288] sm:$0xf]  ;;  %v391_v24 = vld [vmem:[%s2049_s25 + $0x290] sm:$0xf] }
  0x5d   : > { %308 = vst [vmem:[%s2054_s6 + $0xa0] sm:$0xf] %v307_v46  ;;  %v393_v25 = vld [vmem:[%s2049_s25 + $0x298] sm:$0xf]  ;;  %v395_v26 = vld [vmem:[%s2049_s25 + $0x2a0] sm:$0xf] }
  0x5e   : > { %310 = vst [vmem:[%s2054_s6 + $0xa4] sm:$0xf] %v309_v47  ;;  %v397_v27 = vld [vmem:[%s2049_s25 + $0x2a8] sm:$0xf]  ;;  %v399_v28 = vld [vmem:[%s2049_s25 + $0x2b0] sm:$0xf] }
  0x5f   : > { %312 = vst [vmem:[%s2054_s6 + $0xa8] sm:$0xf] %v311_v48  ;;  %v401_v29 = vld [vmem:[%s2049_s25 + $0x2b8] sm:$0xf]  ;;  %v403_v30 = vld [vmem:[%s2049_s25 + $0x2c0] sm:$0xf] }
  0x60   : > { %314 = vst [vmem:[%s2054_s6 + $0xac] sm:$0xf] %v313_v49  ;;  %v405_v31 = vld [vmem:[%s2049_s25 + $0x2c8] sm:$0xf]  ;;  %v407_v32 = vld [vmem:[%s2049_s25 + $0x2d0] sm:$0xf] }
  0x61   : > { %316 = vst [vmem:[%s2054_s6 + $0xb0] sm:$0xf] %v315_v50  ;;  %v409_v33 = vld [vmem:[%s2049_s25 + $0x2d8] sm:$0xf]  ;;  %v411_v34 = vld [vmem:[%s2049_s25 + $0x2e0] sm:$0xf] }
  0x62   : > { %318 = vst [vmem:[%s2054_s6 + $0xb4] sm:$0xf] %v317_v51  ;;  %v413_v35 = vld [vmem:[%s2049_s25 + $0x2e8] sm:$0xf]  ;;  %v415_v36 = vld [vmem:[%s2049_s25 + $0x2f0] sm:$0xf] }
  0x63   : > { %320 = vst [vmem:[%s2054_s6 + $0xb8] sm:$0xf] %v319_v52  ;;  %v417_v37 = vld [vmem:[%s2049_s25 + $0x2f8] sm:$0xf] }
  0x64   : > { %322 = vst [vmem:[%s2054_s6 + $0xbc] sm:$0xf] %v321_v53 }
  0x65   : > { %324 = vst [vmem:[%s2054_s6 + $0xc0] sm:$0xf] %v323_v54 }
  0x66   : > { %326 = vst [vmem:[%s2054_s6 + $0xc4] sm:$0xf] %v325_v55 }
  0x67   : > { %328 = vst [vmem:[%s2054_s6 + $0xc8] sm:$0xf] %v327_v56 }
  0x68   : > { %330 = vst [vmem:[%s2054_s6 + $0xcc] sm:$0xf] %v329_v57 }
  0x69   : > { %332 = vst [vmem:[%s2054_s6 + $0xd0] sm:$0xf] %v331_v58 }
  0x6a   : > { %334 = vst [vmem:[%s2054_s6 + $0xd4] sm:$0xf] %v333_v59 }
  0x6b   : > { %336 = vst [vmem:[%s2054_s6 + $0xd8] sm:$0xf] %v335_v60 }
  0x6c   : > { %338 = vst [vmem:[%s2054_s6 + $0xdc] sm:$0xf] %v337_v61 }
  0x6d   : > { %340 = vst [vmem:[%s2054_s6 + $0xe0] sm:$0xf] %v339_v62 }
  0x6e   : > { %342 = vst [vmem:[%s2054_s6 + $0xe4] sm:$0xf] %v341_v63 }
  0x6f   : > { %344 = vst [vmem:[%s2054_s6 + $0xe8] sm:$0xf] %v343_v0 }
  0x70   : > { %346 = vst [vmem:[%s2054_s6 + $0xec] sm:$0xf] %v345_v1 }
  0x71   : > { %348 = vst [vmem:[%s2054_s6 + $0xf0] sm:$0xf] %v347_v2 }
  0x72   : > { %350 = vst [vmem:[%s2054_s6 + $0xf4] sm:$0xf] %v349_v3 }
  0x73   : > { %352 = vst [vmem:[%s2054_s6 + $0xf8] sm:$0xf] %v351_v4 }
  0x74   : > { %354 = vst [vmem:[%s2054_s6 + $0xfc] sm:$0xf] %v353_v5 }
  0x75   : > { %356 = vst [vmem:[%s2054_s6 + $0x100] sm:$0xf] %v355_v6 }
  0x76   : > { %358 = vst [vmem:[%s2054_s6 + $0x104] sm:$0xf] %v357_v7 }
  0x77   : > { %360 = vst [vmem:[%s2054_s6 + $0x108] sm:$0xf] %v359_v8 }
  0x78   : > { %362 = vst [vmem:[%s2054_s6 + $0x10c] sm:$0xf] %v361_v9 }
  0x79   : > { %364 = vst [vmem:[%s2054_s6 + $0x110] sm:$0xf] %v363_v10 }
  0x7a   : > { %366 = vst [vmem:[%s2054_s6 + $0x114] sm:$0xf] %v365_v11 }
  0x7b   : > { %368 = vst [vmem:[%s2054_s6 + $0x118] sm:$0xf] %v367_v12 }
  0x7c   : > { %370 = vst [vmem:[%s2054_s6 + $0x11c] sm:$0xf] %v369_v13 }
  0x7d   : > { %372 = vst [vmem:[%s2054_s6 + $0x120] sm:$0xf] %v371_v14 }
  0x7e   : > { %374 = vst [vmem:[%s2054_s6 + $0x124] sm:$0xf] %v373_v15 }
  0x7f   : > { %376 = vst [vmem:[%s2054_s6 + $0x128] sm:$0xf] %v375_v16 }
  0x80   : > { %378 = vst [vmem:[%s2054_s6 + $0x12c] sm:$0xf] %v377_v17 }
  0x81   : > { %380 = vst [vmem:[%s2054_s6 + $0x130] sm:$0xf] %v379_v18 }
  0x82   : > { %382 = vst [vmem:[%s2054_s6 + $0x134] sm:$0xf] %v381_v19 }
  0x83   : > { %384 = vst [vmem:[%s2054_s6 + $0x138] sm:$0xf] %v383_v20 }
  0x84   : > { %386 = vst [vmem:[%s2054_s6 + $0x13c] sm:$0xf] %v385_v21 }
  0x85   : > { %388 = vst [vmem:[%s2054_s6 + $0x140] sm:$0xf] %v387_v22 }
  0x86   : > { %390 = vst [vmem:[%s2054_s6 + $0x144] sm:$0xf] %v389_v23 }
  0x87   : > { %392 = vst [vmem:[%s2054_s6 + $0x148] sm:$0xf] %v391_v24 }
  0x88   : > { %394 = vst [vmem:[%s2054_s6 + $0x14c] sm:$0xf] %v393_v25 }
  0x89   : > { %396 = vst [vmem:[%s2054_s6 + $0x150] sm:$0xf] %v395_v26 }
  0x8a   : > { %398 = vst [vmem:[%s2054_s6 + $0x154] sm:$0xf] %v397_v27 }
  0x8b   : > { %400 = vst [vmem:[%s2054_s6 + $0x158] sm:$0xf] %v399_v28 }
  0x8c   : > { %402 = vst [vmem:[%s2054_s6 + $0x15c] sm:$0xf] %v401_v29 }
  0x8d   : > { %404 = vst [vmem:[%s2054_s6 + $0x160] sm:$0xf] %v403_v30 }
  0x8e   : > { %406 = vst [vmem:[%s2054_s6 + $0x164] sm:$0xf] %v405_v31 }
  0x8f   : > { %408 = vst [vmem:[%s2054_s6 + $0x168] sm:$0xf] %v407_v32 }
  0x90   : > { %410 = vst [vmem:[%s2054_s6 + $0x16c] sm:$0xf] %v409_v33 }
  0x91   : > { %412 = vst [vmem:[%s2054_s6 + $0x170] sm:$0xf] %v411_v34 }
  0x92   : > { %414 = vst [vmem:[%s2054_s6 + $0x174] sm:$0xf] %v413_v35 }
  0x93   : > { %416 = vst [vmem:[%s2054_s6 + $0x178] sm:$0xf] %v415_v36 }
  0x94   : > { %418 = vst [vmem:[%s2054_s6 + $0x17c] sm:$0xf] %v417_v37 }
  0x95 PF: > { %634 = sbr.rel (!%p2025_p11) target bundleno = 155 (0x9b), region = 84  ;;  %s636_s0 = sand.u32 (%p2025_p11), 1, %s1866_s13  }
  0x96   : > { %s1441_s7 = sshll.u32 (%p2025_p11), %s1898_s21, 3  ;;  %s1440_s23 = sshll.u32 (%p2025_p11), %s636_s0, 4 }
  0x97   : > { %s643_s27 = scalar_lea.vmem (%p2025_p11), %s2386_s2, %s1441_s7  ;;  %s638_s29 = scalar_lea.vmem (%p2025_p11), [#allocation4], %s1440_s23 }
  0x98   : > { %v674_v38 = vld [vmem:[%s643_s27] sm:$0xff] (%p2025_p11)  ;;  %v676_v39 = vld [vmem:[%s643_s27 + $0x10] sm:$0xff] (%p2025_p11) }
  0x99   : > { %675 = vst [vmem:[%s638_s29] sm:$0xff] (%p2025_p11), %v674_v38 }
  0x9a   : > { %677 = vst [vmem:[%s638_s29 + $0x8] sm:$0xff] %v676_v39 }
  0x9b PF: > { %p1442_p1 = scmp.ge.s32.totalorder %s1902_s22, 1  ;;  %p682_p2 = scmp.lt.s32.totalorder %s1902_s22, 7 }
  0x9d   : > { %p683_p3 = pnand %p1442_p1, %p682_p2 }
  0x9e   : > { %s689_s25 = sand.u32 (!%p683_p3), 1, %s1878_s16   ;;  %s696_s10 = sand.u32 (!%p683_p3), 1, %s1870_s14  }
  0x9f   : > { %686 = sbr.rel (%p683_p3) target bundleno = 398 (0x18e), region = 122  ;;  %s703_s5 = sand.u32 (!%p683_p3), 1, %s1862_s12  }
  0xa0   : > { %s1725_s4 = smul.u32 (!%p683_p3), 48, %s689_s25  ;;  %s2257_s0 = sshll.u32 (!%p683_p3), %s703_s5, 4 }
  0xa1   : > { %s1726_s6 = smul.u32 (!%p683_p3), 384, %s696_s10  ;;  %s705_s28 = scalar_lea.vmem (!%p683_p3), [#allocation4], %s2257_s0 }
  0xa2   : > { %s2259_s7 = scalar_lea.vmem (!%p683_p3), [#allocation2], %s1725_s4  ;;  %s2265_s26 = scalar_lea.vmem (!%p683_p3), [#allocation5], %s2257_s0 }
  0xa3   : > { %s2261_s23 = scalar_lea.vmem (!%p683_p3), [#allocation3], %s1726_s6  ;;  %p1445_p4 = scmp.ne.s32.totalorder (!%p683_p3), %s1886_s18, 0 }
  0xa5   : > { %741 = sbr.rel (%p1445_p4) target bundleno = 173 (0xad), region = 138 }
  0xaa   : > { %v1904_v40 = vmov 0.0  }
  0xab   : > { %742 = vst [vmem:[%s2265_s26] sm:$0xff] %v1904_v40 }
  0xac   : > { %743 = vst [vmem:[%s2265_s26 + $0x8] sm:$0xff] %v1904_v40 }
  0xad PF: > { %v1682_v41 = vld [vmem:[%s2261_s23 + $0x38] sm:$0xff]  ;;  %v1681_v45 = vld [vmem:[%s2261_s23 + $0x30] sm:$0xff]  ;;  %v1680_v49 = vld [vmem:[%s2261_s23 + $0x28] sm:$0xff]  ;;  %p1662_p5 = scmp.ne.s32.totalorder %s1886_s18, 2 }
  0xae   : > { %v1690_v42 = vld [vmem:[%s2261_s23 + $0x78] sm:$0xff]  ;;  %1166 = vmatpush.bf16.msra.mxu0 %v1682_v41  ;;  %v1689_v46 = vld [vmem:[%s2261_s23 + $0x70] sm:$0xff]  ;;  %v1688_v50 = vld [vmem:[%s2261_s23 + $0x68] sm:$0xff] }
  0xaf   : > { %v1698_v43 = vld [vmem:[%s2261_s23 + $0xb8] sm:$0xff]  ;;  %1180 = vmatpush.bf16.msra.mxu1 %v1690_v42  ;;  %v1697_v47 = vld [vmem:[%s2261_s23 + $0xb0] sm:$0xff]  ;;  %v1696_v51 = vld [vmem:[%s2261_s23 + $0xa8] sm:$0xff] }
  0xb0   : > { %v1706_v44 = vld [vmem:[%s2261_s23 + $0xf8] sm:$0xff]  ;;  %1194 = vmatpush.bf16.msra.mxu2 %v1698_v43  ;;  %v1705_v48 = vld [vmem:[%s2261_s23 + $0xf0] sm:$0xff]  ;;  %v1704_v52 = vld [vmem:[%s2261_s23 + $0xe8] sm:$0xff] }
  0xb1   : > { %1208 = vmatpush.bf16.msra.mxu3 %v1706_v44  ;;  %v1679_v53 = vld [vmem:[%s2261_s23 + $0x20] sm:$0xff]  ;;  %v1678_v57 = vld [vmem:[%s2261_s23 + $0x18] sm:$0xff]  ;;  %v1677_v61 = vld [vmem:[%s2261_s23 + $0x10] sm:$0xff] }
  0xb2   : > { %1167 = vmatpush.bf16.msra.mxu0 %v1681_v45  ;;  %v1687_v54 = vld [vmem:[%s2261_s23 + $0x60] sm:$0xff]  ;;  %v1686_v58 = vld [vmem:[%s2261_s23 + $0x58] sm:$0xff]  ;;  %v1685_v62 = vld [vmem:[%s2261_s23 + $0x50] sm:$0xff] }
  0xb3   : > { %1181 = vmatpush.bf16.msra.mxu1 %v1689_v46  ;;  %v1695_v55 = vld [vmem:[%s2261_s23 + $0xa0] sm:$0xff]  ;;  %v1694_v59 = vld [vmem:[%s2261_s23 + $0x98] sm:$0xff]  ;;  %v1693_v63 = vld [vmem:[%s2261_s23 + $0x90] sm:$0xff] }
  0xb4   : > { %1195 = vmatpush.bf16.msra.mxu2 %v1697_v47  ;;  %v1703_v56 = vld [vmem:[%s2261_s23 + $0xe0] sm:$0xff]  ;;  %v1702_v60 = vld [vmem:[%s2261_s23 + $0xd8] sm:$0xff]  ;;  %v1701_v0 = vld [vmem:[%s2261_s23 + $0xd0] sm:$0xff] }
  0xb5   : > { %1209 = vmatpush.bf16.msra.mxu3 %v1705_v48  ;;  %v1676_v1 = vld [vmem:[%s2261_s23 + $0x8] sm:$0xff]  ;;  %v1675_v5 = vld [vmem:[%s2261_s23] sm:$0xff]  ;;  %v1714_v8 = vld [vmem:[%s2261_s23 + $0x138] sm:$0xff] }
  0xb6   : > { %1168 = vmatpush.bf16.msra.mxu0 %v1680_v49  ;;  %v1684_v2 = vld [vmem:[%s2261_s23 + $0x48] sm:$0xff]  ;;  %v1683_v6 = vld [vmem:[%s2261_s23 + $0x40] sm:$0xff]  ;;  %v1722_v13 = vld [vmem:[%s2261_s23 + $0x178] sm:$0xff] }
  0xb7   : > { %1182 = vmatpush.bf16.msra.mxu1 %v1688_v50  ;;  %v1692_v3 = vld [vmem:[%s2261_s23 + $0x88] sm:$0xff]  ;;  %v1691_v7 = vld [vmem:[%s2261_s23 + $0x80] sm:$0xff]  ;;  %v1713_v22 = vld [vmem:[%s2261_s23 + $0x130] sm:$0xff] }
  0xb8   : > { %1196 = vmatpush.bf16.msra.mxu2 %v1696_v51  ;;  %v1700_v4 = vld [vmem:[%s2261_s23 + $0xc8] sm:$0xff]  ;;  %v1448_v9 = vld [vmem:[%s2259_s7] sm:$0xf]  ;;  %v1669_v11 = vld [vmem:[%s2259_s7 + $0x4] sm:$0xf] }
  0xb9   : > { %1210 = vmatpush.bf16.msra.mxu3 %v1704_v52  ;;  %v1672_v10 = vld [vmem:[%s2259_s7 + $0x14] sm:$0xf0]  ;;  %v1450_v12 = vld [vmem:[%s2259_s7 + $0x18] sm:$0xf0]  ;;  %v1456_v14 = vld [vmem:[%s2259_s7 + $0x8] sm:$0xf] }
  0xba   : > { %1169 = vmatpush.bf16.msra.mxu0 %v1679_v53  ;;  %v1673_v15 = vld [vmem:[%s2259_s7 + $0x1c] sm:$0xf0]  ;;  %v1670_v17 = vld [vmem:[%s2259_s7 + $0xc] sm:$0xf]  ;;  %v1458_v18 = vld [vmem:[%s2259_s7 + $0x20] sm:$0xf0]  ;;  %v1449_v19 = vor.u32 %v1672_v10, %v1448_v9  ;;  %v1453_v20 = vor.u32 %v1669_v11, %v1450_v12 }
  0xbb   : > { %1183 = vmatpush.bf16.msra.mxu1 %v1687_v54  ;;  %v1699_v16 = vld [vmem:[%s2261_s23 + $0xc0] sm:$0xff]  ;;  %v1457_v21 = vor.u32 %v1673_v15, %v1456_v14  ;;  %v1461_v23 = vor.u32 %v1670_v17, %v1458_v18  ;;  %v1721_v24 = vld [vmem:[%s2261_s23 + $0x170] sm:$0xff]  ;;  %v1712_v25 = vld [vmem:[%s2261_s23 + $0x128] sm:$0xff] }
  0xbc   : > { %1197 = vmatpush.bf16.msra.mxu2 %v1695_v55  ;;  %v1720_v26 = vld [vmem:[%s2261_s23 + $0x168] sm:$0xff]  ;;  %v1711_v27 = vld [vmem:[%s2261_s23 + $0x120] sm:$0xff]  ;;  %v1710_v29 = vld [vmem:[%s2261_s23 + $0x118] sm:$0xff] }
  0xbd   : > { %1211 = vmatpush.bf16.msra.mxu3 %v1703_v56  ;;  %v1719_v28 = vld [vmem:[%s2261_s23 + $0x160] sm:$0xff]  ;;  %v1718_v30 = vld [vmem:[%s2261_s23 + $0x158] sm:$0xff]  ;;  %v1709_v31 = vld [vmem:[%s2261_s23 + $0x110] sm:$0xff] }
  0xbe   : > { %1170 = vmatpush.bf16.msra.mxu0 %v1678_v57  ;;  %v1717_v32 = vld [vmem:[%s2261_s23 + $0x150] sm:$0xff]  ;;  %v1708_v33 = vld [vmem:[%s2261_s23 + $0x108] sm:$0xff]  ;;  %v1707_v35 = vld [vmem:[%s2261_s23 + $0x100] sm:$0xff] }
  0xbf   : > { %1184 = vmatpush.bf16.msra.mxu1 %v1686_v58  ;;  %v1716_v34 = vld [vmem:[%s2261_s23 + $0x148] sm:$0xff]  ;;  %v1464_v36 = vld [vmem:[%s2259_s7 + $0x10] sm:$0xf]  ;;  %v1671_v39 = vld [vmem:[%s2259_s7 + $0x14] sm:$0xf] }
  0xc0   : > { %1198 = vmatpush.bf16.msra.mxu2 %v1694_v59  ;;  %v1674_v37 = vld [vmem:[%s2259_s7 + $0x24] sm:$0xf0]  ;;  %v1715_v38 = vld [vmem:[%s2261_s23 + $0x140] sm:$0xff]  ;;  %v1466_v40 = vld [vmem:[%s2259_s7 + $0x28] sm:$0xf0] }
  0xc1   : > { %1212 = vmatpush.bf16.msra.mxu3 %v1702_v60  ;;  %v1465_v41 = vor.u32 %v1674_v37, %v1464_v36  ;;  %v1469_v42 = vor.u32 %v1671_v39, %v1466_v40  ;;  %v744_v57 = vld [vmem:[%s2265_s26] sm:$0xff] }
  0xc2   : > { %1171 = vmatpush.bf16.msra.mxu0 %v1677_v61 }
  0xc3   : > { %1185 = vmatpush.bf16.msra.mxu1 %v1685_v62 }
  0xc4   : > { %1199 = vmatpush.bf16.msra.mxu2 %v1693_v63 }
  0xc5   : > { %1213 = vmatpush.bf16.msra.mxu3 %v1701_v0 }
  0xc6   : > { %1172 = vmatpush.bf16.msra.mxu0 %v1676_v1  ;;  %v745_v1 = vld [vmem:[%s2265_s26 + $0x8] sm:$0xff] }
  0xc7   : > { %1186 = vmatpush.bf16.msra.mxu1 %v1684_v2 }
  0xc8   : > { %1200 = vmatpush.bf16.msra.mxu2 %v1692_v3 }
  0xc9   : > { %1214 = vmatpush.bf16.msra.mxu3 %v1700_v4 }
  0xca   : > { %1173 = vmatpush.bf16.msra.mxu0 %v1675_v5 }
  0xcb   : > { %1187 = vmatpush.bf16.msra.mxu1 %v1683_v6 }
  0xcc   : > { %1201 = vmatpush.bf16.msra.mxu2 %v1691_v7 }
  0xcd   : > { %1215 = vmatpush.bf16.msra.mxu3 %v1699_v16  ;;  %1174 = vmatmul.bf16.vlgmr.msra.gmra.mxu0 %v1449_v19 }
  0xce   : > { %1222 = vmatpush.bf16.msrb.mxu0 %v1714_v8  ;;  %1188 = vmatmul.bf16.vlgmr.msra.gmra.mxu1 %v1453_v20 }
  0xcf   : > { %1236 = vmatpush.bf16.msrb.mxu1 %v1722_v13  ;;  %1202 = vmatmul.bf16.vlgmr.msra.gmra.mxu2 %v1457_v21 }
  0xd0   : > { %1216 = vmatmul.bf16.vlgmr.msra.gmra.mxu3 %v1461_v23 }
  0xd2   : > { %1223 = vmatpush.bf16.msrb.mxu0 %v1713_v22 }
  0xd3   : > { %1237 = vmatpush.bf16.msrb.mxu1 %v1721_v24 }
  0xd6   : > { %1224 = vmatpush.bf16.msrb.mxu0 %v1712_v25 }
  0xd7   : > { %1238 = vmatpush.bf16.msrb.mxu1 %v1720_v26 }
  0xda   : > { %1225 = vmatpush.bf16.msrb.mxu0 %v1711_v27 }
  0xdb   : > { %1239 = vmatpush.bf16.msrb.mxu1 %v1719_v28 }
  0xde   : > { %1226 = vmatpush.bf16.msrb.mxu0 %v1710_v29 }
  0xdf   : > { %1240 = vmatpush.bf16.msrb.mxu1 %v1718_v30 }
  0xe2   : > { %1227 = vmatpush.bf16.msrb.mxu0 %v1709_v31 }
  0xe3   : > { %1241 = vmatpush.bf16.msrb.mxu1 %v1717_v32 }
  0xe6   : > { %1228 = vmatpush.bf16.msrb.mxu0 %v1708_v33 }
  0xe7   : > { %1242 = vmatpush.bf16.msrb.mxu1 %v1716_v34 }
  0xea   : > { %1229 = vmatpush.bf16.msrb.mxu0 %v1707_v35 }
  0xeb   : > { %1243 = vmatpush.bf16.msrb.mxu1 %v1715_v38 }
  0xed   : > { %1230 = vmatmul.bf16.vlgmr.msrb.gmra.mxu0 %v1465_v41 }
  0xee   : > { %1244 = vmatmul.bf16.vlgmr.msrb.gmra.mxu1 %v1469_v42 }
 0x14a   : > { %v1175_v43 = vpop.f32.mrf.mxu0 }
 0x14b   : > { %v1189_v44 = vpop.f32.mrf.mxu1 }
 0x14c   : > { %v1190_v46 = vadd.f32 %v1189_v44, %v1175_v43 }
 0x152   : > { %v1203_v45 = vpop.f32.mrf.mxu2  ;;  %v1177_v47 = vpop.f32.mrf.mxu0 }
 0x153   : > { %v1191_v48 = vpop.f32.mrf.mxu1  ;;  %v1217_v49 = vpop.f32.mrf.mxu3  ;;  %v1204_v50 = vadd.f32 %v1203_v45, %v1190_v46 }
 0x154   : > { %v1192_v52 = vadd.f32 %v1191_v48, %v1177_v47 }
 0x155   : > { %v1218_v51 = vadd.f32 %v1217_v49, %v1204_v50 }
 0x15a   : > { %v1205_v53 = vpop.f32.mrf.mxu2 }
 0x15b   : > { %v1206_v58 = vadd.f32 %v1205_v53, %v1192_v52  ;;  %v1219_v60 = vpop.f32.mrf.mxu3 }
 0x15d   : > { %v1220_v62 = vadd.f32 %v1219_v60, %v1206_v58 }
 0x16a   : > { %v1231_v54 = vpop.f32.mrf.mxu0 }
 0x16b   : > { %v1232_v55 = vadd.f32 %v1231_v54, %v1218_v51  ;;  %v1245_v56 = vpop.f32.mrf.mxu1 }
 0x16d   : > { %v1246_v59 = vadd.f32 %v1245_v56, %v1232_v55 }
 0x16f   : > { %v1250_v61 = vadd.f32 %v1246_v59, %v744_v57 }
 0x171   : > { %1252 = vst [vmem:[%s2265_s26] sm:$0xff] %v1250_v61 }
 0x172   : > { %v1233_v63 = vpop.f32.mrf.mxu0 }
 0x173   : > { %v1234_v0 = vadd.f32 %v1233_v63, %v1220_v62  ;;  %v1247_v2 = vpop.f32.mrf.mxu1 }
 0x175   : > { %v1248_v3 = vadd.f32 %v1247_v2, %v1234_v0  ;;  %1257 = sbr.rel (%p1662_p5) target bundleno = 390 (0x186), region = 142 }
 0x177   : > { %v1251_v4 = vadd.f32 %v1248_v3, %v745_v1 }
 0x179   : > { %1253 = vst [vmem:[%s2265_s26 + $0x8] sm:$0xff] %v1251_v4 }
 0x17a   : > { %v1258_v5 = vld [vmem:[%s2265_s26] sm:$0xff]  ;;  %v1261_v9 = vld [vmem:[%s705_s28 + $0x8] sm:$0xff] }
 0x17b   : > { %v1260_v6 = vld [vmem:[%s705_s28] sm:$0xff] }
 0x17c   : > { %v1262_v8 = vadd.f32 %v1260_v6, %v1258_v5 }
 0x17e   : > { %v1264_v11 = vmax.f32 %v1262_v8, 0.0 }
 0x180   : > { %v1259_v7 = vld [vmem:[%s2265_s26 + $0x8] sm:$0xff]  ;;  %1266 = vst [vmem:[%s2265_s26] sm:$0xff] %v1264_v11 }
 0x181   : > { %v1263_v10 = vadd.f32 %v1261_v9, %v1259_v7 }
 0x183   : > { %v1265_v12 = vmax.f32 %v1263_v10, 0.0 }
 0x185   : > { %1267 = vst [vmem:[%s2265_s26 + $0x8] sm:$0xff] %v1265_v12 }
 0x186 PF: > { %1274 = sbr.rel (!%p2029_p13) target bundleno = 398 (0x18e), region = 146  ;;  %s1664_s12 = sshll.u32 (%p2029_p13), %s1890_s19, 3 }
 0x187   : > { %v1310_v13 = vld [vmem:[%s2265_s26] sm:$0xff] (%p2029_p13)  ;;  %s1279_s18 = scalar_lea.vmem (%p2029_p13), %s2387_s3, %s1664_s12 }
 0x188   : > { %1311 = vst [vmem:[%s1279_s18] sm:$0xff] (%p2029_p13), %v1310_v13 }
 0x18c   : > { %v1312_v14 = vld [vmem:[%s2265_s26 + $0x8] sm:$0xff] }
 0x18d   : > { %1313 = vst [vmem:[%s1279_s18 + $0x10] sm:$0xff] %v1312_v14 }
 0x18e PF: > { %s13_s22 = sadd.s32 1, %s1902_s22   ;;  %s2396_s11 = sld [smem:[#allocation6_spill]] }
 0x18f   : > { %p10_p6 = scmp.ge.s32.totalorder %s13_s22, 8   ;;  %s2397_s12 = smov %s1866_s13 }
 0x190   : > { %s2398_s13 = smov %s2021_s9  ;;  %s2399_s14 = smov %s1874_s15 }
 0x191   : > { %s2400_s15 = smov %s2018_s8  ;;  %s2401_s16 = smov %s1882_s17 }
 0x192   : > { %s2402_s17 = smov %s2002_s30  ;;  %s2403_s18 = smov %s1894_s20 }
 0x193   : > { %s2404_s19 = smov %s1898_s21  ;;  %s2405_s20 = smov %s2408_s24 }
 0x194   : > { %s2406_s21 = smov %s2396_s11  ;;  %12 = sbr.rel (!%p10_p6) target bundleno = 8 (0x8), region = 231 }

// kernel: forward.36
= control target key start
LH: loop header
LB: loop body
LE: loop exit
PB: predicated region body
PF: predicated region fallthrough
CT: control target
= control target key end

     0   :  { %s1801_s9 = smov 0   ;;  %s1803_s10 = smov 0   ;;  %s2235_s0 = inlined_call_operand.vmem [shape: bf16[16,2304], index: 0, kind: input, shape index: {}]   ;;  %s2236_s1 = inlined_call_operand.vmem [shape: bf16[2304,256], index: 1, kind: input, shape index: {}]   ;;  %s2237_s2 = inlined_call_operand.vmem [shape: f32[16,256], index: 2, kind: output, shape index: {}]  }
   0x1   :  { %s1805_s11 = smov 0   ;;  %s1807_s12 = smov 0  }
   0x2   :  { %s1809_s13 = smov 0   ;;  %s1811_s14 = smov 0  }
   0x3   :  { %s1813_s15 = smov 0   ;;  %s1815_s16 = smov 0  }
   0x4   :  { %s1817_s17 = smov 0   ;;  %s1819_s18 = smov 0  }
   0x5   :  { %s1821_s19 = smov 0  }
   0x6 LB: > { %s1317_s20 = sadd.s32 4294967295, %s1783_s19   ;;  %s24_s21 = sadd.s32 1, %s1775_s17  ;;  %s1783_s19 = sphi %s1821_s19, %s12_s19   ;;  %s1779_s18 = sphi %s1819_s18, %s2250_s18   ;;  %s1775_s17 = sphi %s1817_s17, %s2249_s17   ;;  %s1771_s16 = sphi %s1815_s16, %s2248_s16   ;;  %s1767_s15 = sphi %s1813_s15, %s2247_s15   ;;  %s1763_s14 = sphi %s1811_s14, %s2246_s14   ;;  %s1759_s13 = sphi %s1809_s13, %s2245_s13   ;;  %s1755_s12 = sphi %s1807_s12, %s2244_s12   ;;  %s1751_s11 = sphi %s1805_s11, %s2243_s11   ;;  %s1747_s10 = sphi %s1803_s10, %s2242_s10   ;;  %s1743_s9 = sphi %s1801_s9, %s2241_s9  }
   0x7   : > { %p25_p0 = scmp.ge.s32.totalorder %s24_s21, 3  ;;  %s27_s22 = sadd.s32 1, %s1779_s18 }
   0x8   : > { %s40_s23 = sadd.s32 1, %s1763_s14  ;;  %p47_p1 = scmp.ne.s32.totalorder %s1763_s14, %s1759_s13 }
   0x9   : > { %s2252_s21 = smov (%p25_p0, %s24_s21), 0  ;;  %s2254_s22 = smov (!%p25_p0, %s27_s22), %s1779_s18 }
   0xa   : > { %s36_s24 = ssub.s32 %s1775_s17, %s2252_s21  ;;  %p48_p2 = scmp.eq.s32.totalorder %s1783_s19, 0 }
   0xb   : > { %p29_p3 = scmp.ge.s32.totalorder %s2254_s22, 2  ;;  %p38_p4 = scmp.eq.s32.totalorder %s36_s24, 0 }
   0xc   : > { %p1868_p5 = por %p48_p2, %p47_p1  ;;  %s68_s26 = sadd.s32 1, %s1755_s12 }
   0xd   : > { %s2256_s22 = smov (%p29_p3, %s2254_s22), 0  ;;  %p75_p6 = scmp.ne.s32.totalorder %s1755_s12, %s1751_s11 }
   0xe   : > { %s1876_s27 = scalar_select %p38_p4, %s1763_s14, %s40_s23  }
   0xf   : > { %s64_s28 = ssub.s32 %s1779_s18, %s2256_s22  ;;  %p1882_p9 = por %p75_p6, %p48_p2 }
  0x10   : > { %s65_s29 = sor.u32 %s64_s28, %s36_s24  ;;  %p94_p7 = scmp.eq.s32.totalorder %s64_s28, 0 }
  0x11   : > { %p66_p8 = scmp.eq.s32.totalorder %s65_s29, 0  ;;  %s96_s3 = sadd.s32 1, %s1747_s10 }
  0x12   : > { %p106_p10 = scmp.ne.s32.totalorder %s1747_s10, %s1743_s9  ;;  %p107_p11 = scmp.eq.s32.totalorder %s1317_s20, 5 }
  0x13   : > { %s1890_s4 = scalar_select %p66_p8, %s1755_s12, %s68_s26  }
  0x14   : > { %s1893_s5 = scalar_select %p94_p7, %s1747_s10, %s96_s3  }
  0x15   : > { %p1895_p12 = por %p107_p11, %p106_p10  ;;  %p1320_p13 = scmp.ge.s32.totalorder %s1783_s19, 6 }
  0x17   : > { %129 = sbr.rel (%p1320_p13) target bundleno = 142 (0x8e), region = 16 }
  0x1c   : > { %132 = sbr.rel (!%p1868_p5) target bundleno = 39 (0x27), region = 20  ;;  %s134_s7 = sand.u32 (%p1868_p5), 1, %s1763_s14  }
  0x1d   : > { %s1548_s8 = smul.u32 (%p1868_p5), 24, %s1775_s17 }
  0x1e   : > { %s1604_s23 = smul.u32 (%p1868_p5), 48, %s134_s7 }
  0x1f   : > { %s142_s28 = scalar_lea.vmem (%p1868_p5), %s2235_s0, %s1548_s8 }
  0x20   : > { %v155_v0 = vld [vmem:[%s142_s28] sm:$0xff] (%p1868_p5)  ;;  %v157_v1 = vld [vmem:[%s142_s28 + $0x8] sm:$0xff] (%p1868_p5)  ;;  %v159_v2 = vld [vmem:[%s142_s28 + $0x10] sm:$0xff] (%p1868_p5)  ;;  %s136_s20 = scalar_lea.vmem (%p1868_p5), [#allocation2], %s1604_s23 }
  0x21   : > { %156 = vst [vmem:[%s136_s20] sm:$0xff] %v155_v0  ;;  %v161_v3 = vld [vmem:[%s142_s28 + $0x48] sm:$0xff]  ;;  %v163_v4 = vld [vmem:[%s142_s28 + $0x50] sm:$0xff]  ;;  %v165_v5 = vld [vmem:[%s142_s28 + $0x58] sm:$0xff] }
  0x22   : > { %158 = vst [vmem:[%s136_s20 + $0x8] sm:$0xff] %v157_v1 }
  0x23   : > { %160 = vst [vmem:[%s136_s20 + $0x10] sm:$0xff] %v159_v2 }
  0x24   : > { %162 = vst [vmem:[%s136_s20 + $0x18] sm:$0xff] %v161_v3 }
  0x25   : > { %164 = vst [vmem:[%s136_s20 + $0x20] sm:$0xff] %v163_v4 }
  0x26   : > { %166 = vst [vmem:[%s136_s20 + $0x28] sm:$0xff] %v165_v5 }
  0x27 PF: > { %172 = sbr.rel (!%p1882_p9) target bundleno = 142 (0x8e), region = 43  ;;  %s174_s25 = sand.u32 (%p1882_p9), 1, %s1755_s12  }
  0x28   : > { %s1549_s29 = smul.u32 (%p1882_p9), 192, %s1775_s17 }
  0x29   : > { %s1605_s3 = smul.u32 (%p1882_p9), 384, %s174_s25 }
  0x2a   : > { %s179_s7 = sadd.s32 (%p1882_p9), %s1779_s18, %s1549_s29 }
  0x2b   : > { %s1323_s8 = sshll.u32 (%p1882_p9), %s179_s7, 2  ;;  %s1920_s30 = scalar_lea.vmem (%p1882_p9), [#allocation3], %s1605_s3 }
  0x2c   : > { %s1915_s26 = scalar_lea.vmem %s2236_s1, %s1323_s8 }
  0x2d   : > { %v198_v6 = vld [vmem:[%s1915_s26] sm:$0xf]  ;;  %v200_v7 = vld [vmem:[%s1915_s26 + $0x8] sm:$0xf]  ;;  %v202_v8 = vld [vmem:[%s1915_s26 + $0x10] sm:$0xf] }
  0x2e   : > { %199 = vst [vmem:[%s1920_s30] sm:$0xf] %v198_v6  ;;  %v204_v9 = vld [vmem:[%s1915_s26 + $0x18] sm:$0xf]  ;;  %v206_v10 = vld [vmem:[%s1915_s26 + $0x20] sm:$0xf] }
  0x2f   : > { %201 = vst [vmem:[%s1920_s30 + $0x4] sm:$0xf] %v200_v7  ;;  %v208_v11 = vld [vmem:[%s1915_s26 + $0x28] sm:$0xf]  ;;  %v210_v12 = vld [vmem:[%s1915_s26 + $0x30] sm:$0xf] }
  0x30   : > { %203 = vst [vmem:[%s1920_s30 + $0x8] sm:$0xf] %v202_v8  ;;  %v212_v13 = vld [vmem:[%s1915_s26 + $0x38] sm:$0xf]  ;;  %v214_v14 = vld [vmem:[%s1915_s26 + $0x40] sm:$0xf] }
  0x31   : > { %205 = vst [vmem:[%s1920_s30 + $0xc] sm:$0xf] %v204_v9  ;;  %v216_v15 = vld [vmem:[%s1915_s26 + $0x48] sm:$0xf]  ;;  %v218_v16 = vld [vmem:[%s1915_s26 + $0x50] sm:$0xf] }
  0x32   : > { %207 = vst [vmem:[%s1920_s30 + $0x10] sm:$0xf] %v206_v10  ;;  %v220_v17 = vld [vmem:[%s1915_s26 + $0x58] sm:$0xf]  ;;  %v222_v18 = vld [vmem:[%s1915_s26 + $0x60] sm:$0xf] }
  0x33   : > { %209 = vst [vmem:[%s1920_s30 + $0x14] sm:$0xf] %v208_v11  ;;  %v224_v19 = vld [vmem:[%s1915_s26 + $0x68] sm:$0xf]  ;;  %v226_v20 = vld [vmem:[%s1915_s26 + $0x70] sm:$0xf] }
  0x34   : > { %211 = vst [vmem:[%s1920_s30 + $0x18] sm:$0xf] %v210_v12  ;;  %v228_v21 = vld [vmem:[%s1915_s26 + $0x78] sm:$0xf]  ;;  %v230_v22 = vld [vmem:[%s1915_s26 + $0x80] sm:$0xf] }
  0x35   : > { %213 = vst [vmem:[%s1920_s30 + $0x1c] sm:$0xf] %v212_v13  ;;  %v232_v23 = vld [vmem:[%s1915_s26 + $0x88] sm:$0xf]  ;;  %v234_v24 = vld [vmem:[%s1915_s26 + $0x90] sm:$0xf] }
  0x36   : > { %215 = vst [vmem:[%s1920_s30 + $0x20] sm:$0xf] %v214_v14  ;;  %v236_v25 = vld [vmem:[%s1915_s26 + $0x98] sm:$0xf]  ;;  %v238_v26 = vld [vmem:[%s1915_s26 + $0xa0] sm:$0xf] }
  0x37   : > { %217 = vst [vmem:[%s1920_s30 + $0x24] sm:$0xf] %v216_v15  ;;  %v240_v27 = vld [vmem:[%s1915_s26 + $0xa8] sm:$0xf]  ;;  %v242_v28 = vld [vmem:[%s1915_s26 + $0xb0] sm:$0xf] }
  0x38   : > { %219 = vst [vmem:[%s1920_s30 + $0x28] sm:$0xf] %v218_v16  ;;  %v244_v29 = vld [vmem:[%s1915_s26 + $0xb8] sm:$0xf]  ;;  %v246_v30 = vld [vmem:[%s1915_s26 + $0xc0] sm:$0xf] }
  0x39   : > { %221 = vst [vmem:[%s1920_s30 + $0x2c] sm:$0xf] %v220_v17  ;;  %v248_v31 = vld [vmem:[%s1915_s26 + $0xc8] sm:$0xf]  ;;  %v250_v32 = vld [vmem:[%s1915_s26 + $0xd0] sm:$0xf] }
  0x3a   : > { %223 = vst [vmem:[%s1920_s30 + $0x30] sm:$0xf] %v222_v18  ;;  %v252_v33 = vld [vmem:[%s1915_s26 + $0xd8] sm:$0xf]  ;;  %v254_v34 = vld [vmem:[%s1915_s26 + $0xe0] sm:$0xf] }
  0x3b   : > { %225 = vst [vmem:[%s1920_s30 + $0x34] sm:$0xf] %v224_v19  ;;  %v256_v35 = vld [vmem:[%s1915_s26 + $0xe8] sm:$0xf]  ;;  %v258_v36 = vld [vmem:[%s1915_s26 + $0xf0] sm:$0xf] }
  0x3c   : > { %227 = vst [vmem:[%s1920_s30 + $0x38] sm:$0xf] %v226_v20  ;;  %v260_v37 = vld [vmem:[%s1915_s26 + $0xf8] sm:$0xf]  ;;  %v262_v38 = vld [vmem:[%s1915_s26 + $0x100] sm:$0xf] }
  0x3d   : > { %229 = vst [vmem:[%s1920_s30 + $0x3c] sm:$0xf] %v228_v21  ;;  %v264_v39 = vld [vmem:[%s1915_s26 + $0x108] sm:$0xf]  ;;  %v266_v40 = vld [vmem:[%s1915_s26 + $0x110] sm:$0xf] }
  0x3e   : > { %231 = vst [vmem:[%s1920_s30 + $0x40] sm:$0xf] %v230_v22  ;;  %v268_v41 = vld [vmem:[%s1915_s26 + $0x118] sm:$0xf]  ;;  %v270_v42 = vld [vmem:[%s1915_s26 + $0x120] sm:$0xf] }
  0x3f   : > { %233 = vst [vmem:[%s1920_s30 + $0x44] sm:$0xf] %v232_v23  ;;  %v272_v43 = vld [vmem:[%s1915_s26 + $0x128] sm:$0xf]  ;;  %v274_v44 = vld [vmem:[%s1915_s26 + $0x130] sm:$0xf] }
  0x40   : > { %235 = vst [vmem:[%s1920_s30 + $0x48] sm:$0xf] %v234_v24  ;;  %v276_v45 = vld [vmem:[%s1915_s26 + $0x138] sm:$0xf]  ;;  %v278_v46 = vld [vmem:[%s1915_s26 + $0x140] sm:$0xf] }
  0x41   : > { %237 = vst [vmem:[%s1920_s30 + $0x4c] sm:$0xf] %v236_v25  ;;  %v280_v47 = vld [vmem:[%s1915_s26 + $0x148] sm:$0xf]  ;;  %v282_v48 = vld [vmem:[%s1915_s26 + $0x150] sm:$0xf] }
  0x42   : > { %239 = vst [vmem:[%s1920_s30 + $0x50] sm:$0xf] %v238_v26  ;;  %v284_v49 = vld [vmem:[%s1915_s26 + $0x158] sm:$0xf]  ;;  %v286_v50 = vld [vmem:[%s1915_s26 + $0x160] sm:$0xf] }
  0x43   : > { %241 = vst [vmem:[%s1920_s30 + $0x54] sm:$0xf] %v240_v27  ;;  %v288_v51 = vld [vmem:[%s1915_s26 + $0x168] sm:$0xf]  ;;  %v290_v52 = vld [vmem:[%s1915_s26 + $0x170] sm:$0xf] }
  0x44   : > { %243 = vst [vmem:[%s1920_s30 + $0x58] sm:$0xf] %v242_v28  ;;  %v292_v53 = vld [vmem:[%s1915_s26 + $0x178] sm:$0xf]  ;;  %v294_v54 = vld [vmem:[%s1915_s26 + $0x180] sm:$0xf] }
  0x45   : > { %245 = vst [vmem:[%s1920_s30 + $0x5c] sm:$0xf] %v244_v29  ;;  %v296_v55 = vld [vmem:[%s1915_s26 + $0x188] sm:$0xf]  ;;  %v298_v56 = vld [vmem:[%s1915_s26 + $0x190] sm:$0xf] }
  0x46   : > { %247 = vst [vmem:[%s1920_s30 + $0x60] sm:$0xf] %v246_v30  ;;  %v300_v57 = vld [vmem:[%s1915_s26 + $0x198] sm:$0xf]  ;;  %v302_v58 = vld [vmem:[%s1915_s26 + $0x1a0] sm:$0xf] }
  0x47   : > { %249 = vst [vmem:[%s1920_s30 + $0x64] sm:$0xf] %v248_v31  ;;  %v304_v59 = vld [vmem:[%s1915_s26 + $0x1a8] sm:$0xf]  ;;  %v306_v60 = vld [vmem:[%s1915_s26 + $0x1b0] sm:$0xf] }
  0x48   : > { %251 = vst [vmem:[%s1920_s30 + $0x68] sm:$0xf] %v250_v32  ;;  %v308_v61 = vld [vmem:[%s1915_s26 + $0x1b8] sm:$0xf]  ;;  %v310_v62 = vld [vmem:[%s1915_s26 + $0x1c0] sm:$0xf] }
  0x49   : > { %253 = vst [vmem:[%s1920_s30 + $0x6c] sm:$0xf] %v252_v33  ;;  %v312_v63 = vld [vmem:[%s1915_s26 + $0x1c8] sm:$0xf]  ;;  %v314_v0 = vld [vmem:[%s1915_s26 + $0x1d0] sm:$0xf] }
  0x4a   : > { %255 = vst [vmem:[%s1920_s30 + $0x70] sm:$0xf] %v254_v34  ;;  %v316_v1 = vld [vmem:[%s1915_s26 + $0x1d8] sm:$0xf]  ;;  %v318_v2 = vld [vmem:[%s1915_s26 + $0x1e0] sm:$0xf] }
  0x4b   : > { %257 = vst [vmem:[%s1920_s30 + $0x74] sm:$0xf] %v256_v35  ;;  %v320_v3 = vld [vmem:[%s1915_s26 + $0x1e8] sm:$0xf]  ;;  %v322_v4 = vld [vmem:[%s1915_s26 + $0x1f0] sm:$0xf] }
  0x4c   : > { %259 = vst [vmem:[%s1920_s30 + $0x78] sm:$0xf] %v258_v36  ;;  %v324_v5 = vld [vmem:[%s1915_s26 + $0x1f8] sm:$0xf]  ;;  %v326_v6 = vld [vmem:[%s1915_s26 + $0x200] sm:$0xf] }
  0x4d   : > { %261 = vst [vmem:[%s1920_s30 + $0x7c] sm:$0xf] %v260_v37  ;;  %v328_v7 = vld [vmem:[%s1915_s26 + $0x208] sm:$0xf]  ;;  %v330_v8 = vld [vmem:[%s1915_s26 + $0x210] sm:$0xf] }
  0x4e   : > { %263 = vst [vmem:[%s1920_s30 + $0x80] sm:$0xf] %v262_v38  ;;  %v332_v9 = vld [vmem:[%s1915_s26 + $0x218] sm:$0xf]  ;;  %v334_v10 = vld [vmem:[%s1915_s26 + $0x220] sm:$0xf] }
  0x4f   : > { %265 = vst [vmem:[%s1920_s30 + $0x84] sm:$0xf] %v264_v39  ;;  %v336_v11 = vld [vmem:[%s1915_s26 + $0x228] sm:$0xf]  ;;  %v338_v12 = vld [vmem:[%s1915_s26 + $0x230] sm:$0xf] }
  0x50   : > { %267 = vst [vmem:[%s1920_s30 + $0x88] sm:$0xf] %v266_v40  ;;  %v340_v13 = vld [vmem:[%s1915_s26 + $0x238] sm:$0xf]  ;;  %v342_v14 = vld [vmem:[%s1915_s26 + $0x240] sm:$0xf] }
  0x51   : > { %269 = vst [vmem:[%s1920_s30 + $0x8c] sm:$0xf] %v268_v41  ;;  %v344_v15 = vld [vmem:[%s1915_s26 + $0x248] sm:$0xf]  ;;  %v346_v16 = vld [vmem:[%s1915_s26 + $0x250] sm:$0xf] }
  0x52   : > { %271 = vst [vmem:[%s1920_s30 + $0x90] sm:$0xf] %v270_v42  ;;  %v348_v17 = vld [vmem:[%s1915_s26 + $0x258] sm:$0xf]  ;;  %v350_v18 = vld [vmem:[%s1915_s26 + $0x260] sm:$0xf] }
  0x53   : > { %273 = vst [vmem:[%s1920_s30 + $0x94] sm:$0xf] %v272_v43  ;;  %v352_v19 = vld [vmem:[%s1915_s26 + $0x268] sm:$0xf]  ;;  %v354_v20 = vld [vmem:[%s1915_s26 + $0x270] sm:$0xf] }
  0x54   : > { %275 = vst [vmem:[%s1920_s30 + $0x98] sm:$0xf] %v274_v44  ;;  %v356_v21 = vld [vmem:[%s1915_s26 + $0x278] sm:$0xf]  ;;  %v358_v22 = vld [vmem:[%s1915_s26 + $0x280] sm:$0xf] }
  0x55   : > { %277 = vst [vmem:[%s1920_s30 + $0x9c] sm:$0xf] %v276_v45  ;;  %v360_v23 = vld [vmem:[%s1915_s26 + $0x288] sm:$0xf]  ;;  %v362_v24 = vld [vmem:[%s1915_s26 + $0x290] sm:$0xf] }
  0x56   : > { %279 = vst [vmem:[%s1920_s30 + $0xa0] sm:$0xf] %v278_v46  ;;  %v364_v25 = vld [vmem:[%s1915_s26 + $0x298] sm:$0xf]  ;;  %v366_v26 = vld [vmem:[%s1915_s26 + $0x2a0] sm:$0xf] }
  0x57   : > { %281 = vst [vmem:[%s1920_s30 + $0xa4] sm:$0xf] %v280_v47  ;;  %v368_v27 = vld [vmem:[%s1915_s26 + $0x2a8] sm:$0xf]  ;;  %v370_v28 = vld [vmem:[%s1915_s26 + $0x2b0] sm:$0xf] }
  0x58   : > { %283 = vst [vmem:[%s1920_s30 + $0xa8] sm:$0xf] %v282_v48  ;;  %v372_v29 = vld [vmem:[%s1915_s26 + $0x2b8] sm:$0xf]  ;;  %v374_v30 = vld [vmem:[%s1915_s26 + $0x2c0] sm:$0xf] }
  0x59   : > { %285 = vst [vmem:[%s1920_s30 + $0xac] sm:$0xf] %v284_v49  ;;  %v376_v31 = vld [vmem:[%s1915_s26 + $0x2c8] sm:$0xf]  ;;  %v378_v32 = vld [vmem:[%s1915_s26 + $0x2d0] sm:$0xf] }
  0x5a   : > { %287 = vst [vmem:[%s1920_s30 + $0xb0] sm:$0xf] %v286_v50  ;;  %v380_v33 = vld [vmem:[%s1915_s26 + $0x2d8] sm:$0xf]  ;;  %v382_v34 = vld [vmem:[%s1915_s26 + $0x2e0] sm:$0xf] }
  0x5b   : > { %289 = vst [vmem:[%s1920_s30 + $0xb4] sm:$0xf] %v288_v51  ;;  %v384_v35 = vld [vmem:[%s1915_s26 + $0x2e8] sm:$0xf]  ;;  %v386_v36 = vld [vmem:[%s1915_s26 + $0x2f0] sm:$0xf] }
  0x5c   : > { %291 = vst [vmem:[%s1920_s30 + $0xb8] sm:$0xf] %v290_v52  ;;  %v388_v37 = vld [vmem:[%s1915_s26 + $0x2f8] sm:$0xf] }
  0x5d   : > { %293 = vst [vmem:[%s1920_s30 + $0xbc] sm:$0xf] %v292_v53 }
  0x5e   : > { %295 = vst [vmem:[%s1920_s30 + $0xc0] sm:$0xf] %v294_v54 }
  0x5f   : > { %297 = vst [vmem:[%s1920_s30 + $0xc4] sm:$0xf] %v296_v55 }
  0x60   : > { %299 = vst [vmem:[%s1920_s30 + $0xc8] sm:$0xf] %v298_v56 }
  0x61   : > { %301 = vst [vmem:[%s1920_s30 + $0xcc] sm:$0xf] %v300_v57 }
  0x62   : > { %303 = vst [vmem:[%s1920_s30 + $0xd0] sm:$0xf] %v302_v58 }
  0x63   : > { %305 = vst [vmem:[%s1920_s30 + $0xd4] sm:$0xf] %v304_v59 }
  0x64   : > { %307 = vst [vmem:[%s1920_s30 + $0xd8] sm:$0xf] %v306_v60 }
  0x65   : > { %309 = vst [vmem:[%s1920_s30 + $0xdc] sm:$0xf] %v308_v61 }
  0x66   : > { %311 = vst [vmem:[%s1920_s30 + $0xe0] sm:$0xf] %v310_v62 }
  0x67   : > { %313 = vst [vmem:[%s1920_s30 + $0xe4] sm:$0xf] %v312_v63 }
  0x68   : > { %315 = vst [vmem:[%s1920_s30 + $0xe8] sm:$0xf] %v314_v0 }
  0x69   : > { %317 = vst [vmem:[%s1920_s30 + $0xec] sm:$0xf] %v316_v1 }
  0x6a   : > { %319 = vst [vmem:[%s1920_s30 + $0xf0] sm:$0xf] %v318_v2 }
  0x6b   : > { %321 = vst [vmem:[%s1920_s30 + $0xf4] sm:$0xf] %v320_v3 }
  0x6c   : > { %323 = vst [vmem:[%s1920_s30 + $0xf8] sm:$0xf] %v322_v4 }
  0x6d   : > { %325 = vst [vmem:[%s1920_s30 + $0xfc] sm:$0xf] %v324_v5 }
  0x6e   : > { %327 = vst [vmem:[%s1920_s30 + $0x100] sm:$0xf] %v326_v6 }
  0x6f   : > { %329 = vst [vmem:[%s1920_s30 + $0x104] sm:$0xf] %v328_v7 }
  0x70   : > { %331 = vst [vmem:[%s1920_s30 + $0x108] sm:$0xf] %v330_v8 }
  0x71   : > { %333 = vst [vmem:[%s1920_s30 + $0x10c] sm:$0xf] %v332_v9 }
  0x72   : > { %335 = vst [vmem:[%s1920_s30 + $0x110] sm:$0xf] %v334_v10 }
  0x73   : > { %337 = vst [vmem:[%s1920_s30 + $0x114] sm:$0xf] %v336_v11 }
  0x74   : > { %339 = vst [vmem:[%s1920_s30 + $0x118] sm:$0xf] %v338_v12 }
  0x75   : > { %341 = vst [vmem:[%s1920_s30 + $0x11c] sm:$0xf] %v340_v13 }
  0x76   : > { %343 = vst [vmem:[%s1920_s30 + $0x120] sm:$0xf] %v342_v14 }
  0x77   : > { %345 = vst [vmem:[%s1920_s30 + $0x124] sm:$0xf] %v344_v15 }
  0x78   : > { %347 = vst [vmem:[%s1920_s30 + $0x128] sm:$0xf] %v346_v16 }
  0x79   : > { %349 = vst [vmem:[%s1920_s30 + $0x12c] sm:$0xf] %v348_v17 }
  0x7a   : > { %351 = vst [vmem:[%s1920_s30 + $0x130] sm:$0xf] %v350_v18 }
  0x7b   : > { %353 = vst [vmem:[%s1920_s30 + $0x134] sm:$0xf] %v352_v19 }
  0x7c   : > { %355 = vst [vmem:[%s1920_s30 + $0x138] sm:$0xf] %v354_v20 }
  0x7d   : > { %357 = vst [vmem:[%s1920_s30 + $0x13c] sm:$0xf] %v356_v21 }
  0x7e   : > { %359 = vst [vmem:[%s1920_s30 + $0x140] sm:$0xf] %v358_v22 }
  0x7f   : > { %361 = vst [vmem:[%s1920_s30 + $0x144] sm:$0xf] %v360_v23 }
  0x80   : > { %363 = vst [vmem:[%s1920_s30 + $0x148] sm:$0xf] %v362_v24 }
  0x81   : > { %365 = vst [vmem:[%s1920_s30 + $0x14c] sm:$0xf] %v364_v25 }
  0x82   : > { %367 = vst [vmem:[%s1920_s30 + $0x150] sm:$0xf] %v366_v26 }
  0x83   : > { %369 = vst [vmem:[%s1920_s30 + $0x154] sm:$0xf] %v368_v27 }
  0x84   : > { %371 = vst [vmem:[%s1920_s30 + $0x158] sm:$0xf] %v370_v28 }
  0x85   : > { %373 = vst [vmem:[%s1920_s30 + $0x15c] sm:$0xf] %v372_v29 }
  0x86   : > { %375 = vst [vmem:[%s1920_s30 + $0x160] sm:$0xf] %v374_v30 }
  0x87   : > { %377 = vst [vmem:[%s1920_s30 + $0x164] sm:$0xf] %v376_v31 }
  0x88   : > { %379 = vst [vmem:[%s1920_s30 + $0x168] sm:$0xf] %v378_v32 }
  0x89   : > { %381 = vst [vmem:[%s1920_s30 + $0x16c] sm:$0xf] %v380_v33 }
  0x8a   : > { %383 = vst [vmem:[%s1920_s30 + $0x170] sm:$0xf] %v382_v34 }
  0x8b   : > { %385 = vst [vmem:[%s1920_s30 + $0x174] sm:$0xf] %v384_v35 }
  0x8c   : > { %387 = vst [vmem:[%s1920_s30 + $0x178] sm:$0xf] %v386_v36 }
  0x8d   : > { %389 = vst [vmem:[%s1920_s30 + $0x17c] sm:$0xf] %v388_v37 }
  0x8e PF: > { %p1324_p0 = scmp.ge.s32.totalorder %s1783_s19, 1  ;;  %p604_p1 = scmp.lt.s32.totalorder %s1783_s19, 7 }
  0x90   : > { %p605_p2 = pnand %p1324_p0, %p604_p1 }
  0x91   : > { %s611_s28 = sand.u32 (!%p605_p2), 1, %s1759_s13   ;;  %s618_s20 = sand.u32 (!%p605_p2), 1, %s1751_s11  }
  0x92   : > { %608 = sbr.rel (%p605_p2) target bundleno = 382 (0x17e), region = 84  ;;  %s639_s29 = sand.u32 (!%p605_p2), 1, %s1743_s9  }
  0x93   : > { %s1606_s25 = smul.u32 (!%p605_p2), 48, %s611_s28  ;;  %s1325_s7 = sshll.u32 (!%p605_p2), %s639_s29, 4 }
  0x94   : > { %s1607_s3 = smul.u32 (!%p605_p2), 384, %s618_s20  ;;  %s2120_s24 = scalar_lea.vmem (!%p605_p2), [#allocation4], %s1325_s7 }
  0x95   : > { %s2116_s8 = scalar_lea.vmem (!%p605_p2), [#allocation2], %s1606_s25  ;;  %p1326_p3 = scmp.ne.s32.totalorder (!%p605_p2), %s1767_s15, 0 }
  0x96   : > { %s2118_s23 = scalar_lea.vmem (!%p605_p2), [#allocation3], %s1607_s3 }
  0x97   : > { %649 = sbr.rel (%p1326_p3) target bundleno = 159 (0x9f), region = 96 }
  0x9c   : > { %v1785_v38 = vmov 0.0  }
  0x9d   : > { %650 = vst [vmem:[%s2120_s24] sm:$0xff] %v1785_v38 }
  0x9e   : > { %651 = vst [vmem:[%s2120_s24 + $0x8] sm:$0xff] %v1785_v38 }
  0x9f PF: > { %v1563_v39 = vld [vmem:[%s2118_s23 + $0x38] sm:$0xff]  ;;  %v1562_v43 = vld [vmem:[%s2118_s23 + $0x30] sm:$0xff]  ;;  %v1561_v47 = vld [vmem:[%s2118_s23 + $0x28] sm:$0xff]  ;;  %p1543_p4 = scmp.ne.s32.totalorder %s1767_s15, 2 }
  0xa0   : > { %v1571_v40 = vld [vmem:[%s2118_s23 + $0x78] sm:$0xff]  ;;  %1074 = vmatpush.bf16.msra.mxu0 %v1563_v39  ;;  %v1570_v44 = vld [vmem:[%s2118_s23 + $0x70] sm:$0xff]  ;;  %v1569_v48 = vld [vmem:[%s2118_s23 + $0x68] sm:$0xff] }
  0xa1   : > { %v1579_v41 = vld [vmem:[%s2118_s23 + $0xb8] sm:$0xff]  ;;  %1088 = vmatpush.bf16.msra.mxu1 %v1571_v40  ;;  %v1578_v45 = vld [vmem:[%s2118_s23 + $0xb0] sm:$0xff]  ;;  %v1577_v49 = vld [vmem:[%s2118_s23 + $0xa8] sm:$0xff] }
  0xa2   : > { %v1587_v42 = vld [vmem:[%s2118_s23 + $0xf8] sm:$0xff]  ;;  %1102 = vmatpush.bf16.msra.mxu2 %v1579_v41  ;;  %v1586_v46 = vld [vmem:[%s2118_s23 + $0xf0] sm:$0xff]  ;;  %v1585_v50 = vld [vmem:[%s2118_s23 + $0xe8] sm:$0xff] }
  0xa3   : > { %1116 = vmatpush.bf16.msra.mxu3 %v1587_v42  ;;  %v1560_v51 = vld [vmem:[%s2118_s23 + $0x20] sm:$0xff]  ;;  %v1559_v55 = vld [vmem:[%s2118_s23 + $0x18] sm:$0xff]  ;;  %v1558_v59 = vld [vmem:[%s2118_s23 + $0x10] sm:$0xff] }
  0xa4   : > { %1075 = vmatpush.bf16.msra.mxu0 %v1562_v43  ;;  %v1568_v52 = vld [vmem:[%s2118_s23 + $0x60] sm:$0xff]  ;;  %v1567_v56 = vld [vmem:[%s2118_s23 + $0x58] sm:$0xff]  ;;  %v1566_v60 = vld [vmem:[%s2118_s23 + $0x50] sm:$0xff] }
  0xa5   : > { %1089 = vmatpush.bf16.msra.mxu1 %v1570_v44  ;;  %v1576_v53 = vld [vmem:[%s2118_s23 + $0xa0] sm:$0xff]  ;;  %v1575_v57 = vld [vmem:[%s2118_s23 + $0x98] sm:$0xff]  ;;  %v1574_v61 = vld [vmem:[%s2118_s23 + $0x90] sm:$0xff] }
  0xa6   : > { %1103 = vmatpush.bf16.msra.mxu2 %v1578_v45  ;;  %v1584_v54 = vld [vmem:[%s2118_s23 + $0xe0] sm:$0xff]  ;;  %v1583_v58 = vld [vmem:[%s2118_s23 + $0xd8] sm:$0xff]  ;;  %v1582_v62 = vld [vmem:[%s2118_s23 + $0xd0] sm:$0xff] }
  0xa7   : > { %1117 = vmatpush.bf16.msra.mxu3 %v1586_v46  ;;  %v1557_v63 = vld [vmem:[%s2118_s23 + $0x8] sm:$0xff]  ;;  %v1556_v3 = vld [vmem:[%s2118_s23] sm:$0xff]  ;;  %v1595_v6 = vld [vmem:[%s2118_s23 + $0x138] sm:$0xff] }
  0xa8   : > { %1076 = vmatpush.bf16.msra.mxu0 %v1561_v47  ;;  %v1565_v0 = vld [vmem:[%s2118_s23 + $0x48] sm:$0xff]  ;;  %v1564_v4 = vld [vmem:[%s2118_s23 + $0x40] sm:$0xff]  ;;  %v1603_v11 = vld [vmem:[%s2118_s23 + $0x178] sm:$0xff] }
  0xa9   : > { %1090 = vmatpush.bf16.msra.mxu1 %v1569_v48  ;;  %v1573_v1 = vld [vmem:[%s2118_s23 + $0x88] sm:$0xff]  ;;  %v1572_v5 = vld [vmem:[%s2118_s23 + $0x80] sm:$0xff]  ;;  %v1594_v20 = vld [vmem:[%s2118_s23 + $0x130] sm:$0xff] }
  0xaa   : > { %1104 = vmatpush.bf16.msra.mxu2 %v1577_v49  ;;  %v1581_v2 = vld [vmem:[%s2118_s23 + $0xc8] sm:$0xff]  ;;  %v1329_v7 = vld [vmem:[%s2116_s8] sm:$0xf]  ;;  %v1550_v9 = vld [vmem:[%s2116_s8 + $0x4] sm:$0xf] }
  0xab   : > { %1118 = vmatpush.bf16.msra.mxu3 %v1585_v50  ;;  %v1553_v8 = vld [vmem:[%s2116_s8 + $0x14] sm:$0xf0]  ;;  %v1331_v10 = vld [vmem:[%s2116_s8 + $0x18] sm:$0xf0]  ;;  %v1337_v12 = vld [vmem:[%s2116_s8 + $0x8] sm:$0xf] }
  0xac   : > { %1077 = vmatpush.bf16.msra.mxu0 %v1560_v51  ;;  %v1554_v13 = vld [vmem:[%s2116_s8 + $0x1c] sm:$0xf0]  ;;  %v1551_v15 = vld [vmem:[%s2116_s8 + $0xc] sm:$0xf]  ;;  %v1339_v16 = vld [vmem:[%s2116_s8 + $0x20] sm:$0xf0]  ;;  %v1330_v17 = vor.u32 %v1553_v8, %v1329_v7  ;;  %v1334_v18 = vor.u32 %v1550_v9, %v1331_v10 }
  0xad   : > { %1091 = vmatpush.bf16.msra.mxu1 %v1568_v52  ;;  %v1580_v14 = vld [vmem:[%s2118_s23 + $0xc0] sm:$0xff]  ;;  %v1338_v19 = vor.u32 %v1554_v13, %v1337_v12  ;;  %v1342_v21 = vor.u32 %v1551_v15, %v1339_v16  ;;  %v1602_v22 = vld [vmem:[%s2118_s23 + $0x170] sm:$0xff]  ;;  %v1593_v23 = vld [vmem:[%s2118_s23 + $0x128] sm:$0xff] }
  0xae   : > { %1105 = vmatpush.bf16.msra.mxu2 %v1576_v53  ;;  %v1601_v24 = vld [vmem:[%s2118_s23 + $0x168] sm:$0xff]  ;;  %v1592_v25 = vld [vmem:[%s2118_s23 + $0x120] sm:$0xff]  ;;  %v1591_v27 = vld [vmem:[%s2118_s23 + $0x118] sm:$0xff] }
  0xaf   : > { %1119 = vmatpush.bf16.msra.mxu3 %v1584_v54  ;;  %v1600_v26 = vld [vmem:[%s2118_s23 + $0x160] sm:$0xff]  ;;  %v1599_v28 = vld [vmem:[%s2118_s23 + $0x158] sm:$0xff]  ;;  %v1590_v29 = vld [vmem:[%s2118_s23 + $0x110] sm:$0xff] }
  0xb0   : > { %1078 = vmatpush.bf16.msra.mxu0 %v1559_v55  ;;  %v1598_v30 = vld [vmem:[%s2118_s23 + $0x150] sm:$0xff]  ;;  %v1589_v31 = vld [vmem:[%s2118_s23 + $0x108] sm:$0xff]  ;;  %v1588_v33 = vld [vmem:[%s2118_s23 + $0x100] sm:$0xff] }
  0xb1   : > { %1092 = vmatpush.bf16.msra.mxu1 %v1567_v56  ;;  %v1597_v32 = vld [vmem:[%s2118_s23 + $0x148] sm:$0xff]  ;;  %v1345_v34 = vld [vmem:[%s2116_s8 + $0x10] sm:$0xf]  ;;  %v1552_v37 = vld [vmem:[%s2116_s8 + $0x14] sm:$0xf] }
  0xb2   : > { %1106 = vmatpush.bf16.msra.mxu2 %v1575_v57  ;;  %v1555_v35 = vld [vmem:[%s2116_s8 + $0x24] sm:$0xf0]  ;;  %v1596_v36 = vld [vmem:[%s2118_s23 + $0x140] sm:$0xff]  ;;  %v1347_v38 = vld [vmem:[%s2116_s8 + $0x28] sm:$0xf0] }
  0xb3   : > { %1120 = vmatpush.bf16.msra.mxu3 %v1583_v58  ;;  %v1346_v39 = vor.u32 %v1555_v35, %v1345_v34  ;;  %v1350_v40 = vor.u32 %v1552_v37, %v1347_v38  ;;  %v652_v55 = vld [vmem:[%s2120_s24] sm:$0xff] }
  0xb4   : > { %1079 = vmatpush.bf16.msra.mxu0 %v1558_v59 }
  0xb5   : > { %1093 = vmatpush.bf16.msra.mxu1 %v1566_v60 }
  0xb6   : > { %1107 = vmatpush.bf16.msra.mxu2 %v1574_v61 }
  0xb7   : > { %1121 = vmatpush.bf16.msra.mxu3 %v1582_v62 }
  0xb8   : > { %1080 = vmatpush.bf16.msra.mxu0 %v1557_v63  ;;  %v653_v63 = vld [vmem:[%s2120_s24 + $0x8] sm:$0xff] }
  0xb9   : > { %1094 = vmatpush.bf16.msra.mxu1 %v1565_v0 }
  0xba   : > { %1108 = vmatpush.bf16.msra.mxu2 %v1573_v1 }
  0xbb   : > { %1122 = vmatpush.bf16.msra.mxu3 %v1581_v2 }
  0xbc   : > { %1081 = vmatpush.bf16.msra.mxu0 %v1556_v3 }
  0xbd   : > { %1095 = vmatpush.bf16.msra.mxu1 %v1564_v4 }
  0xbe   : > { %1109 = vmatpush.bf16.msra.mxu2 %v1572_v5 }
  0xbf   : > { %1123 = vmatpush.bf16.msra.mxu3 %v1580_v14  ;;  %1082 = vmatmul.bf16.vlgmr.msra.gmra.mxu0 %v1330_v17 }
  0xc0   : > { %1130 = vmatpush.bf16.msrb.mxu0 %v1595_v6  ;;  %1096 = vmatmul.bf16.vlgmr.msra.gmra.mxu1 %v1334_v18 }
  0xc1   : > { %1144 = vmatpush.bf16.msrb.mxu1 %v1603_v11  ;;  %1110 = vmatmul.bf16.vlgmr.msra.gmra.mxu2 %v1338_v19 }
  0xc2   : > { %1124 = vmatmul.bf16.vlgmr.msra.gmra.mxu3 %v1342_v21 }
  0xc4   : > { %1131 = vmatpush.bf16.msrb.mxu0 %v1594_v20 }
  0xc5   : > { %1145 = vmatpush.bf16.msrb.mxu1 %v1602_v22 }
  0xc8   : > { %1132 = vmatpush.bf16.msrb.mxu0 %v1593_v23 }
  0xc9   : > { %1146 = vmatpush.bf16.msrb.mxu1 %v1601_v24 }
  0xcc   : > { %1133 = vmatpush.bf16.msrb.mxu0 %v1592_v25 }
  0xcd   : > { %1147 = vmatpush.bf16.msrb.mxu1 %v1600_v26 }
  0xd0   : > { %1134 = vmatpush.bf16.msrb.mxu0 %v1591_v27 }
  0xd1   : > { %1148 = vmatpush.bf16.msrb.mxu1 %v1599_v28 }
  0xd4   : > { %1135 = vmatpush.bf16.msrb.mxu0 %v1590_v29 }
  0xd5   : > { %1149 = vmatpush.bf16.msrb.mxu1 %v1598_v30 }
  0xd8   : > { %1136 = vmatpush.bf16.msrb.mxu0 %v1589_v31 }
  0xd9   : > { %1150 = vmatpush.bf16.msrb.mxu1 %v1597_v32 }
  0xdc   : > { %1137 = vmatpush.bf16.msrb.mxu0 %v1588_v33 }
  0xdd   : > { %1151 = vmatpush.bf16.msrb.mxu1 %v1596_v36 }
  0xdf   : > { %1138 = vmatmul.bf16.vlgmr.msrb.gmra.mxu0 %v1346_v39 }
  0xe0   : > { %1152 = vmatmul.bf16.vlgmr.msrb.gmra.mxu1 %v1350_v40 }
 0x13c   : > { %v1083_v41 = vpop.f32.mrf.mxu0 }
 0x13d   : > { %v1097_v42 = vpop.f32.mrf.mxu1 }
 0x13e   : > { %v1098_v44 = vadd.f32 %v1097_v42, %v1083_v41 }
 0x144   : > { %v1111_v43 = vpop.f32.mrf.mxu2  ;;  %v1085_v45 = vpop.f32.mrf.mxu0 }
 0x145   : > { %v1099_v46 = vpop.f32.mrf.mxu1  ;;  %v1125_v47 = vpop.f32.mrf.mxu3  ;;  %v1112_v48 = vadd.f32 %v1111_v43, %v1098_v44 }
 0x146   : > { %v1100_v50 = vadd.f32 %v1099_v46, %v1085_v45 }
 0x147   : > { %v1126_v49 = vadd.f32 %v1125_v47, %v1112_v48 }
 0x14c   : > { %v1113_v51 = vpop.f32.mrf.mxu2 }
 0x14d   : > { %v1114_v56 = vadd.f32 %v1113_v51, %v1100_v50  ;;  %v1127_v58 = vpop.f32.mrf.mxu3 }
 0x14f   : > { %v1128_v60 = vadd.f32 %v1127_v58, %v1114_v56 }
 0x15c   : > { %v1139_v52 = vpop.f32.mrf.mxu0 }
 0x15d   : > { %v1140_v53 = vadd.f32 %v1139_v52, %v1126_v49  ;;  %v1153_v54 = vpop.f32.mrf.mxu1 }
 0x15f   : > { %v1154_v57 = vadd.f32 %v1153_v54, %v1140_v53 }
 0x161   : > { %v1158_v59 = vadd.f32 %v1154_v57, %v652_v55 }
 0x163   : > { %1160 = vst [vmem:[%s2120_s24] sm:$0xff] %v1158_v59 }
 0x164   : > { %v1141_v61 = vpop.f32.mrf.mxu0 }
 0x165   : > { %v1142_v62 = vadd.f32 %v1141_v61, %v1128_v60  ;;  %v1155_v0 = vpop.f32.mrf.mxu1 }
 0x167   : > { %v1156_v1 = vadd.f32 %v1155_v0, %v1142_v62  ;;  %1165 = sbr.rel (%p1543_p4) target bundleno = 374 (0x176), region = 100 }
 0x169   : > { %v1159_v2 = vadd.f32 %v1156_v1, %v653_v63 }
 0x16b   : > { %1161 = vst [vmem:[%s2120_s24 + $0x8] sm:$0xff] %v1159_v2 }
 0x16c   : > { %v1166_v3 = vld [vmem:[%s2120_s24] sm:$0xff] }
 0x16d   : > { %v1168_v5 = vmax.f32 %v1166_v3, 0.0 }
 0x16f   : > { %1170 = vst [vmem:[%s2120_s24] sm:$0xff] %v1168_v5 }
 0x172   : > { %v1167_v4 = vld [vmem:[%s2120_s24 + $0x8] sm:$0xff] }
 0x173   : > { %v1169_v6 = vmax.f32 %v1167_v4, 0.0 }
 0x175   : > { %1171 = vst [vmem:[%s2120_s24 + $0x8] sm:$0xff] %v1169_v6 }
 0x176 PF: > { %1178 = sbr.rel (!%p1895_p12) target bundleno = 382 (0x17e), region = 104  ;;  %s1545_s9 = sshll.u32 (%p1895_p12), %s1771_s16, 3  ;;  %v1214_v7 = vld [vmem:[%s2120_s24] sm:$0xff] (%p1895_p12) }
 0x177   : > { %s1183_s15 = scalar_lea.vmem (%p1895_p12), %s2237_s2, %s1545_s9 }
 0x178   : > { %1215 = vst [vmem:[%s1183_s15] sm:$0xff] (%p1895_p12), %v1214_v7 }
 0x17c   : > { %v1216_v8 = vld [vmem:[%s2120_s24 + $0x8] sm:$0xff] }
 0x17d   : > { %1217 = vst [vmem:[%s1183_s15 + $0x10] sm:$0xff] %v1216_v8 }
 0x17e PF: > { %s12_s19 = sadd.s32 1, %s1783_s19   ;;  %s2241_s9 = smov %s1747_s10 }
 0x17f   : > { %p9_p5 = scmp.ge.s32.totalorder %s12_s19, 8   ;;  %s2242_s10 = smov %s1893_s5 }
 0x180   : > { %s2243_s11 = smov %s1755_s12  ;;  %s2244_s12 = smov %s1890_s4 }
 0x181   : > { %s2245_s13 = smov %s1763_s14  ;;  %s2246_s14 = smov %s1876_s27 }
 0x182   : > { %s2247_s15 = smov %s1775_s17  ;;  %s2248_s16 = smov %s1779_s18 }
 0x183   : > { %s2249_s17 = smov %s2252_s21  ;;  %s2250_s18 = smov %s2256_s22 }
 0x184   :  { %11 = sbr.rel (!%p9_p5) target bundleno = 6 (0x6), region = 181 }

// kernel: forward.38
= control target key start
LH: loop header
LB: loop body
LE: loop exit
PB: predicated region body
PF: predicated region fallthrough
CT: control target
= control target key end

     0   :  { %s2318_s9 = smov 0   ;;  %s2320_s10 = smov 0   ;;  %s2932_s0 = inlined_call_operand.vmem [shape: bf16[16,2304], index: 0, kind: input, shape index: {}]   ;;  %s2933_s1 = inlined_call_operand.vmem [shape: bf16[2304,512], index: 1, kind: input, shape index: {}]   ;;  %s2934_s2 = inlined_call_operand.vmem [shape: f32[16,512], index: 2, kind: output, shape index: {}]  }
   0x1   :  { %s2322_s11 = smov 0   ;;  %s2324_s12 = smov 0  }
   0x2   :  { %s2326_s13 = smov 0   ;;  %s2328_s14 = smov 0  }
   0x3   :  { %s2330_s15 = smov 0   ;;  %s2332_s16 = smov 0  }
   0x4   :  { %s2334_s17 = smov 0   ;;  %s2336_s18 = smov 0  }
   0x5   :  { %s2338_s19 = smov 0  }
   0x6 LB: > { %s1591_s20 = sadd.s32 4294967295, %s2300_s19   ;;  %s24_s21 = sadd.s32 1, %s2292_s17  ;;  %s2300_s19 = sphi %s2338_s19, %s12_s19   ;;  %s2296_s18 = sphi %s2336_s18, %s2947_s18   ;;  %s2292_s17 = sphi %s2334_s17, %s2946_s17   ;;  %s2288_s16 = sphi %s2332_s16, %s2945_s16   ;;  %s2284_s15 = sphi %s2330_s15, %s2944_s15   ;;  %s2280_s14 = sphi %s2328_s14, %s2943_s14   ;;  %s2276_s13 = sphi %s2326_s13, %s2942_s13   ;;  %s2272_s12 = sphi %s2324_s12, %s2941_s12   ;;  %s2268_s11 = sphi %s2322_s11, %s2940_s11   ;;  %s2264_s10 = sphi %s2320_s10, %s2939_s10   ;;  %s2260_s9 = sphi %s2318_s9, %s2938_s9  }
   0x7   : > { %p25_p0 = scmp.ge.s32.totalorder %s24_s21, 3  ;;  %s27_s22 = sadd.s32 1, %s2296_s18 }
   0x8   : > { %s40_s23 = sadd.s32 1, %s2280_s14  ;;  %p47_p1 = scmp.ne.s32.totalorder %s2280_s14, %s2276_s13 }
   0x9   : > { %s2949_s21 = smov (%p25_p0, %s24_s21), 0  ;;  %s2951_s22 = smov (!%p25_p0, %s27_s22), %s2296_s18 }
   0xa   : > { %s36_s24 = ssub.s32 %s2292_s17, %s2949_s21  ;;  %p48_p2 = scmp.eq.s32.totalorder %s2300_s19, 0 }
   0xb   : > { %p29_p3 = scmp.ge.s32.totalorder %s2951_s22, 2  ;;  %p38_p4 = scmp.eq.s32.totalorder %s36_s24, 0 }
   0xc   : > { %p2385_p5 = por %p48_p2, %p47_p1  ;;  %s68_s26 = sadd.s32 1, %s2272_s12 }
   0xd   : > { %s2953_s22 = smov (%p29_p3, %s2951_s22), 0  ;;  %p75_p6 = scmp.ne.s32.totalorder %s2272_s12, %s2268_s11 }
   0xe   : > { %s2393_s27 = scalar_select %p38_p4, %s2280_s14, %s40_s23  }
   0xf   : > { %s64_s28 = ssub.s32 %s2296_s18, %s2953_s22  ;;  %p2399_p9 = por %p75_p6, %p48_p2 }
  0x10   : > { %s65_s29 = sor.u32 %s64_s28, %s36_s24  ;;  %p94_p7 = scmp.eq.s32.totalorder %s64_s28, 0 }
  0x11   : > { %p66_p8 = scmp.eq.s32.totalorder %s65_s29, 0  ;;  %s96_s3 = sadd.s32 1, %s2264_s10 }
  0x12   : > { %p106_p10 = scmp.ne.s32.totalorder %s2264_s10, %s2260_s9  ;;  %p107_p11 = scmp.eq.s32.totalorder %s1591_s20, 5 }
  0x13   : > { %s2407_s4 = scalar_select %p66_p8, %s2272_s12, %s68_s26  }
  0x14   : > { %s2410_s5 = scalar_select %p94_p7, %s2264_s10, %s96_s3  }
  0x15   : > { %p2412_p12 = por %p107_p11, %p106_p10  ;;  %p1594_p13 = scmp.ge.s32.totalorder %s2300_s19, 6 }
  0x17   : > { %129 = sbr.rel (%p1594_p13) target bundleno = 143 (0x8f), region = 16 }
  0x1c   : > { %132 = sbr.rel (!%p2385_p5) target bundleno = 39 (0x27), region = 20  ;;  %s134_s7 = sand.u32 (%p2385_p5), 1, %s2280_s14  }
  0x1d   : > { %s2016_s8 = smul.u32 (%p2385_p5), 24, %s2292_s17 }
  0x1e   : > { %s2121_s23 = smul.u32 (%p2385_p5), 48, %s134_s7 }
  0x1f   : > { %s142_s28 = scalar_lea.vmem (%p2385_p5), %s2932_s0, %s2016_s8 }
  0x20   : > { %v155_v0 = vld [vmem:[%s142_s28] sm:$0xff] (%p2385_p5)  ;;  %v157_v1 = vld [vmem:[%s142_s28 + $0x8] sm:$0xff] (%p2385_p5)  ;;  %v159_v2 = vld [vmem:[%s142_s28 + $0x10] sm:$0xff] (%p2385_p5)  ;;  %s136_s20 = scalar_lea.vmem (%p2385_p5), [#allocation2], %s2121_s23 }
  0x21   : > { %156 = vst [vmem:[%s136_s20] sm:$0xff] %v155_v0  ;;  %v161_v3 = vld [vmem:[%s142_s28 + $0x48] sm:$0xff]  ;;  %v163_v4 = vld [vmem:[%s142_s28 + $0x50] sm:$0xff]  ;;  %v165_v5 = vld [vmem:[%s142_s28 + $0x58] sm:$0xff] }
  0x22   : > { %158 = vst [vmem:[%s136_s20 + $0x8] sm:$0xff] %v157_v1 }
  0x23   : > { %160 = vst [vmem:[%s136_s20 + $0x10] sm:$0xff] %v159_v2 }
  0x24   : > { %162 = vst [vmem:[%s136_s20 + $0x18] sm:$0xff] %v161_v3 }
  0x25   : > { %164 = vst [vmem:[%s136_s20 + $0x20] sm:$0xff] %v163_v4 }
  0x26   : > { %166 = vst [vmem:[%s136_s20 + $0x28] sm:$0xff] %v165_v5 }
  0x27 PF: > { %172 = sbr.rel (!%p2399_p9) target bundleno = 143 (0x8f), region = 43  ;;  %s174_s25 = sand.u32 (%p2399_p9), 1, %s2272_s12  }
  0x28   : > { %s2122_s29 = smul.u32 (%p2399_p9), 768, %s174_s25  ;;  %s1596_s3 = sshll.u32 (%p2399_p9), %s2296_s18, 1 }
  0x29   : > { %s2017_s7 = smul.u32 (%p2399_p9), 384, %s2292_s17 }
  0x2a   : > { %s2437_s30 = scalar_lea.vmem (%p2399_p9), [#allocation3], %s2122_s29 }
  0x2b   : > { %s180_s8 = sadd.s32 (%p2399_p9), %s2017_s7, %s1596_s3 }
  0x2c   : > { %s1598_s23 = sshll.u32 %s180_s8, 2 }
  0x2d   : > { %s2432_s28 = scalar_lea.vmem %s2933_s1, %s1598_s23 }
  0x2e   : > { %v401_v6 = vld [vmem:[%s2432_s28] sm:$0xff]  ;;  %v403_v7 = vld [vmem:[%s2432_s28 + $0x10] sm:$0xff] }
  0x2f   : > { %v405_v8 = vld [vmem:[%s2432_s28 + $0x20] sm:$0xff]  ;;  %402 = vst [vmem:[%s2437_s30] sm:$0xff] %v401_v6  ;;  %v407_v9 = vld [vmem:[%s2432_s28 + $0x30] sm:$0xff] }
  0x30   : > { %404 = vst [vmem:[%s2437_s30 + $0x8] sm:$0xff] %v403_v7  ;;  %v409_v10 = vld [vmem:[%s2432_s28 + $0x40] sm:$0xff]  ;;  %v411_v11 = vld [vmem:[%s2432_s28 + $0x50] sm:$0xff] }
  0x31   : > { %406 = vst [vmem:[%s2437_s30 + $0x10] sm:$0xff] %v405_v8  ;;  %v413_v12 = vld [vmem:[%s2432_s28 + $0x60] sm:$0xff]  ;;  %v415_v13 = vld [vmem:[%s2432_s28 + $0x70] sm:$0xff] }
  0x32   : > { %408 = vst [vmem:[%s2437_s30 + $0x18] sm:$0xff] %v407_v9  ;;  %v417_v14 = vld [vmem:[%s2432_s28 + $0x80] sm:$0xff]  ;;  %v419_v15 = vld [vmem:[%s2432_s28 + $0x90] sm:$0xff] }
  0x33   : > { %410 = vst [vmem:[%s2437_s30 + $0x20] sm:$0xff] %v409_v10  ;;  %v421_v16 = vld [vmem:[%s2432_s28 + $0xa0] sm:$0xff]  ;;  %v423_v17 = vld [vmem:[%s2432_s28 + $0xb0] sm:$0xff] }
  0x34   : > { %412 = vst [vmem:[%s2437_s30 + $0x28] sm:$0xff] %v411_v11  ;;  %v425_v18 = vld [vmem:[%s2432_s28 + $0xc0] sm:$0xff]  ;;  %v427_v19 = vld [vmem:[%s2432_s28 + $0xd0] sm:$0xff] }
  0x35   : > { %414 = vst [vmem:[%s2437_s30 + $0x30] sm:$0xff] %v413_v12  ;;  %v429_v20 = vld [vmem:[%s2432_s28 + $0xe0] sm:$0xff]  ;;  %v431_v21 = vld [vmem:[%s2432_s28 + $0xf0] sm:$0xff] }
  0x36   : > { %416 = vst [vmem:[%s2437_s30 + $0x38] sm:$0xff] %v415_v13  ;;  %v433_v22 = vld [vmem:[%s2432_s28 + $0x100] sm:$0xff]  ;;  %v435_v23 = vld [vmem:[%s2432_s28 + $0x110] sm:$0xff] }
  0x37   : > { %418 = vst [vmem:[%s2437_s30 + $0x40] sm:$0xff] %v417_v14  ;;  %v437_v24 = vld [vmem:[%s2432_s28 + $0x120] sm:$0xff]  ;;  %v439_v25 = vld [vmem:[%s2432_s28 + $0x130] sm:$0xff] }
  0x38   : > { %420 = vst [vmem:[%s2437_s30 + $0x48] sm:$0xff] %v419_v15  ;;  %v441_v26 = vld [vmem:[%s2432_s28 + $0x140] sm:$0xff]  ;;  %v443_v27 = vld [vmem:[%s2432_s28 + $0x150] sm:$0xff] }
  0x39   : > { %422 = vst [vmem:[%s2437_s30 + $0x50] sm:$0xff] %v421_v16  ;;  %v445_v28 = vld [vmem:[%s2432_s28 + $0x160] sm:$0xff]  ;;  %v447_v29 = vld [vmem:[%s2432_s28 + $0x170] sm:$0xff] }
  0x3a   : > { %424 = vst [vmem:[%s2437_s30 + $0x58] sm:$0xff] %v423_v17  ;;  %v449_v30 = vld [vmem:[%s2432_s28 + $0x180] sm:$0xff]  ;;  %v451_v31 = vld [vmem:[%s2432_s28 + $0x190] sm:$0xff] }
  0x3b   : > { %426 = vst [vmem:[%s2437_s30 + $0x60] sm:$0xff] %v425_v18  ;;  %v453_v32 = vld [vmem:[%s2432_s28 + $0x1a0] sm:$0xff]  ;;  %v455_v33 = vld [vmem:[%s2432_s28 + $0x1b0] sm:$0xff] }
  0x3c   : > { %428 = vst [vmem:[%s2437_s30 + $0x68] sm:$0xff] %v427_v19  ;;  %v457_v34 = vld [vmem:[%s2432_s28 + $0x1c0] sm:$0xff]  ;;  %v459_v35 = vld [vmem:[%s2432_s28 + $0x1d0] sm:$0xff] }
  0x3d   : > { %430 = vst [vmem:[%s2437_s30 + $0x70] sm:$0xff] %v429_v20  ;;  %v461_v36 = vld [vmem:[%s2432_s28 + $0x1e0] sm:$0xff]  ;;  %v463_v37 = vld [vmem:[%s2432_s28 + $0x1f0] sm:$0xff] }
  0x3e   : > { %432 = vst [vmem:[%s2437_s30 + $0x78] sm:$0xff] %v431_v21  ;;  %v465_v38 = vld [vmem:[%s2432_s28 + $0x200] sm:$0xff]  ;;  %v467_v39 = vld [vmem:[%s2432_s28 + $0x210] sm:$0xff] }
  0x3f   : > { %434 = vst [vmem:[%s2437_s30 + $0x80] sm:$0xff] %v433_v22  ;;  %v469_v40 = vld [vmem:[%s2432_s28 + $0x220] sm:$0xff]  ;;  %v471_v41 = vld [vmem:[%s2432_s28 + $0x230] sm:$0xff] }
  0x40   : > { %436 = vst [vmem:[%s2437_s30 + $0x88] sm:$0xff] %v435_v23  ;;  %v473_v42 = vld [vmem:[%s2432_s28 + $0x240] sm:$0xff]  ;;  %v475_v43 = vld [vmem:[%s2432_s28 + $0x250] sm:$0xff] }
  0x41   : > { %438 = vst [vmem:[%s2437_s30 + $0x90] sm:$0xff] %v437_v24  ;;  %v477_v44 = vld [vmem:[%s2432_s28 + $0x260] sm:$0xff]  ;;  %v479_v45 = vld [vmem:[%s2432_s28 + $0x270] sm:$0xff] }
  0x42   : > { %440 = vst [vmem:[%s2437_s30 + $0x98] sm:$0xff] %v439_v25  ;;  %v481_v46 = vld [vmem:[%s2432_s28 + $0x280] sm:$0xff]  ;;  %v483_v47 = vld [vmem:[%s2432_s28 + $0x290] sm:$0xff] }
  0x43   : > { %442 = vst [vmem:[%s2437_s30 + $0xa0] sm:$0xff] %v441_v26  ;;  %v485_v48 = vld [vmem:[%s2432_s28 + $0x2a0] sm:$0xff]  ;;  %v487_v49 = vld [vmem:[%s2432_s28 + $0x2b0] sm:$0xff] }
  0x44   : > { %444 = vst [vmem:[%s2437_s30 + $0xa8] sm:$0xff] %v443_v27  ;;  %v489_v50 = vld [vmem:[%s2432_s28 + $0x2c0] sm:$0xff]  ;;  %v491_v51 = vld [vmem:[%s2432_s28 + $0x2d0] sm:$0xff] }
  0x45   : > { %446 = vst [vmem:[%s2437_s30 + $0xb0] sm:$0xff] %v445_v28  ;;  %v493_v52 = vld [vmem:[%s2432_s28 + $0x2e0] sm:$0xff]  ;;  %v495_v53 = vld [vmem:[%s2432_s28 + $0x2f0] sm:$0xff] }
  0x46   : > { %448 = vst [vmem:[%s2437_s30 + $0xb8] sm:$0xff] %v447_v29  ;;  %v497_v54 = vld [vmem:[%s2432_s28 + $0x300] sm:$0xff]  ;;  %v499_v55 = vld [vmem:[%s2432_s28 + $0x310] sm:$0xff] }
  0x47   : > { %450 = vst [vmem:[%s2437_s30 + $0xc0] sm:$0xff] %v449_v30  ;;  %v501_v56 = vld [vmem:[%s2432_s28 + $0x320] sm:$0xff]  ;;  %v503_v57 = vld [vmem:[%s2432_s28 + $0x330] sm:$0xff] }
  0x48   : > { %452 = vst [vmem:[%s2437_s30 + $0xc8] sm:$0xff] %v451_v31  ;;  %v505_v58 = vld [vmem:[%s2432_s28 + $0x340] sm:$0xff]  ;;  %v507_v59 = vld [vmem:[%s2432_s28 + $0x350] sm:$0xff] }
  0x49   : > { %454 = vst [vmem:[%s2437_s30 + $0xd0] sm:$0xff] %v453_v32  ;;  %v509_v60 = vld [vmem:[%s2432_s28 + $0x360] sm:$0xff]  ;;  %v511_v61 = vld [vmem:[%s2432_s28 + $0x370] sm:$0xff] }
  0x4a   : > { %456 = vst [vmem:[%s2437_s30 + $0xd8] sm:$0xff] %v455_v33  ;;  %v513_v62 = vld [vmem:[%s2432_s28 + $0x380] sm:$0xff]  ;;  %v515_v63 = vld [vmem:[%s2432_s28 + $0x390] sm:$0xff] }
  0x4b   : > { %458 = vst [vmem:[%s2437_s30 + $0xe0] sm:$0xff] %v457_v34  ;;  %v517_v0 = vld [vmem:[%s2432_s28 + $0x3a0] sm:$0xff]  ;;  %v519_v1 = vld [vmem:[%s2432_s28 + $0x3b0] sm:$0xff] }
  0x4c   : > { %460 = vst [vmem:[%s2437_s30 + $0xe8] sm:$0xff] %v459_v35  ;;  %v521_v2 = vld [vmem:[%s2432_s28 + $0x3c0] sm:$0xff]  ;;  %v523_v3 = vld [vmem:[%s2432_s28 + $0x3d0] sm:$0xff] }
  0x4d   : > { %462 = vst [vmem:[%s2437_s30 + $0xf0] sm:$0xff] %v461_v36  ;;  %v525_v4 = vld [vmem:[%s2432_s28 + $0x3e0] sm:$0xff]  ;;  %v527_v5 = vld [vmem:[%s2432_s28 + $0x3f0] sm:$0xff] }
  0x4e   : > { %464 = vst [vmem:[%s2437_s30 + $0xf8] sm:$0xff] %v463_v37  ;;  %v529_v6 = vld [vmem:[%s2432_s28 + $0x400] sm:$0xff]  ;;  %v531_v7 = vld [vmem:[%s2432_s28 + $0x410] sm:$0xff] }
  0x4f   : > { %466 = vst [vmem:[%s2437_s30 + $0x100] sm:$0xff] %v465_v38  ;;  %v533_v8 = vld [vmem:[%s2432_s28 + $0x420] sm:$0xff]  ;;  %v535_v9 = vld [vmem:[%s2432_s28 + $0x430] sm:$0xff] }
  0x50   : > { %468 = vst [vmem:[%s2437_s30 + $0x108] sm:$0xff] %v467_v39  ;;  %v537_v10 = vld [vmem:[%s2432_s28 + $0x440] sm:$0xff]  ;;  %v539_v11 = vld [vmem:[%s2432_s28 + $0x450] sm:$0xff] }
  0x51   : > { %470 = vst [vmem:[%s2437_s30 + $0x110] sm:$0xff] %v469_v40  ;;  %v541_v12 = vld [vmem:[%s2432_s28 + $0x460] sm:$0xff]  ;;  %v543_v13 = vld [vmem:[%s2432_s28 + $0x470] sm:$0xff] }
  0x52   : > { %472 = vst [vmem:[%s2437_s30 + $0x118] sm:$0xff] %v471_v41  ;;  %v545_v14 = vld [vmem:[%s2432_s28 + $0x480] sm:$0xff]  ;;  %v547_v15 = vld [vmem:[%s2432_s28 + $0x490] sm:$0xff] }
  0x53   : > { %474 = vst [vmem:[%s2437_s30 + $0x120] sm:$0xff] %v473_v42  ;;  %v549_v16 = vld [vmem:[%s2432_s28 + $0x4a0] sm:$0xff]  ;;  %v551_v17 = vld [vmem:[%s2432_s28 + $0x4b0] sm:$0xff] }
  0x54   : > { %476 = vst [vmem:[%s2437_s30 + $0x128] sm:$0xff] %v475_v43  ;;  %v553_v18 = vld [vmem:[%s2432_s28 + $0x4c0] sm:$0xff]  ;;  %v555_v19 = vld [vmem:[%s2432_s28 + $0x4d0] sm:$0xff] }
  0x55   : > { %478 = vst [vmem:[%s2437_s30 + $0x130] sm:$0xff] %v477_v44  ;;  %v557_v20 = vld [vmem:[%s2432_s28 + $0x4e0] sm:$0xff]  ;;  %v559_v21 = vld [vmem:[%s2432_s28 + $0x4f0] sm:$0xff] }
  0x56   : > { %480 = vst [vmem:[%s2437_s30 + $0x138] sm:$0xff] %v479_v45  ;;  %v561_v22 = vld [vmem:[%s2432_s28 + $0x500] sm:$0xff]  ;;  %v563_v23 = vld [vmem:[%s2432_s28 + $0x510] sm:$0xff] }
  0x57   : > { %482 = vst [vmem:[%s2437_s30 + $0x140] sm:$0xff] %v481_v46  ;;  %v565_v24 = vld [vmem:[%s2432_s28 + $0x520] sm:$0xff]  ;;  %v567_v25 = vld [vmem:[%s2432_s28 + $0x530] sm:$0xff] }
  0x58   : > { %484 = vst [vmem:[%s2437_s30 + $0x148] sm:$0xff] %v483_v47  ;;  %v569_v26 = vld [vmem:[%s2432_s28 + $0x540] sm:$0xff]  ;;  %v571_v27 = vld [vmem:[%s2432_s28 + $0x550] sm:$0xff] }
  0x59   : > { %486 = vst [vmem:[%s2437_s30 + $0x150] sm:$0xff] %v485_v48  ;;  %v573_v28 = vld [vmem:[%s2432_s28 + $0x560] sm:$0xff]  ;;  %v575_v29 = vld [vmem:[%s2432_s28 + $0x570] sm:$0xff] }
  0x5a   : > { %488 = vst [vmem:[%s2437_s30 + $0x158] sm:$0xff] %v487_v49  ;;  %v577_v30 = vld [vmem:[%s2432_s28 + $0x580] sm:$0xff]  ;;  %v579_v31 = vld [vmem:[%s2432_s28 + $0x590] sm:$0xff] }
  0x5b   : > { %490 = vst [vmem:[%s2437_s30 + $0x160] sm:$0xff] %v489_v50  ;;  %v581_v32 = vld [vmem:[%s2432_s28 + $0x5a0] sm:$0xff]  ;;  %v583_v33 = vld [vmem:[%s2432_s28 + $0x5b0] sm:$0xff] }
  0x5c   : > { %492 = vst [vmem:[%s2437_s30 + $0x168] sm:$0xff] %v491_v51  ;;  %v585_v34 = vld [vmem:[%s2432_s28 + $0x5c0] sm:$0xff]  ;;  %v587_v35 = vld [vmem:[%s2432_s28 + $0x5d0] sm:$0xff] }
  0x5d   : > { %494 = vst [vmem:[%s2437_s30 + $0x170] sm:$0xff] %v493_v52  ;;  %v589_v36 = vld [vmem:[%s2432_s28 + $0x5e0] sm:$0xff]  ;;  %v591_v37 = vld [vmem:[%s2432_s28 + $0x5f0] sm:$0xff] }
  0x5e   : > { %496 = vst [vmem:[%s2437_s30 + $0x178] sm:$0xff] %v495_v53 }
  0x5f   : > { %498 = vst [vmem:[%s2437_s30 + $0x180] sm:$0xff] %v497_v54 }
  0x60   : > { %500 = vst [vmem:[%s2437_s30 + $0x188] sm:$0xff] %v499_v55 }
  0x61   : > { %502 = vst [vmem:[%s2437_s30 + $0x190] sm:$0xff] %v501_v56 }
  0x62   : > { %504 = vst [vmem:[%s2437_s30 + $0x198] sm:$0xff] %v503_v57 }
  0x63   : > { %506 = vst [vmem:[%s2437_s30 + $0x1a0] sm:$0xff] %v505_v58 }
  0x64   : > { %508 = vst [vmem:[%s2437_s30 + $0x1a8] sm:$0xff] %v507_v59 }
  0x65   : > { %510 = vst [vmem:[%s2437_s30 + $0x1b0] sm:$0xff] %v509_v60 }
  0x66   : > { %512 = vst [vmem:[%s2437_s30 + $0x1b8] sm:$0xff] %v511_v61 }
  0x67   : > { %514 = vst [vmem:[%s2437_s30 + $0x1c0] sm:$0xff] %v513_v62 }
  0x68   : > { %516 = vst [vmem:[%s2437_s30 + $0x1c8] sm:$0xff] %v515_v63 }
  0x69   : > { %518 = vst [vmem:[%s2437_s30 + $0x1d0] sm:$0xff] %v517_v0 }
  0x6a   : > { %520 = vst [vmem:[%s2437_s30 + $0x1d8] sm:$0xff] %v519_v1 }
  0x6b   : > { %522 = vst [vmem:[%s2437_s30 + $0x1e0] sm:$0xff] %v521_v2 }
  0x6c   : > { %524 = vst [vmem:[%s2437_s30 + $0x1e8] sm:$0xff] %v523_v3 }
  0x6d   : > { %526 = vst [vmem:[%s2437_s30 + $0x1f0] sm:$0xff] %v525_v4 }
  0x6e   : > { %528 = vst [vmem:[%s2437_s30 + $0x1f8] sm:$0xff] %v527_v5 }
  0x6f   : > { %530 = vst [vmem:[%s2437_s30 + $0x200] sm:$0xff] %v529_v6 }
  0x70   : > { %532 = vst [vmem:[%s2437_s30 + $0x208] sm:$0xff] %v531_v7 }
  0x71   : > { %534 = vst [vmem:[%s2437_s30 + $0x210] sm:$0xff] %v533_v8 }
  0x72   : > { %536 = vst [vmem:[%s2437_s30 + $0x218] sm:$0xff] %v535_v9 }
  0x73   : > { %538 = vst [vmem:[%s2437_s30 + $0x220] sm:$0xff] %v537_v10 }
  0x74   : > { %540 = vst [vmem:[%s2437_s30 + $0x228] sm:$0xff] %v539_v11 }
  0x75   : > { %542 = vst [vmem:[%s2437_s30 + $0x230] sm:$0xff] %v541_v12 }
  0x76   : > { %544 = vst [vmem:[%s2437_s30 + $0x238] sm:$0xff] %v543_v13 }
  0x77   : > { %546 = vst [vmem:[%s2437_s30 + $0x240] sm:$0xff] %v545_v14 }
  0x78   : > { %548 = vst [vmem:[%s2437_s30 + $0x248] sm:$0xff] %v547_v15 }
  0x79   : > { %550 = vst [vmem:[%s2437_s30 + $0x250] sm:$0xff] %v549_v16 }
  0x7a   : > { %552 = vst [vmem:[%s2437_s30 + $0x258] sm:$0xff] %v551_v17 }
  0x7b   : > { %554 = vst [vmem:[%s2437_s30 + $0x260] sm:$0xff] %v553_v18 }
  0x7c   : > { %556 = vst [vmem:[%s2437_s30 + $0x268] sm:$0xff] %v555_v19 }
  0x7d   : > { %558 = vst [vmem:[%s2437_s30 + $0x270] sm:$0xff] %v557_v20 }
  0x7e   : > { %560 = vst [vmem:[%s2437_s30 + $0x278] sm:$0xff] %v559_v21 }
  0x7f   : > { %562 = vst [vmem:[%s2437_s30 + $0x280] sm:$0xff] %v561_v22 }
  0x80   : > { %564 = vst [vmem:[%s2437_s30 + $0x288] sm:$0xff] %v563_v23 }
  0x81   : > { %566 = vst [vmem:[%s2437_s30 + $0x290] sm:$0xff] %v565_v24 }
  0x82   : > { %568 = vst [vmem:[%s2437_s30 + $0x298] sm:$0xff] %v567_v25 }
  0x83   : > { %570 = vst [vmem:[%s2437_s30 + $0x2a0] sm:$0xff] %v569_v26 }
  0x84   : > { %572 = vst [vmem:[%s2437_s30 + $0x2a8] sm:$0xff] %v571_v27 }
  0x85   : > { %574 = vst [vmem:[%s2437_s30 + $0x2b0] sm:$0xff] %v573_v28 }
  0x86   : > { %576 = vst [vmem:[%s2437_s30 + $0x2b8] sm:$0xff] %v575_v29 }
  0x87   : > { %578 = vst [vmem:[%s2437_s30 + $0x2c0] sm:$0xff] %v577_v30 }
  0x88   : > { %580 = vst [vmem:[%s2437_s30 + $0x2c8] sm:$0xff] %v579_v31 }
  0x89   : > { %582 = vst [vmem:[%s2437_s30 + $0x2d0] sm:$0xff] %v581_v32 }
  0x8a   : > { %584 = vst [vmem:[%s2437_s30 + $0x2d8] sm:$0xff] %v583_v33 }
  0x8b   : > { %586 = vst [vmem:[%s2437_s30 + $0x2e0] sm:$0xff] %v585_v34 }
  0x8c   : > { %588 = vst [vmem:[%s2437_s30 + $0x2e8] sm:$0xff] %v587_v35 }
  0x8d   : > { %590 = vst [vmem:[%s2437_s30 + $0x2f0] sm:$0xff] %v589_v36 }
  0x8e   : > { %592 = vst [vmem:[%s2437_s30 + $0x2f8] sm:$0xff] %v591_v37 }
  0x8f PF: > { %p1599_p0 = scmp.ge.s32.totalorder %s2300_s19, 1  ;;  %p597_p1 = scmp.lt.s32.totalorder %s2300_s19, 7 }
  0x91   : > { %p598_p2 = pnand %p1599_p0, %p597_p1 }
  0x92   : > { %s604_s20 = sand.u32 (!%p598_p2), 1, %s2276_s13   ;;  %s611_s25 = sand.u32 (!%p598_p2), 1, %s2268_s11  }
  0x93   : > { %601 = sbr.rel (%p598_p2) target bundleno = 427 (0x1ab), region = 81  ;;  %s632_s3 = sand.u32 (!%p598_p2), 1, %s2260_s9  }
  0x94   : > { %s2123_s29 = smul.u32 (!%p598_p2), 48, %s604_s20  ;;  %s1600_s8 = sshll.u32 (!%p598_p2), %s632_s3, 5 }
  0x95   : > { %s2124_s7 = smul.u32 (!%p598_p2), 768, %s611_s25  ;;  %s2637_s26 = scalar_lea.vmem (!%p598_p2), [#allocation4], %s1600_s8 }
  0x96   : > { %s2633_s23 = scalar_lea.vmem (!%p598_p2), [#allocation2], %s2123_s29  ;;  %p1601_p3 = scmp.ne.s32.totalorder (!%p598_p2), %s2284_s15, 0 }
  0x97   : > { %s2635_s24 = scalar_lea.vmem (!%p598_p2), [#allocation3], %s2124_s7 }
  0x98   : > { %644 = sbr.rel (%p1601_p3) target bundleno = 162 (0xa2), region = 93 }
  0x9d   : > { %v2302_v38 = vmov 0.0  }
  0x9e   : > { %645 = vst [vmem:[%s2637_s26] sm:$0xff] %v2302_v38 }
  0x9f   : > { %646 = vst [vmem:[%s2637_s26 + $0x8] sm:$0xff] %v2302_v38 }
  0xa0   : > { %647 = vst [vmem:[%s2637_s26 + $0x10] sm:$0xff] %v2302_v38 }
  0xa1   : > { %648 = vst [vmem:[%s2637_s26 + $0x18] sm:$0xff] %v2302_v38 }
  0xa2 PF: > { %v1684_v39 = vld [vmem:[%s2635_s24 + $0x70] sm:$0xf]  ;;  %v2039_v40 = vld [vmem:[%s2635_s24 + $0x74] sm:$0xf0]  ;;  %v1676_v50 = vld [vmem:[%s2635_s24 + $0x60] sm:$0xf] }
  0xa3   : > { %v1748_v41 = vld [vmem:[%s2635_s24 + $0xf0] sm:$0xf]  ;;  %v1685_v42 = vor.u32 %v2039_v40, %v1684_v39  ;;  %v2055_v43 = vld [vmem:[%s2635_s24 + $0xf4] sm:$0xf0]  ;;  %v2037_v52 = vld [vmem:[%s2635_s24 + $0x64] sm:$0xf0] }
  0xa4   : > { %v1812_v44 = vld [vmem:[%s2635_s24 + $0x170] sm:$0xf]  ;;  %v2071_v45 = vld [vmem:[%s2635_s24 + $0x174] sm:$0xf0]  ;;  %v1749_v46 = vor.u32 %v2055_v43, %v1748_v41  ;;  %v1740_v53 = vld [vmem:[%s2635_s24 + $0xe0] sm:$0xf]  ;;  %v1677_v55 = vor.u32 %v2037_v52, %v1676_v50 }
  0xa5   : > { %v1813_v47 = vor.u32 %v2071_v45, %v1812_v44  ;;  %v1876_v48 = vld [vmem:[%s2635_s24 + $0x1f0] sm:$0xf]  ;;  %v2087_v49 = vld [vmem:[%s2635_s24 + $0x1f4] sm:$0xf0]  ;;  %1265 = vmatpush.bf16.msra.mxu0 %v1685_v42  ;;  %v2053_v54 = vld [vmem:[%s2635_s24 + $0xe4] sm:$0xf0] }
  0xa6   : > { %v1877_v51 = vor.u32 %v2087_v49, %v1876_v48  ;;  %1279 = vmatpush.bf16.msra.mxu1 %v1749_v46  ;;  %v1741_v56 = vor.u32 %v2053_v54, %v1740_v53  ;;  %v1804_v57 = vld [vmem:[%s2635_s24 + $0x160] sm:$0xf]  ;;  %v2069_v58 = vld [vmem:[%s2635_s24 + $0x164] sm:$0xf0]  ;;  %v1668_v62 = vld [vmem:[%s2635_s24 + $0x50] sm:$0xf] }
  0xa7   : > { %1293 = vmatpush.bf16.msra.mxu2 %v1813_v47  ;;  %v1868_v59 = vld [vmem:[%s2635_s24 + $0x1e0] sm:$0xf]  ;;  %v1805_v60 = vor.u32 %v2069_v58, %v1804_v57  ;;  %v2085_v61 = vld [vmem:[%s2635_s24 + $0x1e4] sm:$0xf0]  ;;  %v2035_v63 = vld [vmem:[%s2635_s24 + $0x54] sm:$0xf0] }
  0xa8   : > { %1307 = vmatpush.bf16.msra.mxu3 %v1877_v51  ;;  %v1869_v0 = vor.u32 %v2085_v61, %v1868_v59  ;;  %v1732_v1 = vld [vmem:[%s2635_s24 + $0xd0] sm:$0xf]  ;;  %v2051_v2 = vld [vmem:[%s2635_s24 + $0xd4] sm:$0xf0]  ;;  %v1669_v4 = vor.u32 %v2035_v63, %v1668_v62  ;;  %v1660_v10 = vld [vmem:[%s2635_s24 + $0x40] sm:$0xf] }
  0xa9   : > { %v1796_v3 = vld [vmem:[%s2635_s24 + $0x150] sm:$0xf]  ;;  %1266 = vmatpush.bf16.msra.mxu0 %v1677_v55  ;;  %v2067_v5 = vld [vmem:[%s2635_s24 + $0x154] sm:$0xf0]  ;;  %v1733_v8 = vor.u32 %v2051_v2, %v1732_v1  ;;  %v2033_v11 = vld [vmem:[%s2635_s24 + $0x44] sm:$0xf0] }
  0xaa   : > { %v1860_v6 = vld [vmem:[%s2635_s24 + $0x1d0] sm:$0xf]  ;;  %v2083_v7 = vld [vmem:[%s2635_s24 + $0x1d4] sm:$0xf0]  ;;  %1280 = vmatpush.bf16.msra.mxu1 %v1741_v56  ;;  %v1797_v9 = vor.u32 %v2067_v5, %v1796_v3  ;;  %v1724_v12 = vld [vmem:[%s2635_s24 + $0xc0] sm:$0xf]  ;;  %v1661_v19 = vor.u32 %v2033_v11, %v1660_v10 }
  0xab   : > { %1294 = vmatpush.bf16.msra.mxu2 %v1805_v60  ;;  %v1861_v13 = vor.u32 %v2083_v7, %v1860_v6  ;;  %v2049_v14 = vld [vmem:[%s2635_s24 + $0xc4] sm:$0xf0]  ;;  %v1788_v15 = vld [vmem:[%s2635_s24 + $0x140] sm:$0xf]  ;;  %v1652_v22 = vld [vmem:[%s2635_s24 + $0x30] sm:$0xf] }
  0xac   : > { %1308 = vmatpush.bf16.msra.mxu3 %v1869_v0  ;;  %v2065_v16 = vld [vmem:[%s2635_s24 + $0x144] sm:$0xf0]  ;;  %v1852_v17 = vld [vmem:[%s2635_s24 + $0x1c0] sm:$0xf]  ;;  %v1725_v20 = vor.u32 %v2049_v14, %v1724_v12  ;;  %v2031_v23 = vld [vmem:[%s2635_s24 + $0x34] sm:$0xf0] }
  0xad   : > { %v2081_v18 = vld [vmem:[%s2635_s24 + $0x1c4] sm:$0xf0]  ;;  %1267 = vmatpush.bf16.msra.mxu0 %v1669_v4  ;;  %v1789_v21 = vor.u32 %v2065_v16, %v1788_v15  ;;  %v1716_v24 = vld [vmem:[%s2635_s24 + $0xb0] sm:$0xf]  ;;  %v2047_v26 = vld [vmem:[%s2635_s24 + $0xb4] sm:$0xf0]  ;;  %v1653_v31 = vor.u32 %v2031_v23, %v1652_v22 }
  0xae   : > { %1281 = vmatpush.bf16.msra.mxu1 %v1733_v8  ;;  %v1853_v25 = vor.u32 %v2081_v18, %v1852_v17  ;;  %v1780_v27 = vld [vmem:[%s2635_s24 + $0x130] sm:$0xf]  ;;  %v2063_v28 = vld [vmem:[%s2635_s24 + $0x134] sm:$0xf0]  ;;  %v1717_v32 = vor.u32 %v2047_v26, %v1716_v24  ;;  %v1644_v34 = vld [vmem:[%s2635_s24 + $0x20] sm:$0xf] }
  0xaf   : > { %1295 = vmatpush.bf16.msra.mxu2 %v1797_v9  ;;  %v1844_v29 = vld [vmem:[%s2635_s24 + $0x1b0] sm:$0xf]  ;;  %v2079_v30 = vld [vmem:[%s2635_s24 + $0x1b4] sm:$0xf0]  ;;  %v1781_v33 = vor.u32 %v2063_v28, %v1780_v27  ;;  %v2029_v35 = vld [vmem:[%s2635_s24 + $0x24] sm:$0xf0] }
  0xb0   : > { %1309 = vmatpush.bf16.msra.mxu3 %v1861_v13  ;;  %v1708_v36 = vld [vmem:[%s2635_s24 + $0xa0] sm:$0xf]  ;;  %v1845_v37 = vor.u32 %v2079_v30, %v1844_v29  ;;  %v2045_v38 = vld [vmem:[%s2635_s24 + $0xa4] sm:$0xf0]  ;;  %v1645_v43 = vor.u32 %v2029_v35, %v1644_v34  ;;  %v1636_v46 = vld [vmem:[%s2635_s24 + $0x10] sm:$0xf] }
  0xb1   : > { %1268 = vmatpush.bf16.msra.mxu0 %v1661_v19  ;;  %v1772_v39 = vld [vmem:[%s2635_s24 + $0x120] sm:$0xf]  ;;  %v2061_v40 = vld [vmem:[%s2635_s24 + $0x124] sm:$0xf0]  ;;  %v1709_v44 = vor.u32 %v2045_v38, %v1708_v36  ;;  %v2027_v47 = vld [vmem:[%s2635_s24 + $0x14] sm:$0xf0] }
  0xb2   : > { %1282 = vmatpush.bf16.msra.mxu1 %v1725_v20  ;;  %v1836_v41 = vld [vmem:[%s2635_s24 + $0x1a0] sm:$0xf]  ;;  %v2077_v42 = vld [vmem:[%s2635_s24 + $0x1a4] sm:$0xf0]  ;;  %v1773_v45 = vor.u32 %v2061_v40, %v1772_v39  ;;  %v1700_v48 = vld [vmem:[%s2635_s24 + $0x90] sm:$0xf]  ;;  %v1637_v55 = vor.u32 %v2027_v47, %v1636_v46 }
  0xb3   : > { %1296 = vmatpush.bf16.msra.mxu2 %v1789_v21  ;;  %v1837_v49 = vor.u32 %v2077_v42, %v1836_v41  ;;  %v2043_v50 = vld [vmem:[%s2635_s24 + $0x94] sm:$0xf0]  ;;  %v1764_v51 = vld [vmem:[%s2635_s24 + $0x110] sm:$0xf]  ;;  %v1628_v56 = vld [vmem:[%s2635_s24] sm:$0xf] }
  0xb4   : > { %1310 = vmatpush.bf16.msra.mxu3 %v1853_v25  ;;  %v2059_v52 = vld [vmem:[%s2635_s24 + $0x114] sm:$0xf0]  ;;  %v1828_v53 = vld [vmem:[%s2635_s24 + $0x190] sm:$0xf]  ;;  %v2025_v57 = vld [vmem:[%s2635_s24 + $0x4] sm:$0xf0]  ;;  %v1701_v58 = vor.u32 %v2043_v50, %v1700_v48 }
  0xb5   : > { %1269 = vmatpush.bf16.msra.mxu0 %v1653_v31  ;;  %v2075_v54 = vld [vmem:[%s2635_s24 + $0x194] sm:$0xf0]  ;;  %v1765_v59 = vor.u32 %v2059_v52, %v1764_v51  ;;  %v1692_v60 = vld [vmem:[%s2635_s24 + $0x80] sm:$0xf]  ;;  %v2041_v61 = vld [vmem:[%s2635_s24 + $0x84] sm:$0xf0]  ;;  %v1629_v6 = vor.u32 %v2025_v57, %v1628_v56 }
  0xb6   : > { %1283 = vmatpush.bf16.msra.mxu1 %v1717_v32  ;;  %v1756_v62 = vld [vmem:[%s2635_s24 + $0x100] sm:$0xf]  ;;  %v1829_v63 = vor.u32 %v2075_v54, %v1828_v53  ;;  %v2057_v0 = vld [vmem:[%s2635_s24 + $0x104] sm:$0xf0]  ;;  %v1940_v3 = vld [vmem:[%s2635_s24 + $0x270] sm:$0xf]  ;;  %v1693_v10 = vor.u32 %v2041_v61, %v1692_v60 }
  0xb7   : > { %1297 = vmatpush.bf16.msra.mxu2 %v1781_v33  ;;  %v1820_v1 = vld [vmem:[%s2635_s24 + $0x180] sm:$0xf]  ;;  %v2073_v2 = vld [vmem:[%s2635_s24 + $0x184] sm:$0xf0]  ;;  %v2103_v4 = vld [vmem:[%s2635_s24 + $0x274] sm:$0xf0]  ;;  %v1757_v11 = vor.u32 %v2057_v0, %v1756_v62 }
  0xb8   : > { %1311 = vmatpush.bf16.msra.mxu3 %v1845_v37  ;;  %v2004_v5 = vld [vmem:[%s2635_s24 + $0x2f0] sm:$0xf]  ;;  %v2119_v7 = vld [vmem:[%s2635_s24 + $0x2f4] sm:$0xf0]  ;;  %v2038_v8 = vld [vmem:[%s2635_s24 + $0x74] sm:$0xf]  ;;  %v1821_v14 = vor.u32 %v2073_v2, %v1820_v1  ;;  %v1941_v15 = vor.u32 %v2103_v4, %v1940_v3 }
  0xb9   : > { %1270 = vmatpush.bf16.msra.mxu0 %v1645_v43  ;;  %v1686_v9 = vld [vmem:[%s2635_s24 + $0x78] sm:$0xf0]  ;;  %v2054_v12 = vld [vmem:[%s2635_s24 + $0xf4] sm:$0xf]  ;;  %v1932_v16 = vld [vmem:[%s2635_s24 + $0x260] sm:$0xf]  ;;  %v2005_v18 = vor.u32 %v2119_v7, %v2004_v5 }
  0xba   : > { %1284 = vmatpush.bf16.msra.mxu1 %v1709_v44  ;;  %v1750_v13 = vld [vmem:[%s2635_s24 + $0xf8] sm:$0xf0]  ;;  %v2101_v17 = vld [vmem:[%s2635_s24 + $0x264] sm:$0xf0]  ;;  %v1689_v19 = vor.u32 %v2038_v8, %v1686_v9  ;;  %v1996_v20 = vld [vmem:[%s2635_s24 + $0x2e0] sm:$0xf] }
  0xbb   : > { %1298 = vmatpush.bf16.msra.mxu2 %v1773_v45  ;;  %v2117_v21 = vld [vmem:[%s2635_s24 + $0x2e4] sm:$0xf0]  ;;  %v2036_v22 = vld [vmem:[%s2635_s24 + $0x64] sm:$0xf]  ;;  %v1753_v23 = vor.u32 %v2054_v12, %v1750_v13  ;;  %v1678_v24 = vld [vmem:[%s2635_s24 + $0x68] sm:$0xf0]  ;;  %v1933_v30 = vor.u32 %v2101_v17, %v1932_v16 }
  0xbc   : > { %1312 = vmatpush.bf16.msra.mxu3 %v1837_v49  ;;  %v2052_v25 = vld [vmem:[%s2635_s24 + $0xe4] sm:$0xf]  ;;  %v1742_v26 = vld [vmem:[%s2635_s24 + $0xe8] sm:$0xf0]  ;;  %v1924_v27 = vld [vmem:[%s2635_s24 + $0x250] sm:$0xf]  ;;  %v1997_v35 = vor.u32 %v2117_v21, %v1996_v20  ;;  %v1681_v36 = vor.u32 %v2036_v22, %v1678_v24 }
  0xbd   : > { %1271 = vmatpush.bf16.msra.mxu0 %v1637_v55  ;;  %v1604_v28 = vld [vmem:[%s2633_s23] sm:$0xf]  ;;  %v2021_v29 = vld [vmem:[%s2633_s23 + $0x14] sm:$0xf0]  ;;  %v2034_v37 = vld [vmem:[%s2635_s24 + $0x54] sm:$0xf]  ;;  %v1745_v40 = vor.u32 %v2052_v25, %v1742_v26 }
  0xbe   : > { %1285 = vmatpush.bf16.msra.mxu1 %v1701_v58  ;;  %v2099_v31 = vld [vmem:[%s2635_s24 + $0x254] sm:$0xf0]  ;;  %v1988_v32 = vld [vmem:[%s2635_s24 + $0x2d0] sm:$0xf]  ;;  %v2730_v34 = vor.u32 %v2021_v29, %v1604_v28  ;;  %v1670_v38 = vld [vmem:[%s2635_s24 + $0x58] sm:$0xf0] }
  0xbf   : > { %1299 = vmatpush.bf16.msra.mxu2 %v1765_v59  ;;  %v2115_v33 = vld [vmem:[%s2635_s24 + $0x2d4] sm:$0xf0]  ;;  %v2050_v39 = vld [vmem:[%s2635_s24 + $0xd4] sm:$0xf]  ;;  %v1734_v41 = vld [vmem:[%s2635_s24 + $0xd8] sm:$0xf0]  ;;  %v1925_v48 = vor.u32 %v2099_v31, %v1924_v27  ;;  %v1673_v52 = vor.u32 %v2034_v37, %v1670_v38 }
  0xc0   : > { %1313 = vmatpush.bf16.msra.mxu3 %v1829_v63  ;;  %v2018_v42 = vld [vmem:[%s2633_s23 + $0x4] sm:$0xf]  ;;  %v1606_v43 = vld [vmem:[%s2633_s23 + $0x18] sm:$0xf0]  ;;  %v1612_v45 = vld [vmem:[%s2633_s23 + $0x8] sm:$0xf]  ;;  %v1989_v51 = vor.u32 %v2115_v33, %v1988_v32  ;;  %v1737_v57 = vor.u32 %v2050_v39, %v1734_v41 }
  0xc1   : > { %1272 = vmatpush.bf16.msra.mxu0 %v1629_v6  ;;  %v2739_v44 = vor.u32 %v2018_v42, %v1606_v43  ;;  %v2022_v46 = vld [vmem:[%s2633_s23 + $0x1c] sm:$0xf0]  ;;  %v2019_v47 = vld [vmem:[%s2633_s23 + $0xc] sm:$0xf]  ;;  %v1614_v50 = vld [vmem:[%s2633_s23 + $0x20] sm:$0xf0] }
  0xc2   : > { %1286 = vmatpush.bf16.msra.mxu1 %v1693_v10  ;;  %v2744_v49 = vor.u32 %v2022_v46, %v1612_v45  ;;  %v1916_v53 = vld [vmem:[%s2635_s24 + $0x240] sm:$0xf]  ;;  %v2097_v54 = vld [vmem:[%s2635_s24 + $0x244] sm:$0xf0]  ;;  %v2750_v56 = vor.u32 %v2019_v47, %v1614_v50  ;;  %v2032_v59 = vld [vmem:[%s2635_s24 + $0x44] sm:$0xf] }
  0xc3   : > { %1300 = vmatpush.bf16.msra.mxu2 %v1757_v11  ;;  %v1980_v55 = vld [vmem:[%s2635_s24 + $0x2c0] sm:$0xf]  ;;  %v2113_v58 = vld [vmem:[%s2635_s24 + $0x2c4] sm:$0xf0]  ;;  %v1662_v60 = vld [vmem:[%s2635_s24 + $0x48] sm:$0xf0]  ;;  %v1917_v63 = vor.u32 %v2097_v54, %v1916_v53 }
  0xc4   : > { %1314 = vmatpush.bf16.msra.mxu3 %v1821_v14  ;;  %1273 = vmatmul.bf16.vlgmr.msra.gmra.mxu0 %v2730_v34  ;;  %v2048_v61 = vld [vmem:[%s2635_s24 + $0xc4] sm:$0xf]  ;;  %v1726_v62 = vld [vmem:[%s2635_s24 + $0xc8] sm:$0xf0]  ;;  %v1981_v0 = vor.u32 %v2113_v58, %v1980_v55  ;;  %v1665_v1 = vor.u32 %v2032_v59, %v1662_v60  ;;  %v1908_v2 = vld [vmem:[%s2635_s24 + $0x230] sm:$0xf] }
  0xc5   : > { %1321 = vmatpush.bf16.msrb.mxu0 %v1941_v15  ;;  %1287 = vmatmul.bf16.vlgmr.msra.gmra.mxu1 %v2739_v44  ;;  %v2095_v3 = vld [vmem:[%s2635_s24 + $0x234] sm:$0xf0]  ;;  %v1972_v4 = vld [vmem:[%s2635_s24 + $0x2b0] sm:$0xf]  ;;  %v1729_v5 = vor.u32 %v2048_v61, %v1726_v62  ;;  %v2030_v7 = vld [vmem:[%s2635_s24 + $0x34] sm:$0xf] }
  0xc6   : > { %1335 = vmatpush.bf16.msrb.mxu1 %v2005_v18  ;;  %1301 = vmatmul.bf16.vlgmr.msra.gmra.mxu2 %v2744_v49  ;;  %v2111_v6 = vld [vmem:[%s2635_s24 + $0x2b4] sm:$0xf0]  ;;  %v1654_v8 = vld [vmem:[%s2635_s24 + $0x38] sm:$0xf0]  ;;  %v2046_v9 = vld [vmem:[%s2635_s24 + $0xb4] sm:$0xf]  ;;  %v1909_v11 = vor.u32 %v2095_v3, %v1908_v2 }
  0xc7   : > { %1349 = vmatpush.bf16.msrb.mxu2 %v1689_v19  ;;  %1315 = vmatmul.bf16.vlgmr.msra.gmra.mxu3 %v2750_v56  ;;  %v1718_v10 = vld [vmem:[%s2635_s24 + $0xb8] sm:$0xf0]  ;;  %v1973_v12 = vor.u32 %v2111_v6, %v1972_v4  ;;  %v1657_v13 = vor.u32 %v2030_v7, %v1654_v8  ;;  %v1900_v14 = vld [vmem:[%s2635_s24 + $0x220] sm:$0xf]  ;;  %v2093_v15 = vld [vmem:[%s2635_s24 + $0x224] sm:$0xf0] }
  0xc8   : > { %1363 = vmatpush.bf16.msrb.mxu3 %v1753_v23  ;;  %v1964_v16 = vld [vmem:[%s2635_s24 + $0x2a0] sm:$0xf]  ;;  %v1721_v17 = vor.u32 %v2046_v9, %v1718_v10  ;;  %v2109_v18 = vld [vmem:[%s2635_s24 + $0x2a4] sm:$0xf0]  ;;  %v2028_v19 = vld [vmem:[%s2635_s24 + $0x24] sm:$0xf]  ;;  %v1901_v23 = vor.u32 %v2093_v15, %v1900_v14 }
  0xc9   : > { %1322 = vmatpush.bf16.msrb.mxu0 %v1933_v30  ;;  %v1646_v20 = vld [vmem:[%s2635_s24 + $0x28] sm:$0xf0]  ;;  %v2044_v21 = vld [vmem:[%s2635_s24 + $0xa4] sm:$0xf]  ;;  %v1965_v24 = vor.u32 %v2109_v18, %v1964_v16  ;;  %v1892_v26 = vld [vmem:[%s2635_s24 + $0x210] sm:$0xf] }
  0xca   : > { %1336 = vmatpush.bf16.msrb.mxu1 %v1997_v35  ;;  %v1710_v22 = vld [vmem:[%s2635_s24 + $0xa8] sm:$0xf0]  ;;  %v1649_v25 = vor.u32 %v2028_v19, %v1646_v20  ;;  %v2091_v27 = vld [vmem:[%s2635_s24 + $0x214] sm:$0xf0]  ;;  %v1956_v28 = vld [vmem:[%s2635_s24 + $0x290] sm:$0xf] }
  0xcb   : > { %1350 = vmatpush.bf16.msrb.mxu2 %v1681_v36  ;;  %v1713_v29 = vor.u32 %v2044_v21, %v1710_v22  ;;  %v2107_v30 = vld [vmem:[%s2635_s24 + $0x294] sm:$0xf0]  ;;  %v2026_v31 = vld [vmem:[%s2635_s24 + $0x14] sm:$0xf]  ;;  %v1638_v32 = vld [vmem:[%s2635_s24 + $0x18] sm:$0xf0]  ;;  %v1893_v36 = vor.u32 %v2091_v27, %v1892_v26 }
  0xcc   : > { %1364 = vmatpush.bf16.msrb.mxu3 %v1745_v40  ;;  %v2042_v33 = vld [vmem:[%s2635_s24 + $0x94] sm:$0xf]  ;;  %v1702_v35 = vld [vmem:[%s2635_s24 + $0x98] sm:$0xf0]  ;;  %v1884_v37 = vld [vmem:[%s2635_s24 + $0x200] sm:$0xf]  ;;  %v1957_v40 = vor.u32 %v2107_v30, %v1956_v28  ;;  %v1641_v41 = vor.u32 %v2026_v31, %v1638_v32 }
  0xcd   : > { %1323 = vmatpush.bf16.msrb.mxu0 %v1925_v48  ;;  %v2089_v38 = vld [vmem:[%s2635_s24 + $0x204] sm:$0xf0]  ;;  %v1948_v39 = vld [vmem:[%s2635_s24 + $0x280] sm:$0xf]  ;;  %v2024_v43 = vld [vmem:[%s2635_s24 + $0x4] sm:$0xf]  ;;  %v1705_v46 = vor.u32 %v2042_v33, %v1702_v35 }
  0xce   : > { %1337 = vmatpush.bf16.msrb.mxu1 %v1989_v51  ;;  %v2105_v42 = vld [vmem:[%s2635_s24 + $0x284] sm:$0xf0]  ;;  %v1630_v45 = vld [vmem:[%s2635_s24 + $0x8] sm:$0xf0]  ;;  %v2040_v47 = vld [vmem:[%s2635_s24 + $0x84] sm:$0xf]  ;;  %v1885_v54 = vor.u32 %v2089_v38, %v1884_v37 }
  0xcf   : > { %1351 = vmatpush.bf16.msrb.mxu2 %v1673_v52  ;;  %v1694_v48 = vld [vmem:[%s2635_s24 + $0x88] sm:$0xf0]  ;;  %v2070_v50 = vld [vmem:[%s2635_s24 + $0x174] sm:$0xf]  ;;  %v1814_v51 = vld [vmem:[%s2635_s24 + $0x178] sm:$0xf0]  ;;  %v1949_v59 = vor.u32 %v2105_v42, %v1948_v39  ;;  %v1633_v60 = vor.u32 %v2024_v43, %v1630_v45 }
  0xd0   : > { %1365 = vmatpush.bf16.msrb.mxu3 %v1737_v57  ;;  %v2086_v52 = vld [vmem:[%s2635_s24 + $0x1f4] sm:$0xf]  ;;  %v1878_v53 = vld [vmem:[%s2635_s24 + $0x1f8] sm:$0xf0]  ;;  %v1620_v62 = vld [vmem:[%s2633_s23 + $0x10] sm:$0xf] }
  0xd1   : > { %1324 = vmatpush.bf16.msrb.mxu0 %v1917_v63  ;;  %v2102_v55 = vld [vmem:[%s2635_s24 + $0x274] sm:$0xf]  ;;  %v1942_v57 = vld [vmem:[%s2635_s24 + $0x278] sm:$0xf0]  ;;  %v2023_v63 = vld [vmem:[%s2633_s23 + $0x24] sm:$0xf0]  ;;  %v1881_v4 = vor.u32 %v2086_v52, %v1878_v53 }
  0xd2   : > { %1338 = vmatpush.bf16.msrb.mxu1 %v1981_v0  ;;  %v2118_v58 = vld [vmem:[%s2635_s24 + $0x2f4] sm:$0xf]  ;;  %v2006_v61 = vld [vmem:[%s2635_s24 + $0x2f8] sm:$0xf0]  ;;  %v1697_v0 = vor.u32 %v2040_v47, %v1694_v48  ;;  %v2068_v6 = vld [vmem:[%s2635_s24 + $0x164] sm:$0xf]  ;;  %v2807_v10 = vor.u32 %v2023_v63, %v1620_v62 }
  0xd3   : > { %1352 = vmatpush.bf16.msrb.mxu2 %v1665_v1  ;;  %v1817_v1 = vor.u32 %v2070_v50, %v1814_v51  ;;  %v2020_v2 = vld [vmem:[%s2633_s23 + $0x14] sm:$0xf]  ;;  %v1622_v3 = vld [vmem:[%s2633_s23 + $0x28] sm:$0xf0]  ;;  %v2009_v9 = vor.u32 %v2118_v58, %v2006_v61  ;;  %p2010_p4 = scmp.ne.s32.totalorder %s2284_s15, 2 }
  0xd4   : > { %1366 = vmatpush.bf16.msrb.mxu3 %v1729_v5  ;;  %v1945_v5 = vor.u32 %v2102_v55, %v1942_v57  ;;  %v1806_v7 = vld [vmem:[%s2635_s24 + $0x168] sm:$0xf0]  ;;  %v2084_v8 = vld [vmem:[%s2635_s24 + $0x1e4] sm:$0xf]  ;;  %v2812_v14 = vor.u32 %v2020_v2, %v1622_v3  ;;  %v2066_v20 = vld [vmem:[%s2635_s24 + $0x154] sm:$0xf] }
  0xd5   : > { %1325 = vmatpush.bf16.msrb.mxu0 %v1909_v11  ;;  %v1870_v11 = vld [vmem:[%s2635_s24 + $0x1e8] sm:$0xf0]  ;;  %v2116_v15 = vld [vmem:[%s2635_s24 + $0x2e4] sm:$0xf]  ;;  %v1798_v21 = vld [vmem:[%s2635_s24 + $0x158] sm:$0xf0] }
  0xd6   : > { %1339 = vmatpush.bf16.msrb.mxu1 %v1973_v12  ;;  %v2100_v12 = vld [vmem:[%s2635_s24 + $0x264] sm:$0xf]  ;;  %v1998_v16 = vld [vmem:[%s2635_s24 + $0x2e8] sm:$0xf0]  ;;  %v1873_v18 = vor.u32 %v2084_v8, %v1870_v11  ;;  %v2082_v22 = vld [vmem:[%s2635_s24 + $0x1d4] sm:$0xf] }
  0xd7   : > { %1353 = vmatpush.bf16.msrb.mxu2 %v1657_v13  ;;  %v1934_v13 = vld [vmem:[%s2635_s24 + $0x268] sm:$0xf0]  ;;  %v1926_v26 = vld [vmem:[%s2635_s24 + $0x258] sm:$0xf0]  ;;  %v2114_v27 = vld [vmem:[%s2635_s24 + $0x2d4] sm:$0xf] }
  0xd8   : > { %1367 = vmatpush.bf16.msrb.mxu3 %v1721_v17  ;;  %v1809_v17 = vor.u32 %v2068_v6, %v1806_v7  ;;  %v1937_v19 = vor.u32 %v2100_v12, %v1934_v13  ;;  %v1990_v28 = vld [vmem:[%s2635_s24 + $0x2d8] sm:$0xf0]  ;;  %v2064_v32 = vld [vmem:[%s2635_s24 + $0x144] sm:$0xf]  ;;  %v1790_v33 = vld [vmem:[%s2635_s24 + $0x148] sm:$0xf0] }
  0xd9   : > { %1326 = vmatpush.bf16.msrb.mxu0 %v1901_v23  ;;  %v2001_v23 = vor.u32 %v2116_v15, %v1998_v16  ;;  %v2080_v35 = vld [vmem:[%s2635_s24 + $0x1c4] sm:$0xf]  ;;  %v1918_v38 = vld [vmem:[%s2635_s24 + $0x248] sm:$0xf0]  ;;  %v2062_v43 = vld [vmem:[%s2635_s24 + $0x134] sm:$0xf] }
  0xda   : > { %1340 = vmatpush.bf16.msrb.mxu1 %v1965_v24  ;;  %v1862_v24 = vld [vmem:[%s2635_s24 + $0x1d8] sm:$0xf0]  ;;  %v2096_v37 = vld [vmem:[%s2635_s24 + $0x244] sm:$0xf]  ;;  %v1982_v39 = vld [vmem:[%s2635_s24 + $0x2c8] sm:$0xf0] }
  0xdb   : > { %1354 = vmatpush.bf16.msrb.mxu2 %v1649_v25  ;;  %v2098_v25 = vld [vmem:[%s2635_s24 + $0x254] sm:$0xf]  ;;  %v1865_v30 = vor.u32 %v2082_v22, %v1862_v24  ;;  %v1921_v42 = vor.u32 %v2096_v37, %v1918_v38  ;;  %v1782_v45 = vld [vmem:[%s2635_s24 + $0x138] sm:$0xf0]  ;;  %v2060_v58 = vld [vmem:[%s2635_s24 + $0x124] sm:$0xf] }
  0xdc   : > { %1368 = vmatpush.bf16.msrb.mxu3 %v1713_v29  ;;  %v1801_v29 = vor.u32 %v2066_v20, %v1798_v21  ;;  %v1929_v31 = vor.u32 %v2098_v25, %v1926_v26  ;;  %v1846_v48 = vld [vmem:[%s2635_s24 + $0x1b8] sm:$0xf0]  ;;  %v2094_v50 = vld [vmem:[%s2635_s24 + $0x234] sm:$0xf]  ;;  %v1838_v62 = vld [vmem:[%s2635_s24 + $0x1a8] sm:$0xf0] }
  0xdd   : > { %1327 = vmatpush.bf16.msrb.mxu0 %v1893_v36  ;;  %v1854_v36 = vld [vmem:[%s2635_s24 + $0x1c8] sm:$0xf0]  ;;  %v1910_v51 = vld [vmem:[%s2635_s24 + $0x238] sm:$0xf0]  ;;  %v2110_v52 = vld [vmem:[%s2635_s24 + $0x2b4] sm:$0xf] }
  0xde   : > { %1341 = vmatpush.bf16.msrb.mxu1 %v1957_v40  ;;  %v1793_v40 = vor.u32 %v2064_v32, %v1790_v33  ;;  %v1974_v53 = vld [vmem:[%s2635_s24 + $0x2b8] sm:$0xf0]  ;;  %v1913_v57 = vor.u32 %v2094_v50, %v1910_v51  ;;  %v2092_v63 = vld [vmem:[%s2635_s24 + $0x224] sm:$0xf]  ;;  %v1966_v2 = vld [vmem:[%s2635_s24 + $0x2a8] sm:$0xf0] }
  0xdf   : > { %1355 = vmatpush.bf16.msrb.mxu2 %v1641_v41  ;;  %v1857_v41 = vor.u32 %v2080_v35, %v1854_v36  ;;  %v1977_v61 = vor.u32 %v2110_v52, %v1974_v53  ;;  %v2058_v6 = vld [vmem:[%s2635_s24 + $0x114] sm:$0xf]  ;;  %v1766_v7 = vld [vmem:[%s2635_s24 + $0x118] sm:$0xf0]  ;;  %v2056_v20 = vld [vmem:[%s2635_s24 + $0x104] sm:$0xf] }
  0xe0   : > { %1369 = vmatpush.bf16.msrb.mxu3 %v1705_v46  ;;  %v2078_v46 = vld [vmem:[%s2635_s24 + $0x1b4] sm:$0xf]  ;;  %v1830_v11 = vld [vmem:[%s2635_s24 + $0x198] sm:$0xf0]  ;;  %v1758_v21 = vld [vmem:[%s2635_s24 + $0x108] sm:$0xf0] }
  0xe1   : > { %1328 = vmatpush.bf16.msrb.mxu0 %v1885_v54  ;;  %v1785_v54 = vor.u32 %v2062_v43, %v1782_v45  ;;  %v1849_v55 = vor.u32 %v2078_v46, %v1846_v48  ;;  %v2074_v8 = vld [vmem:[%s2635_s24 + $0x194] sm:$0xf]  ;;  %v1894_v13 = vld [vmem:[%s2635_s24 + $0x218] sm:$0xf0]  ;;  %v2072_v22 = vld [vmem:[%s2635_s24 + $0x184] sm:$0xf] }
  0xe2   : > { %1342 = vmatpush.bf16.msrb.mxu1 %v1949_v59  ;;  %v1774_v59 = vld [vmem:[%s2635_s24 + $0x128] sm:$0xf0]  ;;  %v2090_v12 = vld [vmem:[%s2635_s24 + $0x214] sm:$0xf]  ;;  %v1958_v16 = vld [vmem:[%s2635_s24 + $0x298] sm:$0xf0] }
  0xe3   : > { %1356 = vmatpush.bf16.msrb.mxu2 %v1633_v60  ;;  %v2076_v60 = vld [vmem:[%s2635_s24 + $0x1a4] sm:$0xf]  ;;  %v1777_v3 = vor.u32 %v2060_v58, %v1774_v59  ;;  %v2106_v15 = vld [vmem:[%s2635_s24 + $0x294] sm:$0xf]  ;;  %v1822_v24 = vld [vmem:[%s2635_s24 + $0x188] sm:$0xf0] }
  0xe4   : > { %1370 = vmatpush.bf16.msrb.mxu3 %v1697_v0  ;;  %1329 = vmatmul.bf16.vlgmr.msrb.gmra.mxu0 %v2807_v10  ;;  %v1902_v0 = vld [vmem:[%s2635_s24 + $0x228] sm:$0xf0]  ;;  %v2088_v25 = vld [vmem:[%s2635_s24 + $0x204] sm:$0xf]  ;;  %v651_v53 = vld [vmem:[%s2637_s26 + $0x10] sm:$0xff] }
  0xe5   : > { %1377 = vmatpush.bf16.msra.mxu0 %v1817_v1  ;;  %1343 = vmatmul.bf16.vlgmr.msrb.gmra.mxu1 %v2812_v14  ;;  %v2108_v1 = vld [vmem:[%s2635_s24 + $0x2a4] sm:$0xf]  ;;  %v1886_v26 = vld [vmem:[%s2635_s24 + $0x208] sm:$0xf0] }
  0xe6   : > { %1391 = vmatpush.bf16.msra.mxu1 %v1881_v4  ;;  %1357 = vmatmul.bf16.vlgmr.msrb.gmra.mxu2 %v2730_v34  ;;  %v1993_v34 = vor.u32 %v2114_v27, %v1990_v28  ;;  %v1841_v4 = vor.u32 %v2076_v60, %v1838_v62  ;;  %v2104_v27 = vld [vmem:[%s2635_s24 + $0x284] sm:$0xf]  ;;  %v1950_v28 = vld [vmem:[%s2635_s24 + $0x288] sm:$0xf0] }
  0xe7   : > { %1405 = vmatpush.bf16.msra.mxu2 %v1945_v5  ;;  %1371 = vmatmul.bf16.vlgmr.msrb.gmra.mxu3 %v2739_v44  ;;  %v2112_v44 = vld [vmem:[%s2635_s24 + $0x2c4] sm:$0xf]  ;;  %v1905_v5 = vor.u32 %v2092_v63, %v1902_v0  ;;  %v1953_v32 = vor.u32 %v2104_v27, %v1950_v28 }
  0xe8   : > { %1419 = vmatpush.bf16.msra.mxu3 %v2009_v9  ;;  %v1985_v47 = vor.u32 %v2112_v44, %v1982_v39  ;;  %v1969_v9 = vor.u32 %v2108_v1, %v1966_v2  ;;  %v649_v43 = vld [vmem:[%s2637_s26] sm:$0xff] }
  0xe9   : > { %1378 = vmatpush.bf16.msra.mxu0 %v1809_v17  ;;  %v1769_v17 = vor.u32 %v2058_v6, %v1766_v7  ;;  %v650_v7 = vld [vmem:[%s2637_s26 + $0x8] sm:$0xff] }
  0xea   : > { %1392 = vmatpush.bf16.msra.mxu1 %v1873_v18  ;;  %v1833_v18 = vor.u32 %v2074_v8, %v1830_v11 }
  0xeb   : > { %1406 = vmatpush.bf16.msra.mxu2 %v1937_v19  ;;  %v1897_v19 = vor.u32 %v2090_v12, %v1894_v13 }
  0xec   : > { %1420 = vmatpush.bf16.msra.mxu3 %v2001_v23  ;;  %v1961_v23 = vor.u32 %v2106_v15, %v1958_v16 }
  0xed   : > { %1379 = vmatpush.bf16.msra.mxu0 %v1801_v29  ;;  %v1761_v29 = vor.u32 %v2056_v20, %v1758_v21 }
  0xee   : > { %1393 = vmatpush.bf16.msra.mxu1 %v1865_v30  ;;  %v1825_v30 = vor.u32 %v2072_v22, %v1822_v24 }
  0xef   : > { %1407 = vmatpush.bf16.msra.mxu2 %v1929_v31  ;;  %v1889_v31 = vor.u32 %v2088_v25, %v1886_v26 }
  0xf0   : > { %1421 = vmatpush.bf16.msra.mxu3 %v1993_v34 }
  0xf1   : > { %1380 = vmatpush.bf16.msra.mxu0 %v1793_v40 }
  0xf2   : > { %1394 = vmatpush.bf16.msra.mxu1 %v1857_v41 }
  0xf3   : > { %1408 = vmatpush.bf16.msra.mxu2 %v1921_v42 }
  0xf4   : > { %1422 = vmatpush.bf16.msra.mxu3 %v1985_v47 }
  0xf5   : > { %1381 = vmatpush.bf16.msra.mxu0 %v1785_v54 }
  0xf6   : > { %1395 = vmatpush.bf16.msra.mxu1 %v1849_v55 }
  0xf7   : > { %1409 = vmatpush.bf16.msra.mxu2 %v1913_v57 }
  0xf8   : > { %1423 = vmatpush.bf16.msra.mxu3 %v1977_v61 }
  0xf9   : > { %1382 = vmatpush.bf16.msra.mxu0 %v1777_v3 }
  0xfa   : > { %1396 = vmatpush.bf16.msra.mxu1 %v1841_v4 }
  0xfb   : > { %1410 = vmatpush.bf16.msra.mxu2 %v1905_v5 }
  0xfc   : > { %1424 = vmatpush.bf16.msra.mxu3 %v1969_v9 }
  0xfd   : > { %1383 = vmatpush.bf16.msra.mxu0 %v1769_v17  ;;  %v652_v17 = vld [vmem:[%s2637_s26 + $0x18] sm:$0xff] }
  0xfe   : > { %1397 = vmatpush.bf16.msra.mxu1 %v1833_v18 }
  0xff   : > { %1411 = vmatpush.bf16.msra.mxu2 %v1897_v19 }
 0x100   : > { %1425 = vmatpush.bf16.msra.mxu3 %v1961_v23 }
 0x101   : > { %1384 = vmatpush.bf16.msra.mxu0 %v1761_v29 }
 0x102   : > { %1398 = vmatpush.bf16.msra.mxu1 %v1825_v30 }
 0x103   : > { %1412 = vmatpush.bf16.msra.mxu2 %v1889_v31 }
 0x104   : > { %1426 = vmatpush.bf16.msra.mxu3 %v1953_v32  ;;  %1385 = vmatmul.bf16.vlgmr.msra.gmra.mxu0 %v2744_v49 }
 0x105   : > { %1399 = vmatmul.bf16.vlgmr.msra.gmra.mxu1 %v2750_v56 }
 0x106   : > { %1413 = vmatmul.bf16.vlgmr.msra.gmra.mxu2 %v2807_v10 }
 0x107   : > { %1427 = vmatmul.bf16.vlgmr.msra.gmra.mxu3 %v2812_v14 }
 0x141   : > { %v1274_v33 = vpop.f32.mrf.mxu0 }
 0x142   : > { %v1288_v35 = vpop.f32.mrf.mxu1 }
 0x143   : > { %v1289_v34 = vadd.f32 %v1288_v35, %v1274_v33 }
 0x149   : > { %v1276_v36 = vpop.f32.mrf.mxu0  ;;  %v1302_v37 = vpop.f32.mrf.mxu2 }
 0x14a   : > { %v1290_v38 = vpop.f32.mrf.mxu1  ;;  %v1303_v44 = vadd.f32 %v1302_v37, %v1289_v34  ;;  %v1316_v39 = vpop.f32.mrf.mxu3 }
 0x14b   : > { %v1291_v41 = vadd.f32 %v1290_v38, %v1276_v36 }
 0x14c   : > { %v1317_v40 = vadd.f32 %v1316_v39, %v1303_v44 }
 0x151   : > { %v1304_v42 = vpop.f32.mrf.mxu2 }
 0x152   : > { %v1305_v45 = vadd.f32 %v1304_v42, %v1291_v41  ;;  %v1318_v46 = vpop.f32.mrf.mxu3 }
 0x154   : > { %v1319_v48 = vadd.f32 %v1318_v46, %v1305_v45 }
 0x161   : > { %v1330_v49 = vpop.f32.mrf.mxu0 }
 0x162   : > { %v1331_v56 = vadd.f32 %v1330_v49, %v1317_v40  ;;  %v1344_v10 = vpop.f32.mrf.mxu1 }
 0x164   : > { %v1345_v14 = vadd.f32 %v1344_v10, %v1331_v56 }
 0x166   : > { %v1433_v47 = vadd.f32 %v1345_v14, %v649_v43 }
 0x168   : > { %1437 = vst [vmem:[%s2637_s26] sm:$0xff] %v1433_v47 }
 0x169   : > { %v1332_v50 = vpop.f32.mrf.mxu0  ;;  %v1358_v57 = vpop.f32.mrf.mxu2 }
 0x16a   : > { %v1333_v51 = vadd.f32 %v1332_v50, %v1319_v48  ;;  %v1346_v52 = vpop.f32.mrf.mxu1  ;;  %v1372_v58 = vpop.f32.mrf.mxu3 }
 0x16b   : > { %v1373_v60 = vadd.f32 %v1372_v58, %v1358_v57 }
 0x16c   : > { %v1347_v54 = vadd.f32 %v1346_v52, %v1333_v51 }
 0x16e   : > { %v1435_v55 = vadd.f32 %v1347_v54, %v651_v53 }
 0x170   : > { %1439 = vst [vmem:[%s2637_s26 + $0x10] sm:$0xff] %v1435_v55 }
 0x171   : > { %v1360_v59 = vpop.f32.mrf.mxu2 }
 0x172   : > { %v1374_v61 = vpop.f32.mrf.mxu3 }
 0x173   : > { %v1375_v3 = vadd.f32 %v1374_v61, %v1360_v59 }
 0x181   : > { %v1386_v62 = vpop.f32.mrf.mxu0 }
 0x182   : > { %v1387_v63 = vadd.f32 %v1386_v62, %v1373_v60  ;;  %v1400_v0 = vpop.f32.mrf.mxu1 }
 0x184   : > { %v1401_v1 = vadd.f32 %v1400_v0, %v1387_v63 }
 0x189   : > { %v1414_v2 = vpop.f32.mrf.mxu2  ;;  %v1388_v6 = vpop.f32.mrf.mxu0 }
 0x18a   : > { %v1415_v4 = vadd.f32 %v1414_v2, %v1401_v1  ;;  %v1428_v5 = vpop.f32.mrf.mxu3  ;;  %v1389_v9 = vadd.f32 %v1388_v6, %v1375_v3  ;;  %v1402_v12 = vpop.f32.mrf.mxu1 }
 0x18c   : > { %v1429_v8 = vadd.f32 %v1428_v5, %v1415_v4  ;;  %v1403_v13 = vadd.f32 %v1402_v12, %v1389_v9 }
 0x18e   : > { %v1434_v11 = vadd.f32 %v1429_v8, %v650_v7 }
 0x190   : > { %1438 = vst [vmem:[%s2637_s26 + $0x8] sm:$0xff] %v1434_v11 }
 0x191   : > { %v1416_v15 = vpop.f32.mrf.mxu2 }
 0x192   : > { %v1417_v16 = vadd.f32 %v1416_v15, %v1403_v13  ;;  %v1430_v18 = vpop.f32.mrf.mxu3 }
 0x194   : > { %v1431_v19 = vadd.f32 %v1430_v18, %v1417_v16  ;;  %1444 = sbr.rel (%p2010_p4) target bundleno = 419 (0x1a3), region = 97 }
 0x196   : > { %v1436_v20 = vadd.f32 %v1431_v19, %v652_v17 }
 0x198   : > { %1440 = vst [vmem:[%s2637_s26 + $0x18] sm:$0xff] %v1436_v20 }
 0x199   : > { %v1445_v21 = vld [vmem:[%s2637_s26] sm:$0xff]  ;;  %v1446_v22 = vld [vmem:[%s2637_s26 + $0x8] sm:$0xff]  ;;  %v1447_v23 = vld [vmem:[%s2637_s26 + $0x10] sm:$0xff] }
 0x19a   : > { %v1449_v24 = vmax.f32 %v1445_v21, 0.0  ;;  %v1450_v25 = vmax.f32 %v1446_v22, 0.0  ;;  %v1451_v26 = vmax.f32 %v1447_v23, 0.0 }
 0x19c   : > { %1453 = vst [vmem:[%s2637_s26] sm:$0xff] %v1449_v24 }
 0x19d   : > { %1454 = vst [vmem:[%s2637_s26 + $0x8] sm:$0xff] %v1450_v25 }
 0x19e   : > { %1455 = vst [vmem:[%s2637_s26 + $0x10] sm:$0xff] %v1451_v26 }
 0x19f   : > { %v1448_v27 = vld [vmem:[%s2637_s26 + $0x18] sm:$0xff] }
 0x1a0   : > { %v1452_v28 = vmax.f32 %v1448_v27, 0.0 }
 0x1a2   : > { %1456 = vst [vmem:[%s2637_s26 + $0x18] sm:$0xff] %v1452_v28 }
 0x1a3 PF: > { %1463 = sbr.rel (!%p2412_p12) target bundleno = 427 (0x1ab), region = 101  ;;  %s2120_s9 = sshll.u32 (%p2412_p12), %s2288_s16, 4  ;;  %v1482_v29 = vld [vmem:[%s2637_s26] sm:$0xff] (%p2412_p12) }
 0x1a4   : > { %v1484_v30 = vld [vmem:[%s2637_s26 + $0x8] sm:$0xff] (%p2412_p12)  ;;  %s1469_s15 = scalar_lea.vmem (%p2412_p12), %s2934_s2, %s2120_s9 }
 0x1a5   : > { %v1486_v31 = vld [vmem:[%s2637_s26 + $0x10] sm:$0xff] (%p2412_p12)  ;;  %1483 = vst [vmem:[%s1469_s15] sm:$0xff] (%p2412_p12), %v1482_v29 }
 0x1a6   : > { %1485 = vst [vmem:[%s1469_s15 + $0x8] sm:$0xff] (%p2412_p12), %v1484_v30 }
 0x1a7   : > { %1487 = vst [vmem:[%s1469_s15 + $0x20] sm:$0xff] (%p2412_p12), %v1486_v31 }
 0x1a9   : > { %v1488_v32 = vld [vmem:[%s2637_s26 + $0x18] sm:$0xff] }
 0x1aa   : > { %1489 = vst [vmem:[%s1469_s15 + $0x28] sm:$0xff] %v1488_v32 }
 0x1ab PF: > { %s12_s19 = sadd.s32 1, %s2300_s19   ;;  %s2938_s9 = smov %s2264_s10 }
 0x1ac   : > { %p9_p5 = scmp.ge.s32.totalorder %s12_s19, 8   ;;  %s2939_s10 = smov %s2410_s5 }
 0x1ad   : > { %s2940_s11 = smov %s2272_s12  ;;  %s2941_s12 = smov %s2407_s4 }
 0x1ae   : > { %s2942_s13 = smov %s2280_s14  ;;  %s2943_s14 = smov %s2393_s27 }
 0x1af   : > { %s2944_s15 = smov %s2292_s17  ;;  %s2945_s16 = smov %s2296_s18 }
 0x1b0   : > { %s2946_s17 = smov %s2949_s21  ;;  %s2947_s18 = smov %s2953_s22 }
 0x1b1   :  { %11 = sbr.rel (!%p9_p5) target bundleno = 6 (0x6), region = 163 }

// kernel: forward.39
= control target key start
LH: loop header
LB: loop body
LE: loop exit
PB: predicated region body
PF: predicated region fallthrough
CT: control target
= control target key end

     0   :  { %s1075_s9 = smov 0   ;;  %s1077_s10 = smov 0   ;;  %s1297_s0 = inlined_call_operand.vmem [shape: bf16[16,256], index: 0, kind: input, shape index: {}]   ;;  %s1298_s1 = inlined_call_operand.vmem [shape: bf16[256,512], index: 1, kind: input, shape index: {}]   ;;  %s1299_s2 = inlined_call_operand.vmem [shape: f32[16,512], index: 2, kind: output, shape index: {}]  }
   0x1   :  { %s1079_s11 = smov 0   ;;  %s1081_s12 = smov 0  }
   0x2   :  { %s1083_s13 = smov 0  }
   0x3 LB: > { %s27_s14 = sadd.s32 1, %s1054_s12  ;;  %s791_s15 = sadd.s32 4294967295, %s1058_s13   ;;  %s1058_s13 = sphi %s1083_s13, %s12_s13   ;;  %s1054_s12 = sphi %s1081_s12, %s1304_s12   ;;  %s1050_s11 = sphi %s1079_s11, %s1303_s11   ;;  %s1046_s10 = sphi %s1077_s10, %s1302_s10   ;;  %s1042_s9 = sphi %s1075_s9, %s1301_s9  }
   0x4   : > { %p29_p0 = scmp.ge.s32.totalorder %s27_s14, 2  ;;  %p75_p1 = scmp.ne.s32.totalorder %s1046_s10, %s1042_s9 }
   0x5   : > { %p76_p2 = scmp.eq.s32.totalorder %s1058_s13, 0  ;;  %p107_p4 = scmp.eq.s32.totalorder %s791_s15, 1 }
   0x6   : > { %s1306_s14 = smov (%p29_p0, %s27_s14), 0  ;;  %s68_s17 = sadd.s32 1, %s1046_s10 }
   0x7   : > { %p77_p3 = por %p76_p2, %p75_p1  ;;  %s64_s16 = ssub.s32 %s1054_s12, %s1306_s14 }
   0x8   : > { %p66_p5 = scmp.eq.s32.totalorder %s64_s16, 0  ;;  %p1110_p6 = por %p107_p4, %p75_p1 }
   0x9   : > { %p795_p7 = scmp.ge.s32.totalorder %s1058_s13, 2 }
   0xa   : > { %s1115_s19 = scalar_select %p66_p5, %s1046_s10, %s68_s17  }
   0xb   : > { %144 = sbr.rel (%p795_p7) target bundleno = 52 (0x34), region = 20 }
  0x10   : > { %147 = sbr.rel (!%p77_p3) target bundleno = 52 (0x34), region = 24  ;;  %s149_s20 = sand.u32 (%p77_p3), 1, %s1046_s10  }
  0x11   : > { %s943_s21 = sshll.u32 (%p77_p3), %s1054_s12, 3  ;;  %s796_s22 = sshll.u32 (%p77_p3), %s149_s20, 8 }
  0x12   : > { %s1123_s25 = scalar_lea.vmem (%p77_p3), %s1298_s1, %s943_s21  ;;  %s1128_s26 = scalar_lea.vmem (%p77_p3), [#allocation2], %s796_s22 }
  0x13   : > { %v248_v0 = vld [vmem:[%s1123_s25] sm:$0xff] (%p77_p3)  ;;  %v250_v1 = vld [vmem:[%s1123_s25 + $0x10] sm:$0xff] (%p77_p3) }
  0x14   : > { %v252_v2 = vld [vmem:[%s1123_s25 + $0x20] sm:$0xff] (%p77_p3)  ;;  %249 = vst [vmem:[%s1128_s26] sm:$0xff] (%p77_p3), %v248_v0  ;;  %v254_v3 = vld [vmem:[%s1123_s25 + $0x30] sm:$0xff] (%p77_p3) }
  0x15   : > { %251 = vst [vmem:[%s1128_s26 + $0x8] sm:$0xff] %v250_v1  ;;  %v256_v4 = vld [vmem:[%s1123_s25 + $0x40] sm:$0xff]  ;;  %v258_v5 = vld [vmem:[%s1123_s25 + $0x50] sm:$0xff] }
  0x16   : > { %253 = vst [vmem:[%s1128_s26 + $0x10] sm:$0xff] %v252_v2  ;;  %v260_v6 = vld [vmem:[%s1123_s25 + $0x60] sm:$0xff]  ;;  %v262_v7 = vld [vmem:[%s1123_s25 + $0x70] sm:$0xff] }
  0x17   : > { %255 = vst [vmem:[%s1128_s26 + $0x18] sm:$0xff] %v254_v3  ;;  %v264_v8 = vld [vmem:[%s1123_s25 + $0x80] sm:$0xff]  ;;  %v266_v9 = vld [vmem:[%s1123_s25 + $0x90] sm:$0xff] }
  0x18   : > { %257 = vst [vmem:[%s1128_s26 + $0x20] sm:$0xff] %v256_v4  ;;  %v268_v10 = vld [vmem:[%s1123_s25 + $0xa0] sm:$0xff]  ;;  %v270_v11 = vld [vmem:[%s1123_s25 + $0xb0] sm:$0xff] }
  0x19   : > { %259 = vst [vmem:[%s1128_s26 + $0x28] sm:$0xff] %v258_v5  ;;  %v272_v12 = vld [vmem:[%s1123_s25 + $0xc0] sm:$0xff]  ;;  %v274_v13 = vld [vmem:[%s1123_s25 + $0xd0] sm:$0xff] }
  0x1a   : > { %261 = vst [vmem:[%s1128_s26 + $0x30] sm:$0xff] %v260_v6  ;;  %v276_v14 = vld [vmem:[%s1123_s25 + $0xe0] sm:$0xff]  ;;  %v278_v15 = vld [vmem:[%s1123_s25 + $0xf0] sm:$0xff] }
  0x1b   : > { %263 = vst [vmem:[%s1128_s26 + $0x38] sm:$0xff] %v262_v7  ;;  %v280_v16 = vld [vmem:[%s1123_s25 + $0x100] sm:$0xff]  ;;  %v282_v17 = vld [vmem:[%s1123_s25 + $0x110] sm:$0xff] }
  0x1c   : > { %265 = vst [vmem:[%s1128_s26 + $0x40] sm:$0xff] %v264_v8  ;;  %v284_v18 = vld [vmem:[%s1123_s25 + $0x120] sm:$0xff]  ;;  %v286_v19 = vld [vmem:[%s1123_s25 + $0x130] sm:$0xff] }
  0x1d   : > { %267 = vst [vmem:[%s1128_s26 + $0x48] sm:$0xff] %v266_v9  ;;  %v288_v20 = vld [vmem:[%s1123_s25 + $0x140] sm:$0xff]  ;;  %v290_v21 = vld [vmem:[%s1123_s25 + $0x150] sm:$0xff] }
  0x1e   : > { %269 = vst [vmem:[%s1128_s26 + $0x50] sm:$0xff] %v268_v10  ;;  %v292_v22 = vld [vmem:[%s1123_s25 + $0x160] sm:$0xff]  ;;  %v294_v23 = vld [vmem:[%s1123_s25 + $0x170] sm:$0xff] }
  0x1f   : > { %271 = vst [vmem:[%s1128_s26 + $0x58] sm:$0xff] %v270_v11  ;;  %v296_v24 = vld [vmem:[%s1123_s25 + $0x180] sm:$0xff]  ;;  %v298_v25 = vld [vmem:[%s1123_s25 + $0x190] sm:$0xff] }
  0x20   : > { %273 = vst [vmem:[%s1128_s26 + $0x60] sm:$0xff] %v272_v12  ;;  %v300_v26 = vld [vmem:[%s1123_s25 + $0x1a0] sm:$0xff]  ;;  %v302_v27 = vld [vmem:[%s1123_s25 + $0x1b0] sm:$0xff] }
  0x21   : > { %275 = vst [vmem:[%s1128_s26 + $0x68] sm:$0xff] %v274_v13  ;;  %v304_v28 = vld [vmem:[%s1123_s25 + $0x1c0] sm:$0xff]  ;;  %v306_v29 = vld [vmem:[%s1123_s25 + $0x1d0] sm:$0xff] }
  0x22   : > { %277 = vst [vmem:[%s1128_s26 + $0x70] sm:$0xff] %v276_v14  ;;  %v308_v30 = vld [vmem:[%s1123_s25 + $0x1e0] sm:$0xff]  ;;  %v310_v31 = vld [vmem:[%s1123_s25 + $0x1f0] sm:$0xff] }
  0x23   : > { %279 = vst [vmem:[%s1128_s26 + $0x78] sm:$0xff] %v278_v15 }
  0x24   : > { %281 = vst [vmem:[%s1128_s26 + $0x80] sm:$0xff] %v280_v16 }
  0x25   : > { %283 = vst [vmem:[%s1128_s26 + $0x88] sm:$0xff] %v282_v17 }
  0x26   : > { %285 = vst [vmem:[%s1128_s26 + $0x90] sm:$0xff] %v284_v18 }
  0x27   : > { %287 = vst [vmem:[%s1128_s26 + $0x98] sm:$0xff] %v286_v19 }
  0x28   : > { %289 = vst [vmem:[%s1128_s26 + $0xa0] sm:$0xff] %v288_v20 }
  0x29   : > { %291 = vst [vmem:[%s1128_s26 + $0xa8] sm:$0xff] %v290_v21 }
  0x2a   : > { %293 = vst [vmem:[%s1128_s26 + $0xb0] sm:$0xff] %v292_v22 }
  0x2b   : > { %295 = vst [vmem:[%s1128_s26 + $0xb8] sm:$0xff] %v294_v23 }
  0x2c   : > { %297 = vst [vmem:[%s1128_s26 + $0xc0] sm:$0xff] %v296_v24 }
  0x2d   : > { %299 = vst [vmem:[%s1128_s26 + $0xc8] sm:$0xff] %v298_v25 }
  0x2e   : > { %301 = vst [vmem:[%s1128_s26 + $0xd0] sm:$0xff] %v300_v26 }
  0x2f   : > { %303 = vst [vmem:[%s1128_s26 + $0xd8] sm:$0xff] %v302_v27 }
  0x30   : > { %305 = vst [vmem:[%s1128_s26 + $0xe0] sm:$0xff] %v304_v28 }
  0x31   : > { %307 = vst [vmem:[%s1128_s26 + $0xe8] sm:$0xff] %v306_v29 }
  0x32   : > { %309 = vst [vmem:[%s1128_s26 + $0xf0] sm:$0xff] %v308_v30 }
  0x33   : > { %311 = vst [vmem:[%s1128_s26 + $0xf8] sm:$0xff] %v310_v31 }
  0x34 PF: > { %p799_p8 = scmp.ge.s32.totalorder %s1058_s13, 1  ;;  %p316_p9 = scmp.lt.s32.totalorder %s1058_s13, 3 }
  0x36   : > { %p317_p10 = pnand %p799_p8, %p316_p9 }
  0x37   : > { %s323_s27 = sand.u32 (!%p317_p10), 1, %s1042_s9  }
  0x38   : > { %320 = sbr.rel (%p317_p10) target bundleno = 248 (0xf8), region = 62  ;;  %s800_s28 = sshll.u32 (!%p317_p10), %s323_s27, 8 }
  0x39   : > { %s1196_s29 = scalar_lea.vmem (!%p317_p10), [#allocation2], %s800_s28  ;;  %s801_s16 = sshll.u32 (!%p317_p10), %s323_s27, 5 }
  0x3a   : > { %s352_s17 = scalar_lea.vmem (!%p317_p10), [#allocation3], %s801_s16 }
  0x3d   : > { %v868_v32 = vld [vmem:[%s1196_s29 + $0x70] sm:$0xf]  ;;  %v961_v33 = vld [vmem:[%s1196_s29 + $0x74] sm:$0xf0]  ;;  %v960_v37 = vld [vmem:[%s1196_s29 + $0x74] sm:$0xf] }
  0x3e   : > { %v932_v34 = vld [vmem:[%s1196_s29 + $0xf0] sm:$0xf]  ;;  %v869_v35 = vor.u32 %v961_v33, %v868_v32  ;;  %v977_v36 = vld [vmem:[%s1196_s29 + $0xf4] sm:$0xf0]  ;;  %v870_v38 = vld [vmem:[%s1196_s29 + $0x78] sm:$0xf0] }
  0x3f   : > { %v933_v39 = vor.u32 %v977_v36, %v932_v34  ;;  %v873_v40 = vor.u32 %v960_v37, %v870_v38  ;;  %v976_v41 = vld [vmem:[%s1196_s29 + $0xf4] sm:$0xf]  ;;  %v934_v42 = vld [vmem:[%s1196_s29 + $0xf8] sm:$0xf0]  ;;  %v860_v43 = vld [vmem:[%s1196_s29 + $0x60] sm:$0xf] }
  0x40   : > { %585 = vmatpush.bf16.msra.mxu0 %v869_v35  ;;  %v937_v44 = vor.u32 %v976_v41, %v934_v42  ;;  %v959_v45 = vld [vmem:[%s1196_s29 + $0x64] sm:$0xf0]  ;;  %v924_v46 = vld [vmem:[%s1196_s29 + $0xe0] sm:$0xf]  ;;  %v958_v50 = vld [vmem:[%s1196_s29 + $0x64] sm:$0xf] }
  0x41   : > { %v975_v47 = vld [vmem:[%s1196_s29 + $0xe4] sm:$0xf0]  ;;  %599 = vmatpush.bf16.msra.mxu1 %v933_v39  ;;  %613 = vmatpush.bf16.msra.mxu2 %v873_v40  ;;  %v861_v48 = vor.u32 %v959_v45, %v860_v43  ;;  %v862_v51 = vld [vmem:[%s1196_s29 + $0x68] sm:$0xf0]  ;;  %v974_v52 = vld [vmem:[%s1196_s29 + $0xe4] sm:$0xf] }
  0x42   : > { %v925_v49 = vor.u32 %v975_v47, %v924_v46  ;;  %627 = vmatpush.bf16.msra.mxu3 %v937_v44  ;;  %v865_v53 = vor.u32 %v958_v50, %v862_v51  ;;  %v926_v54 = vld [vmem:[%s1196_s29 + $0xe8] sm:$0xf0]  ;;  %v852_v55 = vld [vmem:[%s1196_s29 + $0x50] sm:$0xf]  ;;  %v957_v56 = vld [vmem:[%s1196_s29 + $0x54] sm:$0xf0] }
  0x43   : > { %v929_v57 = vor.u32 %v974_v52, %v926_v54  ;;  %v916_v58 = vld [vmem:[%s1196_s29 + $0xd0] sm:$0xf]  ;;  %v973_v59 = vld [vmem:[%s1196_s29 + $0xd4] sm:$0xf0]  ;;  %v956_v60 = vld [vmem:[%s1196_s29 + $0x54] sm:$0xf]  ;;  %v853_v61 = vor.u32 %v957_v56, %v852_v55 }
  0x44   : > { %586 = vmatpush.bf16.msra.mxu0 %v861_v48  ;;  %v854_v62 = vld [vmem:[%s1196_s29 + $0x58] sm:$0xf0]  ;;  %v972_v63 = vld [vmem:[%s1196_s29 + $0xd4] sm:$0xf]  ;;  %v917_v1 = vor.u32 %v973_v59, %v916_v58  ;;  %v844_v3 = vld [vmem:[%s1196_s29 + $0x40] sm:$0xf] }
  0x45   : > { %v918_v0 = vld [vmem:[%s1196_s29 + $0xd8] sm:$0xf0]  ;;  %600 = vmatpush.bf16.msra.mxu1 %v925_v49  ;;  %614 = vmatpush.bf16.msra.mxu2 %v865_v53  ;;  %v857_v2 = vor.u32 %v956_v60, %v854_v62  ;;  %v955_v4 = vld [vmem:[%s1196_s29 + $0x44] sm:$0xf0]  ;;  %v908_v5 = vld [vmem:[%s1196_s29 + $0xc0] sm:$0xf] }
  0x46   : > { %628 = vmatpush.bf16.msra.mxu3 %v929_v57  ;;  %v921_v6 = vor.u32 %v972_v63, %v918_v0  ;;  %v971_v7 = vld [vmem:[%s1196_s29 + $0xc4] sm:$0xf0]  ;;  %v954_v8 = vld [vmem:[%s1196_s29 + $0x44] sm:$0xf]  ;;  %v846_v9 = vld [vmem:[%s1196_s29 + $0x48] sm:$0xf0]  ;;  %v845_v12 = vor.u32 %v955_v4, %v844_v3 }
  0x47   : > { %v970_v10 = vld [vmem:[%s1196_s29 + $0xc4] sm:$0xf]  ;;  %v910_v11 = vld [vmem:[%s1196_s29 + $0xc8] sm:$0xf0]  ;;  %v909_v13 = vor.u32 %v971_v7, %v908_v5  ;;  %v849_v14 = vor.u32 %v954_v8, %v846_v9  ;;  %v836_v15 = vld [vmem:[%s1196_s29 + $0x30] sm:$0xf] }
  0x48   : > { %587 = vmatpush.bf16.msra.mxu0 %v853_v61  ;;  %v953_v16 = vld [vmem:[%s1196_s29 + $0x34] sm:$0xf0]  ;;  %v900_v17 = vld [vmem:[%s1196_s29 + $0xb0] sm:$0xf]  ;;  %v913_v18 = vor.u32 %v970_v10, %v910_v11  ;;  %v952_v20 = vld [vmem:[%s1196_s29 + $0x34] sm:$0xf] }
  0x49   : > { %601 = vmatpush.bf16.msra.mxu1 %v917_v1  ;;  %615 = vmatpush.bf16.msra.mxu2 %v857_v2  ;;  %v969_v19 = vld [vmem:[%s1196_s29 + $0xb4] sm:$0xf0]  ;;  %v838_v21 = vld [vmem:[%s1196_s29 + $0x38] sm:$0xf0]  ;;  %v968_v22 = vld [vmem:[%s1196_s29 + $0xb4] sm:$0xf]  ;;  %v837_v24 = vor.u32 %v953_v16, %v836_v15 }
  0x4a   : > { %629 = vmatpush.bf16.msra.mxu3 %v921_v6  ;;  %v902_v23 = vld [vmem:[%s1196_s29 + $0xb8] sm:$0xf0]  ;;  %v901_v25 = vor.u32 %v969_v19, %v900_v17  ;;  %v841_v26 = vor.u32 %v952_v20, %v838_v21  ;;  %v828_v27 = vld [vmem:[%s1196_s29 + $0x20] sm:$0xf]  ;;  %v951_v28 = vld [vmem:[%s1196_s29 + $0x24] sm:$0xf0] }
  0x4b   : > { %v892_v29 = vld [vmem:[%s1196_s29 + $0xa0] sm:$0xf]  ;;  %v905_v30 = vor.u32 %v968_v22, %v902_v23  ;;  %v967_v31 = vld [vmem:[%s1196_s29 + $0xa4] sm:$0xf0]  ;;  %v950_v32 = vld [vmem:[%s1196_s29 + $0x24] sm:$0xf]  ;;  %v829_v36 = vor.u32 %v951_v28, %v828_v27 }
  0x4c   : > { %588 = vmatpush.bf16.msra.mxu0 %v845_v12  ;;  %v830_v33 = vld [vmem:[%s1196_s29 + $0x28] sm:$0xf0]  ;;  %v966_v34 = vld [vmem:[%s1196_s29 + $0xa4] sm:$0xf]  ;;  %v893_v37 = vor.u32 %v967_v31, %v892_v29  ;;  %v820_v39 = vld [vmem:[%s1196_s29 + $0x10] sm:$0xf] }
  0x4d   : > { %602 = vmatpush.bf16.msra.mxu1 %v909_v13  ;;  %616 = vmatpush.bf16.msra.mxu2 %v849_v14  ;;  %v894_v35 = vld [vmem:[%s1196_s29 + $0xa8] sm:$0xf0]  ;;  %v833_v38 = vor.u32 %v950_v32, %v830_v33  ;;  %v949_v40 = vld [vmem:[%s1196_s29 + $0x14] sm:$0xf0]  ;;  %v884_v41 = vld [vmem:[%s1196_s29 + $0x90] sm:$0xf] }
  0x4e   : > { %630 = vmatpush.bf16.msra.mxu3 %v913_v18  ;;  %v897_v42 = vor.u32 %v966_v34, %v894_v35  ;;  %v965_v43 = vld [vmem:[%s1196_s29 + $0x94] sm:$0xf0]  ;;  %v948_v44 = vld [vmem:[%s1196_s29 + $0x14] sm:$0xf]  ;;  %v822_v45 = vld [vmem:[%s1196_s29 + $0x18] sm:$0xf0]  ;;  %v821_v48 = vor.u32 %v949_v40, %v820_v39 }
  0x4f   : > { %v964_v46 = vld [vmem:[%s1196_s29 + $0x94] sm:$0xf]  ;;  %v886_v47 = vld [vmem:[%s1196_s29 + $0x98] sm:$0xf0]  ;;  %v885_v49 = vor.u32 %v965_v43, %v884_v41  ;;  %v825_v50 = vor.u32 %v948_v44, %v822_v45  ;;  %v812_v51 = vld [vmem:[%s1196_s29] sm:$0xf] }
  0x50   : > { %589 = vmatpush.bf16.msra.mxu0 %v837_v24  ;;  %v947_v52 = vld [vmem:[%s1196_s29 + $0x4] sm:$0xf0]  ;;  %v876_v53 = vld [vmem:[%s1196_s29 + $0x80] sm:$0xf]  ;;  %v889_v54 = vor.u32 %v964_v46, %v886_v47  ;;  %v946_v56 = vld [vmem:[%s1196_s29 + $0x4] sm:$0xf] }
  0x51   : > { %603 = vmatpush.bf16.msra.mxu1 %v901_v25  ;;  %617 = vmatpush.bf16.msra.mxu2 %v841_v26  ;;  %v963_v55 = vld [vmem:[%s1196_s29 + $0x84] sm:$0xf0]  ;;  %v814_v57 = vld [vmem:[%s1196_s29 + $0x8] sm:$0xf0]  ;;  %v962_v58 = vld [vmem:[%s1196_s29 + $0x84] sm:$0xf]  ;;  %v813_v60 = vor.u32 %v947_v52, %v812_v51 }
  0x52   : > { %631 = vmatpush.bf16.msra.mxu3 %v905_v30  ;;  %v878_v59 = vld [vmem:[%s1196_s29 + $0x88] sm:$0xf0]  ;;  %v804_v61 = vld [vmem:[%s1297_s0] sm:$0xf]  ;;  %v945_v62 = vld [vmem:[%s1297_s0 + $0x4] sm:$0xf0]  ;;  %v877_v63 = vor.u32 %v963_v55, %v876_v53  ;;  %v817_v0 = vor.u32 %v946_v56, %v814_v57 }
  0x53   : > { %v944_v1 = vld [vmem:[%s1297_s0 + $0x4] sm:$0xf]  ;;  %v806_v2 = vld [vmem:[%s1297_s0 + $0x8] sm:$0xf0]  ;;  %v881_v3 = vor.u32 %v962_v58, %v878_v59  ;;  %v805_v4 = vor.u32 %v945_v62, %v804_v61  ;;  %s978_s9 = sshll.u32 (%p1110_p6), %s1050_s11, 4 }
  0x54   : > { %590 = vmatpush.bf16.msra.mxu0 %v829_v36  ;;  %v809_v5 = vor.u32 %v944_v1, %v806_v2  ;;  %s672_s22 = scalar_lea.vmem (%p1110_p6), %s1299_s2, %s978_s9 }
  0x55   : > { %604 = vmatpush.bf16.msra.mxu1 %v893_v37  ;;  %618 = vmatpush.bf16.msra.mxu2 %v833_v38 }
  0x56   : > { %632 = vmatpush.bf16.msra.mxu3 %v897_v42 }
  0x58   : > { %591 = vmatpush.bf16.msra.mxu0 %v821_v48 }
  0x59   : > { %605 = vmatpush.bf16.msra.mxu1 %v885_v49  ;;  %619 = vmatpush.bf16.msra.mxu2 %v825_v50 }
  0x5a   : > { %633 = vmatpush.bf16.msra.mxu3 %v889_v54 }
  0x5c   : > { %592 = vmatpush.bf16.msra.mxu0 %v813_v60 }
  0x5d   : > { %606 = vmatpush.bf16.msra.mxu1 %v877_v63  ;;  %620 = vmatpush.bf16.msra.mxu2 %v817_v0 }
  0x5e   : > { %634 = vmatpush.bf16.msra.mxu3 %v881_v3 }
  0x5f   : > { %593 = vmatmul.bf16.vlgmr.msra.gmra.mxu0 %v805_v4 }
  0x60   : > { %607 = vmatmul.bf16.vlgmr.msra.gmra.mxu1 %v809_v5  ;;  %621 = vmatmul.bf16.vlgmr.msra.gmra.mxu2 %v805_v4 }
  0x61   : > { %635 = vmatmul.bf16.vlgmr.msra.gmra.mxu3 %v809_v5 }
  0xdc   : > { %v594_v6 = vpop.f32.mrf.mxu0 }
  0xdd   : > { %v608_v7 = vpop.f32.mrf.mxu1 }
  0xde   : > { %v609_v8 = vadd.f32 %v608_v7, %v594_v6 }
  0xe0   : > { %656 = vst [vmem:[%s352_s17] sm:$0xff] %v609_v8 }
  0xe3   : > { %v622_v9 = vpop.f32.mrf.mxu2 }
  0xe4   : > { %v636_v10 = vpop.f32.mrf.mxu3  ;;  %v596_v11 = vpop.f32.mrf.mxu0 }
  0xe5   : > { %v637_v12 = vadd.f32 %v636_v10, %v622_v9  ;;  %v610_v13 = vpop.f32.mrf.mxu1 }
  0xe6   : > { %v611_v14 = vadd.f32 %v610_v13, %v596_v11 }
  0xe7   : > { %657 = vst [vmem:[%s352_s17 + $0x8] sm:$0xff] %v637_v12  ;;  %v685_v18 = vld [vmem:[%s352_s17] sm:$0xff] (%p1110_p6) }
  0xe8   : > { %658 = vst [vmem:[%s352_s17 + $0x10] sm:$0xff] %v611_v14 }
  0xe9   : > { %686 = vst [vmem:[%s672_s22] sm:$0xff] (%p1110_p6), %v685_v18 }
  0xeb   : > { %v624_v15 = vpop.f32.mrf.mxu2  ;;  %666 = sbr.rel (!%p1110_p6) target bundleno = 248 (0xf8), region = 78 }
  0xec   : > { %v638_v16 = vpop.f32.mrf.mxu3 }
  0xed   : > { %v639_v17 = vadd.f32 %v638_v16, %v624_v15 }
  0xee   : > { %v687_v19 = vld [vmem:[%s352_s17 + $0x8] sm:$0xff] (%p1110_p6) }
  0xef   : > { %659 = vst [vmem:[%s352_s17 + $0x18] sm:$0xff] %v639_v17  ;;  %v689_v20 = vld [vmem:[%s352_s17 + $0x10] sm:$0xff] (%p1110_p6) }
  0xf0   : > { %688 = vst [vmem:[%s672_s22 + $0x8] sm:$0xff] %v687_v19 }
  0xf1   : > { %690 = vst [vmem:[%s672_s22 + $0x20] sm:$0xff] %v689_v20 }
  0xf6   : > { %v691_v21 = vld [vmem:[%s352_s17 + $0x18] sm:$0xff] }
  0xf7   : > { %692 = vst [vmem:[%s672_s22 + $0x28] sm:$0xff] %v691_v21 }
  0xf8 PF: > { %s12_s13 = sadd.s32 1, %s1058_s13   ;;  %s1301_s9 = smov %s1046_s10 }
  0xf9   : > { %p9_p11 = scmp.ge.s32.totalorder %s12_s13, 4   ;;  %s1302_s10 = smov %s1115_s19 }
  0xfa   : > { %s1303_s11 = smov %s1054_s12  ;;  %s1304_s12 = smov %s1306_s14 }
  0xfb   :  { %11 = sbr.rel (!%p9_p11) target bundleno = 3 (0x3), region = 135 }

// kernel: forward.40
= control target key start
LH: loop header
LB: loop body
LE: loop exit
PB: predicated region body
PF: predicated region fallthrough
CT: control target
= control target key end

     0   :  { %s3074_s0 = inlined_call_operand.vmem [shape: bf16[16,4608], index: 0, kind: input, shape index: {}]   ;;  %s3075_s1 = inlined_call_operand.vmem [shape: bf16[4608,512], index: 1, kind: input, shape index: {}]   ;;  %s3076_s2 = inlined_call_operand.vmem [shape: f32[16,512], index: 2, kind: input, shape index: {}]   ;;  %s3077_s3 = inlined_call_operand.vmem [shape: f32[16,512], index: 3, kind: output, shape index: {}]  }
   0x1   :  { %3079 = sst [smem:[#allocation7_spill]] %s3074_s0 }
   0x2   :  { %s2437_s12 = smov 0   ;;  %s2439_s13 = smov 0  }
   0x3   :  { %s2441_s14 = smov 0   ;;  %s2443_s15 = smov 0  }
   0x4   :  { %s2445_s16 = smov 0   ;;  %s2447_s17 = smov 0  }
   0x5   :  { %s2449_s18 = smov 0   ;;  %s2451_s19 = smov 0  }
   0x6   :  { %s2453_s20 = smov 0   ;;  %s2455_s21 = smov 0  }
   0x7   :  { %s2457_s22 = smov 0  }
   0x8 LB: > { %s1700_s23 = sadd.s32 4294967295, %s2414_s22   ;;  %s25_s24 = sadd.s32 1, %s2406_s20  ;;  %s2414_s22 = sphi %s2457_s22, %s13_s22   ;;  %s2410_s21 = sphi %s2455_s21, %s3096_s21   ;;  %s2406_s20 = sphi %s2453_s20, %s3095_s20   ;;  %s2402_s19 = sphi %s2451_s19, %s3094_s19   ;;  %s2398_s18 = sphi %s2449_s18, %s3093_s18   ;;  %s2394_s17 = sphi %s2447_s17, %s3092_s17   ;;  %s2390_s16 = sphi %s2445_s16, %s3091_s16   ;;  %s2386_s15 = sphi %s2443_s15, %s3090_s15   ;;  %s2382_s14 = sphi %s2441_s14, %s3089_s14   ;;  %s2378_s13 = sphi %s2439_s13, %s3088_s13   ;;  %s2374_s12 = sphi %s2437_s12, %s3087_s12  }
   0x9   : > { %p26_p0 = scmp.ge.s32.totalorder %s25_s24, 6  ;;  %s28_s25 = sadd.s32 1, %s2410_s21 }
   0xa   : > { %s41_s26 = sadd.s32 1, %s2394_s17  ;;  %p48_p1 = scmp.ne.s32.totalorder %s2394_s17, %s2390_s16 }
   0xb   : > { %s3098_s24 = smov (%p26_p0, %s25_s24), 0  ;;  %s3100_s25 = smov (!%p26_p0, %s28_s25), %s2410_s21 }
   0xc   : > { %s37_s27 = ssub.s32 %s2406_s20, %s3098_s24  ;;  %p49_p2 = scmp.eq.s32.totalorder %s2414_s22, 0 }
   0xd   : > { %p30_p3 = scmp.ge.s32.totalorder %s3100_s25, 2  ;;  %p39_p4 = scmp.eq.s32.totalorder %s37_s27, 0 }
   0xe   : > { %p2506_p5 = por %p49_p2, %p48_p1  ;;  %s69_s29 = sadd.s32 1, %s2386_s15 }
   0xf   : > { %s3102_s25 = smov (%p30_p3, %s3100_s25), 0  ;;  %p76_p6 = scmp.ne.s32.totalorder %s2386_s15, %s2382_s14 }
  0x10   : > { %3081 = sst [smem:[#allocation6_spill]] %s3102_s25  ;;  %s65_s4 = ssub.s32 %s2410_s21, %s3102_s25 }
  0x11   : > { %s2514_s30 = scalar_select %p39_p4, %s2394_s17, %s41_s26  }
  0x12   : > { %s66_s5 = sor.u32 %s65_s4, %s37_s27  ;;  %p95_p7 = scmp.eq.s32.totalorder %s65_s4, 0 }
  0x13   : > { %p67_p8 = scmp.eq.s32.totalorder %s66_s5, 0  ;;  %p2522_p9 = por %p76_p6, %p49_p2 }
  0x14   : > { %s97_s7 = sadd.s32 1, %s2378_s13  ;;  %p104_p10 = scmp.ne.s32.totalorder %s2378_s13, %s2374_s12 }
  0x15   : > { %s2530_s8 = scalar_select %p67_p8, %s2386_s15, %s69_s29  }
  0x16   : > { %s2533_s9 = scalar_select %p95_p7, %s2378_s13, %s97_s7  }
  0x17   : > { %p2537_p11 = por %p104_p10, %p49_p2  ;;  %p136_p12 = scmp.eq.s32.totalorder %s1700_s23, 11 }
  0x18   : > { %p1703_p0 = scmp.ge.s32.totalorder %s2414_s22, 12 }
  0x19   : > { %p2541_p13 = por %p136_p12, %p104_p10 }
  0x1a   : > { %158 = sbr.rel (%p1703_p0) target bundleno = 158 (0x9e), region = 16 }
  0x1f   : > { %161 = sbr.rel (!%p2506_p5) target bundleno = 46 (0x2e), region = 20  ;;  %s163_s26 = sand.u32 (%p2506_p5), 1, %s2394_s17  }
  0x20   : > { %s2129_s27 = smul.u32 (%p2506_p5), 24, %s2406_s20  ;;  %s3085_s0 = sld [smem:[#allocation7_spill]] (%p2506_p5) }
  0x21   : > { %s2235_s29 = smul.u32 (%p2506_p5), 48, %s163_s26 }
  0x23   : > { %s165_s23 = scalar_lea.vmem (%p2506_p5), [#allocation2], %s2235_s29 }
  0x26   : > { %s171_s7 = scalar_lea.vmem %s3085_s0, %s2129_s27 }
  0x27   : > { %v184_v0 = vld [vmem:[%s171_s7] sm:$0xff]  ;;  %v186_v1 = vld [vmem:[%s171_s7 + $0x8] sm:$0xff]  ;;  %v188_v2 = vld [vmem:[%s171_s7 + $0x10] sm:$0xff] }
  0x28   : > { %185 = vst [vmem:[%s165_s23] sm:$0xff] %v184_v0  ;;  %v190_v3 = vld [vmem:[%s171_s7 + $0x90] sm:$0xff]  ;;  %v192_v4 = vld [vmem:[%s171_s7 + $0x98] sm:$0xff]  ;;  %v194_v5 = vld [vmem:[%s171_s7 + $0xa0] sm:$0xff] }
  0x29   : > { %187 = vst [vmem:[%s165_s23 + $0x8] sm:$0xff] %v186_v1 }
  0x2a   : > { %189 = vst [vmem:[%s165_s23 + $0x10] sm:$0xff] %v188_v2 }
  0x2b   : > { %191 = vst [vmem:[%s165_s23 + $0x18] sm:$0xff] %v190_v3 }
  0x2c   : > { %193 = vst [vmem:[%s165_s23 + $0x20] sm:$0xff] %v192_v4 }
  0x2d   : > { %195 = vst [vmem:[%s165_s23 + $0x28] sm:$0xff] %v194_v5 }
  0x2e PF: > { %201 = sbr.rel (!%p2522_p9) target bundleno = 150 (0x96), region = 43  ;;  %s203_s28 = sand.u32 (%p2522_p9), 1, %s2386_s15  }
  0x2f   : > { %s2236_s26 = smul.u32 (%p2522_p9), 768, %s203_s28  ;;  %s1705_s27 = sshll.u32 (%p2522_p9), %s2410_s21, 1 }
  0x30   : > { %s2130_s29 = smul.u32 (%p2522_p9), 384, %s2406_s20 }
  0x31   : > { %s2566_s6 = scalar_lea.vmem (%p2522_p9), [#allocation3], %s2236_s26 }
  0x32   : > { %s209_s4 = sadd.s32 (%p2522_p9), %s2130_s29, %s1705_s27 }
  0x33   : > { %s1707_s5 = sshll.u32 %s209_s4, 2 }
  0x34   : > { %s2561_s7 = scalar_lea.vmem %s3075_s1, %s1707_s5 }
  0x35   : > { %v430_v6 = vld [vmem:[%s2561_s7] sm:$0xff]  ;;  %v432_v7 = vld [vmem:[%s2561_s7 + $0x10] sm:$0xff] }
  0x36   : > { %v434_v8 = vld [vmem:[%s2561_s7 + $0x20] sm:$0xff]  ;;  %431 = vst [vmem:[%s2566_s6] sm:$0xff] %v430_v6  ;;  %v436_v9 = vld [vmem:[%s2561_s7 + $0x30] sm:$0xff] }
  0x37   : > { %433 = vst [vmem:[%s2566_s6 + $0x8] sm:$0xff] %v432_v7  ;;  %v438_v10 = vld [vmem:[%s2561_s7 + $0x40] sm:$0xff]  ;;  %v440_v11 = vld [vmem:[%s2561_s7 + $0x50] sm:$0xff] }
  0x38   : > { %435 = vst [vmem:[%s2566_s6 + $0x10] sm:$0xff] %v434_v8  ;;  %v442_v12 = vld [vmem:[%s2561_s7 + $0x60] sm:$0xff]  ;;  %v444_v13 = vld [vmem:[%s2561_s7 + $0x70] sm:$0xff] }
  0x39   : > { %437 = vst [vmem:[%s2566_s6 + $0x18] sm:$0xff] %v436_v9  ;;  %v446_v14 = vld [vmem:[%s2561_s7 + $0x80] sm:$0xff]  ;;  %v448_v15 = vld [vmem:[%s2561_s7 + $0x90] sm:$0xff] }
  0x3a   : > { %439 = vst [vmem:[%s2566_s6 + $0x20] sm:$0xff] %v438_v10  ;;  %v450_v16 = vld [vmem:[%s2561_s7 + $0xa0] sm:$0xff]  ;;  %v452_v17 = vld [vmem:[%s2561_s7 + $0xb0] sm:$0xff] }
  0x3b   : > { %441 = vst [vmem:[%s2566_s6 + $0x28] sm:$0xff] %v440_v11  ;;  %v454_v18 = vld [vmem:[%s2561_s7 + $0xc0] sm:$0xff]  ;;  %v456_v19 = vld [vmem:[%s2561_s7 + $0xd0] sm:$0xff] }
  0x3c   : > { %443 = vst [vmem:[%s2566_s6 + $0x30] sm:$0xff] %v442_v12  ;;  %v458_v20 = vld [vmem:[%s2561_s7 + $0xe0] sm:$0xff]  ;;  %v460_v21 = vld [vmem:[%s2561_s7 + $0xf0] sm:$0xff] }
  0x3d   : > { %445 = vst [vmem:[%s2566_s6 + $0x38] sm:$0xff] %v444_v13  ;;  %v462_v22 = vld [vmem:[%s2561_s7 + $0x100] sm:$0xff]  ;;  %v464_v23 = vld [vmem:[%s2561_s7 + $0x110] sm:$0xff] }
  0x3e   : > { %447 = vst [vmem:[%s2566_s6 + $0x40] sm:$0xff] %v446_v14  ;;  %v466_v24 = vld [vmem:[%s2561_s7 + $0x120] sm:$0xff]  ;;  %v468_v25 = vld [vmem:[%s2561_s7 + $0x130] sm:$0xff] }
  0x3f   : > { %449 = vst [vmem:[%s2566_s6 + $0x48] sm:$0xff] %v448_v15  ;;  %v470_v26 = vld [vmem:[%s2561_s7 + $0x140] sm:$0xff]  ;;  %v472_v27 = vld [vmem:[%s2561_s7 + $0x150] sm:$0xff] }
  0x40   : > { %451 = vst [vmem:[%s2566_s6 + $0x50] sm:$0xff] %v450_v16  ;;  %v474_v28 = vld [vmem:[%s2561_s7 + $0x160] sm:$0xff]  ;;  %v476_v29 = vld [vmem:[%s2561_s7 + $0x170] sm:$0xff] }
  0x41   : > { %453 = vst [vmem:[%s2566_s6 + $0x58] sm:$0xff] %v452_v17  ;;  %v478_v30 = vld [vmem:[%s2561_s7 + $0x180] sm:$0xff]  ;;  %v480_v31 = vld [vmem:[%s2561_s7 + $0x190] sm:$0xff] }
  0x42   : > { %455 = vst [vmem:[%s2566_s6 + $0x60] sm:$0xff] %v454_v18  ;;  %v482_v32 = vld [vmem:[%s2561_s7 + $0x1a0] sm:$0xff]  ;;  %v484_v33 = vld [vmem:[%s2561_s7 + $0x1b0] sm:$0xff] }
  0x43   : > { %457 = vst [vmem:[%s2566_s6 + $0x68] sm:$0xff] %v456_v19  ;;  %v486_v34 = vld [vmem:[%s2561_s7 + $0x1c0] sm:$0xff]  ;;  %v488_v35 = vld [vmem:[%s2561_s7 + $0x1d0] sm:$0xff] }
  0x44   : > { %459 = vst [vmem:[%s2566_s6 + $0x70] sm:$0xff] %v458_v20  ;;  %v490_v36 = vld [vmem:[%s2561_s7 + $0x1e0] sm:$0xff]  ;;  %v492_v37 = vld [vmem:[%s2561_s7 + $0x1f0] sm:$0xff] }
  0x45   : > { %461 = vst [vmem:[%s2566_s6 + $0x78] sm:$0xff] %v460_v21  ;;  %v494_v38 = vld [vmem:[%s2561_s7 + $0x200] sm:$0xff]  ;;  %v496_v39 = vld [vmem:[%s2561_s7 + $0x210] sm:$0xff] }
  0x46   : > { %463 = vst [vmem:[%s2566_s6 + $0x80] sm:$0xff] %v462_v22  ;;  %v498_v40 = vld [vmem:[%s2561_s7 + $0x220] sm:$0xff]  ;;  %v500_v41 = vld [vmem:[%s2561_s7 + $0x230] sm:$0xff] }
  0x47   : > { %465 = vst [vmem:[%s2566_s6 + $0x88] sm:$0xff] %v464_v23  ;;  %v502_v42 = vld [vmem:[%s2561_s7 + $0x240] sm:$0xff]  ;;  %v504_v43 = vld [vmem:[%s2561_s7 + $0x250] sm:$0xff] }
  0x48   : > { %467 = vst [vmem:[%s2566_s6 + $0x90] sm:$0xff] %v466_v24  ;;  %v506_v44 = vld [vmem:[%s2561_s7 + $0x260] sm:$0xff]  ;;  %v508_v45 = vld [vmem:[%s2561_s7 + $0x270] sm:$0xff] }
  0x49   : > { %469 = vst [vmem:[%s2566_s6 + $0x98] sm:$0xff] %v468_v25  ;;  %v510_v46 = vld [vmem:[%s2561_s7 + $0x280] sm:$0xff]  ;;  %v512_v47 = vld [vmem:[%s2561_s7 + $0x290] sm:$0xff] }
  0x4a   : > { %471 = vst [vmem:[%s2566_s6 + $0xa0] sm:$0xff] %v470_v26  ;;  %v514_v48 = vld [vmem:[%s2561_s7 + $0x2a0] sm:$0xff]  ;;  %v516_v49 = vld [vmem:[%s2561_s7 + $0x2b0] sm:$0xff] }
  0x4b   : > { %473 = vst [vmem:[%s2566_s6 + $0xa8] sm:$0xff] %v472_v27  ;;  %v518_v50 = vld [vmem:[%s2561_s7 + $0x2c0] sm:$0xff]  ;;  %v520_v51 = vld [vmem:[%s2561_s7 + $0x2d0] sm:$0xff] }
  0x4c   : > { %475 = vst [vmem:[%s2566_s6 + $0xb0] sm:$0xff] %v474_v28  ;;  %v522_v52 = vld [vmem:[%s2561_s7 + $0x2e0] sm:$0xff]  ;;  %v524_v53 = vld [vmem:[%s2561_s7 + $0x2f0] sm:$0xff] }
  0x4d   : > { %477 = vst [vmem:[%s2566_s6 + $0xb8] sm:$0xff] %v476_v29  ;;  %v526_v54 = vld [vmem:[%s2561_s7 + $0x300] sm:$0xff]  ;;  %v528_v55 = vld [vmem:[%s2561_s7 + $0x310] sm:$0xff] }
  0x4e   : > { %479 = vst [vmem:[%s2566_s6 + $0xc0] sm:$0xff] %v478_v30  ;;  %v530_v56 = vld [vmem:[%s2561_s7 + $0x320] sm:$0xff]  ;;  %v532_v57 = vld [vmem:[%s2561_s7 + $0x330] sm:$0xff] }
  0x4f   : > { %481 = vst [vmem:[%s2566_s6 + $0xc8] sm:$0xff] %v480_v31  ;;  %v534_v58 = vld [vmem:[%s2561_s7 + $0x340] sm:$0xff]  ;;  %v536_v59 = vld [vmem:[%s2561_s7 + $0x350] sm:$0xff] }
  0x50   : > { %483 = vst [vmem:[%s2566_s6 + $0xd0] sm:$0xff] %v482_v32  ;;  %v538_v60 = vld [vmem:[%s2561_s7 + $0x360] sm:$0xff]  ;;  %v540_v61 = vld [vmem:[%s2561_s7 + $0x370] sm:$0xff] }
  0x51   : > { %485 = vst [vmem:[%s2566_s6 + $0xd8] sm:$0xff] %v484_v33  ;;  %v542_v62 = vld [vmem:[%s2561_s7 + $0x380] sm:$0xff]  ;;  %v544_v63 = vld [vmem:[%s2561_s7 + $0x390] sm:$0xff] }
  0x52   : > { %487 = vst [vmem:[%s2566_s6 + $0xe0] sm:$0xff] %v486_v34  ;;  %v546_v0 = vld [vmem:[%s2561_s7 + $0x3a0] sm:$0xff]  ;;  %v548_v1 = vld [vmem:[%s2561_s7 + $0x3b0] sm:$0xff] }
  0x53   : > { %489 = vst [vmem:[%s2566_s6 + $0xe8] sm:$0xff] %v488_v35  ;;  %v550_v2 = vld [vmem:[%s2561_s7 + $0x3c0] sm:$0xff]  ;;  %v552_v3 = vld [vmem:[%s2561_s7 + $0x3d0] sm:$0xff] }
  0x54   : > { %491 = vst [vmem:[%s2566_s6 + $0xf0] sm:$0xff] %v490_v36  ;;  %v554_v4 = vld [vmem:[%s2561_s7 + $0x3e0] sm:$0xff]  ;;  %v556_v5 = vld [vmem:[%s2561_s7 + $0x3f0] sm:$0xff] }
  0x55   : > { %493 = vst [vmem:[%s2566_s6 + $0xf8] sm:$0xff] %v492_v37  ;;  %v558_v6 = vld [vmem:[%s2561_s7 + $0x400] sm:$0xff]  ;;  %v560_v7 = vld [vmem:[%s2561_s7 + $0x410] sm:$0xff] }
  0x56   : > { %495 = vst [vmem:[%s2566_s6 + $0x100] sm:$0xff] %v494_v38  ;;  %v562_v8 = vld [vmem:[%s2561_s7 + $0x420] sm:$0xff]  ;;  %v564_v9 = vld [vmem:[%s2561_s7 + $0x430] sm:$0xff] }
  0x57   : > { %497 = vst [vmem:[%s2566_s6 + $0x108] sm:$0xff] %v496_v39  ;;  %v566_v10 = vld [vmem:[%s2561_s7 + $0x440] sm:$0xff]  ;;  %v568_v11 = vld [vmem:[%s2561_s7 + $0x450] sm:$0xff] }
  0x58   : > { %499 = vst [vmem:[%s2566_s6 + $0x110] sm:$0xff] %v498_v40  ;;  %v570_v12 = vld [vmem:[%s2561_s7 + $0x460] sm:$0xff]  ;;  %v572_v13 = vld [vmem:[%s2561_s7 + $0x470] sm:$0xff] }
  0x59   : > { %501 = vst [vmem:[%s2566_s6 + $0x118] sm:$0xff] %v500_v41  ;;  %v574_v14 = vld [vmem:[%s2561_s7 + $0x480] sm:$0xff]  ;;  %v576_v15 = vld [vmem:[%s2561_s7 + $0x490] sm:$0xff] }
  0x5a   : > { %503 = vst [vmem:[%s2566_s6 + $0x120] sm:$0xff] %v502_v42  ;;  %v578_v16 = vld [vmem:[%s2561_s7 + $0x4a0] sm:$0xff]  ;;  %v580_v17 = vld [vmem:[%s2561_s7 + $0x4b0] sm:$0xff] }
  0x5b   : > { %505 = vst [vmem:[%s2566_s6 + $0x128] sm:$0xff] %v504_v43  ;;  %v582_v18 = vld [vmem:[%s2561_s7 + $0x4c0] sm:$0xff]  ;;  %v584_v19 = vld [vmem:[%s2561_s7 + $0x4d0] sm:$0xff] }
  0x5c   : > { %507 = vst [vmem:[%s2566_s6 + $0x130] sm:$0xff] %v506_v44  ;;  %v586_v20 = vld [vmem:[%s2561_s7 + $0x4e0] sm:$0xff]  ;;  %v588_v21 = vld [vmem:[%s2561_s7 + $0x4f0] sm:$0xff] }
  0x5d   : > { %509 = vst [vmem:[%s2566_s6 + $0x138] sm:$0xff] %v508_v45  ;;  %v590_v22 = vld [vmem:[%s2561_s7 + $0x500] sm:$0xff]  ;;  %v592_v23 = vld [vmem:[%s2561_s7 + $0x510] sm:$0xff] }
  0x5e   : > { %511 = vst [vmem:[%s2566_s6 + $0x140] sm:$0xff] %v510_v46  ;;  %v594_v24 = vld [vmem:[%s2561_s7 + $0x520] sm:$0xff]  ;;  %v596_v25 = vld [vmem:[%s2561_s7 + $0x530] sm:$0xff] }
  0x5f   : > { %513 = vst [vmem:[%s2566_s6 + $0x148] sm:$0xff] %v512_v47  ;;  %v598_v26 = vld [vmem:[%s2561_s7 + $0x540] sm:$0xff]  ;;  %v600_v27 = vld [vmem:[%s2561_s7 + $0x550] sm:$0xff] }
  0x60   : > { %515 = vst [vmem:[%s2566_s6 + $0x150] sm:$0xff] %v514_v48  ;;  %v602_v28 = vld [vmem:[%s2561_s7 + $0x560] sm:$0xff]  ;;  %v604_v29 = vld [vmem:[%s2561_s7 + $0x570] sm:$0xff] }
  0x61   : > { %517 = vst [vmem:[%s2566_s6 + $0x158] sm:$0xff] %v516_v49  ;;  %v606_v30 = vld [vmem:[%s2561_s7 + $0x580] sm:$0xff]  ;;  %v608_v31 = vld [vmem:[%s2561_s7 + $0x590] sm:$0xff] }
  0x62   : > { %519 = vst [vmem:[%s2566_s6 + $0x160] sm:$0xff] %v518_v50  ;;  %v610_v32 = vld [vmem:[%s2561_s7 + $0x5a0] sm:$0xff]  ;;  %v612_v33 = vld [vmem:[%s2561_s7 + $0x5b0] sm:$0xff] }
  0x63   : > { %521 = vst [vmem:[%s2566_s6 + $0x168] sm:$0xff] %v520_v51  ;;  %v614_v34 = vld [vmem:[%s2561_s7 + $0x5c0] sm:$0xff]  ;;  %v616_v35 = vld [vmem:[%s2561_s7 + $0x5d0] sm:$0xff] }
  0x64   : > { %523 = vst [vmem:[%s2566_s6 + $0x170] sm:$0xff] %v522_v52  ;;  %v618_v36 = vld [vmem:[%s2561_s7 + $0x5e0] sm:$0xff]  ;;  %v620_v37 = vld [vmem:[%s2561_s7 + $0x5f0] sm:$0xff] }
  0x65   : > { %525 = vst [vmem:[%s2566_s6 + $0x178] sm:$0xff] %v524_v53 }
  0x66   : > { %527 = vst [vmem:[%s2566_s6 + $0x180] sm:$0xff] %v526_v54 }
  0x67   : > { %529 = vst [vmem:[%s2566_s6 + $0x188] sm:$0xff] %v528_v55 }
  0x68   : > { %531 = vst [vmem:[%s2566_s6 + $0x190] sm:$0xff] %v530_v56 }
  0x69   : > { %533 = vst [vmem:[%s2566_s6 + $0x198] sm:$0xff] %v532_v57 }
  0x6a   : > { %535 = vst [vmem:[%s2566_s6 + $0x1a0] sm:$0xff] %v534_v58 }
  0x6b   : > { %537 = vst [vmem:[%s2566_s6 + $0x1a8] sm:$0xff] %v536_v59 }
  0x6c   : > { %539 = vst [vmem:[%s2566_s6 + $0x1b0] sm:$0xff] %v538_v60 }
  0x6d   : > { %541 = vst [vmem:[%s2566_s6 + $0x1b8] sm:$0xff] %v540_v61 }
  0x6e   : > { %543 = vst [vmem:[%s2566_s6 + $0x1c0] sm:$0xff] %v542_v62 }
  0x6f   : > { %545 = vst [vmem:[%s2566_s6 + $0x1c8] sm:$0xff] %v544_v63 }
  0x70   : > { %547 = vst [vmem:[%s2566_s6 + $0x1d0] sm:$0xff] %v546_v0 }
  0x71   : > { %549 = vst [vmem:[%s2566_s6 + $0x1d8] sm:$0xff] %v548_v1 }
  0x72   : > { %551 = vst [vmem:[%s2566_s6 + $0x1e0] sm:$0xff] %v550_v2 }
  0x73   : > { %553 = vst [vmem:[%s2566_s6 + $0x1e8] sm:$0xff] %v552_v3 }
  0x74   : > { %555 = vst [vmem:[%s2566_s6 + $0x1f0] sm:$0xff] %v554_v4 }
  0x75   : > { %557 = vst [vmem:[%s2566_s6 + $0x1f8] sm:$0xff] %v556_v5 }
  0x76   : > { %559 = vst [vmem:[%s2566_s6 + $0x200] sm:$0xff] %v558_v6 }
  0x77   : > { %561 = vst [vmem:[%s2566_s6 + $0x208] sm:$0xff] %v560_v7 }
  0x78   : > { %563 = vst [vmem:[%s2566_s6 + $0x210] sm:$0xff] %v562_v8 }
  0x79   : > { %565 = vst [vmem:[%s2566_s6 + $0x218] sm:$0xff] %v564_v9 }
  0x7a   : > { %567 = vst [vmem:[%s2566_s6 + $0x220] sm:$0xff] %v566_v10 }
  0x7b   : > { %569 = vst [vmem:[%s2566_s6 + $0x228] sm:$0xff] %v568_v11 }
  0x7c   : > { %571 = vst [vmem:[%s2566_s6 + $0x230] sm:$0xff] %v570_v12 }
  0x7d   : > { %573 = vst [vmem:[%s2566_s6 + $0x238] sm:$0xff] %v572_v13 }
  0x7e   : > { %575 = vst [vmem:[%s2566_s6 + $0x240] sm:$0xff] %v574_v14 }
  0x7f   : > { %577 = vst [vmem:[%s2566_s6 + $0x248] sm:$0xff] %v576_v15 }
  0x80   : > { %579 = vst [vmem:[%s2566_s6 + $0x250] sm:$0xff] %v578_v16 }
  0x81   : > { %581 = vst [vmem:[%s2566_s6 + $0x258] sm:$0xff] %v580_v17 }
  0x82   : > { %583 = vst [vmem:[%s2566_s6 + $0x260] sm:$0xff] %v582_v18 }
  0x83   : > { %585 = vst [vmem:[%s2566_s6 + $0x268] sm:$0xff] %v584_v19 }
  0x84   : > { %587 = vst [vmem:[%s2566_s6 + $0x270] sm:$0xff] %v586_v20 }
  0x85   : > { %589 = vst [vmem:[%s2566_s6 + $0x278] sm:$0xff] %v588_v21 }
  0x86   : > { %591 = vst [vmem:[%s2566_s6 + $0x280] sm:$0xff] %v590_v22 }
  0x87   : > { %593 = vst [vmem:[%s2566_s6 + $0x288] sm:$0xff] %v592_v23 }
  0x88   : > { %595 = vst [vmem:[%s2566_s6 + $0x290] sm:$0xff] %v594_v24 }
  0x89   : > { %597 = vst [vmem:[%s2566_s6 + $0x298] sm:$0xff] %v596_v25 }
  0x8a   : > { %599 = vst [vmem:[%s2566_s6 + $0x2a0] sm:$0xff] %v598_v26 }
  0x8b   : > { %601 = vst [vmem:[%s2566_s6 + $0x2a8] sm:$0xff] %v600_v27 }
  0x8c   : > { %603 = vst [vmem:[%s2566_s6 + $0x2b0] sm:$0xff] %v602_v28 }
  0x8d   : > { %605 = vst [vmem:[%s2566_s6 + $0x2b8] sm:$0xff] %v604_v29 }
  0x8e   : > { %607 = vst [vmem:[%s2566_s6 + $0x2c0] sm:$0xff] %v606_v30 }
  0x8f   : > { %609 = vst [vmem:[%s2566_s6 + $0x2c8] sm:$0xff] %v608_v31 }
  0x90   : > { %611 = vst [vmem:[%s2566_s6 + $0x2d0] sm:$0xff] %v610_v32 }
  0x91   : > { %613 = vst [vmem:[%s2566_s6 + $0x2d8] sm:$0xff] %v612_v33 }
  0x92   : > { %615 = vst [vmem:[%s2566_s6 + $0x2e0] sm:$0xff] %v614_v34 }
  0x93   : > { %617 = vst [vmem:[%s2566_s6 + $0x2e8] sm:$0xff] %v616_v35 }
  0x94   : > { %619 = vst [vmem:[%s2566_s6 + $0x2f0] sm:$0xff] %v618_v36 }
  0x95   : > { %621 = vst [vmem:[%s2566_s6 + $0x2f8] sm:$0xff] %v620_v37 }
  0x96 PF: > { %627 = sbr.rel (!%p2537_p11) target bundleno = 158 (0x9e), region = 81  ;;  %s629_s0 = sand.u32 (%p2537_p11), 1, %s2378_s13  }
  0x97   : > { %s2131_s25 = sshll.u32 (%p2537_p11), %s2410_s21, 4  ;;  %s1708_s23 = sshll.u32 (%p2537_p11), %s629_s0, 5 }
  0x98   : > { %s637_s27 = scalar_lea.vmem (%p2537_p11), %s3076_s2, %s2131_s25  ;;  %s631_s29 = scalar_lea.vmem (%p2537_p11), [#allocation4], %s1708_s23 }
  0x99   : > { %v650_v38 = vld [vmem:[%s637_s27] sm:$0xff] (%p2537_p11)  ;;  %v652_v39 = vld [vmem:[%s637_s27 + $0x8] sm:$0xff] (%p2537_p11) }
  0x9a   : > { %v654_v40 = vld [vmem:[%s637_s27 + $0x20] sm:$0xff] (%p2537_p11)  ;;  %651 = vst [vmem:[%s631_s29] sm:$0xff] (%p2537_p11), %v650_v38  ;;  %v656_v41 = vld [vmem:[%s637_s27 + $0x28] sm:$0xff] (%p2537_p11) }
  0x9b   : > { %653 = vst [vmem:[%s631_s29 + $0x8] sm:$0xff] %v652_v39 }
  0x9c   : > { %655 = vst [vmem:[%s631_s29 + $0x10] sm:$0xff] %v654_v40 }
  0x9d   : > { %657 = vst [vmem:[%s631_s29 + $0x18] sm:$0xff] %v656_v41 }
  0x9e PF: > { %p1711_p1 = scmp.ge.s32.totalorder %s2414_s22, 1  ;;  %p662_p2 = scmp.lt.s32.totalorder %s2414_s22, 13 }
  0xa0   : > { %p663_p3 = pnand %p1711_p1, %p662_p2 }
  0xa1   : > { %s669_s10 = sand.u32 (!%p663_p3), 1, %s2390_s16   ;;  %s676_s4 = sand.u32 (!%p663_p3), 1, %s2382_s14  }
  0xa2   : > { %666 = sbr.rel (%p663_p3) target bundleno = 445 (0x1bd), region = 104  ;;  %s683_s7 = sand.u32 (!%p663_p3), 1, %s2374_s12  }
  0xa3   : > { %s2237_s5 = smul.u32 (!%p663_p3), 48, %s669_s10  ;;  %s1712_s0 = sshll.u32 (!%p663_p3), %s683_s7, 5 }
  0xa4   : > { %s2238_s6 = smul.u32 (!%p663_p3), 768, %s676_s4  ;;  %s2773_s28 = scalar_lea.vmem (!%p663_p3), [#allocation4], %s1712_s0 }
  0xa5   : > { %s2769_s25 = scalar_lea.vmem (!%p663_p3), [#allocation2], %s2237_s5  ;;  %s2775_s26 = scalar_lea.vmem (!%p663_p3), [#allocation5], %s1712_s0 }
  0xa6   : > { %s2771_s23 = scalar_lea.vmem (!%p663_p3), [#allocation3], %s2238_s6  ;;  %p1714_p4 = scmp.ne.s32.totalorder (!%p663_p3), %s2398_s18, 0 }
  0xa8   : > { %724 = sbr.rel (%p1714_p4) target bundleno = 178 (0xb2), region = 120 }
  0xad   : > { %v2416_v42 = vmov 0.0  }
  0xae   : > { %725 = vst [vmem:[%s2775_s26] sm:$0xff] %v2416_v42 }
  0xaf   : > { %726 = vst [vmem:[%s2775_s26 + $0x8] sm:$0xff] %v2416_v42 }
  0xb0   : > { %727 = vst [vmem:[%s2775_s26 + $0x10] sm:$0xff] %v2416_v42 }
  0xb1   : > { %728 = vst [vmem:[%s2775_s26 + $0x18] sm:$0xff] %v2416_v42 }
  0xb2 PF: > { %v1797_v43 = vld [vmem:[%s2771_s23 + $0x70] sm:$0xf]  ;;  %v2153_v44 = vld [vmem:[%s2771_s23 + $0x74] sm:$0xf0]  ;;  %v1789_v54 = vld [vmem:[%s2771_s23 + $0x60] sm:$0xf] }
  0xb3   : > { %v1861_v45 = vld [vmem:[%s2771_s23 + $0xf0] sm:$0xf]  ;;  %v1798_v46 = vor.u32 %v2153_v44, %v1797_v43  ;;  %v2169_v47 = vld [vmem:[%s2771_s23 + $0xf4] sm:$0xf0]  ;;  %v2151_v56 = vld [vmem:[%s2771_s23 + $0x64] sm:$0xf0] }
  0xb4   : > { %v1925_v48 = vld [vmem:[%s2771_s23 + $0x170] sm:$0xf]  ;;  %v2185_v49 = vld [vmem:[%s2771_s23 + $0x174] sm:$0xf0]  ;;  %v1862_v50 = vor.u32 %v2169_v47, %v1861_v45  ;;  %v1853_v57 = vld [vmem:[%s2771_s23 + $0xe0] sm:$0xf]  ;;  %v1790_v59 = vor.u32 %v2151_v56, %v1789_v54 }
  0xb5   : > { %v1926_v51 = vor.u32 %v2185_v49, %v1925_v48  ;;  %v1989_v52 = vld [vmem:[%s2771_s23 + $0x1f0] sm:$0xf]  ;;  %v2201_v53 = vld [vmem:[%s2771_s23 + $0x1f4] sm:$0xf0]  ;;  %1345 = vmatpush.bf16.msra.mxu0 %v1798_v46  ;;  %v2167_v58 = vld [vmem:[%s2771_s23 + $0xe4] sm:$0xf0] }
  0xb6   : > { %v1990_v55 = vor.u32 %v2201_v53, %v1989_v52  ;;  %1359 = vmatpush.bf16.msra.mxu1 %v1862_v50  ;;  %v1854_v60 = vor.u32 %v2167_v58, %v1853_v57  ;;  %v1917_v61 = vld [vmem:[%s2771_s23 + $0x160] sm:$0xf]  ;;  %v2183_v62 = vld [vmem:[%s2771_s23 + $0x164] sm:$0xf0]  ;;  %v1781_v2 = vld [vmem:[%s2771_s23 + $0x50] sm:$0xf] }
  0xb7   : > { %1373 = vmatpush.bf16.msra.mxu2 %v1926_v51  ;;  %v1981_v63 = vld [vmem:[%s2771_s23 + $0x1e0] sm:$0xf]  ;;  %v1918_v0 = vor.u32 %v2183_v62, %v1917_v61  ;;  %v2199_v1 = vld [vmem:[%s2771_s23 + $0x1e4] sm:$0xf0]  ;;  %v2149_v3 = vld [vmem:[%s2771_s23 + $0x54] sm:$0xf0] }
  0xb8   : > { %1387 = vmatpush.bf16.msra.mxu3 %v1990_v55  ;;  %v1982_v4 = vor.u32 %v2199_v1, %v1981_v63  ;;  %v1845_v5 = vld [vmem:[%s2771_s23 + $0xd0] sm:$0xf]  ;;  %v2165_v6 = vld [vmem:[%s2771_s23 + $0xd4] sm:$0xf0]  ;;  %v1782_v8 = vor.u32 %v2149_v3, %v1781_v2  ;;  %v1773_v14 = vld [vmem:[%s2771_s23 + $0x40] sm:$0xf] }
  0xb9   : > { %v1909_v7 = vld [vmem:[%s2771_s23 + $0x150] sm:$0xf]  ;;  %1346 = vmatpush.bf16.msra.mxu0 %v1790_v59  ;;  %v2181_v9 = vld [vmem:[%s2771_s23 + $0x154] sm:$0xf0]  ;;  %v1846_v12 = vor.u32 %v2165_v6, %v1845_v5  ;;  %v2147_v15 = vld [vmem:[%s2771_s23 + $0x44] sm:$0xf0] }
  0xba   : > { %v1973_v10 = vld [vmem:[%s2771_s23 + $0x1d0] sm:$0xf]  ;;  %v2197_v11 = vld [vmem:[%s2771_s23 + $0x1d4] sm:$0xf0]  ;;  %1360 = vmatpush.bf16.msra.mxu1 %v1854_v60  ;;  %v1910_v13 = vor.u32 %v2181_v9, %v1909_v7  ;;  %v1837_v16 = vld [vmem:[%s2771_s23 + $0xc0] sm:$0xf]  ;;  %v1774_v23 = vor.u32 %v2147_v15, %v1773_v14 }
  0xbb   : > { %1374 = vmatpush.bf16.msra.mxu2 %v1918_v0  ;;  %v1974_v17 = vor.u32 %v2197_v11, %v1973_v10  ;;  %v2163_v18 = vld [vmem:[%s2771_s23 + $0xc4] sm:$0xf0]  ;;  %v1901_v19 = vld [vmem:[%s2771_s23 + $0x140] sm:$0xf]  ;;  %v1765_v26 = vld [vmem:[%s2771_s23 + $0x30] sm:$0xf] }
  0xbc   : > { %1388 = vmatpush.bf16.msra.mxu3 %v1982_v4  ;;  %v2179_v20 = vld [vmem:[%s2771_s23 + $0x144] sm:$0xf0]  ;;  %v1965_v21 = vld [vmem:[%s2771_s23 + $0x1c0] sm:$0xf]  ;;  %v1838_v24 = vor.u32 %v2163_v18, %v1837_v16  ;;  %v2145_v27 = vld [vmem:[%s2771_s23 + $0x34] sm:$0xf0] }
  0xbd   : > { %v2195_v22 = vld [vmem:[%s2771_s23 + $0x1c4] sm:$0xf0]  ;;  %1347 = vmatpush.bf16.msra.mxu0 %v1782_v8  ;;  %v1902_v25 = vor.u32 %v2179_v20, %v1901_v19  ;;  %v1829_v28 = vld [vmem:[%s2771_s23 + $0xb0] sm:$0xf]  ;;  %v2161_v30 = vld [vmem:[%s2771_s23 + $0xb4] sm:$0xf0]  ;;  %v1766_v35 = vor.u32 %v2145_v27, %v1765_v26 }
  0xbe   : > { %1361 = vmatpush.bf16.msra.mxu1 %v1846_v12  ;;  %v1966_v29 = vor.u32 %v2195_v22, %v1965_v21  ;;  %v1893_v31 = vld [vmem:[%s2771_s23 + $0x130] sm:$0xf]  ;;  %v2177_v32 = vld [vmem:[%s2771_s23 + $0x134] sm:$0xf0]  ;;  %v1830_v36 = vor.u32 %v2161_v30, %v1829_v28  ;;  %v1757_v38 = vld [vmem:[%s2771_s23 + $0x20] sm:$0xf] }
  0xbf   : > { %1375 = vmatpush.bf16.msra.mxu2 %v1910_v13  ;;  %v1957_v33 = vld [vmem:[%s2771_s23 + $0x1b0] sm:$0xf]  ;;  %v2193_v34 = vld [vmem:[%s2771_s23 + $0x1b4] sm:$0xf0]  ;;  %v1894_v37 = vor.u32 %v2177_v32, %v1893_v31  ;;  %v2143_v39 = vld [vmem:[%s2771_s23 + $0x24] sm:$0xf0] }
  0xc0   : > { %1389 = vmatpush.bf16.msra.mxu3 %v1974_v17  ;;  %v1821_v40 = vld [vmem:[%s2771_s23 + $0xa0] sm:$0xf]  ;;  %v1958_v41 = vor.u32 %v2193_v34, %v1957_v33  ;;  %v2159_v42 = vld [vmem:[%s2771_s23 + $0xa4] sm:$0xf0]  ;;  %v1758_v47 = vor.u32 %v2143_v39, %v1757_v38  ;;  %v1749_v50 = vld [vmem:[%s2771_s23 + $0x10] sm:$0xf] }
  0xc1   : > { %1348 = vmatpush.bf16.msra.mxu0 %v1774_v23  ;;  %v1885_v43 = vld [vmem:[%s2771_s23 + $0x120] sm:$0xf]  ;;  %v2175_v44 = vld [vmem:[%s2771_s23 + $0x124] sm:$0xf0]  ;;  %v1822_v48 = vor.u32 %v2159_v42, %v1821_v40  ;;  %v2141_v51 = vld [vmem:[%s2771_s23 + $0x14] sm:$0xf0] }
  0xc2   : > { %1362 = vmatpush.bf16.msra.mxu1 %v1838_v24  ;;  %v1949_v45 = vld [vmem:[%s2771_s23 + $0x1a0] sm:$0xf]  ;;  %v2191_v46 = vld [vmem:[%s2771_s23 + $0x1a4] sm:$0xf0]  ;;  %v1886_v49 = vor.u32 %v2175_v44, %v1885_v43  ;;  %v1813_v52 = vld [vmem:[%s2771_s23 + $0x90] sm:$0xf]  ;;  %v1750_v59 = vor.u32 %v2141_v51, %v1749_v50 }
  0xc3   : > { %1376 = vmatpush.bf16.msra.mxu2 %v1902_v25  ;;  %v1950_v53 = vor.u32 %v2191_v46, %v1949_v45  ;;  %v2157_v54 = vld [vmem:[%s2771_s23 + $0x94] sm:$0xf0]  ;;  %v1877_v55 = vld [vmem:[%s2771_s23 + $0x110] sm:$0xf]  ;;  %v1741_v60 = vld [vmem:[%s2771_s23] sm:$0xf] }
  0xc4   : > { %1390 = vmatpush.bf16.msra.mxu3 %v1966_v29  ;;  %v2173_v56 = vld [vmem:[%s2771_s23 + $0x114] sm:$0xf0]  ;;  %v1941_v57 = vld [vmem:[%s2771_s23 + $0x190] sm:$0xf]  ;;  %v2139_v61 = vld [vmem:[%s2771_s23 + $0x4] sm:$0xf0]  ;;  %v1814_v62 = vor.u32 %v2157_v54, %v1813_v52 }
  0xc5   : > { %1349 = vmatpush.bf16.msra.mxu0 %v1766_v35  ;;  %v2189_v58 = vld [vmem:[%s2771_s23 + $0x194] sm:$0xf0]  ;;  %v1878_v63 = vor.u32 %v2173_v56, %v1877_v55  ;;  %v1805_v0 = vld [vmem:[%s2771_s23 + $0x80] sm:$0xf]  ;;  %v2155_v1 = vld [vmem:[%s2771_s23 + $0x84] sm:$0xf0]  ;;  %v1742_v10 = vor.u32 %v2139_v61, %v1741_v60 }
  0xc6   : > { %1363 = vmatpush.bf16.msra.mxu1 %v1830_v36  ;;  %v1869_v2 = vld [vmem:[%s2771_s23 + $0x100] sm:$0xf]  ;;  %v1942_v3 = vor.u32 %v2189_v58, %v1941_v57  ;;  %v2171_v4 = vld [vmem:[%s2771_s23 + $0x104] sm:$0xf0]  ;;  %v2053_v7 = vld [vmem:[%s2771_s23 + $0x270] sm:$0xf]  ;;  %v1806_v14 = vor.u32 %v2155_v1, %v1805_v0 }
  0xc7   : > { %1377 = vmatpush.bf16.msra.mxu2 %v1894_v37  ;;  %v1933_v5 = vld [vmem:[%s2771_s23 + $0x180] sm:$0xf]  ;;  %v2187_v6 = vld [vmem:[%s2771_s23 + $0x184] sm:$0xf0]  ;;  %v2217_v8 = vld [vmem:[%s2771_s23 + $0x274] sm:$0xf0]  ;;  %v1870_v15 = vor.u32 %v2171_v4, %v1869_v2 }
  0xc8   : > { %1391 = vmatpush.bf16.msra.mxu3 %v1958_v41  ;;  %v2117_v9 = vld [vmem:[%s2771_s23 + $0x2f0] sm:$0xf]  ;;  %v2233_v11 = vld [vmem:[%s2771_s23 + $0x2f4] sm:$0xf0]  ;;  %v2152_v12 = vld [vmem:[%s2771_s23 + $0x74] sm:$0xf]  ;;  %v1934_v18 = vor.u32 %v2187_v6, %v1933_v5  ;;  %v2054_v19 = vor.u32 %v2217_v8, %v2053_v7 }
  0xc9   : > { %1350 = vmatpush.bf16.msra.mxu0 %v1758_v47  ;;  %v1799_v13 = vld [vmem:[%s2771_s23 + $0x78] sm:$0xf0]  ;;  %v2168_v16 = vld [vmem:[%s2771_s23 + $0xf4] sm:$0xf]  ;;  %v2045_v20 = vld [vmem:[%s2771_s23 + $0x260] sm:$0xf]  ;;  %v2118_v22 = vor.u32 %v2233_v11, %v2117_v9 }
  0xca   : > { %1364 = vmatpush.bf16.msra.mxu1 %v1822_v48  ;;  %v1863_v17 = vld [vmem:[%s2771_s23 + $0xf8] sm:$0xf0]  ;;  %v2215_v21 = vld [vmem:[%s2771_s23 + $0x264] sm:$0xf0]  ;;  %v1802_v23 = vor.u32 %v2152_v12, %v1799_v13  ;;  %v2109_v24 = vld [vmem:[%s2771_s23 + $0x2e0] sm:$0xf] }
  0xcb   : > { %1378 = vmatpush.bf16.msra.mxu2 %v1886_v49  ;;  %v2231_v25 = vld [vmem:[%s2771_s23 + $0x2e4] sm:$0xf0]  ;;  %v2150_v26 = vld [vmem:[%s2771_s23 + $0x64] sm:$0xf]  ;;  %v1866_v27 = vor.u32 %v2168_v16, %v1863_v17  ;;  %v1791_v28 = vld [vmem:[%s2771_s23 + $0x68] sm:$0xf0]  ;;  %v2046_v34 = vor.u32 %v2215_v21, %v2045_v20 }
  0xcc   : > { %1392 = vmatpush.bf16.msra.mxu3 %v1950_v53  ;;  %v2166_v29 = vld [vmem:[%s2771_s23 + $0xe4] sm:$0xf]  ;;  %v1855_v30 = vld [vmem:[%s2771_s23 + $0xe8] sm:$0xf0]  ;;  %v2037_v31 = vld [vmem:[%s2771_s23 + $0x250] sm:$0xf]  ;;  %v2110_v39 = vor.u32 %v2231_v25, %v2109_v24  ;;  %v1794_v40 = vor.u32 %v2150_v26, %v1791_v28 }
  0xcd   : > { %1351 = vmatpush.bf16.msra.mxu0 %v1750_v59  ;;  %v1717_v32 = vld [vmem:[%s2769_s25] sm:$0xf]  ;;  %v2135_v33 = vld [vmem:[%s2769_s25 + $0x14] sm:$0xf0]  ;;  %v2148_v41 = vld [vmem:[%s2771_s23 + $0x54] sm:$0xf]  ;;  %v1858_v44 = vor.u32 %v2166_v29, %v1855_v30 }
  0xce   : > { %1365 = vmatpush.bf16.msra.mxu1 %v1814_v62  ;;  %v2213_v35 = vld [vmem:[%s2771_s23 + $0x254] sm:$0xf0]  ;;  %v2101_v36 = vld [vmem:[%s2771_s23 + $0x2d0] sm:$0xf]  ;;  %v2868_v38 = vor.u32 %v2135_v33, %v1717_v32  ;;  %v1783_v42 = vld [vmem:[%s2771_s23 + $0x58] sm:$0xf0] }
  0xcf   : > { %1379 = vmatpush.bf16.msra.mxu2 %v1878_v63  ;;  %v2229_v37 = vld [vmem:[%s2771_s23 + $0x2d4] sm:$0xf0]  ;;  %v2164_v43 = vld [vmem:[%s2771_s23 + $0xd4] sm:$0xf]  ;;  %v1847_v45 = vld [vmem:[%s2771_s23 + $0xd8] sm:$0xf0]  ;;  %v2038_v52 = vor.u32 %v2213_v35, %v2037_v31  ;;  %v1786_v56 = vor.u32 %v2148_v41, %v1783_v42 }
  0xd0   : > { %1393 = vmatpush.bf16.msra.mxu3 %v1942_v3  ;;  %v2132_v46 = vld [vmem:[%s2769_s25 + $0x4] sm:$0xf]  ;;  %v1719_v47 = vld [vmem:[%s2769_s25 + $0x18] sm:$0xf0]  ;;  %v1725_v49 = vld [vmem:[%s2769_s25 + $0x8] sm:$0xf]  ;;  %v2102_v55 = vor.u32 %v2229_v37, %v2101_v36  ;;  %v1850_v61 = vor.u32 %v2164_v43, %v1847_v45 }
  0xd1   : > { %1352 = vmatpush.bf16.msra.mxu0 %v1742_v10  ;;  %v2877_v48 = vor.u32 %v2132_v46, %v1719_v47  ;;  %v2136_v50 = vld [vmem:[%s2769_s25 + $0x1c] sm:$0xf0]  ;;  %v2133_v51 = vld [vmem:[%s2769_s25 + $0xc] sm:$0xf]  ;;  %v1727_v54 = vld [vmem:[%s2769_s25 + $0x20] sm:$0xf0] }
  0xd2   : > { %1366 = vmatpush.bf16.msra.mxu1 %v1806_v14  ;;  %v2882_v53 = vor.u32 %v2136_v50, %v1725_v49  ;;  %v2029_v57 = vld [vmem:[%s2771_s23 + $0x240] sm:$0xf]  ;;  %v2211_v58 = vld [vmem:[%s2771_s23 + $0x244] sm:$0xf0]  ;;  %v2888_v60 = vor.u32 %v2133_v51, %v1727_v54  ;;  %v2146_v63 = vld [vmem:[%s2771_s23 + $0x44] sm:$0xf] }
  0xd3   : > { %1380 = vmatpush.bf16.msra.mxu2 %v1870_v15  ;;  %v2093_v59 = vld [vmem:[%s2771_s23 + $0x2c0] sm:$0xf]  ;;  %v2227_v62 = vld [vmem:[%s2771_s23 + $0x2c4] sm:$0xf0]  ;;  %v1775_v0 = vld [vmem:[%s2771_s23 + $0x48] sm:$0xf0]  ;;  %v2030_v3 = vor.u32 %v2211_v58, %v2029_v57 }
  0xd4   : > { %1394 = vmatpush.bf16.msra.mxu3 %v1934_v18  ;;  %1353 = vmatmul.bf16.vlgmr.msra.gmra.mxu0 %v2868_v38  ;;  %v2162_v1 = vld [vmem:[%s2771_s23 + $0xc4] sm:$0xf]  ;;  %v1839_v2 = vld [vmem:[%s2771_s23 + $0xc8] sm:$0xf0]  ;;  %v2094_v4 = vor.u32 %v2227_v62, %v2093_v59  ;;  %v1778_v5 = vor.u32 %v2146_v63, %v1775_v0  ;;  %v2021_v6 = vld [vmem:[%s2771_s23 + $0x230] sm:$0xf] }
  0xd5   : > { %1401 = vmatpush.bf16.msrb.mxu0 %v2054_v19  ;;  %1367 = vmatmul.bf16.vlgmr.msra.gmra.mxu1 %v2877_v48  ;;  %v2209_v7 = vld [vmem:[%s2771_s23 + $0x234] sm:$0xf0]  ;;  %v2085_v8 = vld [vmem:[%s2771_s23 + $0x2b0] sm:$0xf]  ;;  %v1842_v9 = vor.u32 %v2162_v1, %v1839_v2  ;;  %v2144_v11 = vld [vmem:[%s2771_s23 + $0x34] sm:$0xf] }
  0xd6   : > { %1415 = vmatpush.bf16.msrb.mxu1 %v2118_v22  ;;  %1381 = vmatmul.bf16.vlgmr.msra.gmra.mxu2 %v2882_v53  ;;  %v2225_v10 = vld [vmem:[%s2771_s23 + $0x2b4] sm:$0xf0]  ;;  %v1767_v12 = vld [vmem:[%s2771_s23 + $0x38] sm:$0xf0]  ;;  %v2160_v13 = vld [vmem:[%s2771_s23 + $0xb4] sm:$0xf]  ;;  %v2022_v15 = vor.u32 %v2209_v7, %v2021_v6 }
  0xd7   : > { %1429 = vmatpush.bf16.msrb.mxu2 %v1802_v23  ;;  %1395 = vmatmul.bf16.vlgmr.msra.gmra.mxu3 %v2888_v60  ;;  %v1831_v14 = vld [vmem:[%s2771_s23 + $0xb8] sm:$0xf0]  ;;  %v2086_v16 = vor.u32 %v2225_v10, %v2085_v8  ;;  %v1770_v17 = vor.u32 %v2144_v11, %v1767_v12  ;;  %v2013_v18 = vld [vmem:[%s2771_s23 + $0x220] sm:$0xf]  ;;  %v2207_v19 = vld [vmem:[%s2771_s23 + $0x224] sm:$0xf0] }
  0xd8   : > { %1443 = vmatpush.bf16.msrb.mxu3 %v1866_v27  ;;  %v2077_v20 = vld [vmem:[%s2771_s23 + $0x2a0] sm:$0xf]  ;;  %v1834_v21 = vor.u32 %v2160_v13, %v1831_v14  ;;  %v2223_v22 = vld [vmem:[%s2771_s23 + $0x2a4] sm:$0xf0]  ;;  %v2142_v23 = vld [vmem:[%s2771_s23 + $0x24] sm:$0xf]  ;;  %v2014_v27 = vor.u32 %v2207_v19, %v2013_v18 }
  0xd9   : > { %1402 = vmatpush.bf16.msrb.mxu0 %v2046_v34  ;;  %v1759_v24 = vld [vmem:[%s2771_s23 + $0x28] sm:$0xf0]  ;;  %v2158_v25 = vld [vmem:[%s2771_s23 + $0xa4] sm:$0xf]  ;;  %v2078_v28 = vor.u32 %v2223_v22, %v2077_v20  ;;  %v2005_v30 = vld [vmem:[%s2771_s23 + $0x210] sm:$0xf] }
  0xda   : > { %1416 = vmatpush.bf16.msrb.mxu1 %v2110_v39  ;;  %v1823_v26 = vld [vmem:[%s2771_s23 + $0xa8] sm:$0xf0]  ;;  %v1762_v29 = vor.u32 %v2142_v23, %v1759_v24  ;;  %v2205_v31 = vld [vmem:[%s2771_s23 + $0x214] sm:$0xf0]  ;;  %v2069_v32 = vld [vmem:[%s2771_s23 + $0x290] sm:$0xf] }
  0xdb   : > { %1430 = vmatpush.bf16.msrb.mxu2 %v1794_v40  ;;  %v1826_v33 = vor.u32 %v2158_v25, %v1823_v26  ;;  %v2221_v34 = vld [vmem:[%s2771_s23 + $0x294] sm:$0xf0]  ;;  %v2140_v35 = vld [vmem:[%s2771_s23 + $0x14] sm:$0xf]  ;;  %v1751_v36 = vld [vmem:[%s2771_s23 + $0x18] sm:$0xf0]  ;;  %v2006_v40 = vor.u32 %v2205_v31, %v2005_v30 }
  0xdc   : > { %1444 = vmatpush.bf16.msrb.mxu3 %v1858_v44  ;;  %v2156_v37 = vld [vmem:[%s2771_s23 + $0x94] sm:$0xf]  ;;  %v1815_v39 = vld [vmem:[%s2771_s23 + $0x98] sm:$0xf0]  ;;  %v1997_v41 = vld [vmem:[%s2771_s23 + $0x200] sm:$0xf]  ;;  %v2070_v44 = vor.u32 %v2221_v34, %v2069_v32  ;;  %v1754_v45 = vor.u32 %v2140_v35, %v1751_v36 }
  0xdd   : > { %1403 = vmatpush.bf16.msrb.mxu0 %v2038_v52  ;;  %v2203_v42 = vld [vmem:[%s2771_s23 + $0x204] sm:$0xf0]  ;;  %v2061_v43 = vld [vmem:[%s2771_s23 + $0x280] sm:$0xf]  ;;  %v2138_v47 = vld [vmem:[%s2771_s23 + $0x4] sm:$0xf]  ;;  %v1818_v50 = vor.u32 %v2156_v37, %v1815_v39 }
  0xde   : > { %1417 = vmatpush.bf16.msrb.mxu1 %v2102_v55  ;;  %v2219_v46 = vld [vmem:[%s2771_s23 + $0x284] sm:$0xf0]  ;;  %v1743_v49 = vld [vmem:[%s2771_s23 + $0x8] sm:$0xf0]  ;;  %v2154_v51 = vld [vmem:[%s2771_s23 + $0x84] sm:$0xf]  ;;  %v1998_v58 = vor.u32 %v2203_v42, %v1997_v41 }
  0xdf   : > { %1431 = vmatpush.bf16.msrb.mxu2 %v1786_v56  ;;  %v1807_v52 = vld [vmem:[%s2771_s23 + $0x88] sm:$0xf0]  ;;  %v2184_v54 = vld [vmem:[%s2771_s23 + $0x174] sm:$0xf]  ;;  %v1927_v55 = vld [vmem:[%s2771_s23 + $0x178] sm:$0xf0]  ;;  %v2062_v63 = vor.u32 %v2219_v46, %v2061_v43  ;;  %v1746_v0 = vor.u32 %v2138_v47, %v1743_v49 }
  0xe0   : > { %1445 = vmatpush.bf16.msrb.mxu3 %v1850_v61  ;;  %v2200_v56 = vld [vmem:[%s2771_s23 + $0x1f4] sm:$0xf]  ;;  %v1991_v57 = vld [vmem:[%s2771_s23 + $0x1f8] sm:$0xf0]  ;;  %v1733_v2 = vld [vmem:[%s2769_s25 + $0x10] sm:$0xf] }
  0xe1   : > { %1404 = vmatpush.bf16.msrb.mxu0 %v2030_v3  ;;  %v2216_v59 = vld [vmem:[%s2771_s23 + $0x274] sm:$0xf]  ;;  %v2055_v61 = vld [vmem:[%s2771_s23 + $0x278] sm:$0xf0]  ;;  %v2137_v3 = vld [vmem:[%s2769_s25 + $0x24] sm:$0xf0]  ;;  %v1994_v8 = vor.u32 %v2200_v56, %v1991_v57 }
  0xe2   : > { %1418 = vmatpush.bf16.msrb.mxu1 %v2094_v4  ;;  %v2232_v62 = vld [vmem:[%s2771_s23 + $0x2f4] sm:$0xf]  ;;  %v2119_v1 = vld [vmem:[%s2771_s23 + $0x2f8] sm:$0xf0]  ;;  %v1810_v4 = vor.u32 %v2154_v51, %v1807_v52  ;;  %v2182_v10 = vld [vmem:[%s2771_s23 + $0x164] sm:$0xf]  ;;  %v2945_v14 = vor.u32 %v2137_v3, %v1733_v2 }
  0xe3   : > { %1432 = vmatpush.bf16.msrb.mxu2 %v1778_v5  ;;  %v1930_v5 = vor.u32 %v2184_v54, %v1927_v55  ;;  %v2134_v6 = vld [vmem:[%s2769_s25 + $0x14] sm:$0xf]  ;;  %v1735_v7 = vld [vmem:[%s2769_s25 + $0x28] sm:$0xf0]  ;;  %v2122_v13 = vor.u32 %v2232_v62, %v2119_v1  ;;  %p2123_p5 = scmp.ne.s32.totalorder %s2398_s18, 5 }
  0xe4   : > { %1446 = vmatpush.bf16.msrb.mxu3 %v1842_v9  ;;  %v2058_v9 = vor.u32 %v2216_v59, %v2055_v61  ;;  %v1919_v11 = vld [vmem:[%s2771_s23 + $0x168] sm:$0xf0]  ;;  %v2198_v12 = vld [vmem:[%s2771_s23 + $0x1e4] sm:$0xf]  ;;  %v2950_v18 = vor.u32 %v2134_v6, %v1735_v7  ;;  %v2180_v24 = vld [vmem:[%s2771_s23 + $0x154] sm:$0xf] }
  0xe5   : > { %1405 = vmatpush.bf16.msrb.mxu0 %v2022_v15  ;;  %v1983_v15 = vld [vmem:[%s2771_s23 + $0x1e8] sm:$0xf0]  ;;  %v2230_v19 = vld [vmem:[%s2771_s23 + $0x2e4] sm:$0xf]  ;;  %v1911_v25 = vld [vmem:[%s2771_s23 + $0x158] sm:$0xf0] }
  0xe6   : > { %1419 = vmatpush.bf16.msrb.mxu1 %v2086_v16  ;;  %v2214_v16 = vld [vmem:[%s2771_s23 + $0x264] sm:$0xf]  ;;  %v2111_v20 = vld [vmem:[%s2771_s23 + $0x2e8] sm:$0xf0]  ;;  %v1986_v22 = vor.u32 %v2198_v12, %v1983_v15  ;;  %v2196_v26 = vld [vmem:[%s2771_s23 + $0x1d4] sm:$0xf] }
  0xe7   : > { %1433 = vmatpush.bf16.msrb.mxu2 %v1770_v17  ;;  %v2047_v17 = vld [vmem:[%s2771_s23 + $0x268] sm:$0xf0]  ;;  %v2039_v30 = vld [vmem:[%s2771_s23 + $0x258] sm:$0xf0]  ;;  %v2228_v31 = vld [vmem:[%s2771_s23 + $0x2d4] sm:$0xf] }
  0xe8   : > { %1447 = vmatpush.bf16.msrb.mxu3 %v1834_v21  ;;  %v1922_v21 = vor.u32 %v2182_v10, %v1919_v11  ;;  %v2050_v23 = vor.u32 %v2214_v16, %v2047_v17  ;;  %v2103_v32 = vld [vmem:[%s2771_s23 + $0x2d8] sm:$0xf0]  ;;  %v2178_v36 = vld [vmem:[%s2771_s23 + $0x144] sm:$0xf]  ;;  %v1903_v37 = vld [vmem:[%s2771_s23 + $0x148] sm:$0xf0] }
  0xe9   : > { %1406 = vmatpush.bf16.msrb.mxu0 %v2014_v27  ;;  %v2114_v27 = vor.u32 %v2230_v19, %v2111_v20  ;;  %v2194_v39 = vld [vmem:[%s2771_s23 + $0x1c4] sm:$0xf]  ;;  %v2031_v42 = vld [vmem:[%s2771_s23 + $0x248] sm:$0xf0]  ;;  %v2176_v47 = vld [vmem:[%s2771_s23 + $0x134] sm:$0xf] }
  0xea   : > { %1420 = vmatpush.bf16.msrb.mxu1 %v2078_v28  ;;  %v1975_v28 = vld [vmem:[%s2771_s23 + $0x1d8] sm:$0xf0]  ;;  %v2210_v41 = vld [vmem:[%s2771_s23 + $0x244] sm:$0xf]  ;;  %v2095_v43 = vld [vmem:[%s2771_s23 + $0x2c8] sm:$0xf0] }
  0xeb   : > { %1434 = vmatpush.bf16.msrb.mxu2 %v1762_v29  ;;  %v2212_v29 = vld [vmem:[%s2771_s23 + $0x254] sm:$0xf]  ;;  %v1978_v34 = vor.u32 %v2196_v26, %v1975_v28  ;;  %v2034_v46 = vor.u32 %v2210_v41, %v2031_v42  ;;  %v1895_v49 = vld [vmem:[%s2771_s23 + $0x138] sm:$0xf0]  ;;  %v2174_v62 = vld [vmem:[%s2771_s23 + $0x124] sm:$0xf] }
  0xec   : > { %1448 = vmatpush.bf16.msrb.mxu3 %v1826_v33  ;;  %v1914_v33 = vor.u32 %v2180_v24, %v1911_v25  ;;  %v2042_v35 = vor.u32 %v2212_v29, %v2039_v30  ;;  %v1959_v52 = vld [vmem:[%s2771_s23 + $0x1b8] sm:$0xf0]  ;;  %v2208_v54 = vld [vmem:[%s2771_s23 + $0x234] sm:$0xf]  ;;  %v1951_v2 = vld [vmem:[%s2771_s23 + $0x1a8] sm:$0xf0] }
  0xed   : > { %1407 = vmatpush.bf16.msrb.mxu0 %v2006_v40  ;;  %v1967_v40 = vld [vmem:[%s2771_s23 + $0x1c8] sm:$0xf0]  ;;  %v2023_v55 = vld [vmem:[%s2771_s23 + $0x238] sm:$0xf0]  ;;  %v2224_v56 = vld [vmem:[%s2771_s23 + $0x2b4] sm:$0xf] }
  0xee   : > { %1421 = vmatpush.bf16.msrb.mxu1 %v2070_v44  ;;  %v1906_v44 = vor.u32 %v2178_v36, %v1903_v37  ;;  %v2087_v57 = vld [vmem:[%s2771_s23 + $0x2b8] sm:$0xf0]  ;;  %v2026_v61 = vor.u32 %v2208_v54, %v2023_v55  ;;  %v2206_v3 = vld [vmem:[%s2771_s23 + $0x224] sm:$0xf]  ;;  %v2079_v6 = vld [vmem:[%s2771_s23 + $0x2a8] sm:$0xf0] }
  0xef   : > { %1435 = vmatpush.bf16.msrb.mxu2 %v1754_v45  ;;  %v1970_v45 = vor.u32 %v2194_v39, %v1967_v40  ;;  %v2090_v1 = vor.u32 %v2224_v56, %v2087_v57  ;;  %v2172_v10 = vld [vmem:[%s2771_s23 + $0x114] sm:$0xf]  ;;  %v1879_v11 = vld [vmem:[%s2771_s23 + $0x118] sm:$0xf0]  ;;  %v2170_v24 = vld [vmem:[%s2771_s23 + $0x104] sm:$0xf] }
  0xf0   : > { %1449 = vmatpush.bf16.msrb.mxu3 %v1818_v50  ;;  %v2192_v50 = vld [vmem:[%s2771_s23 + $0x1b4] sm:$0xf]  ;;  %v1943_v15 = vld [vmem:[%s2771_s23 + $0x198] sm:$0xf0]  ;;  %v1871_v25 = vld [vmem:[%s2771_s23 + $0x108] sm:$0xf0] }
  0xf1   : > { %1408 = vmatpush.bf16.msrb.mxu0 %v1998_v58  ;;  %v1898_v58 = vor.u32 %v2176_v47, %v1895_v49  ;;  %v1962_v59 = vor.u32 %v2192_v50, %v1959_v52  ;;  %v2188_v12 = vld [vmem:[%s2771_s23 + $0x194] sm:$0xf]  ;;  %v2007_v17 = vld [vmem:[%s2771_s23 + $0x218] sm:$0xf0]  ;;  %v2186_v26 = vld [vmem:[%s2771_s23 + $0x184] sm:$0xf] }
  0xf2   : > { %1422 = vmatpush.bf16.msrb.mxu1 %v2062_v63  ;;  %v1887_v63 = vld [vmem:[%s2771_s23 + $0x128] sm:$0xf0]  ;;  %v2204_v16 = vld [vmem:[%s2771_s23 + $0x214] sm:$0xf]  ;;  %v2071_v20 = vld [vmem:[%s2771_s23 + $0x298] sm:$0xf0] }
  0xf3   : > { %1436 = vmatpush.bf16.msrb.mxu2 %v1746_v0  ;;  %v2190_v0 = vld [vmem:[%s2771_s23 + $0x1a4] sm:$0xf]  ;;  %v1890_v7 = vor.u32 %v2174_v62, %v1887_v63  ;;  %v2220_v19 = vld [vmem:[%s2771_s23 + $0x294] sm:$0xf]  ;;  %v1935_v28 = vld [vmem:[%s2771_s23 + $0x188] sm:$0xf0] }
  0xf4   : > { %1450 = vmatpush.bf16.msrb.mxu3 %v1810_v4  ;;  %1409 = vmatmul.bf16.vlgmr.msrb.gmra.mxu0 %v2945_v14  ;;  %v2015_v4 = vld [vmem:[%s2771_s23 + $0x228] sm:$0xf0]  ;;  %v2202_v29 = vld [vmem:[%s2771_s23 + $0x204] sm:$0xf]  ;;  %v731_v57 = vld [vmem:[%s2775_s26 + $0x10] sm:$0xff] }
  0xf5   : > { %1457 = vmatpush.bf16.msra.mxu0 %v1930_v5  ;;  %1423 = vmatmul.bf16.vlgmr.msrb.gmra.mxu1 %v2950_v18  ;;  %v2222_v5 = vld [vmem:[%s2771_s23 + $0x2a4] sm:$0xf]  ;;  %v1999_v30 = vld [vmem:[%s2771_s23 + $0x208] sm:$0xf0] }
  0xf6   : > { %1471 = vmatpush.bf16.msra.mxu1 %v1994_v8  ;;  %1437 = vmatmul.bf16.vlgmr.msrb.gmra.mxu2 %v2868_v38  ;;  %v2106_v38 = vor.u32 %v2228_v31, %v2103_v32  ;;  %v1954_v8 = vor.u32 %v2190_v0, %v1951_v2  ;;  %v2218_v31 = vld [vmem:[%s2771_s23 + $0x284] sm:$0xf]  ;;  %v2063_v32 = vld [vmem:[%s2771_s23 + $0x288] sm:$0xf0] }
  0xf7   : > { %1485 = vmatpush.bf16.msra.mxu2 %v2058_v9  ;;  %1451 = vmatmul.bf16.vlgmr.msrb.gmra.mxu3 %v2877_v48  ;;  %v2226_v48 = vld [vmem:[%s2771_s23 + $0x2c4] sm:$0xf]  ;;  %v2018_v9 = vor.u32 %v2206_v3, %v2015_v4  ;;  %v2066_v36 = vor.u32 %v2218_v31, %v2063_v32 }
  0xf8   : > { %1499 = vmatpush.bf16.msra.mxu3 %v2122_v13  ;;  %v2098_v51 = vor.u32 %v2226_v48, %v2095_v43  ;;  %v2082_v13 = vor.u32 %v2222_v5, %v2079_v6  ;;  %v729_v47 = vld [vmem:[%s2775_s26] sm:$0xff] }
  0xf9   : > { %1458 = vmatpush.bf16.msra.mxu0 %v1922_v21  ;;  %v1882_v21 = vor.u32 %v2172_v10, %v1879_v11  ;;  %v730_v11 = vld [vmem:[%s2775_s26 + $0x8] sm:$0xff] }
  0xfa   : > { %1472 = vmatpush.bf16.msra.mxu1 %v1986_v22  ;;  %v1946_v22 = vor.u32 %v2188_v12, %v1943_v15 }
  0xfb   : > { %1486 = vmatpush.bf16.msra.mxu2 %v2050_v23  ;;  %v2010_v23 = vor.u32 %v2204_v16, %v2007_v17 }
  0xfc   : > { %1500 = vmatpush.bf16.msra.mxu3 %v2114_v27  ;;  %v2074_v27 = vor.u32 %v2220_v19, %v2071_v20 }
  0xfd   : > { %1459 = vmatpush.bf16.msra.mxu0 %v1914_v33  ;;  %v1874_v33 = vor.u32 %v2170_v24, %v1871_v25 }
  0xfe   : > { %1473 = vmatpush.bf16.msra.mxu1 %v1978_v34  ;;  %v1938_v34 = vor.u32 %v2186_v26, %v1935_v28 }
  0xff   : > { %1487 = vmatpush.bf16.msra.mxu2 %v2042_v35  ;;  %v2002_v35 = vor.u32 %v2202_v29, %v1999_v30 }
 0x100   : > { %1501 = vmatpush.bf16.msra.mxu3 %v2106_v38 }
 0x101   : > { %1460 = vmatpush.bf16.msra.mxu0 %v1906_v44 }
 0x102   : > { %1474 = vmatpush.bf16.msra.mxu1 %v1970_v45 }
 0x103   : > { %1488 = vmatpush.bf16.msra.mxu2 %v2034_v46 }
 0x104   : > { %1502 = vmatpush.bf16.msra.mxu3 %v2098_v51 }
 0x105   : > { %1461 = vmatpush.bf16.msra.mxu0 %v1898_v58 }
 0x106   : > { %1475 = vmatpush.bf16.msra.mxu1 %v1962_v59 }
 0x107   : > { %1489 = vmatpush.bf16.msra.mxu2 %v2026_v61 }
 0x108   : > { %1503 = vmatpush.bf16.msra.mxu3 %v2090_v1 }
 0x109   : > { %1462 = vmatpush.bf16.msra.mxu0 %v1890_v7 }
 0x10a   : > { %1476 = vmatpush.bf16.msra.mxu1 %v1954_v8 }
 0x10b   : > { %1490 = vmatpush.bf16.msra.mxu2 %v2018_v9 }
 0x10c   : > { %1504 = vmatpush.bf16.msra.mxu3 %v2082_v13 }
 0x10d   : > { %1463 = vmatpush.bf16.msra.mxu0 %v1882_v21  ;;  %v732_v21 = vld [vmem:[%s2775_s26 + $0x18] sm:$0xff] }
 0x10e   : > { %1477 = vmatpush.bf16.msra.mxu1 %v1946_v22 }
 0x10f   : > { %1491 = vmatpush.bf16.msra.mxu2 %v2010_v23 }
 0x110   : > { %1505 = vmatpush.bf16.msra.mxu3 %v2074_v27 }
 0x111   : > { %1464 = vmatpush.bf16.msra.mxu0 %v1874_v33 }
 0x112   : > { %1478 = vmatpush.bf16.msra.mxu1 %v1938_v34 }
 0x113   : > { %1492 = vmatpush.bf16.msra.mxu2 %v2002_v35 }
 0x114   : > { %1506 = vmatpush.bf16.msra.mxu3 %v2066_v36  ;;  %1465 = vmatmul.bf16.vlgmr.msra.gmra.mxu0 %v2882_v53 }
 0x115   : > { %1479 = vmatmul.bf16.vlgmr.msra.gmra.mxu1 %v2888_v60 }
 0x116   : > { %1493 = vmatmul.bf16.vlgmr.msra.gmra.mxu2 %v2945_v14 }
 0x117   : > { %1507 = vmatmul.bf16.vlgmr.msra.gmra.mxu3 %v2950_v18 }
 0x151   : > { %v1354_v37 = vpop.f32.mrf.mxu0 }
 0x152   : > { %v1368_v39 = vpop.f32.mrf.mxu1 }
 0x153   : > { %v1369_v38 = vadd.f32 %v1368_v39, %v1354_v37 }
 0x159   : > { %v1356_v40 = vpop.f32.mrf.mxu0  ;;  %v1382_v41 = vpop.f32.mrf.mxu2 }
 0x15a   : > { %v1370_v42 = vpop.f32.mrf.mxu1  ;;  %v1383_v48 = vadd.f32 %v1382_v41, %v1369_v38  ;;  %v1396_v43 = vpop.f32.mrf.mxu3 }
 0x15b   : > { %v1371_v45 = vadd.f32 %v1370_v42, %v1356_v40 }
 0x15c   : > { %v1397_v44 = vadd.f32 %v1396_v43, %v1383_v48 }
 0x161   : > { %v1384_v46 = vpop.f32.mrf.mxu2 }
 0x162   : > { %v1385_v49 = vadd.f32 %v1384_v46, %v1371_v45  ;;  %v1398_v50 = vpop.f32.mrf.mxu3 }
 0x164   : > { %v1399_v52 = vadd.f32 %v1398_v50, %v1385_v49 }
 0x171   : > { %v1410_v53 = vpop.f32.mrf.mxu0 }
 0x172   : > { %v1411_v60 = vadd.f32 %v1410_v53, %v1397_v44  ;;  %v1424_v14 = vpop.f32.mrf.mxu1 }
 0x174   : > { %v1425_v18 = vadd.f32 %v1424_v14, %v1411_v60 }
 0x176   : > { %v1513_v51 = vadd.f32 %v1425_v18, %v729_v47 }
 0x178   : > { %1517 = vst [vmem:[%s2775_s26] sm:$0xff] %v1513_v51 }
 0x179   : > { %v1412_v54 = vpop.f32.mrf.mxu0  ;;  %v1438_v61 = vpop.f32.mrf.mxu2 }
 0x17a   : > { %v1413_v55 = vadd.f32 %v1412_v54, %v1399_v52  ;;  %v1426_v56 = vpop.f32.mrf.mxu1  ;;  %v1452_v62 = vpop.f32.mrf.mxu3 }
 0x17b   : > { %v1453_v0 = vadd.f32 %v1452_v62, %v1438_v61 }
 0x17c   : > { %v1427_v58 = vadd.f32 %v1426_v56, %v1413_v55 }
 0x17e   : > { %v1515_v59 = vadd.f32 %v1427_v58, %v731_v57 }
 0x180   : > { %1519 = vst [vmem:[%s2775_s26 + $0x10] sm:$0xff] %v1515_v59 }
 0x181   : > { %v1440_v63 = vpop.f32.mrf.mxu2 }
 0x182   : > { %v1454_v1 = vpop.f32.mrf.mxu3 }
 0x183   : > { %v1455_v7 = vadd.f32 %v1454_v1, %v1440_v63 }
 0x191   : > { %v1466_v2 = vpop.f32.mrf.mxu0 }
 0x192   : > { %v1467_v3 = vadd.f32 %v1466_v2, %v1453_v0  ;;  %v1480_v4 = vpop.f32.mrf.mxu1 }
 0x194   : > { %v1481_v5 = vadd.f32 %v1480_v4, %v1467_v3 }
 0x199   : > { %v1494_v6 = vpop.f32.mrf.mxu2  ;;  %v1468_v10 = vpop.f32.mrf.mxu0 }
 0x19a   : > { %v1495_v8 = vadd.f32 %v1494_v6, %v1481_v5  ;;  %v1508_v9 = vpop.f32.mrf.mxu3  ;;  %v1469_v13 = vadd.f32 %v1468_v10, %v1455_v7  ;;  %v1482_v16 = vpop.f32.mrf.mxu1 }
 0x19c   : > { %v1509_v12 = vadd.f32 %v1508_v9, %v1495_v8  ;;  %v1483_v17 = vadd.f32 %v1482_v16, %v1469_v13 }
 0x19e   : > { %v1514_v15 = vadd.f32 %v1509_v12, %v730_v11 }
 0x1a0   : > { %1518 = vst [vmem:[%s2775_s26 + $0x8] sm:$0xff] %v1514_v15 }
 0x1a1   : > { %v1496_v19 = vpop.f32.mrf.mxu2 }
 0x1a2   : > { %v1497_v20 = vadd.f32 %v1496_v19, %v1483_v17  ;;  %v1510_v22 = vpop.f32.mrf.mxu3 }
 0x1a4   : > { %v1511_v23 = vadd.f32 %v1510_v22, %v1497_v20  ;;  %1524 = sbr.rel (%p2123_p5) target bundleno = 437 (0x1b5), region = 124 }
 0x1a6   : > { %v1516_v24 = vadd.f32 %v1511_v23, %v732_v21 }
 0x1a8   : > { %1520 = vst [vmem:[%s2775_s26 + $0x18] sm:$0xff] %v1516_v24 }
 0x1a9   : > { %v1525_v25 = vld [vmem:[%s2775_s26] sm:$0xff]  ;;  %v1526_v27 = vld [vmem:[%s2775_s26 + $0x8] sm:$0xff]  ;;  %v1527_v30 = vld [vmem:[%s2775_s26 + $0x10] sm:$0xff] }
 0x1aa   : > { %v1529_v26 = vld [vmem:[%s2773_s28] sm:$0xff]  ;;  %v1530_v29 = vld [vmem:[%s2773_s28 + $0x8] sm:$0xff]  ;;  %v1531_v31 = vld [vmem:[%s2773_s28 + $0x10] sm:$0xff] }
 0x1ab   : > { %v1533_v28 = vadd.f32 %v1529_v26, %v1525_v25  ;;  %v1534_v32 = vadd.f32 %v1530_v29, %v1526_v27  ;;  %v1535_v33 = vadd.f32 %v1531_v31, %v1527_v30  ;;  %v1532_v35 = vld [vmem:[%s2773_s28 + $0x18] sm:$0xff] }
 0x1ad   : > { %v1537_v36 = vmax.f32 %v1533_v28, 0.0  ;;  %v1538_v39 = vmax.f32 %v1534_v32, 0.0  ;;  %v1539_v38 = vmax.f32 %v1535_v33, 0.0 }
 0x1af   : > { %v1528_v34 = vld [vmem:[%s2775_s26 + $0x18] sm:$0xff]  ;;  %1541 = vst [vmem:[%s2775_s26] sm:$0xff] %v1537_v36 }
 0x1b0   : > { %v1536_v37 = vadd.f32 %v1532_v35, %v1528_v34  ;;  %1542 = vst [vmem:[%s2775_s26 + $0x8] sm:$0xff] %v1538_v39 }
 0x1b1   : > { %1543 = vst [vmem:[%s2775_s26 + $0x10] sm:$0xff] %v1539_v38 }
 0x1b2   : > { %v1540_v40 = vmax.f32 %v1536_v37, 0.0 }
 0x1b4   : > { %1544 = vst [vmem:[%s2775_s26 + $0x18] sm:$0xff] %v1540_v40 }
 0x1b5 PF: > { %1551 = sbr.rel (!%p2541_p13) target bundleno = 445 (0x1bd), region = 128  ;;  %s2234_s12 = sshll.u32 (%p2541_p13), %s2402_s19, 4 }
 0x1b6   : > { %v1570_v41 = vld [vmem:[%s2775_s26] sm:$0xff] (%p2541_p13)  ;;  %s1557_s18 = scalar_lea.vmem (%p2541_p13), %s3077_s3, %s2234_s12 }
 0x1b7   : > { %v1572_v42 = vld [vmem:[%s2775_s26 + $0x8] sm:$0xff] (%p2541_p13)  ;;  %1571 = vst [vmem:[%s1557_s18] sm:$0xff] (%p2541_p13), %v1570_v41 }
 0x1b8   : > { %v1574_v48 = vld [vmem:[%s2775_s26 + $0x10] sm:$0xff] (%p2541_p13)  ;;  %1573 = vst [vmem:[%s1557_s18 + $0x8] sm:$0xff] (%p2541_p13), %v1572_v42 }
 0x1b9   : > { %1575 = vst [vmem:[%s1557_s18 + $0x20] sm:$0xff] (%p2541_p13), %v1574_v48 }
 0x1bb   : > { %v1576_v43 = vld [vmem:[%s2775_s26 + $0x18] sm:$0xff] }
 0x1bc   : > { %1577 = vst [vmem:[%s1557_s18 + $0x28] sm:$0xff] %v1576_v43 }
 0x1bd PF: > { %s13_s22 = sadd.s32 1, %s2414_s22   ;;  %s3086_s11 = sld [smem:[#allocation6_spill]] }
 0x1be   : > { %p10_p6 = scmp.ge.s32.totalorder %s13_s22, 14   ;;  %s3087_s12 = smov %s2378_s13 }
 0x1bf   : > { %s3088_s13 = smov %s2533_s9  ;;  %s3089_s14 = smov %s2386_s15 }
 0x1c0   : > { %s3090_s15 = smov %s2530_s8  ;;  %s3091_s16 = smov %s2394_s17 }
 0x1c1   : > { %s3092_s17 = smov %s2514_s30  ;;  %s3093_s18 = smov %s2406_s20 }
 0x1c2   : > { %s3094_s19 = smov %s2410_s21  ;;  %s3095_s20 = smov %s3098_s24 }
 0x1c3   : > { %s3096_s21 = smov %s3086_s11  ;;  %12 = sbr.rel (!%p10_p6) target bundleno = 8 (0x8), region = 198 }

// kernel: forward.41
= control target key start
LH: loop header
LB: loop body
LE: loop exit
PB: predicated region body
PF: predicated region fallthrough
CT: control target
= control target key end

     0   :  { %s2318_s9 = smov 0   ;;  %s2320_s10 = smov 0   ;;  %s2932_s0 = inlined_call_operand.vmem [shape: bf16[16,4608], index: 0, kind: input, shape index: {}]   ;;  %s2933_s1 = inlined_call_operand.vmem [shape: bf16[4608,512], index: 1, kind: input, shape index: {}]   ;;  %s2934_s2 = inlined_call_operand.vmem [shape: f32[16,512], index: 2, kind: output, shape index: {}]  }
   0x1   :  { %s2322_s11 = smov 0   ;;  %s2324_s12 = smov 0  }
   0x2   :  { %s2326_s13 = smov 0   ;;  %s2328_s14 = smov 0  }
   0x3   :  { %s2330_s15 = smov 0   ;;  %s2332_s16 = smov 0  }
   0x4   :  { %s2334_s17 = smov 0   ;;  %s2336_s18 = smov 0  }
   0x5   :  { %s2338_s19 = smov 0  }
   0x6 LB: > { %s1591_s20 = sadd.s32 4294967295, %s2300_s19   ;;  %s24_s21 = sadd.s32 1, %s2292_s17  ;;  %s2300_s19 = sphi %s2338_s19, %s12_s19   ;;  %s2296_s18 = sphi %s2336_s18, %s2947_s18   ;;  %s2292_s17 = sphi %s2334_s17, %s2946_s17   ;;  %s2288_s16 = sphi %s2332_s16, %s2945_s16   ;;  %s2284_s15 = sphi %s2330_s15, %s2944_s15   ;;  %s2280_s14 = sphi %s2328_s14, %s2943_s14   ;;  %s2276_s13 = sphi %s2326_s13, %s2942_s13   ;;  %s2272_s12 = sphi %s2324_s12, %s2941_s12   ;;  %s2268_s11 = sphi %s2322_s11, %s2940_s11   ;;  %s2264_s10 = sphi %s2320_s10, %s2939_s10   ;;  %s2260_s9 = sphi %s2318_s9, %s2938_s9  }
   0x7   : > { %p25_p0 = scmp.ge.s32.totalorder %s24_s21, 6  ;;  %s27_s22 = sadd.s32 1, %s2296_s18 }
   0x8   : > { %s40_s23 = sadd.s32 1, %s2280_s14  ;;  %p47_p1 = scmp.ne.s32.totalorder %s2280_s14, %s2276_s13 }
   0x9   : > { %s2949_s21 = smov (%p25_p0, %s24_s21), 0  ;;  %s2951_s22 = smov (!%p25_p0, %s27_s22), %s2296_s18 }
   0xa   : > { %s36_s24 = ssub.s32 %s2292_s17, %s2949_s21  ;;  %p48_p2 = scmp.eq.s32.totalorder %s2300_s19, 0 }
   0xb   : > { %p29_p3 = scmp.ge.s32.totalorder %s2951_s22, 2  ;;  %p38_p4 = scmp.eq.s32.totalorder %s36_s24, 0 }
   0xc   : > { %p2385_p5 = por %p48_p2, %p47_p1  ;;  %s68_s26 = sadd.s32 1, %s2272_s12 }
   0xd   : > { %s2953_s22 = smov (%p29_p3, %s2951_s22), 0  ;;  %p75_p6 = scmp.ne.s32.totalorder %s2272_s12, %s2268_s11 }
   0xe   : > { %s2393_s27 = scalar_select %p38_p4, %s2280_s14, %s40_s23  }
   0xf   : > { %s64_s28 = ssub.s32 %s2296_s18, %s2953_s22  ;;  %p2399_p9 = por %p75_p6, %p48_p2 }
  0x10   : > { %s65_s29 = sor.u32 %s64_s28, %s36_s24  ;;  %p94_p7 = scmp.eq.s32.totalorder %s64_s28, 0 }
  0x11   : > { %p66_p8 = scmp.eq.s32.totalorder %s65_s29, 0  ;;  %s96_s3 = sadd.s32 1, %s2264_s10 }
  0x12   : > { %p106_p10 = scmp.ne.s32.totalorder %s2264_s10, %s2260_s9  ;;  %p107_p11 = scmp.eq.s32.totalorder %s1591_s20, 11 }
  0x13   : > { %s2407_s4 = scalar_select %p66_p8, %s2272_s12, %s68_s26  }
  0x14   : > { %s2410_s5 = scalar_select %p94_p7, %s2264_s10, %s96_s3  }
  0x15   : > { %p2412_p12 = por %p107_p11, %p106_p10  ;;  %p1594_p13 = scmp.ge.s32.totalorder %s2300_s19, 12 }
  0x17   : > { %129 = sbr.rel (%p1594_p13) target bundleno = 143 (0x8f), region = 16 }
  0x1c   : > { %132 = sbr.rel (!%p2385_p5) target bundleno = 39 (0x27), region = 20  ;;  %s134_s7 = sand.u32 (%p2385_p5), 1, %s2280_s14  }
  0x1d   : > { %s2016_s8 = smul.u32 (%p2385_p5), 24, %s2292_s17 }
  0x1e   : > { %s2121_s23 = smul.u32 (%p2385_p5), 48, %s134_s7 }
  0x1f   : > { %s142_s28 = scalar_lea.vmem (%p2385_p5), %s2932_s0, %s2016_s8 }
  0x20   : > { %v155_v0 = vld [vmem:[%s142_s28] sm:$0xff] (%p2385_p5)  ;;  %v157_v1 = vld [vmem:[%s142_s28 + $0x8] sm:$0xff] (%p2385_p5)  ;;  %v159_v2 = vld [vmem:[%s142_s28 + $0x10] sm:$0xff] (%p2385_p5)  ;;  %s136_s20 = scalar_lea.vmem (%p2385_p5), [#allocation2], %s2121_s23 }
  0x21   : > { %156 = vst [vmem:[%s136_s20] sm:$0xff] %v155_v0  ;;  %v161_v3 = vld [vmem:[%s142_s28 + $0x90] sm:$0xff]  ;;  %v163_v4 = vld [vmem:[%s142_s28 + $0x98] sm:$0xff]  ;;  %v165_v5 = vld [vmem:[%s142_s28 + $0xa0] sm:$0xff] }
  0x22   : > { %158 = vst [vmem:[%s136_s20 + $0x8] sm:$0xff] %v157_v1 }
  0x23   : > { %160 = vst [vmem:[%s136_s20 + $0x10] sm:$0xff] %v159_v2 }
  0x24   : > { %162 = vst [vmem:[%s136_s20 + $0x18] sm:$0xff] %v161_v3 }
  0x25   : > { %164 = vst [vmem:[%s136_s20 + $0x20] sm:$0xff] %v163_v4 }
  0x26   : > { %166 = vst [vmem:[%s136_s20 + $0x28] sm:$0xff] %v165_v5 }
  0x27 PF: > { %172 = sbr.rel (!%p2399_p9) target bundleno = 143 (0x8f), region = 43  ;;  %s174_s25 = sand.u32 (%p2399_p9), 1, %s2272_s12  }
  0x28   : > { %s2122_s29 = smul.u32 (%p2399_p9), 768, %s174_s25  ;;  %s1596_s3 = sshll.u32 (%p2399_p9), %s2296_s18, 1 }
  0x29   : > { %s2017_s7 = smul.u32 (%p2399_p9), 384, %s2292_s17 }
  0x2a   : > { %s2437_s30 = scalar_lea.vmem (%p2399_p9), [#allocation3], %s2122_s29 }
  0x2b   : > { %s180_s8 = sadd.s32 (%p2399_p9), %s2017_s7, %s1596_s3 }
  0x2c   : > { %s1598_s23 = sshll.u32 %s180_s8, 2 }
  0x2d   : > { %s2432_s28 = scalar_lea.vmem %s2933_s1, %s1598_s23 }
  0x2e   : > { %v401_v6 = vld [vmem:[%s2432_s28] sm:$0xff]  ;;  %v403_v7 = vld [vmem:[%s2432_s28 + $0x10] sm:$0xff] }
  0x2f   : > { %v405_v8 = vld [vmem:[%s2432_s28 + $0x20] sm:$0xff]  ;;  %402 = vst [vmem:[%s2437_s30] sm:$0xff] %v401_v6  ;;  %v407_v9 = vld [vmem:[%s2432_s28 + $0x30] sm:$0xff] }
  0x30   : > { %404 = vst [vmem:[%s2437_s30 + $0x8] sm:$0xff] %v403_v7  ;;  %v409_v10 = vld [vmem:[%s2432_s28 + $0x40] sm:$0xff]  ;;  %v411_v11 = vld [vmem:[%s2432_s28 + $0x50] sm:$0xff] }
  0x31   : > { %406 = vst [vmem:[%s2437_s30 + $0x10] sm:$0xff] %v405_v8  ;;  %v413_v12 = vld [vmem:[%s2432_s28 + $0x60] sm:$0xff]  ;;  %v415_v13 = vld [vmem:[%s2432_s28 + $0x70] sm:$0xff] }
  0x32   : > { %408 = vst [vmem:[%s2437_s30 + $0x18] sm:$0xff] %v407_v9  ;;  %v417_v14 = vld [vmem:[%s2432_s28 + $0x80] sm:$0xff]  ;;  %v419_v15 = vld [vmem:[%s2432_s28 + $0x90] sm:$0xff] }
  0x33   : > { %410 = vst [vmem:[%s2437_s30 + $0x20] sm:$0xff] %v409_v10  ;;  %v421_v16 = vld [vmem:[%s2432_s28 + $0xa0] sm:$0xff]  ;;  %v423_v17 = vld [vmem:[%s2432_s28 + $0xb0] sm:$0xff] }
  0x34   : > { %412 = vst [vmem:[%s2437_s30 + $0x28] sm:$0xff] %v411_v11  ;;  %v425_v18 = vld [vmem:[%s2432_s28 + $0xc0] sm:$0xff]  ;;  %v427_v19 = vld [vmem:[%s2432_s28 + $0xd0] sm:$0xff] }
  0x35   : > { %414 = vst [vmem:[%s2437_s30 + $0x30] sm:$0xff] %v413_v12  ;;  %v429_v20 = vld [vmem:[%s2432_s28 + $0xe0] sm:$0xff]  ;;  %v431_v21 = vld [vmem:[%s2432_s28 + $0xf0] sm:$0xff] }
  0x36   : > { %416 = vst [vmem:[%s2437_s30 + $0x38] sm:$0xff] %v415_v13  ;;  %v433_v22 = vld [vmem:[%s2432_s28 + $0x100] sm:$0xff]  ;;  %v435_v23 = vld [vmem:[%s2432_s28 + $0x110] sm:$0xff] }
  0x37   : > { %418 = vst [vmem:[%s2437_s30 + $0x40] sm:$0xff] %v417_v14  ;;  %v437_v24 = vld [vmem:[%s2432_s28 + $0x120] sm:$0xff]  ;;  %v439_v25 = vld [vmem:[%s2432_s28 + $0x130] sm:$0xff] }
  0x38   : > { %420 = vst [vmem:[%s2437_s30 + $0x48] sm:$0xff] %v419_v15  ;;  %v441_v26 = vld [vmem:[%s2432_s28 + $0x140] sm:$0xff]  ;;  %v443_v27 = vld [vmem:[%s2432_s28 + $0x150] sm:$0xff] }
  0x39   : > { %422 = vst [vmem:[%s2437_s30 + $0x50] sm:$0xff] %v421_v16  ;;  %v445_v28 = vld [vmem:[%s2432_s28 + $0x160] sm:$0xff]  ;;  %v447_v29 = vld [vmem:[%s2432_s28 + $0x170] sm:$0xff] }
  0x3a   : > { %424 = vst [vmem:[%s2437_s30 + $0x58] sm:$0xff] %v423_v17  ;;  %v449_v30 = vld [vmem:[%s2432_s28 + $0x180] sm:$0xff]  ;;  %v451_v31 = vld [vmem:[%s2432_s28 + $0x190] sm:$0xff] }
  0x3b   : > { %426 = vst [vmem:[%s2437_s30 + $0x60] sm:$0xff] %v425_v18  ;;  %v453_v32 = vld [vmem:[%s2432_s28 + $0x1a0] sm:$0xff]  ;;  %v455_v33 = vld [vmem:[%s2432_s28 + $0x1b0] sm:$0xff] }
  0x3c   : > { %428 = vst [vmem:[%s2437_s30 + $0x68] sm:$0xff] %v427_v19  ;;  %v457_v34 = vld [vmem:[%s2432_s28 + $0x1c0] sm:$0xff]  ;;  %v459_v35 = vld [vmem:[%s2432_s28 + $0x1d0] sm:$0xff] }
  0x3d   : > { %430 = vst [vmem:[%s2437_s30 + $0x70] sm:$0xff] %v429_v20  ;;  %v461_v36 = vld [vmem:[%s2432_s28 + $0x1e0] sm:$0xff]  ;;  %v463_v37 = vld [vmem:[%s2432_s28 + $0x1f0] sm:$0xff] }
  0x3e   : > { %432 = vst [vmem:[%s2437_s30 + $0x78] sm:$0xff] %v431_v21  ;;  %v465_v38 = vld [vmem:[%s2432_s28 + $0x200] sm:$0xff]  ;;  %v467_v39 = vld [vmem:[%s2432_s28 + $0x210] sm:$0xff] }
  0x3f   : > { %434 = vst [vmem:[%s2437_s30 + $0x80] sm:$0xff] %v433_v22  ;;  %v469_v40 = vld [vmem:[%s2432_s28 + $0x220] sm:$0xff]  ;;  %v471_v41 = vld [vmem:[%s2432_s28 + $0x230] sm:$0xff] }
  0x40   : > { %436 = vst [vmem:[%s2437_s30 + $0x88] sm:$0xff] %v435_v23  ;;  %v473_v42 = vld [vmem:[%s2432_s28 + $0x240] sm:$0xff]  ;;  %v475_v43 = vld [vmem:[%s2432_s28 + $0x250] sm:$0xff] }
  0x41   : > { %438 = vst [vmem:[%s2437_s30 + $0x90] sm:$0xff] %v437_v24  ;;  %v477_v44 = vld [vmem:[%s2432_s28 + $0x260] sm:$0xff]  ;;  %v479_v45 = vld [vmem:[%s2432_s28 + $0x270] sm:$0xff] }
  0x42   : > { %440 = vst [vmem:[%s2437_s30 + $0x98] sm:$0xff] %v439_v25  ;;  %v481_v46 = vld [vmem:[%s2432_s28 + $0x280] sm:$0xff]  ;;  %v483_v47 = vld [vmem:[%s2432_s28 + $0x290] sm:$0xff] }
  0x43   : > { %442 = vst [vmem:[%s2437_s30 + $0xa0] sm:$0xff] %v441_v26  ;;  %v485_v48 = vld [vmem:[%s2432_s28 + $0x2a0] sm:$0xff]  ;;  %v487_v49 = vld [vmem:[%s2432_s28 + $0x2b0] sm:$0xff] }
  0x44   : > { %444 = vst [vmem:[%s2437_s30 + $0xa8] sm:$0xff] %v443_v27  ;;  %v489_v50 = vld [vmem:[%s2432_s28 + $0x2c0] sm:$0xff]  ;;  %v491_v51 = vld [vmem:[%s2432_s28 + $0x2d0] sm:$0xff] }
  0x45   : > { %446 = vst [vmem:[%s2437_s30 + $0xb0] sm:$0xff] %v445_v28  ;;  %v493_v52 = vld [vmem:[%s2432_s28 + $0x2e0] sm:$0xff]  ;;  %v495_v53 = vld [vmem:[%s2432_s28 + $0x2f0] sm:$0xff] }
  0x46   : > { %448 = vst [vmem:[%s2437_s30 + $0xb8] sm:$0xff] %v447_v29  ;;  %v497_v54 = vld [vmem:[%s2432_s28 + $0x300] sm:$0xff]  ;;  %v499_v55 = vld [vmem:[%s2432_s28 + $0x310] sm:$0xff] }
  0x47   : > { %450 = vst [vmem:[%s2437_s30 + $0xc0] sm:$0xff] %v449_v30  ;;  %v501_v56 = vld [vmem:[%s2432_s28 + $0x320] sm:$0xff]  ;;  %v503_v57 = vld [vmem:[%s2432_s28 + $0x330] sm:$0xff] }
  0x48   : > { %452 = vst [vmem:[%s2437_s30 + $0xc8] sm:$0xff] %v451_v31  ;;  %v505_v58 = vld [vmem:[%s2432_s28 + $0x340] sm:$0xff]  ;;  %v507_v59 = vld [vmem:[%s2432_s28 + $0x350] sm:$0xff] }
  0x49   : > { %454 = vst [vmem:[%s2437_s30 + $0xd0] sm:$0xff] %v453_v32  ;;  %v509_v60 = vld [vmem:[%s2432_s28 + $0x360] sm:$0xff]  ;;  %v511_v61 = vld [vmem:[%s2432_s28 + $0x370] sm:$0xff] }
  0x4a   : > { %456 = vst [vmem:[%s2437_s30 + $0xd8] sm:$0xff] %v455_v33  ;;  %v513_v62 = vld [vmem:[%s2432_s28 + $0x380] sm:$0xff]  ;;  %v515_v63 = vld [vmem:[%s2432_s28 + $0x390] sm:$0xff] }
  0x4b   : > { %458 = vst [vmem:[%s2437_s30 + $0xe0] sm:$0xff] %v457_v34  ;;  %v517_v0 = vld [vmem:[%s2432_s28 + $0x3a0] sm:$0xff]  ;;  %v519_v1 = vld [vmem:[%s2432_s28 + $0x3b0] sm:$0xff] }
  0x4c   : > { %460 = vst [vmem:[%s2437_s30 + $0xe8] sm:$0xff] %v459_v35  ;;  %v521_v2 = vld [vmem:[%s2432_s28 + $0x3c0] sm:$0xff]  ;;  %v523_v3 = vld [vmem:[%s2432_s28 + $0x3d0] sm:$0xff] }
  0x4d   : > { %462 = vst [vmem:[%s2437_s30 + $0xf0] sm:$0xff] %v461_v36  ;;  %v525_v4 = vld [vmem:[%s2432_s28 + $0x3e0] sm:$0xff]  ;;  %v527_v5 = vld [vmem:[%s2432_s28 + $0x3f0] sm:$0xff] }
  0x4e   : > { %464 = vst [vmem:[%s2437_s30 + $0xf8] sm:$0xff] %v463_v37  ;;  %v529_v6 = vld [vmem:[%s2432_s28 + $0x400] sm:$0xff]  ;;  %v531_v7 = vld [vmem:[%s2432_s28 + $0x410] sm:$0xff] }
  0x4f   : > { %466 = vst [vmem:[%s2437_s30 + $0x100] sm:$0xff] %v465_v38  ;;  %v533_v8 = vld [vmem:[%s2432_s28 + $0x420] sm:$0xff]  ;;  %v535_v9 = vld [vmem:[%s2432_s28 + $0x430] sm:$0xff] }
  0x50   : > { %468 = vst [vmem:[%s2437_s30 + $0x108] sm:$0xff] %v467_v39  ;;  %v537_v10 = vld [vmem:[%s2432_s28 + $0x440] sm:$0xff]  ;;  %v539_v11 = vld [vmem:[%s2432_s28 + $0x450] sm:$0xff] }
  0x51   : > { %470 = vst [vmem:[%s2437_s30 + $0x110] sm:$0xff] %v469_v40  ;;  %v541_v12 = vld [vmem:[%s2432_s28 + $0x460] sm:$0xff]  ;;  %v543_v13 = vld [vmem:[%s2432_s28 + $0x470] sm:$0xff] }
  0x52   : > { %472 = vst [vmem:[%s2437_s30 + $0x118] sm:$0xff] %v471_v41  ;;  %v545_v14 = vld [vmem:[%s2432_s28 + $0x480] sm:$0xff]  ;;  %v547_v15 = vld [vmem:[%s2432_s28 + $0x490] sm:$0xff] }
  0x53   : > { %474 = vst [vmem:[%s2437_s30 + $0x120] sm:$0xff] %v473_v42  ;;  %v549_v16 = vld [vmem:[%s2432_s28 + $0x4a0] sm:$0xff]  ;;  %v551_v17 = vld [vmem:[%s2432_s28 + $0x4b0] sm:$0xff] }
  0x54   : > { %476 = vst [vmem:[%s2437_s30 + $0x128] sm:$0xff] %v475_v43  ;;  %v553_v18 = vld [vmem:[%s2432_s28 + $0x4c0] sm:$0xff]  ;;  %v555_v19 = vld [vmem:[%s2432_s28 + $0x4d0] sm:$0xff] }
  0x55   : > { %478 = vst [vmem:[%s2437_s30 + $0x130] sm:$0xff] %v477_v44  ;;  %v557_v20 = vld [vmem:[%s2432_s28 + $0x4e0] sm:$0xff]  ;;  %v559_v21 = vld [vmem:[%s2432_s28 + $0x4f0] sm:$0xff] }
  0x56   : > { %480 = vst [vmem:[%s2437_s30 + $0x138] sm:$0xff] %v479_v45  ;;  %v561_v22 = vld [vmem:[%s2432_s28 + $0x500] sm:$0xff]  ;;  %v563_v23 = vld [vmem:[%s2432_s28 + $0x510] sm:$0xff] }
  0x57   : > { %482 = vst [vmem:[%s2437_s30 + $0x140] sm:$0xff] %v481_v46  ;;  %v565_v24 = vld [vmem:[%s2432_s28 + $0x520] sm:$0xff]  ;;  %v567_v25 = vld [vmem:[%s2432_s28 + $0x530] sm:$0xff] }
  0x58   : > { %484 = vst [vmem:[%s2437_s30 + $0x148] sm:$0xff] %v483_v47  ;;  %v569_v26 = vld [vmem:[%s2432_s28 + $0x540] sm:$0xff]  ;;  %v571_v27 = vld [vmem:[%s2432_s28 + $0x550] sm:$0xff] }
  0x59   : > { %486 = vst [vmem:[%s2437_s30 + $0x150] sm:$0xff] %v485_v48  ;;  %v573_v28 = vld [vmem:[%s2432_s28 + $0x560] sm:$0xff]  ;;  %v575_v29 = vld [vmem:[%s2432_s28 + $0x570] sm:$0xff] }
  0x5a   : > { %488 = vst [vmem:[%s2437_s30 + $0x158] sm:$0xff] %v487_v49  ;;  %v577_v30 = vld [vmem:[%s2432_s28 + $0x580] sm:$0xff]  ;;  %v579_v31 = vld [vmem:[%s2432_s28 + $0x590] sm:$0xff] }
  0x5b   : > { %490 = vst [vmem:[%s2437_s30 + $0x160] sm:$0xff] %v489_v50  ;;  %v581_v32 = vld [vmem:[%s2432_s28 + $0x5a0] sm:$0xff]  ;;  %v583_v33 = vld [vmem:[%s2432_s28 + $0x5b0] sm:$0xff] }
  0x5c   : > { %492 = vst [vmem:[%s2437_s30 + $0x168] sm:$0xff] %v491_v51  ;;  %v585_v34 = vld [vmem:[%s2432_s28 + $0x5c0] sm:$0xff]  ;;  %v587_v35 = vld [vmem:[%s2432_s28 + $0x5d0] sm:$0xff] }
  0x5d   : > { %494 = vst [vmem:[%s2437_s30 + $0x170] sm:$0xff] %v493_v52  ;;  %v589_v36 = vld [vmem:[%s2432_s28 + $0x5e0] sm:$0xff]  ;;  %v591_v37 = vld [vmem:[%s2432_s28 + $0x5f0] sm:$0xff] }
  0x5e   : > { %496 = vst [vmem:[%s2437_s30 + $0x178] sm:$0xff] %v495_v53 }
  0x5f   : > { %498 = vst [vmem:[%s2437_s30 + $0x180] sm:$0xff] %v497_v54 }
  0x60   : > { %500 = vst [vmem:[%s2437_s30 + $0x188] sm:$0xff] %v499_v55 }
  0x61   : > { %502 = vst [vmem:[%s2437_s30 + $0x190] sm:$0xff] %v501_v56 }
  0x62   : > { %504 = vst [vmem:[%s2437_s30 + $0x198] sm:$0xff] %v503_v57 }
  0x63   : > { %506 = vst [vmem:[%s2437_s30 + $0x1a0] sm:$0xff] %v505_v58 }
  0x64   : > { %508 = vst [vmem:[%s2437_s30 + $0x1a8] sm:$0xff] %v507_v59 }
  0x65   : > { %510 = vst [vmem:[%s2437_s30 + $0x1b0] sm:$0xff] %v509_v60 }
  0x66   : > { %512 = vst [vmem:[%s2437_s30 + $0x1b8] sm:$0xff] %v511_v61 }
  0x67   : > { %514 = vst [vmem:[%s2437_s30 + $0x1c0] sm:$0xff] %v513_v62 }
  0x68   : > { %516 = vst [vmem:[%s2437_s30 + $0x1c8] sm:$0xff] %v515_v63 }
  0x69   : > { %518 = vst [vmem:[%s2437_s30 + $0x1d0] sm:$0xff] %v517_v0 }
  0x6a   : > { %520 = vst [vmem:[%s2437_s30 + $0x1d8] sm:$0xff] %v519_v1 }
  0x6b   : > { %522 = vst [vmem:[%s2437_s30 + $0x1e0] sm:$0xff] %v521_v2 }
  0x6c   : > { %524 = vst [vmem:[%s2437_s30 + $0x1e8] sm:$0xff] %v523_v3 }
  0x6d   : > { %526 = vst [vmem:[%s2437_s30 + $0x1f0] sm:$0xff] %v525_v4 }
  0x6e   : > { %528 = vst [vmem:[%s2437_s30 + $0x1f8] sm:$0xff] %v527_v5 }
  0x6f   : > { %530 = vst [vmem:[%s2437_s30 + $0x200] sm:$0xff] %v529_v6 }
  0x70   : > { %532 = vst [vmem:[%s2437_s30 + $0x208] sm:$0xff] %v531_v7 }
  0x71   : > { %534 = vst [vmem:[%s2437_s30 + $0x210] sm:$0xff] %v533_v8 }
  0x72   : > { %536 = vst [vmem:[%s2437_s30 + $0x218] sm:$0xff] %v535_v9 }
  0x73   : > { %538 = vst [vmem:[%s2437_s30 + $0x220] sm:$0xff] %v537_v10 }
  0x74   : > { %540 = vst [vmem:[%s2437_s30 + $0x228] sm:$0xff] %v539_v11 }
  0x75   : > { %542 = vst [vmem:[%s2437_s30 + $0x230] sm:$0xff] %v541_v12 }
  0x76   : > { %544 = vst [vmem:[%s2437_s30 + $0x238] sm:$0xff] %v543_v13 }
  0x77   : > { %546 = vst [vmem:[%s2437_s30 + $0x240] sm:$0xff] %v545_v14 }
  0x78   : > { %548 = vst [vmem:[%s2437_s30 + $0x248] sm:$0xff] %v547_v15 }
  0x79   : > { %550 = vst [vmem:[%s2437_s30 + $0x250] sm:$0xff] %v549_v16 }
  0x7a   : > { %552 = vst [vmem:[%s2437_s30 + $0x258] sm:$0xff] %v551_v17 }
  0x7b   : > { %554 = vst [vmem:[%s2437_s30 + $0x260] sm:$0xff] %v553_v18 }
  0x7c   : > { %556 = vst [vmem:[%s2437_s30 + $0x268] sm:$0xff] %v555_v19 }
  0x7d   : > { %558 = vst [vmem:[%s2437_s30 + $0x270] sm:$0xff] %v557_v20 }
  0x7e   : > { %560 = vst [vmem:[%s2437_s30 + $0x278] sm:$0xff] %v559_v21 }
  0x7f   : > { %562 = vst [vmem:[%s2437_s30 + $0x280] sm:$0xff] %v561_v22 }
  0x80   : > { %564 = vst [vmem:[%s2437_s30 + $0x288] sm:$0xff] %v563_v23 }
  0x81   : > { %566 = vst [vmem:[%s2437_s30 + $0x290] sm:$0xff] %v565_v24 }
  0x82   : > { %568 = vst [vmem:[%s2437_s30 + $0x298] sm:$0xff] %v567_v25 }
  0x83   : > { %570 = vst [vmem:[%s2437_s30 + $0x2a0] sm:$0xff] %v569_v26 }
  0x84   : > { %572 = vst [vmem:[%s2437_s30 + $0x2a8] sm:$0xff] %v571_v27 }
  0x85   : > { %574 = vst [vmem:[%s2437_s30 + $0x2b0] sm:$0xff] %v573_v28 }
  0x86   : > { %576 = vst [vmem:[%s2437_s30 + $0x2b8] sm:$0xff] %v575_v29 }
  0x87   : > { %578 = vst [vmem:[%s2437_s30 + $0x2c0] sm:$0xff] %v577_v30 }
  0x88   : > { %580 = vst [vmem:[%s2437_s30 + $0x2c8] sm:$0xff] %v579_v31 }
  0x89   : > { %582 = vst [vmem:[%s2437_s30 + $0x2d0] sm:$0xff] %v581_v32 }
  0x8a   : > { %584 = vst [vmem:[%s2437_s30 + $0x2d8] sm:$0xff] %v583_v33 }
  0x8b   : > { %586 = vst [vmem:[%s2437_s30 + $0x2e0] sm:$0xff] %v585_v34 }
  0x8c   : > { %588 = vst [vmem:[%s2437_s30 + $0x2e8] sm:$0xff] %v587_v35 }
  0x8d   : > { %590 = vst [vmem:[%s2437_s30 + $0x2f0] sm:$0xff] %v589_v36 }
  0x8e   : > { %592 = vst [vmem:[%s2437_s30 + $0x2f8] sm:$0xff] %v591_v37 }
  0x8f PF: > { %p1599_p0 = scmp.ge.s32.totalorder %s2300_s19, 1  ;;  %p597_p1 = scmp.lt.s32.totalorder %s2300_s19, 13 }
  0x91   : > { %p598_p2 = pnand %p1599_p0, %p597_p1 }
  0x92   : > { %s604_s20 = sand.u32 (!%p598_p2), 1, %s2276_s13   ;;  %s611_s25 = sand.u32 (!%p598_p2), 1, %s2268_s11  }
  0x93   : > { %601 = sbr.rel (%p598_p2) target bundleno = 427 (0x1ab), region = 81  ;;  %s632_s3 = sand.u32 (!%p598_p2), 1, %s2260_s9  }
  0x94   : > { %s2123_s29 = smul.u32 (!%p598_p2), 48, %s604_s20  ;;  %s1600_s8 = sshll.u32 (!%p598_p2), %s632_s3, 5 }
  0x95   : > { %s2124_s7 = smul.u32 (!%p598_p2), 768, %s611_s25  ;;  %s2637_s26 = scalar_lea.vmem (!%p598_p2), [#allocation4], %s1600_s8 }
  0x96   : > { %s2633_s23 = scalar_lea.vmem (!%p598_p2), [#allocation2], %s2123_s29  ;;  %p1601_p3 = scmp.ne.s32.totalorder (!%p598_p2), %s2284_s15, 0 }
  0x97   : > { %s2635_s24 = scalar_lea.vmem (!%p598_p2), [#allocation3], %s2124_s7 }
  0x98   : > { %644 = sbr.rel (%p1601_p3) target bundleno = 162 (0xa2), region = 93 }
  0x9d   : > { %v2302_v38 = vmov 0.0  }
  0x9e   : > { %645 = vst [vmem:[%s2637_s26] sm:$0xff] %v2302_v38 }
  0x9f   : > { %646 = vst [vmem:[%s2637_s26 + $0x8] sm:$0xff] %v2302_v38 }
  0xa0   : > { %647 = vst [vmem:[%s2637_s26 + $0x10] sm:$0xff] %v2302_v38 }
  0xa1   : > { %648 = vst [vmem:[%s2637_s26 + $0x18] sm:$0xff] %v2302_v38 }
  0xa2 PF: > { %v1684_v39 = vld [vmem:[%s2635_s24 + $0x70] sm:$0xf]  ;;  %v2039_v40 = vld [vmem:[%s2635_s24 + $0x74] sm:$0xf0]  ;;  %v1676_v50 = vld [vmem:[%s2635_s24 + $0x60] sm:$0xf] }
  0xa3   : > { %v1748_v41 = vld [vmem:[%s2635_s24 + $0xf0] sm:$0xf]  ;;  %v1685_v42 = vor.u32 %v2039_v40, %v1684_v39  ;;  %v2055_v43 = vld [vmem:[%s2635_s24 + $0xf4] sm:$0xf0]  ;;  %v2037_v52 = vld [vmem:[%s2635_s24 + $0x64] sm:$0xf0] }
  0xa4   : > { %v1812_v44 = vld [vmem:[%s2635_s24 + $0x170] sm:$0xf]  ;;  %v2071_v45 = vld [vmem:[%s2635_s24 + $0x174] sm:$0xf0]  ;;  %v1749_v46 = vor.u32 %v2055_v43, %v1748_v41  ;;  %v1740_v53 = vld [vmem:[%s2635_s24 + $0xe0] sm:$0xf]  ;;  %v1677_v55 = vor.u32 %v2037_v52, %v1676_v50 }
  0xa5   : > { %v1813_v47 = vor.u32 %v2071_v45, %v1812_v44  ;;  %v1876_v48 = vld [vmem:[%s2635_s24 + $0x1f0] sm:$0xf]  ;;  %v2087_v49 = vld [vmem:[%s2635_s24 + $0x1f4] sm:$0xf0]  ;;  %1265 = vmatpush.bf16.msra.mxu0 %v1685_v42  ;;  %v2053_v54 = vld [vmem:[%s2635_s24 + $0xe4] sm:$0xf0] }
  0xa6   : > { %v1877_v51 = vor.u32 %v2087_v49, %v1876_v48  ;;  %1279 = vmatpush.bf16.msra.mxu1 %v1749_v46  ;;  %v1741_v56 = vor.u32 %v2053_v54, %v1740_v53  ;;  %v1804_v57 = vld [vmem:[%s2635_s24 + $0x160] sm:$0xf]  ;;  %v2069_v58 = vld [vmem:[%s2635_s24 + $0x164] sm:$0xf0]  ;;  %v1668_v62 = vld [vmem:[%s2635_s24 + $0x50] sm:$0xf] }
  0xa7   : > { %1293 = vmatpush.bf16.msra.mxu2 %v1813_v47  ;;  %v1868_v59 = vld [vmem:[%s2635_s24 + $0x1e0] sm:$0xf]  ;;  %v1805_v60 = vor.u32 %v2069_v58, %v1804_v57  ;;  %v2085_v61 = vld [vmem:[%s2635_s24 + $0x1e4] sm:$0xf0]  ;;  %v2035_v63 = vld [vmem:[%s2635_s24 + $0x54] sm:$0xf0] }
  0xa8   : > { %1307 = vmatpush.bf16.msra.mxu3 %v1877_v51  ;;  %v1869_v0 = vor.u32 %v2085_v61, %v1868_v59  ;;  %v1732_v1 = vld [vmem:[%s2635_s24 + $0xd0] sm:$0xf]  ;;  %v2051_v2 = vld [vmem:[%s2635_s24 + $0xd4] sm:$0xf0]  ;;  %v1669_v4 = vor.u32 %v2035_v63, %v1668_v62  ;;  %v1660_v10 = vld [vmem:[%s2635_s24 + $0x40] sm:$0xf] }
  0xa9   : > { %v1796_v3 = vld [vmem:[%s2635_s24 + $0x150] sm:$0xf]  ;;  %1266 = vmatpush.bf16.msra.mxu0 %v1677_v55  ;;  %v2067_v5 = vld [vmem:[%s2635_s24 + $0x154] sm:$0xf0]  ;;  %v1733_v8 = vor.u32 %v2051_v2, %v1732_v1  ;;  %v2033_v11 = vld [vmem:[%s2635_s24 + $0x44] sm:$0xf0] }
  0xaa   : > { %v1860_v6 = vld [vmem:[%s2635_s24 + $0x1d0] sm:$0xf]  ;;  %v2083_v7 = vld [vmem:[%s2635_s24 + $0x1d4] sm:$0xf0]  ;;  %1280 = vmatpush.bf16.msra.mxu1 %v1741_v56  ;;  %v1797_v9 = vor.u32 %v2067_v5, %v1796_v3  ;;  %v1724_v12 = vld [vmem:[%s2635_s24 + $0xc0] sm:$0xf]  ;;  %v1661_v19 = vor.u32 %v2033_v11, %v1660_v10 }
  0xab   : > { %1294 = vmatpush.bf16.msra.mxu2 %v1805_v60  ;;  %v1861_v13 = vor.u32 %v2083_v7, %v1860_v6  ;;  %v2049_v14 = vld [vmem:[%s2635_s24 + $0xc4] sm:$0xf0]  ;;  %v1788_v15 = vld [vmem:[%s2635_s24 + $0x140] sm:$0xf]  ;;  %v1652_v22 = vld [vmem:[%s2635_s24 + $0x30] sm:$0xf] }
  0xac   : > { %1308 = vmatpush.bf16.msra.mxu3 %v1869_v0  ;;  %v2065_v16 = vld [vmem:[%s2635_s24 + $0x144] sm:$0xf0]  ;;  %v1852_v17 = vld [vmem:[%s2635_s24 + $0x1c0] sm:$0xf]  ;;  %v1725_v20 = vor.u32 %v2049_v14, %v1724_v12  ;;  %v2031_v23 = vld [vmem:[%s2635_s24 + $0x34] sm:$0xf0] }
  0xad   : > { %v2081_v18 = vld [vmem:[%s2635_s24 + $0x1c4] sm:$0xf0]  ;;  %1267 = vmatpush.bf16.msra.mxu0 %v1669_v4  ;;  %v1789_v21 = vor.u32 %v2065_v16, %v1788_v15  ;;  %v1716_v24 = vld [vmem:[%s2635_s24 + $0xb0] sm:$0xf]  ;;  %v2047_v26 = vld [vmem:[%s2635_s24 + $0xb4] sm:$0xf0]  ;;  %v1653_v31 = vor.u32 %v2031_v23, %v1652_v22 }
  0xae   : > { %1281 = vmatpush.bf16.msra.mxu1 %v1733_v8  ;;  %v1853_v25 = vor.u32 %v2081_v18, %v1852_v17  ;;  %v1780_v27 = vld [vmem:[%s2635_s24 + $0x130] sm:$0xf]  ;;  %v2063_v28 = vld [vmem:[%s2635_s24 + $0x134] sm:$0xf0]  ;;  %v1717_v32 = vor.u32 %v2047_v26, %v1716_v24  ;;  %v1644_v34 = vld [vmem:[%s2635_s24 + $0x20] sm:$0xf] }
  0xaf   : > { %1295 = vmatpush.bf16.msra.mxu2 %v1797_v9  ;;  %v1844_v29 = vld [vmem:[%s2635_s24 + $0x1b0] sm:$0xf]  ;;  %v2079_v30 = vld [vmem:[%s2635_s24 + $0x1b4] sm:$0xf0]  ;;  %v1781_v33 = vor.u32 %v2063_v28, %v1780_v27  ;;  %v2029_v35 = vld [vmem:[%s2635_s24 + $0x24] sm:$0xf0] }
  0xb0   : > { %1309 = vmatpush.bf16.msra.mxu3 %v1861_v13  ;;  %v1708_v36 = vld [vmem:[%s2635_s24 + $0xa0] sm:$0xf]  ;;  %v1845_v37 = vor.u32 %v2079_v30, %v1844_v29  ;;  %v2045_v38 = vld [vmem:[%s2635_s24 + $0xa4] sm:$0xf0]  ;;  %v1645_v43 = vor.u32 %v2029_v35, %v1644_v34  ;;  %v1636_v46 = vld [vmem:[%s2635_s24 + $0x10] sm:$0xf] }
  0xb1   : > { %1268 = vmatpush.bf16.msra.mxu0 %v1661_v19  ;;  %v1772_v39 = vld [vmem:[%s2635_s24 + $0x120] sm:$0xf]  ;;  %v2061_v40 = vld [vmem:[%s2635_s24 + $0x124] sm:$0xf0]  ;;  %v1709_v44 = vor.u32 %v2045_v38, %v1708_v36  ;;  %v2027_v47 = vld [vmem:[%s2635_s24 + $0x14] sm:$0xf0] }
  0xb2   : > { %1282 = vmatpush.bf16.msra.mxu1 %v1725_v20  ;;  %v1836_v41 = vld [vmem:[%s2635_s24 + $0x1a0] sm:$0xf]  ;;  %v2077_v42 = vld [vmem:[%s2635_s24 + $0x1a4] sm:$0xf0]  ;;  %v1773_v45 = vor.u32 %v2061_v40, %v1772_v39  ;;  %v1700_v48 = vld [vmem:[%s2635_s24 + $0x90] sm:$0xf]  ;;  %v1637_v55 = vor.u32 %v2027_v47, %v1636_v46 }
  0xb3   : > { %1296 = vmatpush.bf16.msra.mxu2 %v1789_v21  ;;  %v1837_v49 = vor.u32 %v2077_v42, %v1836_v41  ;;  %v2043_v50 = vld [vmem:[%s2635_s24 + $0x94] sm:$0xf0]  ;;  %v1764_v51 = vld [vmem:[%s2635_s24 + $0x110] sm:$0xf]  ;;  %v1628_v56 = vld [vmem:[%s2635_s24] sm:$0xf] }
  0xb4   : > { %1310 = vmatpush.bf16.msra.mxu3 %v1853_v25  ;;  %v2059_v52 = vld [vmem:[%s2635_s24 + $0x114] sm:$0xf0]  ;;  %v1828_v53 = vld [vmem:[%s2635_s24 + $0x190] sm:$0xf]  ;;  %v2025_v57 = vld [vmem:[%s2635_s24 + $0x4] sm:$0xf0]  ;;  %v1701_v58 = vor.u32 %v2043_v50, %v1700_v48 }
  0xb5   : > { %1269 = vmatpush.bf16.msra.mxu0 %v1653_v31  ;;  %v2075_v54 = vld [vmem:[%s2635_s24 + $0x194] sm:$0xf0]  ;;  %v1765_v59 = vor.u32 %v2059_v52, %v1764_v51  ;;  %v1692_v60 = vld [vmem:[%s2635_s24 + $0x80] sm:$0xf]  ;;  %v2041_v61 = vld [vmem:[%s2635_s24 + $0x84] sm:$0xf0]  ;;  %v1629_v6 = vor.u32 %v2025_v57, %v1628_v56 }
  0xb6   : > { %1283 = vmatpush.bf16.msra.mxu1 %v1717_v32  ;;  %v1756_v62 = vld [vmem:[%s2635_s24 + $0x100] sm:$0xf]  ;;  %v1829_v63 = vor.u32 %v2075_v54, %v1828_v53  ;;  %v2057_v0 = vld [vmem:[%s2635_s24 + $0x104] sm:$0xf0]  ;;  %v1940_v3 = vld [vmem:[%s2635_s24 + $0x270] sm:$0xf]  ;;  %v1693_v10 = vor.u32 %v2041_v61, %v1692_v60 }
  0xb7   : > { %1297 = vmatpush.bf16.msra.mxu2 %v1781_v33  ;;  %v1820_v1 = vld [vmem:[%s2635_s24 + $0x180] sm:$0xf]  ;;  %v2073_v2 = vld [vmem:[%s2635_s24 + $0x184] sm:$0xf0]  ;;  %v2103_v4 = vld [vmem:[%s2635_s24 + $0x274] sm:$0xf0]  ;;  %v1757_v11 = vor.u32 %v2057_v0, %v1756_v62 }
  0xb8   : > { %1311 = vmatpush.bf16.msra.mxu3 %v1845_v37  ;;  %v2004_v5 = vld [vmem:[%s2635_s24 + $0x2f0] sm:$0xf]  ;;  %v2119_v7 = vld [vmem:[%s2635_s24 + $0x2f4] sm:$0xf0]  ;;  %v2038_v8 = vld [vmem:[%s2635_s24 + $0x74] sm:$0xf]  ;;  %v1821_v14 = vor.u32 %v2073_v2, %v1820_v1  ;;  %v1941_v15 = vor.u32 %v2103_v4, %v1940_v3 }
  0xb9   : > { %1270 = vmatpush.bf16.msra.mxu0 %v1645_v43  ;;  %v1686_v9 = vld [vmem:[%s2635_s24 + $0x78] sm:$0xf0]  ;;  %v2054_v12 = vld [vmem:[%s2635_s24 + $0xf4] sm:$0xf]  ;;  %v1932_v16 = vld [vmem:[%s2635_s24 + $0x260] sm:$0xf]  ;;  %v2005_v18 = vor.u32 %v2119_v7, %v2004_v5 }
  0xba   : > { %1284 = vmatpush.bf16.msra.mxu1 %v1709_v44  ;;  %v1750_v13 = vld [vmem:[%s2635_s24 + $0xf8] sm:$0xf0]  ;;  %v2101_v17 = vld [vmem:[%s2635_s24 + $0x264] sm:$0xf0]  ;;  %v1689_v19 = vor.u32 %v2038_v8, %v1686_v9  ;;  %v1996_v20 = vld [vmem:[%s2635_s24 + $0x2e0] sm:$0xf] }
  0xbb   : > { %1298 = vmatpush.bf16.msra.mxu2 %v1773_v45  ;;  %v2117_v21 = vld [vmem:[%s2635_s24 + $0x2e4] sm:$0xf0]  ;;  %v2036_v22 = vld [vmem:[%s2635_s24 + $0x64] sm:$0xf]  ;;  %v1753_v23 = vor.u32 %v2054_v12, %v1750_v13  ;;  %v1678_v24 = vld [vmem:[%s2635_s24 + $0x68] sm:$0xf0]  ;;  %v1933_v30 = vor.u32 %v2101_v17, %v1932_v16 }
  0xbc   : > { %1312 = vmatpush.bf16.msra.mxu3 %v1837_v49  ;;  %v2052_v25 = vld [vmem:[%s2635_s24 + $0xe4] sm:$0xf]  ;;  %v1742_v26 = vld [vmem:[%s2635_s24 + $0xe8] sm:$0xf0]  ;;  %v1924_v27 = vld [vmem:[%s2635_s24 + $0x250] sm:$0xf]  ;;  %v1997_v35 = vor.u32 %v2117_v21, %v1996_v20  ;;  %v1681_v36 = vor.u32 %v2036_v22, %v1678_v24 }
  0xbd   : > { %1271 = vmatpush.bf16.msra.mxu0 %v1637_v55  ;;  %v1604_v28 = vld [vmem:[%s2633_s23] sm:$0xf]  ;;  %v2021_v29 = vld [vmem:[%s2633_s23 + $0x14] sm:$0xf0]  ;;  %v2034_v37 = vld [vmem:[%s2635_s24 + $0x54] sm:$0xf]  ;;  %v1745_v40 = vor.u32 %v2052_v25, %v1742_v26 }
  0xbe   : > { %1285 = vmatpush.bf16.msra.mxu1 %v1701_v58  ;;  %v2099_v31 = vld [vmem:[%s2635_s24 + $0x254] sm:$0xf0]  ;;  %v1988_v32 = vld [vmem:[%s2635_s24 + $0x2d0] sm:$0xf]  ;;  %v2730_v34 = vor.u32 %v2021_v29, %v1604_v28  ;;  %v1670_v38 = vld [vmem:[%s2635_s24 + $0x58] sm:$0xf0] }
  0xbf   : > { %1299 = vmatpush.bf16.msra.mxu2 %v1765_v59  ;;  %v2115_v33 = vld [vmem:[%s2635_s24 + $0x2d4] sm:$0xf0]  ;;  %v2050_v39 = vld [vmem:[%s2635_s24 + $0xd4] sm:$0xf]  ;;  %v1734_v41 = vld [vmem:[%s2635_s24 + $0xd8] sm:$0xf0]  ;;  %v1925_v48 = vor.u32 %v2099_v31, %v1924_v27  ;;  %v1673_v52 = vor.u32 %v2034_v37, %v1670_v38 }
  0xc0   : > { %1313 = vmatpush.bf16.msra.mxu3 %v1829_v63  ;;  %v2018_v42 = vld [vmem:[%s2633_s23 + $0x4] sm:$0xf]  ;;  %v1606_v43 = vld [vmem:[%s2633_s23 + $0x18] sm:$0xf0]  ;;  %v1612_v45 = vld [vmem:[%s2633_s23 + $0x8] sm:$0xf]  ;;  %v1989_v51 = vor.u32 %v2115_v33, %v1988_v32  ;;  %v1737_v57 = vor.u32 %v2050_v39, %v1734_v41 }
  0xc1   : > { %1272 = vmatpush.bf16.msra.mxu0 %v1629_v6  ;;  %v2739_v44 = vor.u32 %v2018_v42, %v1606_v43  ;;  %v2022_v46 = vld [vmem:[%s2633_s23 + $0x1c] sm:$0xf0]  ;;  %v2019_v47 = vld [vmem:[%s2633_s23 + $0xc] sm:$0xf]  ;;  %v1614_v50 = vld [vmem:[%s2633_s23 + $0x20] sm:$0xf0] }
  0xc2   : > { %1286 = vmatpush.bf16.msra.mxu1 %v1693_v10  ;;  %v2744_v49 = vor.u32 %v2022_v46, %v1612_v45  ;;  %v1916_v53 = vld [vmem:[%s2635_s24 + $0x240] sm:$0xf]  ;;  %v2097_v54 = vld [vmem:[%s2635_s24 + $0x244] sm:$0xf0]  ;;  %v2750_v56 = vor.u32 %v2019_v47, %v1614_v50  ;;  %v2032_v59 = vld [vmem:[%s2635_s24 + $0x44] sm:$0xf] }
  0xc3   : > { %1300 = vmatpush.bf16.msra.mxu2 %v1757_v11  ;;  %v1980_v55 = vld [vmem:[%s2635_s24 + $0x2c0] sm:$0xf]  ;;  %v2113_v58 = vld [vmem:[%s2635_s24 + $0x2c4] sm:$0xf0]  ;;  %v1662_v60 = vld [vmem:[%s2635_s24 + $0x48] sm:$0xf0]  ;;  %v1917_v63 = vor.u32 %v2097_v54, %v1916_v53 }
  0xc4   : > { %1314 = vmatpush.bf16.msra.mxu3 %v1821_v14  ;;  %1273 = vmatmul.bf16.vlgmr.msra.gmra.mxu0 %v2730_v34  ;;  %v2048_v61 = vld [vmem:[%s2635_s24 + $0xc4] sm:$0xf]  ;;  %v1726_v62 = vld [vmem:[%s2635_s24 + $0xc8] sm:$0xf0]  ;;  %v1981_v0 = vor.u32 %v2113_v58, %v1980_v55  ;;  %v1665_v1 = vor.u32 %v2032_v59, %v1662_v60  ;;  %v1908_v2 = vld [vmem:[%s2635_s24 + $0x230] sm:$0xf] }
  0xc5   : > { %1321 = vmatpush.bf16.msrb.mxu0 %v1941_v15  ;;  %1287 = vmatmul.bf16.vlgmr.msra.gmra.mxu1 %v2739_v44  ;;  %v2095_v3 = vld [vmem:[%s2635_s24 + $0x234] sm:$0xf0]  ;;  %v1972_v4 = vld [vmem:[%s2635_s24 + $0x2b0] sm:$0xf]  ;;  %v1729_v5 = vor.u32 %v2048_v61, %v1726_v62  ;;  %v2030_v7 = vld [vmem:[%s2635_s24 + $0x34] sm:$0xf] }
  0xc6   : > { %1335 = vmatpush.bf16.msrb.mxu1 %v2005_v18  ;;  %1301 = vmatmul.bf16.vlgmr.msra.gmra.mxu2 %v2744_v49  ;;  %v2111_v6 = vld [vmem:[%s2635_s24 + $0x2b4] sm:$0xf0]  ;;  %v1654_v8 = vld [vmem:[%s2635_s24 + $0x38] sm:$0xf0]  ;;  %v2046_v9 = vld [vmem:[%s2635_s24 + $0xb4] sm:$0xf]  ;;  %v1909_v11 = vor.u32 %v2095_v3, %v1908_v2 }
  0xc7   : > { %1349 = vmatpush.bf16.msrb.mxu2 %v1689_v19  ;;  %1315 = vmatmul.bf16.vlgmr.msra.gmra.mxu3 %v2750_v56  ;;  %v1718_v10 = vld [vmem:[%s2635_s24 + $0xb8] sm:$0xf0]  ;;  %v1973_v12 = vor.u32 %v2111_v6, %v1972_v4  ;;  %v1657_v13 = vor.u32 %v2030_v7, %v1654_v8  ;;  %v1900_v14 = vld [vmem:[%s2635_s24 + $0x220] sm:$0xf]  ;;  %v2093_v15 = vld [vmem:[%s2635_s24 + $0x224] sm:$0xf0] }
  0xc8   : > { %1363 = vmatpush.bf16.msrb.mxu3 %v1753_v23  ;;  %v1964_v16 = vld [vmem:[%s2635_s24 + $0x2a0] sm:$0xf]  ;;  %v1721_v17 = vor.u32 %v2046_v9, %v1718_v10  ;;  %v2109_v18 = vld [vmem:[%s2635_s24 + $0x2a4] sm:$0xf0]  ;;  %v2028_v19 = vld [vmem:[%s2635_s24 + $0x24] sm:$0xf]  ;;  %v1901_v23 = vor.u32 %v2093_v15, %v1900_v14 }
  0xc9   : > { %1322 = vmatpush.bf16.msrb.mxu0 %v1933_v30  ;;  %v1646_v20 = vld [vmem:[%s2635_s24 + $0x28] sm:$0xf0]  ;;  %v2044_v21 = vld [vmem:[%s2635_s24 + $0xa4] sm:$0xf]  ;;  %v1965_v24 = vor.u32 %v2109_v18, %v1964_v16  ;;  %v1892_v26 = vld [vmem:[%s2635_s24 + $0x210] sm:$0xf] }
  0xca   : > { %1336 = vmatpush.bf16.msrb.mxu1 %v1997_v35  ;;  %v1710_v22 = vld [vmem:[%s2635_s24 + $0xa8] sm:$0xf0]  ;;  %v1649_v25 = vor.u32 %v2028_v19, %v1646_v20  ;;  %v2091_v27 = vld [vmem:[%s2635_s24 + $0x214] sm:$0xf0]  ;;  %v1956_v28 = vld [vmem:[%s2635_s24 + $0x290] sm:$0xf] }
  0xcb   : > { %1350 = vmatpush.bf16.msrb.mxu2 %v1681_v36  ;;  %v1713_v29 = vor.u32 %v2044_v21, %v1710_v22  ;;  %v2107_v30 = vld [vmem:[%s2635_s24 + $0x294] sm:$0xf0]  ;;  %v2026_v31 = vld [vmem:[%s2635_s24 + $0x14] sm:$0xf]  ;;  %v1638_v32 = vld [vmem:[%s2635_s24 + $0x18] sm:$0xf0]  ;;  %v1893_v36 = vor.u32 %v2091_v27, %v1892_v26 }
  0xcc   : > { %1364 = vmatpush.bf16.msrb.mxu3 %v1745_v40  ;;  %v2042_v33 = vld [vmem:[%s2635_s24 + $0x94] sm:$0xf]  ;;  %v1702_v35 = vld [vmem:[%s2635_s24 + $0x98] sm:$0xf0]  ;;  %v1884_v37 = vld [vmem:[%s2635_s24 + $0x200] sm:$0xf]  ;;  %v1957_v40 = vor.u32 %v2107_v30, %v1956_v28  ;;  %v1641_v41 = vor.u32 %v2026_v31, %v1638_v32 }
  0xcd   : > { %1323 = vmatpush.bf16.msrb.mxu0 %v1925_v48  ;;  %v2089_v38 = vld [vmem:[%s2635_s24 + $0x204] sm:$0xf0]  ;;  %v1948_v39 = vld [vmem:[%s2635_s24 + $0x280] sm:$0xf]  ;;  %v2024_v43 = vld [vmem:[%s2635_s24 + $0x4] sm:$0xf]  ;;  %v1705_v46 = vor.u32 %v2042_v33, %v1702_v35 }
  0xce   : > { %1337 = vmatpush.bf16.msrb.mxu1 %v1989_v51  ;;  %v2105_v42 = vld [vmem:[%s2635_s24 + $0x284] sm:$0xf0]  ;;  %v1630_v45 = vld [vmem:[%s2635_s24 + $0x8] sm:$0xf0]  ;;  %v2040_v47 = vld [vmem:[%s2635_s24 + $0x84] sm:$0xf]  ;;  %v1885_v54 = vor.u32 %v2089_v38, %v1884_v37 }
  0xcf   : > { %1351 = vmatpush.bf16.msrb.mxu2 %v1673_v52  ;;  %v1694_v48 = vld [vmem:[%s2635_s24 + $0x88] sm:$0xf0]  ;;  %v2070_v50 = vld [vmem:[%s2635_s24 + $0x174] sm:$0xf]  ;;  %v1814_v51 = vld [vmem:[%s2635_s24 + $0x178] sm:$0xf0]  ;;  %v1949_v59 = vor.u32 %v2105_v42, %v1948_v39  ;;  %v1633_v60 = vor.u32 %v2024_v43, %v1630_v45 }
  0xd0   : > { %1365 = vmatpush.bf16.msrb.mxu3 %v1737_v57  ;;  %v2086_v52 = vld [vmem:[%s2635_s24 + $0x1f4] sm:$0xf]  ;;  %v1878_v53 = vld [vmem:[%s2635_s24 + $0x1f8] sm:$0xf0]  ;;  %v1620_v62 = vld [vmem:[%s2633_s23 + $0x10] sm:$0xf] }
  0xd1   : > { %1324 = vmatpush.bf16.msrb.mxu0 %v1917_v63  ;;  %v2102_v55 = vld [vmem:[%s2635_s24 + $0x274] sm:$0xf]  ;;  %v1942_v57 = vld [vmem:[%s2635_s24 + $0x278] sm:$0xf0]  ;;  %v2023_v63 = vld [vmem:[%s2633_s23 + $0x24] sm:$0xf0]  ;;  %v1881_v4 = vor.u32 %v2086_v52, %v1878_v53 }
  0xd2   : > { %1338 = vmatpush.bf16.msrb.mxu1 %v1981_v0  ;;  %v2118_v58 = vld [vmem:[%s2635_s24 + $0x2f4] sm:$0xf]  ;;  %v2006_v61 = vld [vmem:[%s2635_s24 + $0x2f8] sm:$0xf0]  ;;  %v1697_v0 = vor.u32 %v2040_v47, %v1694_v48  ;;  %v2068_v6 = vld [vmem:[%s2635_s24 + $0x164] sm:$0xf]  ;;  %v2807_v10 = vor.u32 %v2023_v63, %v1620_v62 }
  0xd3   : > { %1352 = vmatpush.bf16.msrb.mxu2 %v1665_v1  ;;  %v1817_v1 = vor.u32 %v2070_v50, %v1814_v51  ;;  %v2020_v2 = vld [vmem:[%s2633_s23 + $0x14] sm:$0xf]  ;;  %v1622_v3 = vld [vmem:[%s2633_s23 + $0x28] sm:$0xf0]  ;;  %v2009_v9 = vor.u32 %v2118_v58, %v2006_v61  ;;  %p2010_p4 = scmp.ne.s32.totalorder %s2284_s15, 5 }
  0xd4   : > { %1366 = vmatpush.bf16.msrb.mxu3 %v1729_v5  ;;  %v1945_v5 = vor.u32 %v2102_v55, %v1942_v57  ;;  %v1806_v7 = vld [vmem:[%s2635_s24 + $0x168] sm:$0xf0]  ;;  %v2084_v8 = vld [vmem:[%s2635_s24 + $0x1e4] sm:$0xf]  ;;  %v2812_v14 = vor.u32 %v2020_v2, %v1622_v3  ;;  %v2066_v20 = vld [vmem:[%s2635_s24 + $0x154] sm:$0xf] }
  0xd5   : > { %1325 = vmatpush.bf16.msrb.mxu0 %v1909_v11  ;;  %v1870_v11 = vld [vmem:[%s2635_s24 + $0x1e8] sm:$0xf0]  ;;  %v2116_v15 = vld [vmem:[%s2635_s24 + $0x2e4] sm:$0xf]  ;;  %v1798_v21 = vld [vmem:[%s2635_s24 + $0x158] sm:$0xf0] }
  0xd6   : > { %1339 = vmatpush.bf16.msrb.mxu1 %v1973_v12  ;;  %v2100_v12 = vld [vmem:[%s2635_s24 + $0x264] sm:$0xf]  ;;  %v1998_v16 = vld [vmem:[%s2635_s24 + $0x2e8] sm:$0xf0]  ;;  %v1873_v18 = vor.u32 %v2084_v8, %v1870_v11  ;;  %v2082_v22 = vld [vmem:[%s2635_s24 + $0x1d4] sm:$0xf] }
  0xd7   : > { %1353 = vmatpush.bf16.msrb.mxu2 %v1657_v13  ;;  %v1934_v13 = vld [vmem:[%s2635_s24 + $0x268] sm:$0xf0]  ;;  %v1926_v26 = vld [vmem:[%s2635_s24 + $0x258] sm:$0xf0]  ;;  %v2114_v27 = vld [vmem:[%s2635_s24 + $0x2d4] sm:$0xf] }
  0xd8   : > { %1367 = vmatpush.bf16.msrb.mxu3 %v1721_v17  ;;  %v1809_v17 = vor.u32 %v2068_v6, %v1806_v7  ;;  %v1937_v19 = vor.u32 %v2100_v12, %v1934_v13  ;;  %v1990_v28 = vld [vmem:[%s2635_s24 + $0x2d8] sm:$0xf0]  ;;  %v2064_v32 = vld [vmem:[%s2635_s24 + $0x144] sm:$0xf]  ;;  %v1790_v33 = vld [vmem:[%s2635_s24 + $0x148] sm:$0xf0] }
  0xd9   : > { %1326 = vmatpush.bf16.msrb.mxu0 %v1901_v23  ;;  %v2001_v23 = vor.u32 %v2116_v15, %v1998_v16  ;;  %v2080_v35 = vld [vmem:[%s2635_s24 + $0x1c4] sm:$0xf]  ;;  %v1918_v38 = vld [vmem:[%s2635_s24 + $0x248] sm:$0xf0]  ;;  %v2062_v43 = vld [vmem:[%s2635_s24 + $0x134] sm:$0xf] }
  0xda   : > { %1340 = vmatpush.bf16.msrb.mxu1 %v1965_v24  ;;  %v1862_v24 = vld [vmem:[%s2635_s24 + $0x1d8] sm:$0xf0]  ;;  %v2096_v37 = vld [vmem:[%s2635_s24 + $0x244] sm:$0xf]  ;;  %v1982_v39 = vld [vmem:[%s2635_s24 + $0x2c8] sm:$0xf0] }
  0xdb   : > { %1354 = vmatpush.bf16.msrb.mxu2 %v1649_v25  ;;  %v2098_v25 = vld [vmem:[%s2635_s24 + $0x254] sm:$0xf]  ;;  %v1865_v30 = vor.u32 %v2082_v22, %v1862_v24  ;;  %v1921_v42 = vor.u32 %v2096_v37, %v1918_v38  ;;  %v1782_v45 = vld [vmem:[%s2635_s24 + $0x138] sm:$0xf0]  ;;  %v2060_v58 = vld [vmem:[%s2635_s24 + $0x124] sm:$0xf] }
  0xdc   : > { %1368 = vmatpush.bf16.msrb.mxu3 %v1713_v29  ;;  %v1801_v29 = vor.u32 %v2066_v20, %v1798_v21  ;;  %v1929_v31 = vor.u32 %v2098_v25, %v1926_v26  ;;  %v1846_v48 = vld [vmem:[%s2635_s24 + $0x1b8] sm:$0xf0]  ;;  %v2094_v50 = vld [vmem:[%s2635_s24 + $0x234] sm:$0xf]  ;;  %v1838_v62 = vld [vmem:[%s2635_s24 + $0x1a8] sm:$0xf0] }
  0xdd   : > { %1327 = vmatpush.bf16.msrb.mxu0 %v1893_v36  ;;  %v1854_v36 = vld [vmem:[%s2635_s24 + $0x1c8] sm:$0xf0]  ;;  %v1910_v51 = vld [vmem:[%s2635_s24 + $0x238] sm:$0xf0]  ;;  %v2110_v52 = vld [vmem:[%s2635_s24 + $0x2b4] sm:$0xf] }
  0xde   : > { %1341 = vmatpush.bf16.msrb.mxu1 %v1957_v40  ;;  %v1793_v40 = vor.u32 %v2064_v32, %v1790_v33  ;;  %v1974_v53 = vld [vmem:[%s2635_s24 + $0x2b8] sm:$0xf0]  ;;  %v1913_v57 = vor.u32 %v2094_v50, %v1910_v51  ;;  %v2092_v63 = vld [vmem:[%s2635_s24 + $0x224] sm:$0xf]  ;;  %v1966_v2 = vld [vmem:[%s2635_s24 + $0x2a8] sm:$0xf0] }
  0xdf   : > { %1355 = vmatpush.bf16.msrb.mxu2 %v1641_v41  ;;  %v1857_v41 = vor.u32 %v2080_v35, %v1854_v36  ;;  %v1977_v61 = vor.u32 %v2110_v52, %v1974_v53  ;;  %v2058_v6 = vld [vmem:[%s2635_s24 + $0x114] sm:$0xf]  ;;  %v1766_v7 = vld [vmem:[%s2635_s24 + $0x118] sm:$0xf0]  ;;  %v2056_v20 = vld [vmem:[%s2635_s24 + $0x104] sm:$0xf] }
  0xe0   : > { %1369 = vmatpush.bf16.msrb.mxu3 %v1705_v46  ;;  %v2078_v46 = vld [vmem:[%s2635_s24 + $0x1b4] sm:$0xf]  ;;  %v1830_v11 = vld [vmem:[%s2635_s24 + $0x198] sm:$0xf0]  ;;  %v1758_v21 = vld [vmem:[%s2635_s24 + $0x108] sm:$0xf0] }
  0xe1   : > { %1328 = vmatpush.bf16.msrb.mxu0 %v1885_v54  ;;  %v1785_v54 = vor.u32 %v2062_v43, %v1782_v45  ;;  %v1849_v55 = vor.u32 %v2078_v46, %v1846_v48  ;;  %v2074_v8 = vld [vmem:[%s2635_s24 + $0x194] sm:$0xf]  ;;  %v1894_v13 = vld [vmem:[%s2635_s24 + $0x218] sm:$0xf0]  ;;  %v2072_v22 = vld [vmem:[%s2635_s24 + $0x184] sm:$0xf] }
  0xe2   : > { %1342 = vmatpush.bf16.msrb.mxu1 %v1949_v59  ;;  %v1774_v59 = vld [vmem:[%s2635_s24 + $0x128] sm:$0xf0]  ;;  %v2090_v12 = vld [vmem:[%s2635_s24 + $0x214] sm:$0xf]  ;;  %v1958_v16 = vld [vmem:[%s2635_s24 + $0x298] sm:$0xf0] }
  0xe3   : > { %1356 = vmatpush.bf16.msrb.mxu2 %v1633_v60  ;;  %v2076_v60 = vld [vmem:[%s2635_s24 + $0x1a4] sm:$0xf]  ;;  %v1777_v3 = vor.u32 %v2060_v58, %v1774_v59  ;;  %v2106_v15 = vld [vmem:[%s2635_s24 + $0x294] sm:$0xf]  ;;  %v1822_v24 = vld [vmem:[%s2635_s24 + $0x188] sm:$0xf0] }
  0xe4   : > { %1370 = vmatpush.bf16.msrb.mxu3 %v1697_v0  ;;  %1329 = vmatmul.bf16.vlgmr.msrb.gmra.mxu0 %v2807_v10  ;;  %v1902_v0 = vld [vmem:[%s2635_s24 + $0x228] sm:$0xf0]  ;;  %v2088_v25 = vld [vmem:[%s2635_s24 + $0x204] sm:$0xf]  ;;  %v651_v53 = vld [vmem:[%s2637_s26 + $0x10] sm:$0xff] }
  0xe5   : > { %1377 = vmatpush.bf16.msra.mxu0 %v1817_v1  ;;  %1343 = vmatmul.bf16.vlgmr.msrb.gmra.mxu1 %v2812_v14  ;;  %v2108_v1 = vld [vmem:[%s2635_s24 + $0x2a4] sm:$0xf]  ;;  %v1886_v26 = vld [vmem:[%s2635_s24 + $0x208] sm:$0xf0] }
  0xe6   : > { %1391 = vmatpush.bf16.msra.mxu1 %v1881_v4  ;;  %1357 = vmatmul.bf16.vlgmr.msrb.gmra.mxu2 %v2730_v34  ;;  %v1993_v34 = vor.u32 %v2114_v27, %v1990_v28  ;;  %v1841_v4 = vor.u32 %v2076_v60, %v1838_v62  ;;  %v2104_v27 = vld [vmem:[%s2635_s24 + $0x284] sm:$0xf]  ;;  %v1950_v28 = vld [vmem:[%s2635_s24 + $0x288] sm:$0xf0] }
  0xe7   : > { %1405 = vmatpush.bf16.msra.mxu2 %v1945_v5  ;;  %1371 = vmatmul.bf16.vlgmr.msrb.gmra.mxu3 %v2739_v44  ;;  %v2112_v44 = vld [vmem:[%s2635_s24 + $0x2c4] sm:$0xf]  ;;  %v1905_v5 = vor.u32 %v2092_v63, %v1902_v0  ;;  %v1953_v32 = vor.u32 %v2104_v27, %v1950_v28 }
  0xe8   : > { %1419 = vmatpush.bf16.msra.mxu3 %v2009_v9  ;;  %v1985_v47 = vor.u32 %v2112_v44, %v1982_v39  ;;  %v1969_v9 = vor.u32 %v2108_v1, %v1966_v2  ;;  %v649_v43 = vld [vmem:[%s2637_s26] sm:$0xff] }
  0xe9   : > { %1378 = vmatpush.bf16.msra.mxu0 %v1809_v17  ;;  %v1769_v17 = vor.u32 %v2058_v6, %v1766_v7  ;;  %v650_v7 = vld [vmem:[%s2637_s26 + $0x8] sm:$0xff] }
  0xea   : > { %1392 = vmatpush.bf16.msra.mxu1 %v1873_v18  ;;  %v1833_v18 = vor.u32 %v2074_v8, %v1830_v11 }
  0xeb   : > { %1406 = vmatpush.bf16.msra.mxu2 %v1937_v19  ;;  %v1897_v19 = vor.u32 %v2090_v12, %v1894_v13 }
  0xec   : > { %1420 = vmatpush.bf16.msra.mxu3 %v2001_v23  ;;  %v1961_v23 = vor.u32 %v2106_v15, %v1958_v16 }
  0xed   : > { %1379 = vmatpush.bf16.msra.mxu0 %v1801_v29  ;;  %v1761_v29 = vor.u32 %v2056_v20, %v1758_v21 }
  0xee   : > { %1393 = vmatpush.bf16.msra.mxu1 %v1865_v30  ;;  %v1825_v30 = vor.u32 %v2072_v22, %v1822_v24 }
  0xef   : > { %1407 = vmatpush.bf16.msra.mxu2 %v1929_v31  ;;  %v1889_v31 = vor.u32 %v2088_v25, %v1886_v26 }
  0xf0   : > { %1421 = vmatpush.bf16.msra.mxu3 %v1993_v34 }
  0xf1   : > { %1380 = vmatpush.bf16.msra.mxu0 %v1793_v40 }
  0xf2   : > { %1394 = vmatpush.bf16.msra.mxu1 %v1857_v41 }
  0xf3   : > { %1408 = vmatpush.bf16.msra.mxu2 %v1921_v42 }
  0xf4   : > { %1422 = vmatpush.bf16.msra.mxu3 %v1985_v47 }
  0xf5   : > { %1381 = vmatpush.bf16.msra.mxu0 %v1785_v54 }
  0xf6   : > { %1395 = vmatpush.bf16.msra.mxu1 %v1849_v55 }
  0xf7   : > { %1409 = vmatpush.bf16.msra.mxu2 %v1913_v57 }
  0xf8   : > { %1423 = vmatpush.bf16.msra.mxu3 %v1977_v61 }
  0xf9   : > { %1382 = vmatpush.bf16.msra.mxu0 %v1777_v3 }
  0xfa   : > { %1396 = vmatpush.bf16.msra.mxu1 %v1841_v4 }
  0xfb   : > { %1410 = vmatpush.bf16.msra.mxu2 %v1905_v5 }
  0xfc   : > { %1424 = vmatpush.bf16.msra.mxu3 %v1969_v9 }
  0xfd   : > { %1383 = vmatpush.bf16.msra.mxu0 %v1769_v17  ;;  %v652_v17 = vld [vmem:[%s2637_s26 + $0x18] sm:$0xff] }
  0xfe   : > { %1397 = vmatpush.bf16.msra.mxu1 %v1833_v18 }
  0xff   : > { %1411 = vmatpush.bf16.msra.mxu2 %v1897_v19 }
 0x100   : > { %1425 = vmatpush.bf16.msra.mxu3 %v1961_v23 }
 0x101   : > { %1384 = vmatpush.bf16.msra.mxu0 %v1761_v29 }
 0x102   : > { %1398 = vmatpush.bf16.msra.mxu1 %v1825_v30 }
 0x103   : > { %1412 = vmatpush.bf16.msra.mxu2 %v1889_v31 }
 0x104   : > { %1426 = vmatpush.bf16.msra.mxu3 %v1953_v32  ;;  %1385 = vmatmul.bf16.vlgmr.msra.gmra.mxu0 %v2744_v49 }
 0x105   : > { %1399 = vmatmul.bf16.vlgmr.msra.gmra.mxu1 %v2750_v56 }
 0x106   : > { %1413 = vmatmul.bf16.vlgmr.msra.gmra.mxu2 %v2807_v10 }
 0x107   : > { %1427 = vmatmul.bf16.vlgmr.msra.gmra.mxu3 %v2812_v14 }
 0x141   : > { %v1274_v33 = vpop.f32.mrf.mxu0 }
 0x142   : > { %v1288_v35 = vpop.f32.mrf.mxu1 }
 0x143   : > { %v1289_v34 = vadd.f32 %v1288_v35, %v1274_v33 }
 0x149   : > { %v1276_v36 = vpop.f32.mrf.mxu0  ;;  %v1302_v37 = vpop.f32.mrf.mxu2 }
 0x14a   : > { %v1290_v38 = vpop.f32.mrf.mxu1  ;;  %v1303_v44 = vadd.f32 %v1302_v37, %v1289_v34  ;;  %v1316_v39 = vpop.f32.mrf.mxu3 }
 0x14b   : > { %v1291_v41 = vadd.f32 %v1290_v38, %v1276_v36 }
 0x14c   : > { %v1317_v40 = vadd.f32 %v1316_v39, %v1303_v44 }
 0x151   : > { %v1304_v42 = vpop.f32.mrf.mxu2 }
 0x152   : > { %v1305_v45 = vadd.f32 %v1304_v42, %v1291_v41  ;;  %v1318_v46 = vpop.f32.mrf.mxu3 }
 0x154   : > { %v1319_v48 = vadd.f32 %v1318_v46, %v1305_v45 }
 0x161   : > { %v1330_v49 = vpop.f32.mrf.mxu0 }
 0x162   : > { %v1331_v56 = vadd.f32 %v1330_v49, %v1317_v40  ;;  %v1344_v10 = vpop.f32.mrf.mxu1 }
 0x164   : > { %v1345_v14 = vadd.f32 %v1344_v10, %v1331_v56 }
 0x166   : > { %v1433_v47 = vadd.f32 %v1345_v14, %v649_v43 }
 0x168   : > { %1437 = vst [vmem:[%s2637_s26] sm:$0xff] %v1433_v47 }
 0x169   : > { %v1332_v50 = vpop.f32.mrf.mxu0  ;;  %v1358_v57 = vpop.f32.mrf.mxu2 }
 0x16a   : > { %v1333_v51 = vadd.f32 %v1332_v50, %v1319_v48  ;;  %v1346_v52 = vpop.f32.mrf.mxu1  ;;  %v1372_v58 = vpop.f32.mrf.mxu3 }
 0x16b   : > { %v1373_v60 = vadd.f32 %v1372_v58, %v1358_v57 }
 0x16c   : > { %v1347_v54 = vadd.f32 %v1346_v52, %v1333_v51 }
 0x16e   : > { %v1435_v55 = vadd.f32 %v1347_v54, %v651_v53 }
 0x170   : > { %1439 = vst [vmem:[%s2637_s26 + $0x10] sm:$0xff] %v1435_v55 }
 0x171   : > { %v1360_v59 = vpop.f32.mrf.mxu2 }
 0x172   : > { %v1374_v61 = vpop.f32.mrf.mxu3 }
 0x173   : > { %v1375_v3 = vadd.f32 %v1374_v61, %v1360_v59 }
 0x181   : > { %v1386_v62 = vpop.f32.mrf.mxu0 }
 0x182   : > { %v1387_v63 = vadd.f32 %v1386_v62, %v1373_v60  ;;  %v1400_v0 = vpop.f32.mrf.mxu1 }
 0x184   : > { %v1401_v1 = vadd.f32 %v1400_v0, %v1387_v63 }
 0x189   : > { %v1414_v2 = vpop.f32.mrf.mxu2  ;;  %v1388_v6 = vpop.f32.mrf.mxu0 }
 0x18a   : > { %v1415_v4 = vadd.f32 %v1414_v2, %v1401_v1  ;;  %v1428_v5 = vpop.f32.mrf.mxu3  ;;  %v1389_v9 = vadd.f32 %v1388_v6, %v1375_v3  ;;  %v1402_v12 = vpop.f32.mrf.mxu1 }
 0x18c   : > { %v1429_v8 = vadd.f32 %v1428_v5, %v1415_v4  ;;  %v1403_v13 = vadd.f32 %v1402_v12, %v1389_v9 }
 0x18e   : > { %v1434_v11 = vadd.f32 %v1429_v8, %v650_v7 }
 0x190   : > { %1438 = vst [vmem:[%s2637_s26 + $0x8] sm:$0xff] %v1434_v11 }
 0x191   : > { %v1416_v15 = vpop.f32.mrf.mxu2 }
 0x192   : > { %v1417_v16 = vadd.f32 %v1416_v15, %v1403_v13  ;;  %v1430_v18 = vpop.f32.mrf.mxu3 }
 0x194   : > { %v1431_v19 = vadd.f32 %v1430_v18, %v1417_v16  ;;  %1444 = sbr.rel (%p2010_p4) target bundleno = 419 (0x1a3), region = 97 }
 0x196   : > { %v1436_v20 = vadd.f32 %v1431_v19, %v652_v17 }
 0x198   : > { %1440 = vst [vmem:[%s2637_s26 + $0x18] sm:$0xff] %v1436_v20 }
 0x199   : > { %v1445_v21 = vld [vmem:[%s2637_s26] sm:$0xff]  ;;  %v1446_v22 = vld [vmem:[%s2637_s26 + $0x8] sm:$0xff]  ;;  %v1447_v23 = vld [vmem:[%s2637_s26 + $0x10] sm:$0xff] }
 0x19a   : > { %v1449_v24 = vmax.f32 %v1445_v21, 0.0  ;;  %v1450_v25 = vmax.f32 %v1446_v22, 0.0  ;;  %v1451_v26 = vmax.f32 %v1447_v23, 0.0 }
 0x19c   : > { %1453 = vst [vmem:[%s2637_s26] sm:$0xff] %v1449_v24 }
 0x19d   : > { %1454 = vst [vmem:[%s2637_s26 + $0x8] sm:$0xff] %v1450_v25 }
 0x19e   : > { %1455 = vst [vmem:[%s2637_s26 + $0x10] sm:$0xff] %v1451_v26 }
 0x19f   : > { %v1448_v27 = vld [vmem:[%s2637_s26 + $0x18] sm:$0xff] }
 0x1a0   : > { %v1452_v28 = vmax.f32 %v1448_v27, 0.0 }
 0x1a2   : > { %1456 = vst [vmem:[%s2637_s26 + $0x18] sm:$0xff] %v1452_v28 }
 0x1a3 PF: > { %1463 = sbr.rel (!%p2412_p12) target bundleno = 427 (0x1ab), region = 101  ;;  %s2120_s9 = sshll.u32 (%p2412_p12), %s2288_s16, 4  ;;  %v1482_v29 = vld [vmem:[%s2637_s26] sm:$0xff] (%p2412_p12) }
 0x1a4   : > { %v1484_v30 = vld [vmem:[%s2637_s26 + $0x8] sm:$0xff] (%p2412_p12)  ;;  %s1469_s15 = scalar_lea.vmem (%p2412_p12), %s2934_s2, %s2120_s9 }
 0x1a5   : > { %v1486_v31 = vld [vmem:[%s2637_s26 + $0x10] sm:$0xff] (%p2412_p12)  ;;  %1483 = vst [vmem:[%s1469_s15] sm:$0xff] (%p2412_p12), %v1482_v29 }
 0x1a6   : > { %1485 = vst [vmem:[%s1469_s15 + $0x8] sm:$0xff] (%p2412_p12), %v1484_v30 }
 0x1a7   : > { %1487 = vst [vmem:[%s1469_s15 + $0x20] sm:$0xff] (%p2412_p12), %v1486_v31 }
 0x1a9   : > { %v1488_v32 = vld [vmem:[%s2637_s26 + $0x18] sm:$0xff] }
 0x1aa   : > { %1489 = vst [vmem:[%s1469_s15 + $0x28] sm:$0xff] %v1488_v32 }
 0x1ab PF: > { %s12_s19 = sadd.s32 1, %s2300_s19   ;;  %s2938_s9 = smov %s2264_s10 }
 0x1ac   : > { %p9_p5 = scmp.ge.s32.totalorder %s12_s19, 14   ;;  %s2939_s10 = smov %s2410_s5 }
 0x1ad   : > { %s2940_s11 = smov %s2272_s12  ;;  %s2941_s12 = smov %s2407_s4 }
 0x1ae   : > { %s2942_s13 = smov %s2280_s14  ;;  %s2943_s14 = smov %s2393_s27 }
 0x1af   : > { %s2944_s15 = smov %s2292_s17  ;;  %s2945_s16 = smov %s2296_s18 }
 0x1b0   : > { %s2946_s17 = smov %s2949_s21  ;;  %s2947_s18 = smov %s2953_s22 }
 0x1b1   :  { %11 = sbr.rel (!%p9_p5) target bundleno = 6 (0x6), region = 163 }

// kernel: forward.43
= control target key start
LH: loop header
LB: loop body
LE: loop exit
PB: predicated region body
PF: predicated region fallthrough
CT: control target
= control target key end

     0   :  { %s1705_s12 = smov 0   ;;  %s1707_s13 = smov 0   ;;  %s2238_s0 = inlined_call_operand.vmem [shape: f32[8,1,512], index: 0, kind: input, shape index: {}]   ;;  %s2239_s1 = inlined_call_operand.vmem [shape: bf16[512,1024], index: 1, kind: input, shape index: {}]   ;;  %s2240_s2 = inlined_call_operand.vmem [shape: f32[1,1024], index: 2, kind: input, shape index: {}]   ;;  %s2241_s3 = inlined_call_operand.vmem [shape: f32[8,1024], index: 3, kind: output, shape index: {}]  }
   0x1   :  { %s1709_s14 = smov 0  }
   0x2 LB: > { %s1302_s15 = sadd.s32 4294967295, %s1683_s14   ;;  %s1722_s16 = sadd.s32 1, %s1683_s14   ;;  %s1683_s14 = sphi %s1709_s14, %s2244_s14   ;;  %s1679_s13 = sphi %s1707_s13, %s2243_s13   ;;  %s1675_s12 = sphi %s1705_s12, %s2242_s12  }
   0x3   : > { %s38_s17 = ssub.s32 %s1683_s14, %s1722_s16  ;;  %s41_s18 = sadd.s32 1, %s1679_s13 }
   0x4   : > { %p39_p0 = scmp.eq.s32.totalorder %s38_s17, 0  ;;  %p48_p1 = scmp.ne.s32.totalorder %s1679_s13, %s1675_s12 }
   0x5   : > { %p49_p2 = scmp.eq.s32.totalorder %s1683_s14, 0  ;;  %p1305_p4 = scmp.ge.s32.totalorder %s1683_s14, 4 }
   0x6   : > { %s1731_s19 = scalar_select %p39_p0, %s1679_s13, %s41_s18  }
   0x7   : > { %p50_p3 = por %p49_p2, %p48_p1  ;;  %129 = sbr.rel (%p1305_p4) target bundleno = 80 (0x50), region = 20 }
   0xc   : > { %132 = sbr.rel (!%p50_p3) target bundleno = 80 (0x50), region = 24  ;;  %s134_s20 = sand.u32 (%p50_p3), 1, %s1679_s13  }
   0xd   : > { %s1572_s21 = sshll.u32 (%p50_p3), %s1683_s14, 3  ;;  %s1306_s22 = sshll.u32 (%p50_p3), %s134_s20, 9 }
   0xe   : > { %s1739_s25 = scalar_lea.vmem (%p50_p3), %s2239_s1, %s1572_s21  ;;  %s1744_s26 = scalar_lea.vmem (%p50_p3), [#allocation2], %s1306_s22 }
   0xf   : > { %v294_v0 = vld [vmem:[%s1739_s25] sm:$0xff] (%p50_p3) }
  0x10   : > { %v296_v1 = vld [vmem:[%s1739_s25 + $0x20] sm:$0xff] (%p50_p3)  ;;  %295 = vst [vmem:[%s1744_s26] sm:$0xff] (%p50_p3), %v294_v0 }
  0x11   : > { %v298_v2 = vld [vmem:[%s1739_s25 + $0x40] sm:$0xff]  ;;  %297 = vst [vmem:[%s1744_s26 + $0x8] sm:$0xff] %v296_v1 }
  0x12   : > { %v300_v3 = vld [vmem:[%s1739_s25 + $0x60] sm:$0xff]  ;;  %299 = vst [vmem:[%s1744_s26 + $0x10] sm:$0xff] %v298_v2 }
  0x13   : > { %v302_v4 = vld [vmem:[%s1739_s25 + $0x80] sm:$0xff]  ;;  %301 = vst [vmem:[%s1744_s26 + $0x18] sm:$0xff] %v300_v3 }
  0x14   : > { %v304_v5 = vld [vmem:[%s1739_s25 + $0xa0] sm:$0xff]  ;;  %303 = vst [vmem:[%s1744_s26 + $0x20] sm:$0xff] %v302_v4 }
  0x15   : > { %v306_v6 = vld [vmem:[%s1739_s25 + $0xc0] sm:$0xff]  ;;  %305 = vst [vmem:[%s1744_s26 + $0x28] sm:$0xff] %v304_v5 }
  0x16   : > { %v308_v7 = vld [vmem:[%s1739_s25 + $0xe0] sm:$0xff]  ;;  %307 = vst [vmem:[%s1744_s26 + $0x30] sm:$0xff] %v306_v6 }
  0x17   : > { %v310_v8 = vld [vmem:[%s1739_s25 + $0x100] sm:$0xff]  ;;  %309 = vst [vmem:[%s1744_s26 + $0x38] sm:$0xff] %v308_v7 }
  0x18   : > { %v312_v9 = vld [vmem:[%s1739_s25 + $0x120] sm:$0xff]  ;;  %311 = vst [vmem:[%s1744_s26 + $0x40] sm:$0xff] %v310_v8 }
  0x19   : > { %v314_v10 = vld [vmem:[%s1739_s25 + $0x140] sm:$0xff]  ;;  %313 = vst [vmem:[%s1744_s26 + $0x48] sm:$0xff] %v312_v9 }
  0x1a   : > { %v316_v11 = vld [vmem:[%s1739_s25 + $0x160] sm:$0xff]  ;;  %315 = vst [vmem:[%s1744_s26 + $0x50] sm:$0xff] %v314_v10 }
  0x1b   : > { %v318_v12 = vld [vmem:[%s1739_s25 + $0x180] sm:$0xff]  ;;  %317 = vst [vmem:[%s1744_s26 + $0x58] sm:$0xff] %v316_v11 }
  0x1c   : > { %v320_v13 = vld [vmem:[%s1739_s25 + $0x1a0] sm:$0xff]  ;;  %319 = vst [vmem:[%s1744_s26 + $0x60] sm:$0xff] %v318_v12 }
  0x1d   : > { %v322_v14 = vld [vmem:[%s1739_s25 + $0x1c0] sm:$0xff]  ;;  %321 = vst [vmem:[%s1744_s26 + $0x68] sm:$0xff] %v320_v13 }
  0x1e   : > { %v324_v15 = vld [vmem:[%s1739_s25 + $0x1e0] sm:$0xff]  ;;  %323 = vst [vmem:[%s1744_s26 + $0x70] sm:$0xff] %v322_v14 }
  0x1f   : > { %v326_v16 = vld [vmem:[%s1739_s25 + $0x200] sm:$0xff]  ;;  %325 = vst [vmem:[%s1744_s26 + $0x78] sm:$0xff] %v324_v15 }
  0x20   : > { %v328_v17 = vld [vmem:[%s1739_s25 + $0x220] sm:$0xff]  ;;  %327 = vst [vmem:[%s1744_s26 + $0x80] sm:$0xff] %v326_v16 }
  0x21   : > { %v330_v18 = vld [vmem:[%s1739_s25 + $0x240] sm:$0xff]  ;;  %329 = vst [vmem:[%s1744_s26 + $0x88] sm:$0xff] %v328_v17 }
  0x22   : > { %v332_v19 = vld [vmem:[%s1739_s25 + $0x260] sm:$0xff]  ;;  %331 = vst [vmem:[%s1744_s26 + $0x90] sm:$0xff] %v330_v18 }
  0x23   : > { %v334_v20 = vld [vmem:[%s1739_s25 + $0x280] sm:$0xff]  ;;  %333 = vst [vmem:[%s1744_s26 + $0x98] sm:$0xff] %v332_v19 }
  0x24   : > { %v336_v21 = vld [vmem:[%s1739_s25 + $0x2a0] sm:$0xff]  ;;  %335 = vst [vmem:[%s1744_s26 + $0xa0] sm:$0xff] %v334_v20 }
  0x25   : > { %v338_v22 = vld [vmem:[%s1739_s25 + $0x2c0] sm:$0xff]  ;;  %337 = vst [vmem:[%s1744_s26 + $0xa8] sm:$0xff] %v336_v21 }
  0x26   : > { %v340_v23 = vld [vmem:[%s1739_s25 + $0x2e0] sm:$0xff]  ;;  %339 = vst [vmem:[%s1744_s26 + $0xb0] sm:$0xff] %v338_v22 }
  0x27   : > { %v342_v24 = vld [vmem:[%s1739_s25 + $0x300] sm:$0xff]  ;;  %341 = vst [vmem:[%s1744_s26 + $0xb8] sm:$0xff] %v340_v23 }
  0x28   : > { %v344_v25 = vld [vmem:[%s1739_s25 + $0x320] sm:$0xff]  ;;  %343 = vst [vmem:[%s1744_s26 + $0xc0] sm:$0xff] %v342_v24 }
  0x29   : > { %v346_v26 = vld [vmem:[%s1739_s25 + $0x340] sm:$0xff]  ;;  %345 = vst [vmem:[%s1744_s26 + $0xc8] sm:$0xff] %v344_v25 }
  0x2a   : > { %v348_v27 = vld [vmem:[%s1739_s25 + $0x360] sm:$0xff]  ;;  %347 = vst [vmem:[%s1744_s26 + $0xd0] sm:$0xff] %v346_v26 }
  0x2b   : > { %v350_v28 = vld [vmem:[%s1739_s25 + $0x380] sm:$0xff]  ;;  %349 = vst [vmem:[%s1744_s26 + $0xd8] sm:$0xff] %v348_v27 }
  0x2c   : > { %v352_v29 = vld [vmem:[%s1739_s25 + $0x3a0] sm:$0xff]  ;;  %351 = vst [vmem:[%s1744_s26 + $0xe0] sm:$0xff] %v350_v28 }
  0x2d   : > { %v354_v30 = vld [vmem:[%s1739_s25 + $0x3c0] sm:$0xff]  ;;  %353 = vst [vmem:[%s1744_s26 + $0xe8] sm:$0xff] %v352_v29 }
  0x2e   : > { %v356_v31 = vld [vmem:[%s1739_s25 + $0x3e0] sm:$0xff]  ;;  %355 = vst [vmem:[%s1744_s26 + $0xf0] sm:$0xff] %v354_v30 }
  0x2f   : > { %v358_v32 = vld [vmem:[%s1739_s25 + $0x400] sm:$0xff]  ;;  %357 = vst [vmem:[%s1744_s26 + $0xf8] sm:$0xff] %v356_v31 }
  0x30   : > { %v360_v33 = vld [vmem:[%s1739_s25 + $0x420] sm:$0xff]  ;;  %359 = vst [vmem:[%s1744_s26 + $0x100] sm:$0xff] %v358_v32 }
  0x31   : > { %v362_v34 = vld [vmem:[%s1739_s25 + $0x440] sm:$0xff]  ;;  %361 = vst [vmem:[%s1744_s26 + $0x108] sm:$0xff] %v360_v33 }
  0x32   : > { %v364_v35 = vld [vmem:[%s1739_s25 + $0x460] sm:$0xff]  ;;  %363 = vst [vmem:[%s1744_s26 + $0x110] sm:$0xff] %v362_v34 }
  0x33   : > { %v366_v36 = vld [vmem:[%s1739_s25 + $0x480] sm:$0xff]  ;;  %365 = vst [vmem:[%s1744_s26 + $0x118] sm:$0xff] %v364_v35 }
  0x34   : > { %v368_v37 = vld [vmem:[%s1739_s25 + $0x4a0] sm:$0xff]  ;;  %367 = vst [vmem:[%s1744_s26 + $0x120] sm:$0xff] %v366_v36 }
  0x35   : > { %v370_v38 = vld [vmem:[%s1739_s25 + $0x4c0] sm:$0xff]  ;;  %369 = vst [vmem:[%s1744_s26 + $0x128] sm:$0xff] %v368_v37 }
  0x36   : > { %v372_v39 = vld [vmem:[%s1739_s25 + $0x4e0] sm:$0xff]  ;;  %371 = vst [vmem:[%s1744_s26 + $0x130] sm:$0xff] %v370_v38 }
  0x37   : > { %v374_v40 = vld [vmem:[%s1739_s25 + $0x500] sm:$0xff]  ;;  %373 = vst [vmem:[%s1744_s26 + $0x138] sm:$0xff] %v372_v39 }
  0x38   : > { %v376_v41 = vld [vmem:[%s1739_s25 + $0x520] sm:$0xff]  ;;  %375 = vst [vmem:[%s1744_s26 + $0x140] sm:$0xff] %v374_v40 }
  0x39   : > { %v378_v42 = vld [vmem:[%s1739_s25 + $0x540] sm:$0xff]  ;;  %377 = vst [vmem:[%s1744_s26 + $0x148] sm:$0xff] %v376_v41 }
  0x3a   : > { %v380_v43 = vld [vmem:[%s1739_s25 + $0x560] sm:$0xff]  ;;  %379 = vst [vmem:[%s1744_s26 + $0x150] sm:$0xff] %v378_v42 }
  0x3b   : > { %v382_v44 = vld [vmem:[%s1739_s25 + $0x580] sm:$0xff]  ;;  %381 = vst [vmem:[%s1744_s26 + $0x158] sm:$0xff] %v380_v43 }
  0x3c   : > { %v384_v45 = vld [vmem:[%s1739_s25 + $0x5a0] sm:$0xff]  ;;  %383 = vst [vmem:[%s1744_s26 + $0x160] sm:$0xff] %v382_v44 }
  0x3d   : > { %v386_v46 = vld [vmem:[%s1739_s25 + $0x5c0] sm:$0xff]  ;;  %385 = vst [vmem:[%s1744_s26 + $0x168] sm:$0xff] %v384_v45 }
  0x3e   : > { %v388_v47 = vld [vmem:[%s1739_s25 + $0x5e0] sm:$0xff]  ;;  %387 = vst [vmem:[%s1744_s26 + $0x170] sm:$0xff] %v386_v46 }
  0x3f   : > { %v390_v48 = vld [vmem:[%s1739_s25 + $0x600] sm:$0xff]  ;;  %389 = vst [vmem:[%s1744_s26 + $0x178] sm:$0xff] %v388_v47 }
  0x40   : > { %v392_v49 = vld [vmem:[%s1739_s25 + $0x620] sm:$0xff]  ;;  %391 = vst [vmem:[%s1744_s26 + $0x180] sm:$0xff] %v390_v48 }
  0x41   : > { %v394_v50 = vld [vmem:[%s1739_s25 + $0x640] sm:$0xff]  ;;  %393 = vst [vmem:[%s1744_s26 + $0x188] sm:$0xff] %v392_v49 }
  0x42   : > { %v396_v51 = vld [vmem:[%s1739_s25 + $0x660] sm:$0xff]  ;;  %395 = vst [vmem:[%s1744_s26 + $0x190] sm:$0xff] %v394_v50 }
  0x43   : > { %v398_v52 = vld [vmem:[%s1739_s25 + $0x680] sm:$0xff]  ;;  %397 = vst [vmem:[%s1744_s26 + $0x198] sm:$0xff] %v396_v51 }
  0x44   : > { %v400_v53 = vld [vmem:[%s1739_s25 + $0x6a0] sm:$0xff]  ;;  %399 = vst [vmem:[%s1744_s26 + $0x1a0] sm:$0xff] %v398_v52 }
  0x45   : > { %v402_v54 = vld [vmem:[%s1739_s25 + $0x6c0] sm:$0xff]  ;;  %401 = vst [vmem:[%s1744_s26 + $0x1a8] sm:$0xff] %v400_v53 }
  0x46   : > { %v404_v55 = vld [vmem:[%s1739_s25 + $0x6e0] sm:$0xff]  ;;  %403 = vst [vmem:[%s1744_s26 + $0x1b0] sm:$0xff] %v402_v54 }
  0x47   : > { %v406_v56 = vld [vmem:[%s1739_s25 + $0x700] sm:$0xff]  ;;  %405 = vst [vmem:[%s1744_s26 + $0x1b8] sm:$0xff] %v404_v55 }
  0x48   : > { %v408_v57 = vld [vmem:[%s1739_s25 + $0x720] sm:$0xff]  ;;  %407 = vst [vmem:[%s1744_s26 + $0x1c0] sm:$0xff] %v406_v56 }
  0x49   : > { %v410_v58 = vld [vmem:[%s1739_s25 + $0x740] sm:$0xff]  ;;  %409 = vst [vmem:[%s1744_s26 + $0x1c8] sm:$0xff] %v408_v57 }
  0x4a   : > { %v412_v59 = vld [vmem:[%s1739_s25 + $0x760] sm:$0xff]  ;;  %411 = vst [vmem:[%s1744_s26 + $0x1d0] sm:$0xff] %v410_v58 }
  0x4b   : > { %v414_v60 = vld [vmem:[%s1739_s25 + $0x780] sm:$0xff]  ;;  %413 = vst [vmem:[%s1744_s26 + $0x1d8] sm:$0xff] %v412_v59 }
  0x4c   : > { %v416_v61 = vld [vmem:[%s1739_s25 + $0x7a0] sm:$0xff]  ;;  %415 = vst [vmem:[%s1744_s26 + $0x1e0] sm:$0xff] %v414_v60 }
  0x4d   : > { %v418_v62 = vld [vmem:[%s1739_s25 + $0x7c0] sm:$0xff]  ;;  %417 = vst [vmem:[%s1744_s26 + $0x1e8] sm:$0xff] %v416_v61 }
  0x4e   : > { %v420_v63 = vld [vmem:[%s1739_s25 + $0x7e0] sm:$0xff]  ;;  %419 = vst [vmem:[%s1744_s26 + $0x1f0] sm:$0xff] %v418_v62 }
  0x4f   : > { %421 = vst [vmem:[%s1744_s26 + $0x1f8] sm:$0xff] %v420_v63 }
  0x50 PF: > { %p1309_p5 = scmp.ge.s32.totalorder %s1683_s14, 1  ;;  %p434_p6 = scmp.lt.s32.totalorder %s1683_s14, 5 }
  0x52   : > { %p435_p7 = pnand %p1309_p5, %p434_p6 }
  0x53   : > { %s441_s27 = sand.u32 (!%p435_p7), 1, %s1675_s12   ;;  %s1311_s24 = sshll.u32 (!%p435_p7), %s1302_s15, 1 }
  0x54   : > { %438 = sbr.rel (%p435_p7) target bundleno = 317 (0x13d), region = 66  ;;  %s1310_s28 = sshll.u32 (!%p435_p7), %s441_s27, 9 }
  0x55   : > { %s1874_s29 = scalar_lea.vmem (!%p435_p7), [#allocation2], %s1310_s28  ;;  %p470_p8 = scmp.lt.s32.totalorder (!%p435_p7), %s1311_s24, 7 }
  0x59   : > { %v1372_v0 = vld [vmem:[%s1874_s29 + $0x70] sm:$0xf]  ;;  %v1588_v1 = vld [vmem:[%s1874_s29 + $0x74] sm:$0xf0]  ;;  %v1364_v11 = vld [vmem:[%s1874_s29 + $0x60] sm:$0xf] }
  0x5a   : > { %v1436_v2 = vld [vmem:[%s1874_s29 + $0xf0] sm:$0xf]  ;;  %v1373_v3 = vor.u32 %v1588_v1, %v1372_v0  ;;  %v1604_v4 = vld [vmem:[%s1874_s29 + $0xf4] sm:$0xf0]  ;;  %v1586_v13 = vld [vmem:[%s1874_s29 + $0x64] sm:$0xf0] }
  0x5b   : > { %v1500_v5 = vld [vmem:[%s1874_s29 + $0x170] sm:$0xf]  ;;  %v1620_v6 = vld [vmem:[%s1874_s29 + $0x174] sm:$0xf0]  ;;  %v1437_v7 = vor.u32 %v1604_v4, %v1436_v2  ;;  %v1428_v14 = vld [vmem:[%s1874_s29 + $0xe0] sm:$0xf]  ;;  %v1365_v16 = vor.u32 %v1586_v13, %v1364_v11 }
  0x5c   : > { %v1501_v8 = vor.u32 %v1620_v6, %v1500_v5  ;;  %v1564_v9 = vld [vmem:[%s1874_s29 + $0x1f0] sm:$0xf]  ;;  %v1636_v10 = vld [vmem:[%s1874_s29 + $0x1f4] sm:$0xf0]  ;;  %1125 = vmatpush.bf16.msra.mxu0 %v1373_v3  ;;  %v1602_v15 = vld [vmem:[%s1874_s29 + $0xe4] sm:$0xf0] }
  0x5d   : > { %v1565_v12 = vor.u32 %v1636_v10, %v1564_v9  ;;  %1138 = vmatpush.bf16.msra.mxu1 %v1437_v7  ;;  %v1429_v17 = vor.u32 %v1602_v15, %v1428_v14  ;;  %v1492_v18 = vld [vmem:[%s1874_s29 + $0x160] sm:$0xf]  ;;  %v1618_v19 = vld [vmem:[%s1874_s29 + $0x164] sm:$0xf0]  ;;  %v1356_v23 = vld [vmem:[%s1874_s29 + $0x50] sm:$0xf] }
  0x5e   : > { %1151 = vmatpush.bf16.msra.mxu2 %v1501_v8  ;;  %v1556_v20 = vld [vmem:[%s1874_s29 + $0x1e0] sm:$0xf]  ;;  %v1493_v21 = vor.u32 %v1618_v19, %v1492_v18  ;;  %v1634_v22 = vld [vmem:[%s1874_s29 + $0x1e4] sm:$0xf0]  ;;  %v1584_v24 = vld [vmem:[%s1874_s29 + $0x54] sm:$0xf0] }
  0x5f   : > { %1164 = vmatpush.bf16.msra.mxu3 %v1565_v12  ;;  %v1557_v25 = vor.u32 %v1634_v22, %v1556_v20  ;;  %v1420_v26 = vld [vmem:[%s1874_s29 + $0xd0] sm:$0xf]  ;;  %v1600_v27 = vld [vmem:[%s1874_s29 + $0xd4] sm:$0xf0]  ;;  %v1357_v29 = vor.u32 %v1584_v24, %v1356_v23  ;;  %v1348_v35 = vld [vmem:[%s1874_s29 + $0x40] sm:$0xf] }
  0x60   : > { %v1484_v28 = vld [vmem:[%s1874_s29 + $0x150] sm:$0xf]  ;;  %1126 = vmatpush.bf16.msra.mxu0 %v1365_v16  ;;  %v1616_v30 = vld [vmem:[%s1874_s29 + $0x154] sm:$0xf0]  ;;  %v1421_v33 = vor.u32 %v1600_v27, %v1420_v26  ;;  %v1582_v36 = vld [vmem:[%s1874_s29 + $0x44] sm:$0xf0] }
  0x61   : > { %v1548_v31 = vld [vmem:[%s1874_s29 + $0x1d0] sm:$0xf]  ;;  %v1632_v32 = vld [vmem:[%s1874_s29 + $0x1d4] sm:$0xf0]  ;;  %1139 = vmatpush.bf16.msra.mxu1 %v1429_v17  ;;  %v1485_v34 = vor.u32 %v1616_v30, %v1484_v28  ;;  %v1412_v37 = vld [vmem:[%s1874_s29 + $0xc0] sm:$0xf]  ;;  %v1349_v44 = vor.u32 %v1582_v36, %v1348_v35 }
  0x62   : > { %1152 = vmatpush.bf16.msra.mxu2 %v1493_v21  ;;  %v1549_v38 = vor.u32 %v1632_v32, %v1548_v31  ;;  %v1598_v39 = vld [vmem:[%s1874_s29 + $0xc4] sm:$0xf0]  ;;  %v1476_v40 = vld [vmem:[%s1874_s29 + $0x140] sm:$0xf]  ;;  %v1916_v46 = vld [vmem:[%s2238_s0 + $0x4] sm:$0xf] }
  0x63   : > { %1165 = vmatpush.bf16.msra.mxu3 %v1557_v25  ;;  %v1614_v41 = vld [vmem:[%s1874_s29 + $0x144] sm:$0xf0]  ;;  %v1540_v42 = vld [vmem:[%s1874_s29 + $0x1c0] sm:$0xf]  ;;  %v1413_v47 = vor.u32 %v1598_v39, %v1412_v37  ;;  %v1340_v49 = vld [vmem:[%s1874_s29 + $0x30] sm:$0xf] }
  0x64   : > { %v1630_v43 = vld [vmem:[%s1874_s29 + $0x1c4] sm:$0xf0]  ;;  %1127 = vmatpush.bf16.msra.mxu0 %v1357_v29  ;;  %v1911_v45 = vld [vmem:[%s2238_s0] sm:$0xf]  ;;  %v1477_v48 = vor.u32 %v1614_v41, %v1476_v40  ;;  %v1580_v50 = vld [vmem:[%s1874_s29 + $0x34] sm:$0xf0] }
  0x65   : > { %1140 = vmatpush.bf16.msra.mxu1 %v1421_v33  ;;  %v1404_v51 = vld [vmem:[%s1874_s29 + $0xb0] sm:$0xf]  ;;  %v1541_v52 = vor.u32 %v1630_v43, %v1540_v42  ;;  %v1596_v53 = vld [vmem:[%s1874_s29 + $0xb4] sm:$0xf0]  ;;  %v506_v58 = vperm.slane %v1911_v45, 2  ;;  %v1341_v59 = vor.u32 %v1580_v50, %v1340_v49  ;;  %v510_v62 = vperm.slane %v1916_v46, 2 }
  0x66   : > { %1153 = vmatpush.bf16.msra.mxu2 %v1485_v34  ;;  %v1468_v54 = vld [vmem:[%s1874_s29 + $0x130] sm:$0xf]  ;;  %v1612_v55 = vld [vmem:[%s1874_s29 + $0x134] sm:$0xf0]  ;;  %v1332_v60 = vld [vmem:[%s1874_s29 + $0x20] sm:$0xf]  ;;  %v1405_v63 = vor.u32 %v1596_v53, %v1404_v51 }
  0x67   : > { %1166 = vmatpush.bf16.msra.mxu3 %v1549_v38  ;;  %v1532_v56 = vld [vmem:[%s1874_s29 + $0x1b0] sm:$0xf]  ;;  %v1628_v57 = vld [vmem:[%s1874_s29 + $0x1b4] sm:$0xf0]  ;;  %v1578_v61 = vld [vmem:[%s1874_s29 + $0x24] sm:$0xf0]  ;;  %v1469_v0 = vor.u32 %v1612_v55, %v1468_v54  ;;  %v1960_v16 = vpack.c.bf16 %v506_v58, %v506_v58  ;;  %v1983_v27 = vpack.c.bf16 %v510_v62, %v510_v62 }
  0x68   : > { %1128 = vmatpush.bf16.msra.mxu0 %v1349_v44  ;;  %v1396_v1 = vld [vmem:[%s1874_s29 + $0xa0] sm:$0xf]  ;;  %v1594_v2 = vld [vmem:[%s1874_s29 + $0xa4] sm:$0xf0]  ;;  %v1533_v4 = vor.u32 %v1628_v57, %v1532_v56  ;;  %v1937_v8 = vld [vmem:[%s1874_s29 + $0x10] sm:$0xf]  ;;  %v1333_v17 = vor.u32 %v1578_v61, %v1332_v60 }
  0x69   : > { %1141 = vmatpush.bf16.msra.mxu1 %v1413_v47  ;;  %v1460_v3 = vld [vmem:[%s1874_s29 + $0x120] sm:$0xf]  ;;  %v1610_v5 = vld [vmem:[%s1874_s29 + $0x124] sm:$0xf0]  ;;  %v1940_v9 = vld [vmem:[%s1874_s29 + $0x14] sm:$0xf0]  ;;  %v1397_v22 = vor.u32 %v1594_v2, %v1396_v1  ;;  %v704_v38 = vunpack.c.l.b16 %v1960_v16  ;;  %v708_v55 = vunpack.c.l.b16 %v1983_v27 }
  0x6a   : > { %1154 = vmatpush.bf16.msra.mxu2 %v1477_v48  ;;  %v1524_v6 = vld [vmem:[%s1874_s29 + $0x1a0] sm:$0xf]  ;;  %v1626_v7 = vld [vmem:[%s1874_s29 + $0x1a4] sm:$0xf0]  ;;  %v1943_v10 = vld [vmem:[%s1874_s29 + $0x90] sm:$0xf]  ;;  %v1461_v23 = vor.u32 %v1610_v5, %v1460_v3  ;;  %v1325_v39 = vor.u32 %v1940_v9, %v1937_v8 }
  0x6b   : > { %1167 = vmatpush.bf16.msra.mxu3 %v1541_v52  ;;  %v1946_v11 = vld [vmem:[%s1874_s29 + $0x94] sm:$0xf0]  ;;  %v1949_v12 = vld [vmem:[%s1874_s29 + $0x110] sm:$0xf]  ;;  %v1963_v18 = vld [vmem:[%s1874_s29] sm:$0xf]  ;;  %v1525_v28 = vor.u32 %v1626_v7, %v1524_v6 }
  0x6c   : > { %v1952_v13 = vld [vmem:[%s1874_s29 + $0x114] sm:$0xf0]  ;;  %v1955_v14 = vld [vmem:[%s1874_s29 + $0x190] sm:$0xf]  ;;  %1129 = vmatpush.bf16.msra.mxu0 %v1341_v59  ;;  %v1966_v19 = vld [vmem:[%s1874_s29 + $0x4] sm:$0xf0]  ;;  %v1389_v40 = vor.u32 %v1946_v11, %v1943_v10 }
  0x6d   : > { %v1958_v15 = vld [vmem:[%s1874_s29 + $0x194] sm:$0xf0]  ;;  %v1969_v20 = vld [vmem:[%s1874_s29 + $0x80] sm:$0xf]  ;;  %v1972_v21 = vld [vmem:[%s1874_s29 + $0x84] sm:$0xf0]  ;;  %1142 = vmatpush.bf16.msra.mxu1 %v1405_v63  ;;  %v1453_v41 = vor.u32 %v1952_v13, %v1949_v12  ;;  %v1317_v49 = vor.u32 %v1966_v19, %v1963_v18 }
  0x6e   : > { %1155 = vmatpush.bf16.msra.mxu2 %v1469_v0  ;;  %v1975_v24 = vld [vmem:[%s1874_s29 + $0x100] sm:$0xf]  ;;  %v1978_v25 = vld [vmem:[%s1874_s29 + $0x104] sm:$0xf0]  ;;  %v1989_v30 = vld [vmem:[%s1874_s29 + $0x74] sm:$0xf]  ;;  %v1517_v42 = vor.u32 %v1958_v15, %v1955_v14  ;;  %v1381_v50 = vor.u32 %v1972_v21, %v1969_v20 }
  0x6f   : > { %v1981_v26 = vld [vmem:[%s1874_s29 + $0x180] sm:$0xf]  ;;  %1168 = vmatpush.bf16.msra.mxu3 %v1533_v4  ;;  %v1986_v29 = vld [vmem:[%s1874_s29 + $0x184] sm:$0xf0]  ;;  %v1992_v31 = vld [vmem:[%s1874_s29 + $0x78] sm:$0xf0]  ;;  %v1445_v51 = vor.u32 %v1978_v25, %v1975_v24 }
  0x70   : > { %v1995_v32 = vld [vmem:[%s1874_s29 + $0xf4] sm:$0xf]  ;;  %v1998_v33 = vld [vmem:[%s1874_s29 + $0xf8] sm:$0xf0]  ;;  %v2006_v35 = vld [vmem:[%s2238_s0 + $0x8] sm:$0xf]  ;;  %1130 = vmatpush.bf16.msra.mxu0 %v1333_v17  ;;  %v1509_v56 = vor.u32 %v1986_v29, %v1981_v26  ;;  %v1377_v57 = vor.u32 %v1989_v30, %v1992_v31 }
  0x71   : > { %v2001_v34 = vld [vmem:[%s1874_s29 + $0x174] sm:$0xf]  ;;  %v2011_v36 = vld [vmem:[%s2238_s0 + $0xc] sm:$0xf]  ;;  %v2016_v37 = vld [vmem:[%s2238_s0 + $0x10] sm:$0xf]  ;;  %1143 = vmatpush.bf16.msra.mxu1 %v1397_v22  ;;  %v1441_v58 = vor.u32 %v1995_v32, %v1998_v33 }
  0x72   : > { %v2028_v43 = vld [vmem:[%s1874_s29 + $0x178] sm:$0xf0]  ;;  %v2031_v44 = vld [vmem:[%s1874_s29 + $0x1f4] sm:$0xf]  ;;  %1156 = vmatpush.bf16.msra.mxu2 %v1461_v23  ;;  %v2048_v52 = vld [vmem:[%s1874_s29 + $0x64] sm:$0xf] }
  0x73   : > { %v2034_v47 = vld [vmem:[%s1874_s29 + $0x1f8] sm:$0xf0]  ;;  %v2039_v48 = vld [vmem:[%s2238_s0 + $0x14] sm:$0xf]  ;;  %v2051_v53 = vld [vmem:[%s1874_s29 + $0x68] sm:$0xf0]  ;;  %1169 = vmatpush.bf16.msra.mxu3 %v1525_v28  ;;  %v1505_v59 = vor.u32 %v2001_v34, %v2028_v43 }
  0x74   : > { %v2054_v54 = vld [vmem:[%s1874_s29 + $0xe4] sm:$0xf]  ;;  %v2066_v60 = vld [vmem:[%s1874_s29 + $0xe8] sm:$0xf0]  ;;  %v1569_v63 = vor.u32 %v2031_v44, %v2034_v47  ;;  %v1369_v0 = vor.u32 %v2048_v52, %v2051_v53  ;;  %v2091_v5 = vld [vmem:[%s2238_s0 + $0x18] sm:$0xf]  ;;  %1131 = vmatpush.bf16.msra.mxu0 %v1325_v39 }
  0x75   : > { %v2069_v61 = vld [vmem:[%s1874_s29 + $0x164] sm:$0xf]  ;;  %v2072_v62 = vld [vmem:[%s1874_s29 + $0x168] sm:$0xf0]  ;;  %v1433_v1 = vor.u32 %v2054_v54, %v2066_v60  ;;  %v2098_v7 = vld [vmem:[%s2238_s0 + $0x1c] sm:$0xf]  ;;  %1144 = vmatpush.bf16.msra.mxu1 %v1389_v40 }
  0x76   : > { %v1497_v2 = vor.u32 %v2069_v61, %v2072_v62  ;;  %v2083_v3 = vld [vmem:[%s1874_s29 + $0x1e4] sm:$0xf]  ;;  %v2086_v4 = vld [vmem:[%s1874_s29 + $0x1e8] sm:$0xf0]  ;;  %v514_v8 = vperm.slane %v2006_v35, 2  ;;  %v518_v9 = vperm.slane %v2011_v36, 2  ;;  %1157 = vmatpush.bf16.msra.mxu2 %v1453_v41 }
  0x77   : > { %v1561_v6 = vor.u32 %v2083_v3, %v2086_v4  ;;  %v522_v10 = vperm.slane %v2016_v37, 2  ;;  %v526_v11 = vperm.slane %v2039_v48, 2  ;;  %v530_v12 = vperm.slane %v2091_v5, 2  ;;  %1170 = vmatpush.bf16.msra.mxu3 %v1517_v42  ;;  %v1358_v3 = vld [vmem:[%s1874_s29 + $0x58] sm:$0xf0]  ;;  %s2246_s24 = smov (!%p470_p8, %s1311_s24), 7 }
  0x78   : > { %v534_v13 = vperm.slane %v2098_v7, 2  ;;  %vm735_vm0 = vcmask 1041409   ;;  %v578_v14 = vpack.c.bf16 %v514_v8, %v514_v8  ;;  %v582_v15 = vpack.c.bf16 %v518_v9, %v518_v9  ;;  %1132 = vmatpush.bf16.msra.mxu0 %v1317_v49  ;;  %v1599_v4 = vld [vmem:[%s1874_s29 + $0xd4] sm:$0xf]  ;;  %s472_s27 = scalar_lea.vmem %s2240_s2, %s2246_s24  ;;  %s1313_s28 = sshll.u32 %s2246_s24, 3 }
  0x79   : > { %v586_v17 = vpack.c.bf16 %v522_v10, %v522_v10  ;;  %vm738_vm1 = vcmask 1042434   ;;  %v590_v18 = vpack.c.bf16 %v526_v11, %v526_v11  ;;  %v594_v19 = vpack.c.bf16 %v530_v12, %v530_v12  ;;  %1145 = vmatpush.bf16.msra.mxu1 %v1381_v50  ;;  %v1422_v11 = vld [vmem:[%s1874_s29 + $0xd8] sm:$0xf0]  ;;  %v1615_v12 = vld [vmem:[%s1874_s29 + $0x154] sm:$0xf] }
  0x7a   : > { %v598_v20 = vpack.c.bf16 %v534_v13, %v534_v13  ;;  %vm741_vm2 = vcmask 1043459   ;;  %v712_v21 = vunpack.c.l.b16 %v578_v14  ;;  %v716_v22 = vunpack.c.l.b16 %v582_v15  ;;  %1158 = vmatpush.bf16.msra.mxu2 %v1445_v51  ;;  %v1486_v13 = vld [vmem:[%s1874_s29 + $0x158] sm:$0xf0] }
  0x7b   : > { %v720_v23 = vunpack.c.l.b16 %v586_v17  ;;  %vm744_vm3 = vcmask 1044484   ;;  %v724_v24 = vunpack.c.l.b16 %v590_v18  ;;  %v728_v25 = vunpack.c.l.b16 %v594_v19  ;;  %1171 = vmatpush.bf16.msra.mxu3 %v1509_v56  ;;  %v1631_v19 = vld [vmem:[%s1874_s29 + $0x1d4] sm:$0xf] }
  0x7c   : > { %v732_v26 = vunpack.c.l.b16 %v598_v20  ;;  %vm747_vm4 = vcmask 1045509   ;;  %1177 = vmatpush.bf16.msrb.mxu0 %v1377_v57  ;;  %vm750_vm5 = vcmask 1046534   ;;  %vm753_vm6 = vcmask 1047559   ;;  %v1550_v20 = vld [vmem:[%s1874_s29 + $0x1d8] sm:$0xf0] }
  0x7d   : > { %v769_v27 = vrot.slane %v708_v55, 7  ;;  %v771_v28 = vrot.slane %v712_v21, 6  ;;  %1190 = vmatpush.bf16.msrb.mxu1 %v1441_v58  ;;  %v773_v29 = vrot.slane %v716_v22, 5  ;;  %v775_v30 = vrot.slane %v720_v23, 4 }
  0x7e   : > { %1203 = vmatpush.bf16.msrb.mxu2 %v1505_v59  ;;  %v777_v31 = vrot.slane %v724_v24, 3  ;;  %v779_v32 = vrot.slane %v728_v25, 2  ;;  %v781_v34 = vrot.slane %v732_v26, 1  ;;  %v507_v39 = vperm.slane %v1911_v45, 3 }
  0x7f   : > { %1216 = vmatpush.bf16.msrb.mxu3 %v1569_v63  ;;  %v770_v33 = vsel %vm735_vm0, %v769_v27, %v704_v38  ;;  %v511_v40 = vperm.slane %v1916_v46, 3  ;;  %v515_v42 = vperm.slane %v2006_v35, 3  ;;  %v519_v43 = vperm.slane %v2011_v36, 3 }
  0x80   : > { %v772_v41 = vsel %vm738_vm1, %v771_v28, %v770_v33  ;;  %v523_v44 = vperm.slane %v2016_v37, 3  ;;  %1178 = vmatpush.bf16.msrb.mxu0 %v1369_v0  ;;  %v527_v16 = vperm.slane %v2039_v48, 3  ;;  %v531_v38 = vperm.slane %v2091_v5, 3 }
  0x81   : > { %v774_v47 = vsel %vm741_vm2, %v773_v29, %v772_v41  ;;  %v535_v49 = vperm.slane %v2098_v7, 3  ;;  %1191 = vmatpush.bf16.msrb.mxu1 %v1433_v1  ;;  %v571_v51 = vpack.c.bf16 %v507_v39, %v507_v39  ;;  %v575_v52 = vpack.c.bf16 %v511_v40, %v511_v40 }
  0x82   : > { %1204 = vmatpush.bf16.msrb.mxu2 %v1497_v2  ;;  %v776_v50 = vsel %vm744_vm3, %v775_v30, %v774_v47  ;;  %v504_v53 = vperm.slane %v1911_v45, 0  ;;  %v579_v55 = vpack.c.bf16 %v515_v42, %v515_v42  ;;  %v583_v56 = vpack.c.bf16 %v519_v43, %v519_v43  ;;  %v1583_v2 = vld [vmem:[%s1874_s29 + $0x54] sm:$0xf] }
  0x83   : > { %1217 = vmatpush.bf16.msrb.mxu3 %v1561_v6  ;;  %v778_v54 = vsel %vm747_vm4, %v777_v31, %v776_v50  ;;  %v587_v57 = vpack.c.bf16 %v523_v44, %v523_v44  ;;  %v591_v59 = vpack.c.bf16 %v527_v16, %v527_v16  ;;  %v595_v60 = vpack.c.bf16 %v531_v38, %v531_v38 }
  0x84   : > { %v780_v58 = vsel %vm750_vm5, %v779_v32, %v778_v54  ;;  %v599_v61 = vpack.c.bf16 %v535_v49, %v535_v49  ;;  %v705_v63 = vunpack.c.l.b16 %v571_v51  ;;  %v709_v0 = vunpack.c.l.b16 %v575_v52 }
  0x85   : > { %v782_v62 = vsel %vm753_vm6, %v781_v34, %v780_v58  ;;  %v713_v1 = vunpack.c.l.b16 %v579_v55  ;;  %v717_v8 = vunpack.c.l.b16 %v583_v56  ;;  %v721_v9 = vunpack.c.l.b16 %v587_v57 }
  0x86   : > { %v2127_v6 = vpack.c.b16 %v782_v62, %v782_v62  ;;  %v725_v10 = vunpack.c.l.b16 %v591_v59  ;;  %v729_v14 = vunpack.c.l.b16 %v595_v60  ;;  %v733_v15 = vunpack.c.l.b16 %v599_v61  ;;  %v1581_v59 = vld [vmem:[%s1874_s29 + $0x44] sm:$0xf] }
  0x87   : > { %v783_v17 = vrot.slane %v709_v0, 7  ;;  %v785_v18 = vrot.slane %v713_v1, 6  ;;  %v787_v21 = vrot.slane %v717_v8, 5  ;;  %v789_v22 = vrot.slane %v721_v9, 4  ;;  %v1597_v0 = vld [vmem:[%s1874_s29 + $0xc4] sm:$0xf] }
  0x88   : > { %1159 = vmatmul.bf16.vlgmr.msra.gmra.mxu2 %v2127_v6  ;;  %v791_v23 = vrot.slane %v725_v10, 3  ;;  %v1361_v24 = vor.u32 %v1583_v2, %v1358_v3  ;;  %v793_v26 = vrot.slane %v729_v14, 2  ;;  %v795_v27 = vrot.slane %v733_v15, 1  ;;  %v1414_v1 = vld [vmem:[%s1874_s29 + $0xc8] sm:$0xf0] }
  0x89   : > { %v784_v25 = vsel %vm735_vm0, %v783_v17, %v705_v63  ;;  %v1425_v28 = vor.u32 %v1599_v4, %v1422_v11  ;;  %v1489_v30 = vor.u32 %v1615_v12, %v1486_v13  ;;  %v1553_v31 = vor.u32 %v1631_v19, %v1550_v20  ;;  %v1613_v2 = vld [vmem:[%s1874_s29 + $0x144] sm:$0xf]  ;;  %v1478_v10 = vld [vmem:[%s1874_s29 + $0x148] sm:$0xf0] }
  0x8a   : > { %v786_v29 = vsel %vm738_vm1, %v785_v18, %v784_v25  ;;  %1179 = vmatpush.bf16.msrb.mxu0 %v1361_v24  ;;  %v508_v32 = vperm.slane %v1916_v46, 0  ;;  %v512_v34 = vperm.slane %v2006_v35, 0  ;;  %v516_v39 = vperm.slane %v2011_v36, 0  ;;  %v1629_v11 = vld [vmem:[%s1874_s29 + $0x1c4] sm:$0xf] }
  0x8b   : > { %v788_v33 = vsel %vm741_vm2, %v787_v21, %v786_v29  ;;  %1192 = vmatpush.bf16.msrb.mxu1 %v1425_v28  ;;  %v520_v40 = vperm.slane %v2016_v37, 0  ;;  %1205 = vmatpush.bf16.msrb.mxu2 %v1489_v30  ;;  %v524_v42 = vperm.slane %v2039_v48, 0  ;;  %v528_v43 = vperm.slane %v2091_v5, 0  ;;  %v1542_v12 = vld [vmem:[%s1874_s29 + $0x1c8] sm:$0xf0] }
  0x8c   : > { %v790_v41 = vsel %vm744_vm3, %v789_v22, %v788_v33  ;;  %1218 = vmatpush.bf16.msrb.mxu3 %v1553_v31  ;;  %v532_v44 = vperm.slane %v2098_v7, 0  ;;  %v568_v16 = vpack.c.bf16 %v504_v53, %v504_v53  ;;  %v572_v38 = vpack.c.bf16 %v508_v32, %v508_v32  ;;  %v1350_v53 = vld [vmem:[%s1874_s29 + $0x48] sm:$0xf0] }
  0x8d   : > { %v792_v47 = vsel %vm747_vm4, %v791_v23, %v790_v41  ;;  %v576_v49 = vpack.c.bf16 %v512_v34, %v512_v34  ;;  %v580_v51 = vpack.c.bf16 %v516_v39, %v516_v39  ;;  %v584_v52 = vpack.c.bf16 %v520_v40, %v520_v40 }
  0x8e   : > { %v794_v50 = vsel %vm750_vm5, %v793_v26, %v792_v47  ;;  %v588_v54 = vpack.c.bf16 %v524_v42, %v524_v42  ;;  %v592_v56 = vpack.c.bf16 %v528_v43, %v528_v43  ;;  %v596_v57 = vpack.c.bf16 %v532_v44, %v532_v44 }
  0x8f   : > { %v796_v55 = vsel %vm753_vm6, %v795_v27, %v794_v50  ;;  %v702_v58 = vunpack.c.l.b16 %v568_v16  ;;  %v706_v61 = vunpack.c.l.b16 %v572_v38  ;;  %v710_v62 = vunpack.c.l.b16 %v576_v49  ;;  %v1595_v49 = vld [vmem:[%s1874_s29 + $0xb4] sm:$0xf]  ;;  %v1406_v50 = vld [vmem:[%s1874_s29 + $0xb8] sm:$0xf0] }
  0x90   : > { %v2151_v60 = vpack.c.b16 %v796_v55, %v796_v55  ;;  %v714_v63 = vunpack.c.l.b16 %v580_v51  ;;  %v718_v3 = vunpack.c.l.b16 %v584_v52  ;;  %v722_v4 = vunpack.c.l.b16 %v588_v54  ;;  %v1611_v51 = vld [vmem:[%s1874_s29 + $0x134] sm:$0xf]  ;;  %v1470_v52 = vld [vmem:[%s1874_s29 + $0x138] sm:$0xf0] }
  0x91   : > { %v726_v8 = vunpack.c.l.b16 %v592_v56  ;;  %v730_v9 = vunpack.c.l.b16 %v596_v57  ;;  %v734_v13 = vrot.slane %v706_v61, 7  ;;  %v737_v14 = vrot.slane %v710_v62, 6 }
  0x92   : > { %1172 = vmatmul.bf16.vlgmr.msra.gmra.mxu3 %v2151_v60  ;;  %v740_v15 = vrot.slane %v714_v63, 5  ;;  %v1353_v17 = vor.u32 %v1581_v59, %v1350_v53  ;;  %v743_v18 = vrot.slane %v718_v3, 4  ;;  %v746_v19 = vrot.slane %v722_v4, 3  ;;  %v1534_v59 = vld [vmem:[%s1874_s29 + $0x1b8] sm:$0xf0] }
  0x93   : > { %v749_v20 = vrot.slane %v726_v8, 2  ;;  %v752_v21 = vrot.slane %v730_v9, 1  ;;  %v736_v22 = vsel %vm735_vm0, %v734_v13, %v702_v58  ;;  %v1417_v23 = vor.u32 %v1597_v0, %v1414_v1  ;;  %v1627_v58 = vld [vmem:[%s1874_s29 + $0x1b4] sm:$0xf]  ;;  %v1577_v53 = vld [vmem:[%s1874_s29 + $0x24] sm:$0xf] }
  0x94   : > { %1180 = vmatpush.bf16.msrb.mxu0 %v1353_v17  ;;  %v1481_v24 = vor.u32 %v1613_v2, %v1478_v10  ;;  %v1545_v25 = vor.u32 %v1629_v11, %v1542_v12  ;;  %v739_v26 = vsel %vm738_vm1, %v737_v14, %v736_v22  ;;  %v505_v27 = vperm.slane %v1911_v45, 1  ;;  %v1334_v1 = vld [vmem:[%s1874_s29 + $0x28] sm:$0xf0]  ;;  %v1593_v2 = vld [vmem:[%s1874_s29 + $0xa4] sm:$0xf] }
  0x95   : > { %v509_v28 = vperm.slane %v1916_v46, 1  ;;  %v513_v29 = vperm.slane %v2006_v35, 1  ;;  %v742_v30 = vsel %vm741_vm2, %v740_v15, %v739_v26  ;;  %1193 = vmatpush.bf16.msrb.mxu1 %v1417_v23  ;;  %v517_v31 = vperm.slane %v2011_v36, 1  ;;  %v1398_v10 = vld [vmem:[%s1874_s29 + $0xa8] sm:$0xf0] }
  0x96   : > { %1206 = vmatpush.bf16.msrb.mxu2 %v1481_v24  ;;  %v521_v32 = vperm.slane %v2016_v37, 1  ;;  %v525_v33 = vperm.slane %v2039_v48, 1  ;;  %v745_v34 = vsel %vm744_vm3, %v743_v18, %v742_v30  ;;  %1219 = vmatpush.bf16.msrb.mxu3 %v1545_v25  ;;  %v529_v45 = vperm.slane %v2091_v5, 1  ;;  %v1579_v5 = vld [vmem:[%s1874_s29 + $0x34] sm:$0xf] }
  0x97   : > { %v533_v46 = vperm.slane %v2098_v7, 1  ;;  %v569_v35 = vpack.c.bf16 %v505_v27, %v505_v27  ;;  %v748_v39 = vsel %vm747_vm4, %v746_v19, %v745_v34  ;;  %v573_v36 = vpack.c.bf16 %v509_v28, %v509_v28  ;;  %v1342_v7 = vld [vmem:[%s1874_s29 + $0x38] sm:$0xf0]  ;;  %v1609_v14 = vld [vmem:[%s1874_s29 + $0x124] sm:$0xf] }
  0x98   : > { %v577_v40 = vpack.c.bf16 %v513_v29, %v513_v29  ;;  %v581_v37 = vpack.c.bf16 %v517_v31, %v517_v31  ;;  %v751_v41 = vsel %vm750_vm5, %v749_v20, %v748_v39  ;;  %v585_v48 = vpack.c.bf16 %v521_v32, %v521_v32  ;;  %v1462_v15 = vld [vmem:[%s1874_s29 + $0x128] sm:$0xf0]  ;;  %v1575_v26 = vld [vmem:[%s1874_s29 + $0x14] sm:$0xf]  ;;  %v1326_v27 = vld [vmem:[%s1874_s29 + $0x18] sm:$0xf0] }
  0x99   : > { %v589_v42 = vpack.c.bf16 %v525_v33, %v525_v33  ;;  %v593_v43 = vpack.c.bf16 %v529_v45, %v529_v45  ;;  %v754_v44 = vsel %vm753_vm6, %v752_v21, %v751_v41  ;;  %v597_v47 = vpack.c.bf16 %v533_v46, %v533_v46  ;;  %v1625_v21 = vld [vmem:[%s1874_s29 + $0x1a4] sm:$0xf]  ;;  %v1526_v22 = vld [vmem:[%s1874_s29 + $0x1a8] sm:$0xf0]  ;;  %v1591_v31 = vld [vmem:[%s1874_s29 + $0x94] sm:$0xf] }
  0x9a   : > { %v703_v16 = vunpack.c.l.b16 %v569_v35  ;;  %v707_v38 = vunpack.c.l.b16 %v573_v36  ;;  %v2181_v54 = vpack.c.b16 %v754_v44, %v754_v44  ;;  %v711_v55 = vunpack.c.l.b16 %v577_v40  ;;  %v1390_v34 = vld [vmem:[%s1874_s29 + $0x98] sm:$0xf0]  ;;  %v1607_v45 = vld [vmem:[%s1874_s29 + $0x114] sm:$0xf]  ;;  %v1573_v41 = vld [vmem:[%s1874_s29 + $0x4] sm:$0xf] }
  0x9b   : > { %v715_v56 = vunpack.c.l.b16 %v581_v37  ;;  %v719_v57 = vunpack.c.l.b16 %v585_v48  ;;  %v723_v61 = vunpack.c.l.b16 %v589_v42  ;;  %v727_v62 = vunpack.c.l.b16 %v593_v43  ;;  %v1454_v46 = vld [vmem:[%s1874_s29 + $0x118] sm:$0xf0]  ;;  %v1623_v36 = vld [vmem:[%s1874_s29 + $0x194] sm:$0xf]  ;;  %v1318_v48 = vld [vmem:[%s1874_s29 + $0x8] sm:$0xf0] }
  0x9c   : > { %v731_v63 = vunpack.c.l.b16 %v597_v47  ;;  %v755_v0 = vrot.slane %v707_v38, 7  ;;  %1133 = vmatmul.bf16.vlgmr.msra.gmra.mxu0 %v2181_v54  ;;  %v757_v3 = vrot.slane %v711_v55, 6  ;;  %v1345_v9 = vor.u32 %v1579_v5, %v1342_v7  ;;  %v1518_v40 = vld [vmem:[%s1874_s29 + $0x198] sm:$0xf0]  ;;  %v1589_v7 = vld [vmem:[%s1874_s29 + $0x84] sm:$0xf] }
  0x9d   : > { %v759_v4 = vrot.slane %v715_v56, 5  ;;  %v761_v8 = vrot.slane %v719_v57, 4  ;;  %v763_v12 = vrot.slane %v723_v61, 3  ;;  %v765_v13 = vrot.slane %v727_v62, 2  ;;  %v1382_v47 = vld [vmem:[%s1874_s29 + $0x88] sm:$0xf0] }
  0x9e   : > { %v756_v11 = vsel %vm735_vm0, %v755_v0, %v703_v16  ;;  %1181 = vmatpush.bf16.msrb.mxu0 %v1345_v9  ;;  %v1409_v18 = vor.u32 %v1595_v49, %v1406_v50  ;;  %v1473_v19 = vor.u32 %v1611_v51, %v1470_v52  ;;  %v1537_v20 = vor.u32 %v1627_v58, %v1534_v59  ;;  %v1605_v16 = vld [vmem:[%s1874_s29 + $0x104] sm:$0xf]  ;;  %v1446_v38 = vld [vmem:[%s1874_s29 + $0x108] sm:$0xf0] }
  0x9f   : > { %v758_v17 = vsel %vm738_vm1, %v757_v3, %v756_v11  ;;  %v767_v24 = vrot.slane %v731_v63, 1  ;;  %v1337_v25 = vor.u32 %v1577_v53, %v1334_v1  ;;  %v1401_v29 = vor.u32 %v1593_v2, %v1398_v10  ;;  %v1621_v50 = vld [vmem:[%s1874_s29 + $0x184] sm:$0xf]  ;;  %v1510_v51 = vld [vmem:[%s1874_s29 + $0x188] sm:$0xf0]  ;;  %s478_s29 = scalar_lea.vmem %s2241_s3, %s1313_s28 }
  0xa0   : > { %v760_v23 = vsel %vm741_vm2, %v759_v4, %v758_v17  ;;  %1194 = vmatpush.bf16.msrb.mxu1 %v1409_v18  ;;  %1207 = vmatpush.bf16.msrb.mxu2 %v1473_v19  ;;  %v1465_v30 = vor.u32 %v1609_v14, %v1462_v15  ;;  %v1529_v33 = vor.u32 %v1625_v21, %v1526_v22  ;;  %v664_v53 = vld [vmem:[%s472_s27] sm:$0x3] }
  0xa1   : > { %v762_v28 = vsel %vm744_vm3, %v761_v8, %v760_v23  ;;  %1220 = vmatpush.bf16.msrb.mxu3 %v1537_v20  ;;  %v1329_v39 = vor.u32 %v1575_v26, %v1326_v27  ;;  %v1393_v43 = vor.u32 %v1591_v31, %v1390_v34  ;;  %v1457_v5 = vor.u32 %v1607_v45, %v1454_v46 }
  0xa2   : > { %v764_v32 = vsel %vm747_vm4, %v763_v12, %v762_v28  ;;  %1182 = vmatpush.bf16.msrb.mxu0 %v1337_v25  ;;  %v1521_v44 = vor.u32 %v1623_v36, %v1518_v40  ;;  %v1321_v49 = vor.u32 %v1573_v41, %v1318_v48  ;;  %v1385_v52 = vor.u32 %v1589_v7, %v1382_v47 }
  0xa3   : > { %v766_v35 = vsel %vm750_vm5, %v765_v13, %v764_v32  ;;  %v1449_v55 = vor.u32 %v1605_v16, %v1446_v38  ;;  %v1513_v56 = vor.u32 %v1621_v50, %v1510_v51  ;;  %v666_v62 = vperm.slane %v664_v53, 0 }
  0xa4   : > { %v768_v37 = vsel %vm753_vm6, %v767_v24, %v766_v35  ;;  %1195 = vmatpush.bf16.msrb.mxu1 %v1401_v29  ;;  %1208 = vmatpush.bf16.msrb.mxu2 %v1465_v30  ;;  %v667_v8 = vperm.slane %v664_v53, 1 }
  0xa5   : > { %v798_v42 = vpack.c.b16 %v768_v37, %v768_v37  ;;  %1221 = vmatpush.bf16.msrb.mxu3 %v1529_v33 }
  0xa6   : > { %1183 = vmatpush.bf16.msrb.mxu0 %v1329_v39 }
  0xa7   : > { %1146 = vmatmul.bf16.vlgmr.msra.gmra.mxu1 %v798_v42 }
  0xa8   : > { %1196 = vmatpush.bf16.msrb.mxu1 %v1393_v43  ;;  %1209 = vmatpush.bf16.msrb.mxu2 %v1457_v5 }
  0xa9   : > { %1222 = vmatpush.bf16.msrb.mxu3 %v1521_v44 }
  0xaa   : > { %1184 = vmatpush.bf16.msrb.mxu0 %v1321_v49 }
  0xac   : > { %1197 = vmatpush.bf16.msrb.mxu1 %v1385_v52  ;;  %1210 = vmatpush.bf16.msrb.mxu2 %v1449_v55 }
  0xad   : > { %1223 = vmatpush.bf16.msrb.mxu3 %v1513_v56  ;;  %1185 = vmatmul.bf16.vlgmr.msrb.gmra.mxu0 %v2181_v54 }
  0xaf   : > { %1211 = vmatmul.bf16.vlgmr.msrb.gmra.mxu2 %v2127_v6 }
  0xb0   : > { %1224 = vmatmul.bf16.vlgmr.msrb.gmra.mxu3 %v2151_v60 }
  0xb7   : > { %1198 = vmatmul.bf16.vlgmr.msrb.gmra.mxu1 %v798_v42 }
 0x10b   : > { %v1160_v57 = vpop.f32.mrf.mxu2 }
 0x113   : > { %v1162_v58 = vpop.f32.mrf.mxu2 }
 0x115   : > { %v1173_v59 = vpop.f32.mrf.mxu3 }
 0x119   : > { %v1134_v61 = vpop.f32.mrf.mxu0 }
 0x11a   : > { %v1135_v63 = vadd.f32 %v1134_v61, %v666_v62 }
 0x11d   : > { %v1175_v54 = vpop.f32.mrf.mxu3 }
 0x121   : > { %v1136_v6 = vpop.f32.mrf.mxu0 }
 0x124   : > { %v1147_v0 = vpop.f32.mrf.mxu1 }
 0x125   : > { %v1148_v60 = vadd.f32 %v1147_v0, %v1135_v63 }
 0x127   : > { %v1161_v1 = vadd.f32 %v1160_v57, %v1148_v60 }
 0x129   : > { %v1174_v2 = vadd.f32 %v1173_v59, %v1161_v1 }
 0x12a   : > { %v1186_v3 = vpop.f32.mrf.mxu0 }
 0x12b   : > { %1229 = vst [vmem:[%s478_s29] sm:$0xff] %v1174_v2  ;;  %v1187_v9 = vadd.f32 %v1186_v3, %v667_v8 }
 0x12c   : > { %v1149_v4 = vpop.f32.mrf.mxu1 }
 0x132   : > { %v1212_v10 = vpop.f32.mrf.mxu2  ;;  %v1188_v11 = vpop.f32.mrf.mxu0 }
 0x133   : > { %v1225_v13 = vpop.f32.mrf.mxu3 }
 0x134   : > { %v1199_v12 = vpop.f32.mrf.mxu1 }
 0x135   : > { %v1200_v14 = vadd.f32 %v1199_v12, %v1187_v9 }
 0x137   : > { %v1213_v15 = vadd.f32 %v1212_v10, %v1200_v14 }
 0x139   : > { %v1226_v17 = vadd.f32 %v1225_v13, %v1213_v15 }
 0x13a   : > { %v1214_v18 = vpop.f32.mrf.mxu2 }
 0x13b   : > { %1230 = vst [vmem:[%s478_s29 + $0x8] sm:$0xff] %v1226_v17  ;;  %v1227_v20 = vpop.f32.mrf.mxu3 }
 0x13c   : > { %v1201_v19 = vpop.f32.mrf.mxu1 }
 0x13d PF: > { %p10_p9 = scmp.ge.s32.totalorder %s1722_s16, 6   ;;  %s2242_s12 = smov %s1679_s13 }
 0x13e   : > { %s2243_s13 = smov %s1731_s19  ;;  %s2244_s14 = smov %s1722_s16 }
 0x13f   :  { %12 = sbr.rel (!%p10_p9) target bundleno = 2 (0x2), region = 108 }

</bundles_post_ra>
